<compile_context>
chip_gen: v6e
topology: v6e:2x2x1
jax: 0.10.0
libtpu: 0.0.40
codegen_flags: <defaults>
</compile_context>

<pallas_src>
import jax
import jax.numpy as jnp
from jax.experimental import pallas as pl
from jax.experimental.pallas import tpu as pltpu


def _round_up(x, m):
    return (x + m - 1) // m * m


# ----------------------------------------------------------------------------- kernel
def _make_cascade_kernel(num_conv, num_fc, n_roi, S, c_pad):
    """Fused per-stage ConvFCBBoxHead kernel (one grid step == one cascade stage).

    Ref order: xpad, conv_w[0..num_conv), bn[0..num_conv), fc_w[0..num_fc),
               fc_b[0..num_fc), out.
    """
    P = S * S
    eps = 1e-5

    def kernel(*refs):
        i = 0
        xpad_ref = refs[i]; i += 1
        conv_w_refs = refs[i:i + num_conv]; i += num_conv
        bn_refs = refs[i:i + num_conv]; i += num_conv
        fc_w_refs = refs[i:i + num_fc]; i += num_fc
        fc_b_refs = refs[i:i + num_fc]; i += num_fc
        o_ref = refs[i]

        # ---- conv -> ReLU -> BatchNorm (training-mode batch statistics) ------
        cur = xpad_ref[...]                                   # (S+2, S+2, N, Cin) f32
        act = None
        for l in range(num_conv):
            wl = conv_w_refs[l][0]                            # (9, Cin_l, c_pad) bf16
            if l > 0:
                # rebuild zero-padded spatial layout from previous activation
                # (only traced when num_conv > 1)
                a4 = act.reshape(S, S, n_roi, c_pad)
                zr = jnp.zeros((1, S, n_roi, c_pad), jnp.float32)
                a4 = jnp.concatenate([zr, a4, zr], axis=0)
                zc = jnp.zeros((S + 2, 1, n_roi, c_pad), jnp.float32)
                cur = jnp.concatenate([zc, a4, zc], axis=1)
            acc = jnp.zeros((P * n_roi, c_pad), jnp.float32)
            for dh in range(3):                               # 9 shifted matmuls ==
                for dw in range(3):                           # 3x3 'same' conv
                    tap = cur[dh:dh + S, dw:dw + S, :, :]     # (S, S, N, Cin_l)
                    tap2 = tap.reshape(P * n_roi, tap.shape[-1])   # rows = p*N + n
                    acc = acc + jnp.dot(tap2.astype(jnp.bfloat16),
                                        wl[dh * 3 + dw],
                                        preferred_element_type=jnp.float32)
            acc = jnp.maximum(acc, 0.0)                       # F.relu
            mean = jnp.mean(acc, axis=0, keepdims=True)       # per-channel over N*H*W
            var = jnp.mean(jnp.square(acc - mean), axis=0, keepdims=True)
            bn = bn_refs[l][0]                                # (2, c_pad) f32
            scale = bn[0:1, :] * jax.lax.rsqrt(var + eps)     # gamma folded into scale
            shift = bn[1:2, :] - mean * scale                 # beta  folded into shift
            act = acc * scale + shift                         # (P*N, c_pad) f32

        # ---- flatten + FC stack ----------------------------------------------
        # torch.flatten(x, 1) is NCHW channel-major; the first FC weight was
        # pre-permuted in pack_params() to consume the kernel's (p, n, c) layout,
        # so no transpose/reshape glue is needed here.
        h = None
        for l in range(num_fc):
            bias = fc_b_refs[l][0]                            # (1, F_out_pad) f32
            if l == 0:
                x3 = act.astype(jnp.bfloat16).reshape(P, n_roi, c_pad)
                w = fc_w_refs[0][0]                           # (P, c_pad, F_out_pad)
                y = jax.lax.dot_general(                      # batched MXU matmul
                    x3, w, (((2,), (1,)), ((0,), (0,))),
                    preferred_element_type=jnp.float32)       # (P, N, F_out_pad)
                y = jnp.sum(y, axis=0)                        # contract spatial dim
            else:
                w = fc_w_refs[l][0]                           # (F_in_pad, F_out_pad)
                y = jnp.dot(h.astype(jnp.bfloat16), w,
                            preferred_element_type=jnp.float32)
            y = y + bias
            if l != num_fc - 1:
                y = jnp.maximum(y, 0.0)                       # hidden FC ReLU
            h = y
        o_ref[0] = h                                          # (N, OUT_pad) lane-dense

    return kernel


# ----------------------------------------------------------------------------- forward
def build_cascade_forward(config):
    """CascadeHead.forward over `num_stages` fused ConvFCBBoxHead stages.

    # TODO(synk): ConvNextFPN backbone, MultiScaleRoIAlign, decode_pred_bbox_xyxy_xyxy
    # and UBBR_unreplicate_pred_boxes are not defined in the reference source; the
    # cascade consumes pre-pooled ROI features and returns the per-stage parameterized
    # bbox preds ('param_preds'); the box-decode feedback loop is omitted.
    """
    num_stages = config["num_stages"]
    num_conv = config["num_conv"]
    num_fc = config["num_fc"]
    S = config["roi_feature_size"]
    c_pad = config["c_pad"]
    out_pad = config["fc_out_pads"][-1]

    def forward(pooled_nchw, arrs):
        n_roi = pooled_nchw.shape[0]
        # one-time glue on the stage-shared input: NCHW -> (H, W, N, C) + 'same'
        # zero pad.  All per-stage layout work lives in pack_params().
        x = jnp.transpose(pooled_nchw, (2, 3, 0, 1))
        x = jnp.pad(x, ((1, 1), (1, 1), (0, 0), (0, 0)))      # (S+2, S+2, N, Cin)

        kernel = _make_cascade_kernel(num_conv, num_fc, n_roi, S, c_pad)

        def shared_spec(a):
            nd = a.ndim
            return pl.BlockSpec(a.shape, lambda s, _nd=nd: (0,) * _nd)

        def staged_spec(a):                                   # stage s -> block s
            nd = a.ndim
            return pl.BlockSpec((1,) + a.shape[1:],
                                lambda s, _nd=nd: (s,) + (0,) * (_nd - 1))

        operands = [x]
        in_specs = [shared_spec(x)]
        for group in ("conv_w", "bn", "fc_w", "fc_b"):
            for a in arrs[group]:
                operands.append(a)
                in_specs.append(staged_spec(a))

        out = pl.pallas_call(
            kernel,
            out_shape=jax.ShapeDtypeStruct((num_stages, n_roi, out_pad), jnp.float32),
            grid=(num_stages,),
            in_specs=in_specs,
            out_specs=pl.BlockSpec((1, n_roi, out_pad), lambda s: (s, 0, 0)),
            compiler_params=pltpu.CompilerParams(
                dimension_semantics=("parallel",)),           # shard stages on v7x 2 TCs
        )(*operands)

        # real bbox preds live in the first 4 lanes of the 128-wide slab
        return {"param_preds": [out[s, :, :4] for s in range(num_stages)]}

    return jax.jit(forward)


# ----------------------------------------------------------------------------- params
def init_params(key, *, num_stages, num_conv, num_fc, in_channels,
                conv_out_channels, roi_feature_size, fc_out_features):
    """PyTorch-layout parameters matching ConvFCBBoxHead.initialize()."""
    if num_fc == 1:
        fc_dims = [(conv_out_channels * roi_feature_size ** 2, 4)]
    else:
        fc_dims = ([(conv_out_channels * roi_feature_size ** 2, fc_out_features)]
                   + [(fc_out_features, fc_out_features)] * (num_fc - 2)
                   + [(fc_out_features, 4)])
    stages = []
    for _ in range(num_stages):
        convs = []
        cin = in_channels
        for _ in range(num_conv):
            key, k1 = jax.random.split(key)
            bound = (6.0 / (cin * 9)) ** 0.5                  # kaiming_uniform (relu)
            w = jax.random.uniform(k1, (conv_out_channels, cin, 3, 3),
                                   jnp.float32, -bound, bound)
            convs.append((w, jnp.ones((conv_out_channels,), jnp.float32),
                          jnp.zeros((conv_out_channels,), jnp.float32)))
            cin = conv_out_channels
        fcs = []
        for (fin, fout) in fc_dims:
            key, k1 = jax.random.split(key)
            w = jax.random.normal(k1, (fout, fin), jnp.float32) * 0.001
            fcs.append((w, jnp.zeros((fout,), jnp.float32)))
        stages.append({"convs": convs, "fcs": fcs})
    return stages


def pack_params(stage_params, *, num_conv, num_fc, in_channels, conv_out_channels,
                roi_feature_size, fc_out_features):
    """One-time layout work hoisted out of the hot path: transposes, the NCHW
    channel-major flatten permutation folded into FC0's weight, zero-padding of
    every output width to a lane-dense multiple of 128, bf16 casts, and stacking
    across cascade stages for the stage grid axis."""
    del in_channels, fc_out_features  # implied by the raw parameter shapes
    S = roi_feature_size
    P = S * S
    c_pad = _round_up(conv_out_channels, 128)
    num_stages = len(stage_params)

    conv_w = [[] for _ in range(num_conv)]
    bn = [[] for _ in range(num_conv)]
    fc_w = [[] for _ in range(num_fc)]
    fc_b = [[] for _ in range(num_fc)]
    fc_out_pads = []

    for sp in stage_params:
        for l, (w, gamma, beta) in enumerate(sp["convs"]):
            cout, cin = w.shape[0], w.shape[1]
            # (Cout, Cin, 3, 3) -> (3, 3, Cin, Cout) -> (9, Cin, Cout), pad Cout
            wk = jnp.transpose(w, (2, 3, 1, 0)).reshape(9, cin, cout)
            wk = jnp.pad(wk, ((0, 0), (0, 0), (0, c_pad - cout)))
            if l > 0:                                          # padded input channels
                wk = jnp.pad(wk, ((0, 0), (0, c_pad - cin), (0, 0)))
            conv_w[l].append(wk.astype(jnp.bfloat16))
            g = jnp.pad(gamma, (0, c_pad - cout), constant_values=1.0)
            b = jnp.pad(beta, (0, c_pad - cout))
            bn[l].append(jnp.stack([g, b], axis=0).astype(jnp.float32))
        for l, (w, b) in enumerate(sp["fcs"]):
            n_out, n_in = w.shape
            out_pad = _round_up(n_out, 128)
            if l == 0:
                # W:(F, C*S*S) with NCHW-flatten column order (c, h, w)
                #   -> (P, c_pad, F_pad) consuming the kernel's (p, n, c) layout
                wr = w.reshape(n_out, conv_out_channels, S, S)
                wr = jnp.transpose(wr, (2, 3, 1, 0)).reshape(P, conv_out_channels, n_out)
                wr = jnp.pad(wr, ((0, 0), (0, c_pad - conv_out_channels),
                                  (0, out_pad - n_out)))
            else:
                in_pad = _round_up(n_in, 128)
                wr = jnp.pad(jnp.transpose(w),
                             ((0, in_pad - n_in), (0, out_pad - n_out)))
            fc_w[l].append(wr.astype(jnp.bfloat16))
            fc_b[l].append(jnp.pad(b, (0, out_pad - n_out))
                           .reshape(1, out_pad).astype(jnp.float32))
            if len(fc_out_pads) <= l:
                fc_out_pads.append(out_pad)

    arrays = {
        "conv_w": [jnp.stack(ws) for ws in conv_w],   # (num_stages, 9, Cin_l, c_pad) bf16
        "bn": [jnp.stack(bs) for bs in bn],           # (num_stages, 2, c_pad) f32
        "fc_w": [jnp.stack(ws) for ws in fc_w],       # stage-stacked, pre-permuted bf16
        "fc_b": [jnp.stack(bs) for bs in fc_b],       # (num_stages, 1, F_out_pad) f32
    }
    config = dict(num_stages=num_stages, num_conv=num_conv, num_fc=num_fc,
                  roi_feature_size=S, c_pad=c_pad, fc_out_pads=tuple(fc_out_pads))
    return arrays, config


# ----------------------------------------------------------------------------- main
if __name__ == "__main__":
    # Small, CascadeHead-consistent configuration.
    num_stages = 2
    num_conv = 1
    num_fc = 2
    roi_channels = 16          # in_channels of ConvFCBBoxHead (ROI-align channels)
    conv_out_channels = 32
    roi_feature_size = 8
    fc_out_features = 64
    num_rois = 8

    key = jax.random.PRNGKey(0)
    key, kx = jax.random.split(key)
    # Pre-pooled ROI features, PyTorch NCHW convention: (num_rois, C, S, S)
    pooled_roi_feats = jax.random.normal(
        kx, (num_rois, roi_channels, roi_feature_size, roi_feature_size), jnp.float32)

    raw_params = init_params(
        key,
        num_stages=num_stages, num_conv=num_conv, num_fc=num_fc,
        in_channels=roi_channels, conv_out_channels=conv_out_channels,
        roi_feature_size=roi_feature_size, fc_out_features=fc_out_features)

    arrs, config = pack_params(
        raw_params,
        num_conv=num_conv, num_fc=num_fc, in_channels=roi_channels,
        conv_out_channels=conv_out_channels, roi_feature_size=roi_feature_size,
        fc_out_features=fc_out_features)

    forward = build_cascade_forward(config)
    out = forward(pooled_roi_feats, arrs)
    out = jax.block_until_ready(out)

    for p in out["param_preds"]:
        assert p.shape == (num_rois, 4), p.shape
    print("KERNEL_OK")
</pallas_src>

<mosaic_0001>
module attributes {stable_mosaic.version = 11 : i64} {
  func.func @kernel(%arg0: i32, %arg1: memref<10x10x8x16xf32, #tpu.memory_space<vmem>>, %arg2: memref<1x9x16x128xbf16, #tpu.memory_space<vmem>>, %arg3: memref<1x2x128xf32, #tpu.memory_space<vmem>>, %arg4: memref<1x64x128x128xbf16, #tpu.memory_space<vmem>>, %arg5: memref<1x128x128xbf16, #tpu.memory_space<vmem>>, %arg6: memref<1x1x128xf32, #tpu.memory_space<vmem>>, %arg7: memref<1x1x128xf32, #tpu.memory_space<vmem>>, %arg8: memref<1x8x128xf32, #tpu.memory_space<vmem>>) attributes {dimension_semantics = [#tpu.dimension_semantics<parallel>], iteration_bounds = array<i64: 2>, scalar_prefetch = 0 : i64, scratch_operands = 0 : i64, tpu.core_type = #tpu.core_type<tc>, window_params = [{pipeline_mode = #tpu.pipeline_mode<synchronous>, transform_indices = @transform_0, window_bounds = array<i64: 10, 10, 8, 16>}, {transform_indices = @transform_1, window_bounds = array<i64: 1, 9, 16, 128>}, {transform_indices = @transform_2, window_bounds = array<i64: 1, 2, 128>}, {transform_indices = @transform_3, window_bounds = array<i64: 1, 64, 128, 128>}, {transform_indices = @transform_4, window_bounds = array<i64: 1, 128, 128>}, {transform_indices = @transform_5, window_bounds = array<i64: 1, 1, 128>}, {transform_indices = @transform_6, window_bounds = array<i64: 1, 1, 128>}, {transform_indices = @transform_7, window_bounds = array<i64: 1, 8, 128>}]} {
    %c0 = arith.constant 0 : index
    %c0_0 = arith.constant 0 : index
    %c0_1 = arith.constant 0 : index
    %c0_2 = arith.constant 0 : index
    %0 = vector.load %arg1[%c0, %c0_0, %c0_1, %c0_2] : memref<10x10x8x16xf32, #tpu.memory_space<vmem>>, vector<10x10x8x16xf32>
    %c0_3 = arith.constant 0 : index
    %c0_4 = arith.constant 0 : index
    %c0_5 = arith.constant 0 : index
    %c0_6 = arith.constant 0 : index
    %1 = vector.load %arg2[%c0_3, %c0_4, %c0_5, %c0_6] : memref<1x9x16x128xbf16, #tpu.memory_space<vmem>>, vector<1x9x16x128xbf16>
    %2 = vector.shape_cast %1 : vector<1x9x16x128xbf16> to vector<9x16x128xbf16>
    %cst = arith.constant 0.000000e+00 : f32
    %3 = vector.broadcast %cst : f32 to vector<512x128xf32>
    %4 = vector.extract_strided_slice %0 {offsets = [0, 0, 0, 0], sizes = [8, 8, 8, 16], strides = [1, 1, 1, 1]} : vector<10x10x8x16xf32> to vector<8x8x8x16xf32>
    %5 = vector.shape_cast %4 : vector<8x8x8x16xf32> to vector<512x16xf32>
    %6 = arith.truncf %5 : vector<512x16xf32> to vector<512x16xbf16>
    %7 = vector.extract_strided_slice %2 {offsets = [0, 0, 0], sizes = [1, 16, 128], strides = [1, 1, 1]} : vector<9x16x128xbf16> to vector<1x16x128xbf16>
    %8 = vector.shape_cast %7 : vector<1x16x128xbf16> to vector<16x128xbf16>
    %cst_7 = arith.constant dense<0.000000e+00> : vector<512x128xf32>
    %9 = tpu.matmul %6, %8, %cst_7 {dimension_numbers = #tpu.dot_dimension_numbers<[1], [0], [0], [1], [0, 0, 1, 1], [], []>} : vector<512x16xbf16>, vector<16x128xbf16>, vector<512x128xf32> -> vector<512x128xf32>
    %10 = arith.addf %3, %9 : vector<512x128xf32>
    %11 = vector.extract_strided_slice %0 {offsets = [0, 1, 0, 0], sizes = [8, 8, 8, 16], strides = [1, 1, 1, 1]} : vector<10x10x8x16xf32> to vector<8x8x8x16xf32>
    %12 = vector.shape_cast %11 : vector<8x8x8x16xf32> to vector<512x16xf32>
    %13 = arith.truncf %12 : vector<512x16xf32> to vector<512x16xbf16>
    %14 = vector.extract_strided_slice %2 {offsets = [1, 0, 0], sizes = [1, 16, 128], strides = [1, 1, 1]} : vector<9x16x128xbf16> to vector<1x16x128xbf16>
    %15 = vector.shape_cast %14 : vector<1x16x128xbf16> to vector<16x128xbf16>
    %cst_8 = arith.constant dense<0.000000e+00> : vector<512x128xf32>
    %16 = tpu.matmul %13, %15, %cst_8 {dimension_numbers = #tpu.dot_dimension_numbers<[1], [0], [0], [1], [0, 0, 1, 1], [], []>} : vector<512x16xbf16>, vector<16x128xbf16>, vector<512x128xf32> -> vector<512x128xf32>
    %17 = arith.addf %10, %16 : vector<512x128xf32>
    %18 = vector.extract_strided_slice %0 {offsets = [0, 2, 0, 0], sizes = [8, 8, 8, 16], strides = [1, 1, 1, 1]} : vector<10x10x8x16xf32> to vector<8x8x8x16xf32>
    %19 = vector.shape_cast %18 : vector<8x8x8x16xf32> to vector<512x16xf32>
    %20 = arith.truncf %19 : vector<512x16xf32> to vector<512x16xbf16>
    %21 = vector.extract_strided_slice %2 {offsets = [2, 0, 0], sizes = [1, 16, 128], strides = [1, 1, 1]} : vector<9x16x128xbf16> to vector<1x16x128xbf16>
    %22 = vector.shape_cast %21 : vector<1x16x128xbf16> to vector<16x128xbf16>
    %cst_9 = arith.constant dense<0.000000e+00> : vector<512x128xf32>
    %23 = tpu.matmul %20, %22, %cst_9 {dimension_numbers = #tpu.dot_dimension_numbers<[1], [0], [0], [1], [0, 0, 1, 1], [], []>} : vector<512x16xbf16>, vector<16x128xbf16>, vector<512x128xf32> -> vector<512x128xf32>
    %24 = arith.addf %17, %23 : vector<512x128xf32>
    %25 = vector.extract_strided_slice %0 {offsets = [1, 0, 0, 0], sizes = [8, 8, 8, 16], strides = [1, 1, 1, 1]} : vector<10x10x8x16xf32> to vector<8x8x8x16xf32>
    %26 = vector.shape_cast %25 : vector<8x8x8x16xf32> to vector<512x16xf32>
    %27 = arith.truncf %26 : vector<512x16xf32> to vector<512x16xbf16>
    %28 = vector.extract_strided_slice %2 {offsets = [3, 0, 0], sizes = [1, 16, 128], strides = [1, 1, 1]} : vector<9x16x128xbf16> to vector<1x16x128xbf16>
    %29 = vector.shape_cast %28 : vector<1x16x128xbf16> to vector<16x128xbf16>
    %cst_10 = arith.constant dense<0.000000e+00> : vector<512x128xf32>
    %30 = tpu.matmul %27, %29, %cst_10 {dimension_numbers = #tpu.dot_dimension_numbers<[1], [0], [0], [1], [0, 0, 1, 1], [], []>} : vector<512x16xbf16>, vector<16x128xbf16>, vector<512x128xf32> -> vector<512x128xf32>
    %31 = arith.addf %24, %30 : vector<512x128xf32>
    %32 = vector.extract_strided_slice %0 {offsets = [1, 1, 0, 0], sizes = [8, 8, 8, 16], strides = [1, 1, 1, 1]} : vector<10x10x8x16xf32> to vector<8x8x8x16xf32>
    %33 = vector.shape_cast %32 : vector<8x8x8x16xf32> to vector<512x16xf32>
    %34 = arith.truncf %33 : vector<512x16xf32> to vector<512x16xbf16>
    %35 = vector.extract_strided_slice %2 {offsets = [4, 0, 0], sizes = [1, 16, 128], strides = [1, 1, 1]} : vector<9x16x128xbf16> to vector<1x16x128xbf16>
    %36 = vector.shape_cast %35 : vector<1x16x128xbf16> to vector<16x128xbf16>
    %cst_11 = arith.constant dense<0.000000e+00> : vector<512x128xf32>
    %37 = tpu.matmul %34, %36, %cst_11 {dimension_numbers = #tpu.dot_dimension_numbers<[1], [0], [0], [1], [0, 0, 1, 1], [], []>} : vector<512x16xbf16>, vector<16x128xbf16>, vector<512x128xf32> -> vector<512x128xf32>
    %38 = arith.addf %31, %37 : vector<512x128xf32>
    %39 = vector.extract_strided_slice %0 {offsets = [1, 2, 0, 0], sizes = [8, 8, 8, 16], strides = [1, 1, 1, 1]} : vector<10x10x8x16xf32> to vector<8x8x8x16xf32>
    %40 = vector.shape_cast %39 : vector<8x8x8x16xf32> to vector<512x16xf32>
    %41 = arith.truncf %40 : vector<512x16xf32> to vector<512x16xbf16>
    %42 = vector.extract_strided_slice %2 {offsets = [5, 0, 0], sizes = [1, 16, 128], strides = [1, 1, 1]} : vector<9x16x128xbf16> to vector<1x16x128xbf16>
    %43 = vector.shape_cast %42 : vector<1x16x128xbf16> to vector<16x128xbf16>
    %cst_12 = arith.constant dense<0.000000e+00> : vector<512x128xf32>
    %44 = tpu.matmul %41, %43, %cst_12 {dimension_numbers = #tpu.dot_dimension_numbers<[1], [0], [0], [1], [0, 0, 1, 1], [], []>} : vector<512x16xbf16>, vector<16x128xbf16>, vector<512x128xf32> -> vector<512x128xf32>
    %45 = arith.addf %38, %44 : vector<512x128xf32>
    %46 = vector.extract_strided_slice %0 {offsets = [2, 0, 0, 0], sizes = [8, 8, 8, 16], strides = [1, 1, 1, 1]} : vector<10x10x8x16xf32> to vector<8x8x8x16xf32>
    %47 = vector.shape_cast %46 : vector<8x8x8x16xf32> to vector<512x16xf32>
    %48 = arith.truncf %47 : vector<512x16xf32> to vector<512x16xbf16>
    %49 = vector.extract_strided_slice %2 {offsets = [6, 0, 0], sizes = [1, 16, 128], strides = [1, 1, 1]} : vector<9x16x128xbf16> to vector<1x16x128xbf16>
    %50 = vector.shape_cast %49 : vector<1x16x128xbf16> to vector<16x128xbf16>
    %cst_13 = arith.constant dense<0.000000e+00> : vector<512x128xf32>
    %51 = tpu.matmul %48, %50, %cst_13 {dimension_numbers = #tpu.dot_dimension_numbers<[1], [0], [0], [1], [0, 0, 1, 1], [], []>} : vector<512x16xbf16>, vector<16x128xbf16>, vector<512x128xf32> -> vector<512x128xf32>
    %52 = arith.addf %45, %51 : vector<512x128xf32>
    %53 = vector.extract_strided_slice %0 {offsets = [2, 1, 0, 0], sizes = [8, 8, 8, 16], strides = [1, 1, 1, 1]} : vector<10x10x8x16xf32> to vector<8x8x8x16xf32>
    %54 = vector.shape_cast %53 : vector<8x8x8x16xf32> to vector<512x16xf32>
    %55 = arith.truncf %54 : vector<512x16xf32> to vector<512x16xbf16>
    %56 = vector.extract_strided_slice %2 {offsets = [7, 0, 0], sizes = [1, 16, 128], strides = [1, 1, 1]} : vector<9x16x128xbf16> to vector<1x16x128xbf16>
    %57 = vector.shape_cast %56 : vector<1x16x128xbf16> to vector<16x128xbf16>
    %cst_14 = arith.constant dense<0.000000e+00> : vector<512x128xf32>
    %58 = tpu.matmul %55, %57, %cst_14 {dimension_numbers = #tpu.dot_dimension_numbers<[1], [0], [0], [1], [0, 0, 1, 1], [], []>} : vector<512x16xbf16>, vector<16x128xbf16>, vector<512x128xf32> -> vector<512x128xf32>
    %59 = arith.addf %52, %58 : vector<512x128xf32>
    %60 = vector.extract_strided_slice %0 {offsets = [2, 2, 0, 0], sizes = [8, 8, 8, 16], strides = [1, 1, 1, 1]} : vector<10x10x8x16xf32> to vector<8x8x8x16xf32>
    %61 = vector.shape_cast %60 : vector<8x8x8x16xf32> to vector<512x16xf32>
    %62 = arith.truncf %61 : vector<512x16xf32> to vector<512x16xbf16>
    %63 = vector.extract_strided_slice %2 {offsets = [8, 0, 0], sizes = [1, 16, 128], strides = [1, 1, 1]} : vector<9x16x128xbf16> to vector<1x16x128xbf16>
    %64 = vector.shape_cast %63 : vector<1x16x128xbf16> to vector<16x128xbf16>
    %cst_15 = arith.constant dense<0.000000e+00> : vector<512x128xf32>
    %65 = tpu.matmul %62, %64, %cst_15 {dimension_numbers = #tpu.dot_dimension_numbers<[1], [0], [0], [1], [0, 0, 1, 1], [], []>} : vector<512x16xbf16>, vector<16x128xbf16>, vector<512x128xf32> -> vector<512x128xf32>
    %66 = arith.addf %59, %65 : vector<512x128xf32>
    %cst_16 = arith.constant 0.000000e+00 : f32
    %67 = vector.broadcast %cst_16 : f32 to vector<512x128xf32>
    %68 = arith.maximumf %66, %67 : vector<512x128xf32>
    %cst_17 = arith.constant dense<0.000000e+00> : vector<128xf32>
    %69 = vector.multi_reduction <add>, %68, %cst_17 [0] : vector<512x128xf32> to vector<128xf32>
    %70 = vector.shape_cast %69 : vector<128xf32> to vector<1x128xf32>
    %cst_18 = arith.constant 5.120000e+02 : f32
    %71 = vector.broadcast %cst_18 : f32 to vector<1x128xf32>
    %72 = arith.divf %70, %71 : vector<1x128xf32>
    %73 = vector.broadcast %72 : vector<1x128xf32> to vector<512x128xf32>
    %74 = arith.subf %68, %73 : vector<512x128xf32>
    %75 = arith.mulf %74, %74 : vector<512x128xf32>
    %cst_19 = arith.constant dense<0.000000e+00> : vector<128xf32>
    %76 = vector.multi_reduction <add>, %75, %cst_19 [0] : vector<512x128xf32> to vector<128xf32>
    %77 = vector.shape_cast %76 : vector<128xf32> to vector<1x128xf32>
    %cst_20 = arith.constant 5.120000e+02 : f32
    %78 = vector.broadcast %cst_20 : f32 to vector<1x128xf32>
    %79 = arith.divf %77, %78 : vector<1x128xf32>
    %c0_21 = arith.constant 0 : index
    %c0_22 = arith.constant 0 : index
    %c0_23 = arith.constant 0 : index
    %80 = vector.load %arg3[%c0_21, %c0_22, %c0_23] : memref<1x2x128xf32, #tpu.memory_space<vmem>>, vector<1x2x128xf32>
    %81 = vector.shape_cast %80 : vector<1x2x128xf32> to vector<2x128xf32>
    %82 = vector.extract_strided_slice %81 {offsets = [0, 0], sizes = [1, 128], strides = [1, 1]} : vector<2x128xf32> to vector<1x128xf32>
    %cst_24 = arith.constant 9.99999974E-6 : f32
    %83 = vector.broadcast %cst_24 : f32 to vector<1x128xf32>
    %84 = arith.addf %79, %83 : vector<1x128xf32>
    %85 = math.rsqrt %84 : vector<1x128xf32>
    %86 = arith.mulf %82, %85 : vector<1x128xf32>
    %87 = vector.extract_strided_slice %81 {offsets = [1, 0], sizes = [1, 128], strides = [1, 1]} : vector<2x128xf32> to vector<1x128xf32>
    %88 = arith.mulf %72, %86 : vector<1x128xf32>
    %89 = arith.subf %87, %88 : vector<1x128xf32>
    %90 = vector.broadcast %86 : vector<1x128xf32> to vector<512x128xf32>
    %91 = arith.mulf %68, %90 : vector<512x128xf32>
    %92 = vector.broadcast %89 : vector<1x128xf32> to vector<512x128xf32>
    %93 = arith.addf %91, %92 : vector<512x128xf32>
    %c0_25 = arith.constant 0 : index
    %c0_26 = arith.constant 0 : index
    %c0_27 = arith.constant 0 : index
    %94 = vector.load %arg6[%c0_25, %c0_26, %c0_27] : memref<1x1x128xf32, #tpu.memory_space<vmem>>, vector<1x1x128xf32>
    %95 = vector.shape_cast %94 : vector<1x1x128xf32> to vector<1x128xf32>
    %96 = arith.truncf %93 : vector<512x128xf32> to vector<512x128xbf16>
    %97 = vector.shape_cast %96 : vector<512x128xbf16> to vector<64x8x128xbf16>
    %c0_28 = arith.constant 0 : index
    %c0_29 = arith.constant 0 : index
    %c0_30 = arith.constant 0 : index
    %c0_31 = arith.constant 0 : index
    %98 = vector.load %arg4[%c0_28, %c0_29, %c0_30, %c0_31] : memref<1x64x128x128xbf16, #tpu.memory_space<vmem>>, vector<1x64x128x128xbf16>
    %99 = vector.shape_cast %98 : vector<1x64x128x128xbf16> to vector<64x128x128xbf16>
    %cst_32 = arith.constant dense<0.000000e+00> : vector<64x8x128xf32>
    %100 = tpu.matmul %97, %99, %cst_32 {dimension_numbers = #tpu.dot_dimension_numbers<[2], [1], [1], [2], [0, 0, 0, 1, 1, 2], [0], [0]>} : vector<64x8x128xbf16>, vector<64x128x128xbf16>, vector<64x8x128xf32> -> vector<64x8x128xf32>
    %cst_33 = arith.constant dense<0.000000e+00> : vector<8x128xf32>
    %101 = vector.multi_reduction <add>, %100, %cst_33 [0] : vector<64x8x128xf32> to vector<8x128xf32>
    %102 = vector.broadcast %95 : vector<1x128xf32> to vector<8x128xf32>
    %103 = arith.addf %101, %102 : vector<8x128xf32>
    %cst_34 = arith.constant 0.000000e+00 : f32
    %104 = vector.broadcast %cst_34 : f32 to vector<8x128xf32>
    %105 = arith.maximumf %103, %104 : vector<8x128xf32>
    %c0_35 = arith.constant 0 : index
    %c0_36 = arith.constant 0 : index
    %c0_37 = arith.constant 0 : index
    %106 = vector.load %arg7[%c0_35, %c0_36, %c0_37] : memref<1x1x128xf32, #tpu.memory_space<vmem>>, vector<1x1x128xf32>
    %107 = vector.shape_cast %106 : vector<1x1x128xf32> to vector<1x128xf32>
    %c0_38 = arith.constant 0 : index
    %c0_39 = arith.constant 0 : index
    %c0_40 = arith.constant 0 : index
    %108 = vector.load %arg5[%c0_38, %c0_39, %c0_40] : memref<1x128x128xbf16, #tpu.memory_space<vmem>>, vector<1x128x128xbf16>
    %109 = vector.shape_cast %108 : vector<1x128x128xbf16> to vector<128x128xbf16>
    %110 = arith.truncf %105 : vector<8x128xf32> to vector<8x128xbf16>
    %cst_41 = arith.constant dense<0.000000e+00> : vector<8x128xf32>
    %111 = tpu.matmul %110, %109, %cst_41 {dimension_numbers = #tpu.dot_dimension_numbers<[1], [0], [0], [1], [0, 0, 1, 1], [], []>} : vector<8x128xbf16>, vector<128x128xbf16>, vector<8x128xf32> -> vector<8x128xf32>
    %112 = vector.broadcast %107 : vector<1x128xf32> to vector<8x128xf32>
    %113 = arith.addf %111, %112 : vector<8x128xf32>
    %c0_42 = arith.constant 0 : index
    %c0_43 = arith.constant 0 : index
    %c0_44 = arith.constant 0 : index
    %114 = vector.load %arg8[%c0_42, %c0_43, %c0_44] : memref<1x8x128xf32, #tpu.memory_space<vmem>>, vector<1x8x128xf32>
    %115 = vector.shape_cast %114 : vector<1x8x128xf32> to vector<8x128xf32>
    %116 = vector.shape_cast %113 : vector<8x128xf32> to vector<1x8x128xf32>
    tpu.vector_store %arg8[%c0_42, %c0_43, %c0_44], %116 {strides = array<i32>} : memref<1x8x128xf32, #tpu.memory_space<vmem>>, vector<1x8x128xf32>,
    return
  }
  func.func @transform_0(%arg0: i32) -> (i32, i32, i32, i32) {
    %c0_i32 = arith.constant 0 : i32
    %c0_i32_0 = arith.constant 0 : i32
    %c0_i32_1 = arith.constant 0 : i32
    %c0_i32_2 = arith.constant 0 : i32
    %c0_i32_3 = arith.constant 0 : i32
    return %c0_i32, %c0_i32_0, %c0_i32_1, %c0_i32_2 : i32, i32, i32, i32
  }
  func.func @transform_1(%arg0: i32) -> (i32, i32, i32, i32) {
    %c0_i32 = arith.constant 0 : i32
    %c0_i32_0 = arith.constant 0 : i32
    %c0_i32_1 = arith.constant 0 : i32
    %c0_i32_2 = arith.constant 0 : i32
    return %arg0, %c0_i32, %c0_i32_0, %c0_i32_1 : i32, i32, i32, i32
  }
  func.func @transform_2(%arg0: i32) -> (i32, i32, i32) {
    %c0_i32 = arith.constant 0 : i32
    %c0_i32_0 = arith.constant 0 : i32
    %c0_i32_1 = arith.constant 0 : i32
    return %arg0, %c0_i32, %c0_i32_0 : i32, i32, i32
  }
  func.func @transform_3(%arg0: i32) -> (i32, i32, i32, i32) {
    %c0_i32 = arith.constant 0 : i32
    %c0_i32_0 = arith.constant 0 : i32
    %c0_i32_1 = arith.constant 0 : i32
    %c0_i32_2 = arith.constant 0 : i32
    return %arg0, %c0_i32, %c0_i32_0, %c0_i32_1 : i32, i32, i32, i32
  }
  func.func @transform_4(%arg0: i32) -> (i32, i32, i32) {
    %c0_i32 = arith.constant 0 : i32
    %c0_i32_0 = arith.constant 0 : i32
    %c0_i32_1 = arith.constant 0 : i32
    return %arg0, %c0_i32, %c0_i32_0 : i32, i32, i32
  }
  func.func @transform_5(%arg0: i32) -> (i32, i32, i32) {
    %c0_i32 = arith.constant 0 : i32
    %c0_i32_0 = arith.constant 0 : i32
    %c0_i32_1 = arith.constant 0 : i32
    return %arg0, %c0_i32, %c0_i32_0 : i32, i32, i32
  }
  func.func @transform_6(%arg0: i32) -> (i32, i32, i32) {
    %c0_i32 = arith.constant 0 : i32
    %c0_i32_0 = arith.constant 0 : i32
    %c0_i32_1 = arith.constant 0 : i32
    return %arg0, %c0_i32, %c0_i32_0 : i32, i32, i32
  }
  func.func @transform_7(%arg0: i32) -> (i32, i32, i32) {
    %c0_i32 = arith.constant 0 : i32
    %c0_i32_0 = arith.constant 0 : i32
    %c0_i32_1 = arith.constant 0 : i32
    return %arg0, %c0_i32, %c0_i32_0 : i32, i32, i32
  }
}

</mosaic_0001>

<bundles_post_ra>
// kernel: forward.1
= control target key start
LH: loop header
LB: loop body
LE: loop exit
PB: predicated region body
PF: predicated region fallthrough
CT: control target
= control target key end

     0   :  { %s21243_s0 = inlined_call_operand.vmem [shape: f32[10,10,8,16], index: 0, kind: input, shape index: {}]   ;;  %s21244_s1 = inlined_call_operand.hbm [shape: bf16[2,9,16,128], index: 1, kind: input, shape index: {}]   ;;  %s21245_s2 = inlined_call_operand.hbm [shape: f32[2,2,128], index: 2, kind: input, shape index: {}]   ;;  %s21246_s3 = inlined_call_operand.hbm [shape: bf16[2,64,128,128], index: 3, kind: input, shape index: {}]   ;;  %s21247_s4 = inlined_call_operand.hbm [shape: bf16[2,128,128], index: 4, kind: input, shape index: {}]   ;;  %s21248_s5 = inlined_call_operand.hbm [shape: f32[2,1,128], index: 5, kind: input, shape index: {}]   ;;  %s21249_s6 = inlined_call_operand.hbm [shape: f32[2,1,128], index: 6, kind: input, shape index: {}]   ;;  %s21250_s7 = inlined_call_operand.vmem [shape: f32[2,8,128], index: 7, kind: output, shape index: {}]  }
   0x1   :  { %21422 = sst [smem:[#allocation116_spill]] %s21245_s2 }
   0x2   :  { %21423 = sst [smem:[#allocation117_spill]] %s21247_s4 }
   0x3   :  { %12 = vsyncpa [#allocation3], 0 }
   0x4   :  { %14 = vsyncpa [#allocation3 + $0x1], 0 }
   0x5   :  { %15 = vsyncpa [#allocation5], 0 }
   0x6   :  { %17 = vsyncpa [#allocation5 + $0x1], 0 }
   0x7   :  { %18 = vsyncpa [#allocation8], 0 }
   0x8   :  { %20 = vsyncpa [#allocation8 + $0x1], 0 }
   0x9   :  { %21 = vsyncpa [#allocation11], 0 }
   0xa   :  { %23 = vsyncpa [#allocation11 + $0x1], 0  ;;  %s16426_s24 = smov 0   ;;  %s16428_s25 = smov 0  }
   0xb   :  { %s16430_s26 = smov 0   ;;  %s16432_s27 = smov 0  }
   0xc LB: > { %21424 = sst [smem:[#allocation16_spill]] %s16370_s26  ;;  %s16445_s28 = sadd.s32 4294967295, %s16374_s27   ;;  %s16374_s27 = sphi %s16432_s27, %s21994_s27   ;;  %s16370_s26 = sphi %s16430_s26, %s21996_s26   ;;  %s16366_s25 = sphi %s16428_s25, %s21998_s25   ;;  %s16362_s24 = sphi %s16426_s24, %s21997_s24  }
   0xd   : > { %s16448_s29 = sadd.s32 1, %s16374_s27   ;;  %s57_s8 = sadd.s32 1, %s16370_s26 }
   0xe   : > { %21425 = sst [smem:[#allocation17_spill]] %s16448_s29  ;;  %s54_s30 = ssub.s32 %s16374_s27, %s16448_s29 }
   0xf   : > { %p55_p0 = scmp.eq.s32.totalorder %s54_s30, 0  ;;  %p64_p1 = scmp.ne.s32.totalorder %s16370_s26, %s16366_s25 }
  0x10   : > { %p65_p2 = scmp.eq.s32.totalorder %s16374_s27, 0  ;;  %p70_p3 = scmp.ne.s32.totalorder %s16366_s25, %s16362_s24 }
  0x11   : > { %s16458_s9 = scalar_select %p55_p0, %s16370_s26, %s57_s8  }
  0x12   : > { %p66_p4 = por %p65_p2, %p64_p1  ;;  %p71_p5 = scmp.eq.s32.totalorder %s16445_s28, 0 }
  0x13   : > { %21426 = sst [smem:[#allocation18_spill]] %s16458_s9  ;;  %p15584_p6 = scmp.lt.s32.totalorder %s16374_s27, 2 }
  0x14   : > { %p16462_p7 = por %p71_p5, %p70_p3  ;;  %s16467_s11 = sand.u32 1, %s16370_s26  }
  0x15   : > { %p16469_p8 = pnand %p15584_p6, %p66_p4  ;;  %s21251_s13 = sand.u32 1, %s16374_s27  }
  0x16   : > { %s21427_s10 = scalar_select %p16462_p7, 1, 0 }
  0x17   : > { %s11806_s14 = sshll.u32 %s16467_s11, 1  ;;  %s11807_s15 = sshll.u32 %s16374_s27, 5 }
  0x18   : > { %s278_s16 = scalar_lea.vmem [#allocation4], %s11806_s14  ;;  %s21429_s2 = sld [smem:[#allocation116_spill]] }
  0x19   : > { %s285_s17 = sshll.u32 %s278_s16, 4  ;;  %s16481_s21 = scalar_lea.sflag [#allocation5], %s21251_s13  ;;  %s286_s17 = int_to_ptr.vmem [resolvable:$true] %s285_s17 }
  0x1a   : > { %p16485_p10 = pneg %p16469_p8 }
  0x1e   : > { %s283_s20 = scalar_lea.hbm %s21429_s2, %s11807_s15  ;;  %s16165_s8 = scalar_lea.hbm %s21429_s2, 64 }
  0x1f   : > { %s16160_s22 = scalar_lea.hbm %s283_s20, 32  ;;  %p16166_p13 = scmp.lt.s32.totalorder %s283_s20, %s21429_s2 }
  0x20   : > { %p16161_p9 = scmp.ne.s32.totalorder %s283_s20, %s16160_s22  ;;  %p16167_p0 = scmp.lt.s32.totalorder %s16165_s8, %s16160_s22 }
  0x22   : > { %p16163_p11 = pnand %p16485_p10, %p16161_p9  ;;  %p16168_p1 = por %p16167_p0, %p16166_p13 }
  0x24   : > { %p16164_p12 = pneg %p16163_p11 }
  0x26   : > { %p16169_p2 = pnand %p16168_p1, %p16164_p12 }
  0x28   : > { %16172 = shalt.err (!%p16169_p2)
}
  0x29   : > { %s16173_s16 = scalar_lea.vmem %s286_s17, 32  ;;  %s16376_s18 = smov [#allocation4]  }
  0x2a   : > { %p16174_p3 = scmp.ne.s32.totalorder %s286_s17, %s16173_s16  ;;  %s16178_s19 = sshll.u32 %s16376_s18, 4  ;;  %s16179_s19 = int_to_ptr.vmem [resolvable:$false] %s16178_s19 }
  0x2b   : > { %s16180_s13 = scalar_lea.vmem %s16179_s19, 64  ;;  %p16181_p6 = scmp.lt.s32.totalorder %s286_s17, %s16179_s19 }
  0x2c   : > { %p16176_p4 = pnand %p16174_p3, %p16485_p10  ;;  %p16182_p9 = scmp.lt.s32.totalorder %s16180_s13, %s16173_s16 }
  0x2e   : > { %p16177_p5 = pneg %p16176_p4  ;;  %p16183_p11 = por %p16182_p9, %p16181_p6 }
  0x30   : > { %p16184_p7 = pnand %p16183_p11, %p16177_p5 }
  0x32   : > { %16187 = shalt.err (!%p16184_p7)
}
  0x33   : > { %15571 = dma.hbm_to_vmem [thread:$0]  (!%p16469_p8), %s283_s20, 32, %s286_s17, %s16481_s21  }
  0x34   : > { %p11816_p12 = scmp.ge.s32.totalorder %s16374_s27, 1  ;;  %p366_p13 = scmp.lt.s32.totalorder %s16374_s27, 3 }
  0x35   : > { %s11811_s22 = sshll.u32 %s16467_s11, 6  ;;  %s12707_s13 = sshll.u32 %s16374_s27, 10 }
  0x36   : > { %p16505_p0 = pnand %p11816_p12, %p366_p13  ;;  %s317_s30 = scalar_lea.vmem [#allocation7], %s11811_s22 }
  0x37   : > { %s324_s8 = sshll.u32 %s317_s30, 4  ;;  %s21432_s4 = sld [smem:[#allocation117_spill]]  ;;  %s16515_s8 = int_to_ptr.vmem [resolvable:$true] %s324_s8 }
  0x38   : > { %s21431_s24 = scalar_select %p16505_p0, 1, 0 }
  0x39   : > { %s21433_s17 = sand.u32 1, %s16374_s27  }
  0x3a   : > { %s16519_s20 = scalar_lea.sflag [#allocation8], %s21433_s17 }
  0x3d   : > { %s16513_s16 = scalar_lea.hbm %s21432_s4, %s12707_s13  ;;  %s16193_s30 = scalar_lea.hbm %s21432_s4, 2048 }
  0x3e   : > { %s16188_s18 = scalar_lea.hbm %s16513_s16, 1024  ;;  %p16194_p3 = scmp.lt.s32.totalorder %s16513_s16, %s21432_s4 }
  0x3f   : > { %p16189_p7 = scmp.ne.s32.totalorder %s16513_s16, %s16188_s18  ;;  %p16195_p4 = scmp.lt.s32.totalorder %s16193_s30, %s16188_s18 }
  0x41   : > { %p16191_p1 = pnand %p16189_p7, %p16485_p10  ;;  %p16196_p5 = por %p16195_p4, %p16194_p3 }
  0x43   : > { %p16192_p2 = pneg %p16191_p1 }
  0x45   : > { %p16197_p6 = pnand %p16196_p5, %p16192_p2 }
  0x47   : > { %16200 = shalt.err (!%p16197_p6)
}
  0x48   : > { %s16201_s15 = scalar_lea.vmem %s16515_s8, 1024  ;;  %s16377_s17 = smov [#allocation7]  }
  0x49   : > { %p16202_p9 = scmp.ne.s32.totalorder %s16515_s8, %s16201_s15  ;;  %s16206_s19 = sshll.u32 %s16377_s17, 4  ;;  %s16207_s19 = int_to_ptr.vmem [resolvable:$false] %s16206_s19 }
  0x4a   : > { %s16208_s22 = scalar_lea.vmem %s16207_s19, 2048  ;;  %p16209_p13 = scmp.lt.s32.totalorder %s16515_s8, %s16207_s19 }
  0x4b   : > { %p16204_p11 = pnand %p16202_p9, %p16485_p10  ;;  %p16210_p7 = scmp.lt.s32.totalorder %s16208_s22, %s16201_s15 }
  0x4d   : > { %p16205_p12 = pneg %p16204_p11  ;;  %p16211_p1 = por %p16210_p7, %p16209_p13 }
  0x4f   : > { %p16212_p0 = pnand %p16211_p1, %p16205_p12 }
  0x51   : > { %16215 = shalt.err (!%p16212_p0)
}
  0x52   : > { %s16378_s18 = smov 64   ;;  %s16379_s30 = smov 4  }
  0x53   : > { %15577 = dma.hbm_to_vmem [thread:$0]  (!%p16469_p8), %s16513_s16, 1024, %s16515_s8, %s16519_s20, %s16378_s18, %s16378_s18, %s16379_s30  }
  0x54   : > { %s15550_s14 = smul.u32 72, %s16467_s11  ;;  %s11808_s15 = sshll.u32 %s16467_s11, 12 }
  0x55   : > { %s15551_s13 = smul.u32 1152, %s16374_s27  ;;  %s12706_s9 = sshll.u32 %s16374_s27, 16 }
  0x56   : > { %s257_s2 = scalar_lea.vmem [#allocation2], %s15550_s14  ;;  %s254_s26 = scalar_lea.sflag [#allocation3], %s16467_s11 }
  0x57   : > { %s16551_s22 = scalar_lea.hbm %s21244_s1, %s15551_s13  ;;  %s264_s4 = sshll.u32 %s257_s2, 4  ;;  %s16553_s4 = int_to_ptr.vmem [resolvable:$true] %s264_s4 }
  0x58   : > { %s16216_s29 = scalar_lea.hbm %s16551_s22, 1152  ;;  %s16221_s17 = scalar_lea.hbm %s21244_s1, 2304 }
  0x59   : > { %p16217_p0 = scmp.ne.s32.totalorder %s16551_s22, %s16216_s29  ;;  %p16222_p4 = scmp.lt.s32.totalorder %s16551_s22, %s21244_s1 }
  0x5a   : > { %p16223_p5 = scmp.lt.s32.totalorder %s16221_s17, %s16216_s29 }
  0x5b   : > { %p16219_p2 = pnand %p16217_p0, %p16485_p10 }
  0x5c   : > { %p16224_p6 = por %p16223_p5, %p16222_p4 }
  0x5d   : > { %p16220_p3 = pneg %p16219_p2 }
  0x5f   : > { %p16225_p9 = pnand %p16224_p6, %p16220_p3 }
  0x61   : > { %16228 = shalt.err (!%p16225_p9)
}
  0x62   : > { %s16229_s2 = scalar_lea.vmem %s16553_s4, 1152  ;;  %s16380_s14 = smov [#allocation2]  }
  0x63   : > { %p16230_p11 = scmp.ne.s32.totalorder %s16553_s4, %s16229_s2  ;;  %s16234_s8 = sshll.u32 %s16380_s14, 4  ;;  %s16235_s8 = int_to_ptr.vmem [resolvable:$false] %s16234_s8 }
  0x64   : > { %s16236_s16 = scalar_lea.vmem %s16235_s8, 2304  ;;  %p16237_p7 = scmp.lt.s32.totalorder %s16553_s4, %s16235_s8 }
  0x65   : > { %p16232_p12 = pnand %p16230_p11, %p16485_p10  ;;  %p16238_p1 = scmp.lt.s32.totalorder %s16236_s16, %s16229_s2 }
  0x67   : > { %p16233_p13 = pneg %p16232_p12  ;;  %p16239_p0 = por %p16238_p1, %p16237_p7 }
  0x69   : > { %p16240_p2 = pnand %p16239_p0, %p16233_p13 }
  0x6b   : > { %16243 = shalt.err (!%p16240_p2)
}
  0x6c   : > { %15568 = dma.hbm_to_vmem [thread:$0]  (!%p16469_p8), %s16551_s22, 1152, %s16553_s4, %s254_s26, %s16378_s18, %s16378_s18, %s16379_s30  }
  0x6d   : > { %s16585_s13 = scalar_lea.hbm %s21246_s3, %s12706_s9  ;;  %s296_s19 = scalar_lea.vmem [#allocation6], %s11808_s15 }
  0x6e   : > { %s303_s2 = sshll.u32 %s296_s19, 4  ;;  %s16244_s14 = scalar_lea.hbm %s16585_s13, 65536  ;;  %s304_s2 = int_to_ptr.vmem [resolvable:$true] %s303_s2 }
  0x6f   : > { %p16245_p3 = scmp.ne.s32.totalorder %s16585_s13, %s16244_s14  ;;  %s16249_s26 = scalar_lea.hbm %s21246_s3, 131072 }
  0x70   : > { %p16250_p6 = scmp.lt.s32.totalorder %s16585_s13, %s21246_s3  ;;  %p16251_p9 = scmp.lt.s32.totalorder %s16249_s26, %s16244_s14 }
  0x71   : > { %p16247_p4 = pnand %p16245_p3, %p16485_p10 }
  0x72   : > { %p16252_p11 = por %p16251_p9, %p16250_p6 }
  0x73   : > { %p16248_p5 = pneg %p16247_p4 }
  0x75   : > { %p16253_p12 = pnand %p16252_p11, %p16248_p5 }
  0x77   : > { %16256 = shalt.err (!%p16253_p12)
}
  0x78   : > { %s16257_s9 = scalar_lea.vmem %s304_s2, 65536  ;;  %s16381_s15 = smov [#allocation6]  }
  0x79   : > { %p16258_p13 = scmp.ne.s32.totalorder %s304_s2, %s16257_s9  ;;  %s16262_s29 = sshll.u32 %s16381_s15, 4  ;;  %s16263_s29 = int_to_ptr.vmem [resolvable:$false] %s16262_s29 }
  0x7a   : > { %s16264_s17 = scalar_lea.vmem %s16263_s29, 131072  ;;  %p16265_p0 = scmp.lt.s32.totalorder %s304_s2, %s16263_s29 }
  0x7b   : > { %p16260_p7 = pnand %p16258_p13, %p16485_p10  ;;  %p16266_p2 = scmp.lt.s32.totalorder %s16264_s17, %s16257_s9 }
  0x7d   : > { %p16261_p1 = pneg %p16260_p7  ;;  %p16267_p3 = por %p16266_p2, %p16265_p0 }
  0x7f   : > { %p16268_p4 = pnand %p16267_p3, %p16261_p1 }
  0x81   : > { %16271 = shalt.err (!%p16268_p4)
}
  0x82   : > { %15574 = dma.hbm_to_vmem [thread:$0]  (!%p16469_p8), %s16585_s13, 65536, %s304_s2, %s16481_s21, %s16378_s18, %s16378_s18, %s16379_s30  }
  0x83   : > { %s11814_s19 = sshll.u32 %s16374_s27, 4  ;;  %s337_s14 = scalar_lea.vmem [#allocation9], %s16467_s11 }
  0x84   : > { %s344_s8 = sshll.u32 %s337_s14, 4  ;;  %s342_s22 = scalar_lea.hbm %s21248_s5, %s11814_s19  ;;  %s345_s8 = int_to_ptr.vmem [resolvable:$true] %s344_s8 }
  0x85   : > { %s16272_s16 = scalar_lea.hbm %s342_s22, 16  ;;  %s16277_s29 = scalar_lea.hbm %s21248_s5, 32 }
  0x86   : > { %p16273_p5 = scmp.ne.s32.totalorder %s342_s22, %s16272_s16  ;;  %p16278_p11 = scmp.lt.s32.totalorder %s342_s22, %s21248_s5 }
  0x87   : > { %p16279_p12 = scmp.lt.s32.totalorder %s16277_s29, %s16272_s16 }
  0x88   : > { %p16275_p6 = pnand %p16273_p5, %p16485_p10 }
  0x89   : > { %p16280_p13 = por %p16279_p12, %p16278_p11 }
  0x8a   : > { %p16276_p9 = pneg %p16275_p6 }
  0x8c   : > { %p16281_p7 = pnand %p16280_p13, %p16276_p9 }
  0x8e   : > { %16284 = shalt.err (!%p16281_p7)
}
  0x8f   : > { %s16285_s18 = scalar_lea.vmem %s345_s8, 16  ;;  %s16382_s30 = smov [#allocation9]  }
  0x90   : > { %p16286_p1 = scmp.ne.s32.totalorder %s345_s8, %s16285_s18  ;;  %s16290_s13 = sshll.u32 %s16382_s30, 4  ;;  %s16291_s13 = int_to_ptr.vmem [resolvable:$false] %s16290_s13 }
  0x91   : > { %s16292_s2 = scalar_lea.vmem %s16291_s13, 32  ;;  %p16293_p3 = scmp.lt.s32.totalorder %s345_s8, %s16291_s13 }
  0x92   : > { %p16288_p0 = pnand %p16286_p1, %p16485_p10  ;;  %p16294_p4 = scmp.lt.s32.totalorder %s16292_s2, %s16285_s18 }
  0x94   : > { %p16289_p2 = pneg %p16288_p0  ;;  %p16295_p5 = por %p16294_p4, %p16293_p3 }
  0x96   : > { %p16296_p6 = pnand %p16295_p5, %p16289_p2 }
  0x98   : > { %16299 = shalt.err (!%p16296_p6)
}
  0x99   : > { %15580 = dma.hbm_to_vmem [thread:$0]  (!%p16469_p8), %s342_s22, 16, %s345_s8, %s16519_s20  }
  0x9a   : > { %s16634_s26 = scalar_lea.hbm %s21249_s6, %s11814_s19  ;;  %s354_s16 = scalar_lea.vmem [#allocation10], %s16467_s11 }
  0x9b   : > { %s361_s9 = sshll.u32 %s354_s16, 4  ;;  %s352_s15 = scalar_lea.sflag [#allocation11], %s16467_s11  ;;  %s362_s9 = int_to_ptr.vmem [resolvable:$true] %s361_s9 }
  0x9c   : > { %s16300_s29 = scalar_lea.hbm %s16634_s26, 16  ;;  %s16305_s27 = scalar_lea.hbm %s21249_s6, 32 }
  0x9d   : > { %p16301_p9 = scmp.ne.s32.totalorder %s16634_s26, %s16300_s29  ;;  %p16306_p13 = scmp.lt.s32.totalorder %s16634_s26, %s21249_s6 }
  0x9e   : > { %p16307_p7 = scmp.lt.s32.totalorder %s16305_s27, %s16300_s29 }
  0x9f   : > { %p16303_p11 = pnand %p16301_p9, %p16485_p10 }
  0xa0   : > { %p16308_p1 = por %p16307_p7, %p16306_p13 }
  0xa1   : > { %p16304_p12 = pneg %p16303_p11 }
  0xa3   : > { %p16309_p0 = pnand %p16308_p1, %p16304_p12 }
  0xa5   : > { %16312 = shalt.err (!%p16309_p0)
}
  0xa6   : > { %s16313_s19 = scalar_lea.vmem %s362_s9, 16  ;;  %s16383_s11 = smov [#allocation10]  }
  0xa7   : > { %p16314_p2 = scmp.ne.s32.totalorder %s362_s9, %s16313_s19  ;;  %s16318_s21 = sshll.u32 %s16383_s11, 4  ;;  %s16319_s21 = int_to_ptr.vmem [resolvable:$false] %s16318_s21 }
  0xa8   : > { %s16320_s18 = scalar_lea.vmem %s16319_s21, 32  ;;  %p16321_p5 = scmp.lt.s32.totalorder %s362_s9, %s16319_s21 }
  0xa9   : > { %p16316_p3 = pnand %p16314_p2, %p16485_p10  ;;  %p16322_p6 = scmp.lt.s32.totalorder %s16320_s18, %s16313_s19 }
  0xab   : > { %p16317_p4 = pneg %p16316_p3  ;;  %p16323_p9 = por %p16322_p6, %p16321_p5 }
  0xad   : > { %p16324_p11 = pnand %p16323_p9, %p16317_p4 }
  0xaf   : > { %16327 = shalt.err (!%p16324_p11)
}
  0xb0   : > { %15583 = dma.hbm_to_vmem [thread:$0]  (!%p16469_p8), %s16634_s26, 16, %s362_s9, %s352_s15  }
  0xb1   : > { %p21434_p12 = scmp.ne.s32.totalorder %s21431_s24, 0 }
  0xb3   : > { %370 = sbr.rel (%p21434_p12) target bundleno = 2698 (0xa8a), region = 48 }
  0xb8   : > { %s16657_s23 = sand.u32 1, %s16366_s25   ;;  %p21435_p10 = scmp.ne.s32.totalorder %s21427_s10, 0 }
  0xb9   : > { %s15552_s30 = smul.u32 72, %s16657_s23  ;;  %s373_s13 = scalar_lea.sflag [#allocation3], %s16657_s23 }
  0xbb   : > { %s16661_s2 = scalar_lea.vmem [#allocation2], %s15552_s30 }
  0xbc   : > { %16345 = dma.done.wait (%p21435_p10), %s373_s13, 1152  }
  0xbd   : > { %16347 = vsyncadd (%p21435_p10), %s373_s13, 4294966144  ;;  %s381_s12 = sand.u32 1, %s16445_s28   ;;  %s11817_s24 = sshll.u32 %s16657_s23, 1 }
  0xbe   : > { %s382_s14 = scalar_lea.sflag [#allocation5], %s381_s12  ;;  %s16669_s4 = scalar_lea.vmem [#allocation4], %s11817_s24 }
  0xbf   : > { %16349 = dma.done.wait (%p21435_p10), %s382_s14, 65568  }
  0xc0   : > { %16351 = vsyncadd (%p21435_p10), %s382_s14, 4294901728  ;;  %s11818_s26 = sshll.u32 %s16657_s23, 12  ;;  %s11819_s16 = sshll.u32 %s16657_s23, 6 }
  0xc1   : > { %s16677_s9 = scalar_lea.vmem [#allocation6], %s11818_s26  ;;  %s400_s15 = scalar_lea.sflag [#allocation8], %s381_s12 }
  0xc2   : > { %s16679_s29 = scalar_lea.vmem [#allocation7], %s11819_s16 }
  0xc3   : > { %16353 = dma.done.wait (%p21435_p10), %s400_s15, 1040  }
  0xc4   : > { %16355 = vsyncadd (%p21435_p10), %s400_s15, 4294966256  ;;  %s411_s17 = scalar_lea.vmem [#allocation9], %s16657_s23  ;;  %s417_s20 = scalar_lea.sflag [#allocation11], %s16657_s23 }
  0xc5   : > { %s419_s27 = scalar_lea.vmem [#allocation10], %s16657_s23 }
  0xc6   : > { %16357 = dma.done.wait (%p21435_p10), %s417_s20, 16  }
  0xc7   : > { %16359 = vsyncadd (%p21435_p10), %s417_s20, 4294967280  ;;  %v15621_v0 = vld [vmem:[%s16661_s2 + $0x8] sm:$0xff]   ;;  %vm665_vm0 = vcmask 130048   ;;  %v480_v3 = vld [vmem:[%s21243_s0 + $0x18] sm:$0xff]  ;;  %vm16385_vm1 = vmmov 0   ;;  %p472_p8 = scmp.lt.s32.totalorder %s16445_s28, 1 }
  0xc8   : > { %v478_v1 = vld [vmem:[%s21243_s0 + $0x8] sm:$0xff]  ;;  %v479_v2 = vld [vmem:[%s21243_s0 + $0x10] sm:$0xff]  ;;  %13654 = vmatprep.subr.bf16.mxu0 %v15621_v0  ;;  %15548 = vmatprep.subr.bf16.mxu1 %v15621_v0  ;;  %v481_v4 = vld [vmem:[%s21243_s0 + $0x20] sm:$0xff] }
  0xc9   : > { %v627_v5 = vpack.c.bf16 %v479_v2, %v478_v1  ;;  %13655 = vmatpush3.bf16.msra.mxu0 %v15621_v0  ;;  %15549 = vmatpush3.bf16.msra.mxu1 %v15621_v0  ;;  %v628_v6 = vpack.c.bf16 %v481_v4, %v480_v3  ;;  %v16708_v7 = vld [vmem:[%s21243_s0 + $0x238] sm:$0xff]  ;;  %v549_v8 = vld [vmem:[%s21243_s0 + $0x240] sm:$0xff]  ;;  %v550_v9 = vld [vmem:[%s21243_s0 + $0x248] sm:$0xff]  ;;  %v16803_v40 = vpack.c.bf16 %v480_v3, %v479_v2  ;;  %s22000_s28 = smov (!%p472_p8, %s16445_s28), 1 }
  0xca   : > { %v16717_v10 = vpack.c.bf16 %v550_v9, %v549_v8  ;;  %v16720_v11 = vpack.c.bf16 %v549_v8, %v16708_v7  ;;  %v551_v12 = vld [vmem:[%s21243_s0 + $0x250] sm:$0xff]  ;;  %v482_v15 = vld [vmem:[%s21243_s0 + $0x28] sm:$0xff]  ;;  %v552_v18 = vld [vmem:[%s21243_s0 + $0x258] sm:$0xff] }
  0xcb   : > { %13656 = vmatprep.mubr.msk.bf16.mxu0 %vm665_vm0, %v627_v5  ;;  %v16725_v13 = vpack.c.bf16 %v551_v12, %v550_v9  ;;  %v15622_v14 = vld [vmem:[%s16661_s2 + $0x10] sm:$0xff]   ;;  %v553_v19 = vld [vmem:[%s21243_s0 + $0x260] sm:$0xff]  ;;  %v16748_v21 = vpack.c.bf16 %v552_v18, %v551_v12  ;;  %v554_v25 = vld [vmem:[%s21243_s0 + $0x268] sm:$0xff]  ;;  %v16807_v42 = vpack.c.bf16 %v482_v15, %v481_v4 }
  0xcc   : > { %21436 = vst [vmem:[#allocation19_spill] sm:$0xff] %v16717_v10  ;;  %21437 = vst [vmem:[#allocation20_spill] sm:$0xff] %v16720_v11  ;;  %v483_v16 = vld [vmem:[%s21243_s0 + $0x30] sm:$0xff]  ;;  %13712 = vmatprep.mubr.msk.bf16.mxu1 %vm665_vm0, %v16720_v11  ;;  %13657 = vmatmul.mubr.msk.bf16.vlgmr.msra.gmra.mxu0 %vm665_vm0, %v628_v6  ;;  %v477_v20 = vld [vmem:[%s21243_s0] sm:$0xff]  ;;  %v16750_v22 = vpack.c.bf16 %v553_v19, %v552_v18  ;;  %v16767_v27 = vpack.c.bf16 %v554_v25, %v553_v19 }
  0xcd   : > { %21438 = vst [vmem:[#allocation21_spill] sm:$0xff] %v16725_v13  ;;  %v629_v17 = vpack.c.bf16 %v483_v16, %v482_v15  ;;  %13713 = vmatmul.mubr.msk.bf16.vlgmr.msra.gmra.mxu1 %vm665_vm0, %v16725_v13  ;;  %13786 = vmatprep.subr.bf16.mxu0 %v15622_v14  ;;  %21439 = vst [vmem:[#allocation22_spill] sm:$0xff] %v16748_v21  ;;  %v484_v23 = vld [vmem:[%s21243_s0 + $0x38] sm:$0xff]  ;;  %v16758_v24 = vld [vmem:[%s21243_s0 + $0x40] sm:$0xff]  ;;  %v595_v34 = vpack.c.bf16 %v478_v1, %v477_v20 }
  0xce   : > { %21440 = vst [vmem:[#allocation23_spill] sm:$0xff] %v16750_v22  ;;  %13787 = vmatpush3.bf16.msra.mxu0 %v15622_v14  ;;  %v555_v26 = vld [vmem:[%s21243_s0 + $0x270] sm:$0xff]  ;;  %21441 = vst [vmem:[#allocation24_spill] sm:$0xff] %v16767_v27  ;;  %13716 = vmatprep.mubr.msk.bf16.mxu1 %vm665_vm0, %v16750_v22  ;;  %v15623_v28 = vld [vmem:[%s16661_s2] sm:$0xff]   ;;  %v630_v31 = vpack.c.bf16 %v16758_v24, %v484_v23  ;;  %v16837_v49 = vpack.c.bf16 %v484_v23, %v483_v16 }
  0xcf   : > { %13660 = vmatprep.mubr.msk.bf16.mxu0 %vm665_vm0, %v629_v17  ;;  %v488_v29 = vld [vmem:[%s21243_s0 + $0x58] sm:$0xff]  ;;  %v489_v30 = vld [vmem:[%s21243_s0 + $0x60] sm:$0xff]  ;;  %v16779_v32 = vpack.c.bf16 %v555_v26, %v554_v25  ;;  %13720 = vmatprep.subr.bf16.mxu1 %v15623_v28  ;;  %v490_v35 = vld [vmem:[%s21243_s0 + $0x68] sm:$0xff] }
  0xd0   : > { %v16781_v33 = vpack.c.bf16 %v489_v30, %v488_v29  ;;  %13721 = vmatpush3.bf16.msra.mxu1 %v15623_v28  ;;  %v491_v36 = vld [vmem:[%s21243_s0 + $0x70] sm:$0xff]  ;;  %v492_v37 = vld [vmem:[%s21243_s0 + $0x78] sm:$0xff]  ;;  %v493_v38 = vld [vmem:[%s21243_s0 + $0x80] sm:$0xff]  ;;  %v16870_v59 = vpack.c.bf16 %v490_v35, %v489_v30 }
  0xd1   : > { %21442 = vst [vmem:[#allocation25_spill] sm:$0xff] %v16779_v32  ;;  %v16801_v39 = vpack.c.bf16 %v491_v36, %v490_v35  ;;  %v16805_v41 = vpack.c.bf16 %v493_v38, %v492_v37  ;;  %v494_v43 = vld [vmem:[%s21243_s0 + $0x88] sm:$0xff]  ;;  %v16821_v44 = vld [vmem:[%s21243_s0 + $0x90] sm:$0xff]  ;;  %v15624_v51 = vld [vmem:[%s16661_s2 + $0x18] sm:$0xff]   ;;  %v16874_v61 = vpack.c.bf16 %v492_v37, %v491_v36 }
  0xd2   : > { %v498_v45 = vld [vmem:[%s21243_s0 + $0xa8] sm:$0xff]  ;;  %v499_v46 = vld [vmem:[%s21243_s0 + $0xb0] sm:$0xff]  ;;  %v16835_v48 = vpack.c.bf16 %v16821_v44, %v494_v43  ;;  %v500_v53 = vld [vmem:[%s21243_s0 + $0xb8] sm:$0xff]  ;;  %13852 = vmatprep.subr.bf16.mxu1 %v15624_v51  ;;  %v16904_v4 = vpack.c.bf16 %v494_v43, %v493_v38 }
  0xd3   : > { %v487_v47 = vld [vmem:[%s21243_s0 + $0x50] sm:$0xff]  ;;  %v16839_v50 = vpack.c.bf16 %v499_v46, %v498_v45  ;;  %v501_v54 = vld [vmem:[%s21243_s0 + $0xc0] sm:$0xff]  ;;  %v502_v56 = vld [vmem:[%s21243_s0 + $0xc8] sm:$0xff]  ;;  %v16932_v16 = vpack.c.bf16 %v500_v53, %v499_v46 }
  0xd4   : > { %13661 = vmatmul.mubr.msk.bf16.gmra.mxu0 %vm665_vm0, %v630_v31  ;;  %v16842_v52 = vpack.c.bf16 %v488_v29, %v487_v47  ;;  %v16851_v55 = vld [vmem:[%s16661_s2 + $0x20] sm:$0xff]   ;;  %v503_v57 = vld [vmem:[%s21243_s0 + $0xd0] sm:$0xff]  ;;  %v16868_v58 = vpack.c.bf16 %v501_v54, %v500_v53  ;;  %v504_v62 = vld [vmem:[%s21243_s0 + $0xd8] sm:$0xff]  ;;  %v16936_v18 = vpack.c.bf16 %v502_v56, %v501_v54 }
  0xd5   : > { %13717 = vmatmul.mubr.msk.bf16.gmra.mxu1 %vm665_vm0, %v16779_v32  ;;  %13664 = vmatprep.mubr.msk.bf16.mxu0 %vm665_vm0, %v16781_v33  ;;  %21443 = vst [vmem:[#allocation26_spill] sm:$0xff] %v16839_v50  ;;  %v16872_v60 = vpack.c.bf16 %v503_v57, %v502_v56  ;;  %v16882_v63 = vld [vmem:[%s21243_s0 + $0xe0] sm:$0xff]  ;;  %v508_v0 = vld [vmem:[%s21243_s0 + $0xf8] sm:$0xff]  ;;  %v510_v8 = vld [vmem:[%s21243_s0 + $0x108] sm:$0xff]  ;;  %v16966_v29 = vpack.c.bf16 %v504_v62, %v503_v57 }
  0xd6   : > { %13722 = vmatprep.mubr.msk.bf16.mxu1 %vm665_vm0, %v595_v34  ;;  %13918 = vmatprep.subr.bf16.mxu0 %v16851_v55  ;;  %21444 = vst [vmem:[#allocation27_spill] sm:$0xff] %v16868_v58  ;;  %v509_v1 = vld [vmem:[%s21243_s0 + $0x100] sm:$0xff]  ;;  %v16902_v3 = vpack.c.bf16 %v16882_v63, %v504_v62  ;;  %v511_v9 = vld [vmem:[%s21243_s0 + $0x110] sm:$0xff]  ;;  %v512_v12 = vld [vmem:[%s21243_s0 + $0x118] sm:$0xff] }
  0xd7   : > { %21445 = vst [vmem:[#allocation28_spill] sm:$0xff] %v16872_v60  ;;  %v497_v2 = vld [vmem:[%s21243_s0 + $0xa0] sm:$0xff]  ;;  %v16906_v5 = vpack.c.bf16 %v509_v1, %v508_v0  ;;  %v16930_v15 = vpack.c.bf16 %v511_v9, %v510_v8  ;;  %21450 = vst [vmem:[#allocation33_spill] sm:$0xff] %v16932_v16  ;;  %v514_v19 = vld [vmem:[%s21243_s0 + $0x128] sm:$0xff]  ;;  %v16994_v43 = vpack.c.bf16 %v510_v8, %v509_v1 }
  0xd8   : > { %21446 = vst [vmem:[#allocation29_spill] sm:$0xff] %v16902_v3  ;;  %v16908_v6 = vpack.c.bf16 %v498_v45, %v497_v2  ;;  %v513_v14 = vld [vmem:[%s21243_s0 + $0x120] sm:$0xff]  ;;  %21452 = vst [vmem:[#allocation35_spill] sm:$0xff] %v16936_v18  ;;  %v16944_v20 = vld [vmem:[%s21243_s0 + $0x130] sm:$0xff]  ;;  %v16998_v46 = vpack.c.bf16 %v512_v12, %v511_v9 }
  0xd9   : > { %21447 = vst [vmem:[#allocation30_spill] sm:$0xff] %v16906_v5  ;;  %21449 = vst [vmem:[#allocation32_spill] sm:$0xff] %v16930_v15  ;;  %v16934_v17 = vpack.c.bf16 %v513_v14, %v512_v12  ;;  %v518_v23 = vld [vmem:[%s21243_s0 + $0x148] sm:$0xff]  ;;  %v519_v25 = vld [vmem:[%s21243_s0 + $0x150] sm:$0xff]  ;;  %v16964_v28 = vpack.c.bf16 %v16944_v20, %v514_v19  ;;  %v17028_v62 = vpack.c.bf16 %v514_v19, %v513_v14 }
  0xda   : > { %21448 = vst [vmem:[#allocation31_spill] sm:$0xff] %v16908_v6  ;;  %v507_v26 = vld [vmem:[%s21243_s0 + $0xf0] sm:$0xff]  ;;  %21454 = vst [vmem:[#allocation37_spill] sm:$0xff] %v16966_v29  ;;  %v16968_v30 = vpack.c.bf16 %v519_v25, %v518_v23  ;;  %v520_v34 = vld [vmem:[%s21243_s0 + $0x158] sm:$0xff] }
  0xdb   : > { %21451 = vst [vmem:[#allocation34_spill] sm:$0xff] %v16934_v17  ;;  %21453 = vst [vmem:[#allocation36_spill] sm:$0xff] %v16964_v28  ;;  %v16970_v31 = vpack.c.bf16 %v508_v0, %v507_v26  ;;  %v521_v35 = vld [vmem:[%s21243_s0 + $0x160] sm:$0xff]  ;;  %v522_v36 = vld [vmem:[%s21243_s0 + $0x168] sm:$0xff]  ;;  %v17056_v19 = vpack.c.bf16 %v520_v34, %v519_v25 }
  0xdc   : > { %13665 = vmatmul.mubr.msk.bf16.gmra.mxu0 %vm665_vm0, %v16801_v39  ;;  %21455 = vst [vmem:[#allocation38_spill] sm:$0xff] %v16968_v30  ;;  %v523_v37 = vld [vmem:[%s21243_s0 + $0x170] sm:$0xff]  ;;  %v16992_v38 = vpack.c.bf16 %v521_v35, %v520_v34  ;;  %21458 = vst [vmem:[#allocation41_spill] sm:$0xff] %v16994_v43  ;;  %v524_v47 = vld [vmem:[%s21243_s0 + $0x178] sm:$0xff]  ;;  %v17060_v26 = vpack.c.bf16 %v522_v36, %v521_v35 }
  0xdd   : > { %13723 = vmatmul.mubr.msk.bf16.vlgmr.msra.gmra.mxu1 %vm665_vm0, %v16803_v40  ;;  %13668 = vmatprep.mubr.msk.bf16.mxu0 %vm665_vm0, %v16805_v41  ;;  %21456 = vst [vmem:[#allocation39_spill] sm:$0xff] %v16970_v31  ;;  %v16996_v45 = vpack.c.bf16 %v523_v37, %v522_v36  ;;  %21460 = vst [vmem:[#allocation43_spill] sm:$0xff] %v16998_v46  ;;  %v528_v53 = vld [vmem:[%s21243_s0 + $0x198] sm:$0xff]  ;;  %v529_v54 = vld [vmem:[%s21243_s0 + $0x1a0] sm:$0xff]  ;;  %v17090_v22 = vpack.c.bf16 %v524_v47, %v523_v37 }
  0xde   : > { %13726 = vmatprep.mubr.msk.bf16.mxu1 %vm665_vm0, %v16807_v42  ;;  %13853 = vmatpush3.bf16.msra.mxu1 %v15624_v51  ;;  %21457 = vst [vmem:[#allocation40_spill] sm:$0xff] %v16992_v38  ;;  %v17006_v51 = vld [vmem:[%s21243_s0 + $0x180] sm:$0xff]  ;;  %21462 = vst [vmem:[#allocation45_spill] sm:$0xff] %v17028_v62  ;;  %v17030_v0 = vpack.c.bf16 %v529_v54, %v528_v53  ;;  %v530_v2 = vld [vmem:[%s21243_s0 + $0x1a8] sm:$0xff] }
  0xdf   : > { %21459 = vst [vmem:[#allocation42_spill] sm:$0xff] %v16996_v45  ;;  %v517_v56 = vld [vmem:[%s21243_s0 + $0x140] sm:$0xff]  ;;  %v17026_v57 = vpack.c.bf16 %v17006_v51, %v524_v47  ;;  %v531_v8 = vld [vmem:[%s21243_s0 + $0x1b0] sm:$0xff]  ;;  %v532_v9 = vld [vmem:[%s21243_s0 + $0x1b8] sm:$0xff] }
  0xe0   : > { %21463 = vst [vmem:[#allocation46_spill] sm:$0xff] %v17030_v0  ;;  %v17032_v1 = vpack.c.bf16 %v518_v23, %v517_v56  ;;  %v533_v12 = vld [vmem:[%s21243_s0 + $0x1c0] sm:$0xff]  ;;  %v17054_v14 = vpack.c.bf16 %v531_v8, %v530_v2  ;;  %21466 = vst [vmem:[#allocation49_spill] sm:$0xff] %v17056_v19  ;;  %v534_v56 = vld [vmem:[%s21243_s0 + $0x1c8] sm:$0xff] }
  0xe1   : > { %21461 = vst [vmem:[#allocation44_spill] sm:$0xff] %v17026_v57  ;;  %v17058_v23 = vpack.c.bf16 %v533_v12, %v532_v9  ;;  %21468 = vst [vmem:[#allocation51_spill] sm:$0xff] %v17060_v26  ;;  %v17068_v32 = vld [vmem:[%s21243_s0 + $0x1d0] sm:$0xff]  ;;  %v538_v25 = vld [vmem:[%s21243_s0 + $0x1e8] sm:$0xff] }
  0xe2   : > { %21464 = vst [vmem:[#allocation47_spill] sm:$0xff] %v17032_v1  ;;  %21465 = vst [vmem:[#allocation48_spill] sm:$0xff] %v17054_v14  ;;  %v539_v34 = vld [vmem:[%s21243_s0 + $0x1f0] sm:$0xff]  ;;  %v17088_v36 = vpack.c.bf16 %v17068_v32, %v534_v56  ;;  %v542_v37 = vld [vmem:[%s21243_s0 + $0x208] sm:$0xff] }
  0xe3   : > { %21467 = vst [vmem:[#allocation50_spill] sm:$0xff] %v17058_v23  ;;  %v527_v35 = vld [vmem:[%s21243_s0 + $0x190] sm:$0xff]  ;;  %21470 = vst [vmem:[#allocation53_spill] sm:$0xff] %v17090_v22  ;;  %v17092_v13 = vpack.c.bf16 %v539_v34, %v538_v25 }
  0xe4   : > { %13669 = vmatmul.mubr.msk.bf16.gmra.mxu0 %vm665_vm0, %v16835_v48  ;;  %21469 = vst [vmem:[#allocation52_spill] sm:$0xff] %v17088_v36  ;;  %v17094_v11 = vpack.c.bf16 %v528_v53, %v527_v35  ;;  %v543_v47 = vld [vmem:[%s21243_s0 + $0x210] sm:$0xff]  ;;  %v17118_v35 = vpack.c.bf16 %v530_v2, %v529_v54  ;;  %v537_v54 = vld [vmem:[%s21243_s0 + $0x1e0] sm:$0xff] }
  0xe5   : > { %13727 = vmatmul.mubr.msk.bf16.gmra.mxu1 %vm665_vm0, %v16837_v49  ;;  %13672 = vmatprep.mubr.msk.bf16.mxu0 %vm665_vm0, %v16839_v50  ;;  %21471 = vst [vmem:[#allocation54_spill] sm:$0xff] %v17092_v13 }
  0xe6   : > { %13730 = vmatprep.mubr.msk.bf16.mxu1 %vm665_vm0, %v16842_v52  ;;  %21472 = vst [vmem:[#allocation55_spill] sm:$0xff] %v17094_v11  ;;  %21474 = vst [vmem:[#allocation57_spill] sm:$0xff] %v17118_v35 }
  0xec   : > { %13673 = vmatmul.mubr.msk.bf16.gmra.mxu0 %vm665_vm0, %v16868_v58 }
  0xed   : > { %13731 = vmatmul.mubr.msk.bf16.gmra.mxu1 %vm665_vm0, %v16870_v59  ;;  %13676 = vmatprep.mubr.msk.bf16.mxu0 %vm665_vm0, %v16872_v60 }
  0xee   : > { %13734 = vmatprep.mubr.msk.bf16.mxu1 %vm665_vm0, %v16874_v61 }
  0xf4   : > { %13677 = vmatmul.mubr.msk.bf16.gmra.mxu0 %vm665_vm0, %v16902_v3 }
  0xf5   : > { %13735 = vmatmul.mubr.msk.bf16.gmra.mxu1 %vm665_vm0, %v16904_v4  ;;  %13680 = vmatprep.mubr.msk.bf16.mxu0 %vm665_vm0, %v16906_v5 }
  0xf6   : > { %13738 = vmatprep.mubr.msk.bf16.mxu1 %vm665_vm0, %v16908_v6 }
  0xfc   : > { %13681 = vmatmul.mubr.msk.bf16.gmra.mxu0 %vm665_vm0, %v16930_v15 }
  0xfd   : > { %13739 = vmatmul.mubr.msk.bf16.gmra.mxu1 %vm665_vm0, %v16932_v16  ;;  %13684 = vmatprep.mubr.msk.bf16.mxu0 %vm665_vm0, %v16934_v17 }
  0xfe   : > { %13742 = vmatprep.mubr.msk.bf16.mxu1 %vm665_vm0, %v16936_v18 }
 0x104   : > { %13685 = vmatmul.mubr.msk.bf16.gmra.mxu0 %vm665_vm0, %v16964_v28 }
 0x105   : > { %13743 = vmatmul.mubr.msk.bf16.gmra.mxu1 %vm665_vm0, %v16966_v29  ;;  %13688 = vmatprep.mubr.msk.bf16.mxu0 %vm665_vm0, %v16968_v30 }
 0x106   : > { %13746 = vmatprep.mubr.msk.bf16.mxu1 %vm665_vm0, %v16970_v31 }
 0x10c   : > { %13689 = vmatmul.mubr.msk.bf16.gmra.mxu0 %vm665_vm0, %v16992_v38 }
 0x10d   : > { %13747 = vmatmul.mubr.msk.bf16.gmra.mxu1 %vm665_vm0, %v16994_v43  ;;  %13692 = vmatprep.mubr.msk.bf16.mxu0 %vm665_vm0, %v16996_v45  ;;  %v17130_v45 = vld [vmem:[%s21243_s0 + $0x220] sm:$0xff] }
 0x10e   : > { %13750 = vmatprep.mubr.msk.bf16.mxu1 %vm665_vm0, %v16998_v46 }
 0x114   : > { %13693 = vmatmul.mubr.msk.bf16.gmra.mxu0 %vm665_vm0, %v17026_v57  ;;  %v544_v57 = vld [vmem:[%s21243_s0 + $0x218] sm:$0xff] }
 0x115   : > { %13751 = vmatmul.mubr.msk.bf16.gmra.mxu1 %vm665_vm0, %v17028_v62  ;;  %13696 = vmatprep.mubr.msk.bf16.mxu0 %vm665_vm0, %v17030_v0  ;;  %v17122_v0 = vpack.c.bf16 %v532_v9, %v531_v8  ;;  %v17144_v2 = vpack.c.bf16 %v17130_v45, %v544_v57  ;;  %v17146_v8 = vpack.c.bf16 %v534_v56, %v533_v12  ;;  %v486_v12 = vld [vmem:[%s21243_s0 + $0x48] sm:$0xff] }
 0x116   : > { %13754 = vmatprep.mubr.msk.bf16.mxu1 %vm665_vm0, %v17032_v1  ;;  %v17148_v9 = vpack.c.bf16 %v538_v25, %v537_v54  ;;  %v15626_v56 = vld [vmem:[%s16661_s2 + $0x28] sm:$0xff]  }
 0x117   : > { %21476 = vst [vmem:[#allocation59_spill] sm:$0xff] %v17122_v0  ;;  %21477 = vst [vmem:[#allocation60_spill] sm:$0xff] %v17144_v2  ;;  %v547_v25 = vld [vmem:[%s21243_s0 + $0x230] sm:$0xff]  ;;  %13984 = vmatprep.subr.bf16.mxu1 %v15626_v56 }
 0x118   : > { %21478 = vst [vmem:[#allocation61_spill] sm:$0xff] %v17146_v8  ;;  %21479 = vst [vmem:[#allocation62_spill] sm:$0xff] %v17148_v9 }
 0x11c   : > { %13697 = vmatmul.mubr.msk.bf16.gmra.mxu0 %vm665_vm0, %v17054_v14  ;;  %v541_v14 = vld [vmem:[%s21243_s0 + $0x200] sm:$0xff] }
 0x11d   : > { %13755 = vmatmul.mubr.msk.bf16.gmra.mxu1 %vm665_vm0, %v17056_v19  ;;  %13700 = vmatprep.mubr.msk.bf16.mxu0 %vm665_vm0, %v17058_v23  ;;  %v540_v23 = vld [vmem:[%s21243_s0 + $0x1f8] sm:$0xff] }
 0x11e   : > { %13758 = vmatprep.mubr.msk.bf16.mxu1 %vm665_vm0, %v17060_v26  ;;  %v17116_v53 = vpack.c.bf16 %v541_v14, %v540_v23 }
 0x120   : > { %21473 = vst [vmem:[#allocation56_spill] sm:$0xff] %v17116_v53 }
 0x124   : > { %13701 = vmatmul.mubr.msk.bf16.gmra.mxu0 %vm665_vm0, %v17088_v36  ;;  %v17120_v36 = vpack.c.bf16 %v543_v47, %v542_v37 }
 0x125   : > { %13759 = vmatmul.mubr.msk.bf16.gmra.mxu1 %vm665_vm0, %v17090_v22  ;;  %13704 = vmatprep.mubr.msk.bf16.mxu0 %vm665_vm0, %v17092_v13 }
 0x126   : > { %13762 = vmatprep.mubr.msk.bf16.mxu1 %vm665_vm0, %v17094_v11  ;;  %21475 = vst [vmem:[#allocation58_spill] sm:$0xff] %v17120_v36 }
 0x12c   : > { %13705 = vmatmul.mubr.msk.bf16.gmra.mxu0 %vm665_vm0, %v17116_v53  ;;  %v17160_v53 = vpack.c.bf16 %v542_v37, %v541_v14  ;;  %v17180_v14 = vpack.c.bf16 %v544_v57, %v543_v47  ;;  %v526_v37 = vld [vmem:[%s21243_s0 + $0x188] sm:$0xff]  ;;  %v536_v47 = vld [vmem:[%s21243_s0 + $0x1d8] sm:$0xff] }
 0x12d   : > { %13763 = vmatmul.mubr.msk.bf16.gmra.mxu1 %vm665_vm0, %v17118_v35  ;;  %13708 = vmatprep.mubr.msk.bf16.mxu0 %vm665_vm0, %v17120_v36  ;;  %v17158_v36 = vpack.c.bf16 %v540_v23, %v539_v34  ;;  %v17183_v23 = vpack.c.bf16 %v16708_v7, %v547_v25 }
 0x12e   : > { %13766 = vmatprep.mubr.msk.bf16.mxu1 %vm665_vm0, %v17122_v0  ;;  %21481 = vst [vmem:[#allocation64_spill] sm:$0xff] %v17160_v53  ;;  %21482 = vst [vmem:[#allocation65_spill] sm:$0xff] %v17180_v14 }
 0x12f   : > { %21480 = vst [vmem:[#allocation63_spill] sm:$0xff] %v17158_v36  ;;  %21483 = vst [vmem:[#allocation66_spill] sm:$0xff] %v17183_v23 }
 0x134   : > { %13709 = vmatmul.mubr.msk.bf16.gmra.mxu0 %vm665_vm0, %v17144_v2 }
 0x135   : > { %13767 = vmatmul.mubr.msk.bf16.gmra.mxu1 %vm665_vm0, %v17146_v8  ;;  %13788 = vmatprep.mubr.msk.bf16.mxu0 %vm665_vm0, %v16803_v40  ;;  %v15627_v40 = vld [vmem:[%s16661_s2 + $0x30] sm:$0xff]  }
 0x136   : > { %13770 = vmatprep.mubr.msk.bf16.mxu1 %vm665_vm0, %v17148_v9 }
 0x13c   : > { %13789 = vmatmul.mubr.msk.bf16.vlgmr.msra.gmra.mxu0 %vm665_vm0, %v16807_v42  ;;  %v1442_v42 = vpack.c.bf16 %v486_v12, %v16758_v24  ;;  %v496_v24 = vld [vmem:[%s21243_s0 + $0x98] sm:$0xff] }
 0x13d   : > { %13771 = vmatmul.mubr.msk.bf16.gmra.mxu1 %vm665_vm0, %v17158_v36  ;;  %13919 = vmatpush3.bf16.msra.mxu0 %v16851_v55  ;;  %v17204_v7 = vpack.c.bf16 %v496_v24, %v16821_v44  ;;  %v561_v55 = vld [vmem:[%s21243_s0 + $0x2a0] sm:$0xff]  ;;  %v506_v44 = vld [vmem:[%s21243_s0 + $0xe8] sm:$0xff] }
 0x13e   : > { %13774 = vmatprep.mubr.msk.bf16.mxu1 %vm665_vm0, %v17160_v53  ;;  %13792 = vmatprep.mubr.msk.bf16.mxu0 %vm665_vm0, %v16837_v49  ;;  %v560_v49 = vld [vmem:[%s21243_s0 + $0x298] sm:$0xff]  ;;  %v17234_v34 = vpack.c.bf16 %v506_v44, %v16882_v63 }
 0x13f   : > { %14050 = vmatprep.subr.bf16.mxu0 %v15627_v40  ;;  %v17214_v57 = vpack.c.bf16 %v561_v55, %v560_v49  ;;  %v17304_v40 = vpack.c.bf16 %v536_v47, %v17068_v32 }
 0x140   : > { %21485 = vst [vmem:[#allocation68_spill] sm:$0xff] %v17234_v34 }
 0x141   : > { %21484 = vst [vmem:[#allocation67_spill] sm:$0xff] %v17214_v57  ;;  %21490 = vst [vmem:[#allocation73_spill] sm:$0xff] %v17304_v40 }
 0x144   : > { %13793 = vmatmul.mubr.msk.bf16.gmra.mxu0 %vm665_vm0, %v1442_v42 }
 0x145   : > { %13775 = vmatmul.mubr.msk.bf16.gmra.mxu1 %vm665_vm0, %v17180_v14  ;;  %13796 = vmatprep.mubr.msk.bf16.mxu0 %vm665_vm0, %v16870_v59 }
 0x146   : > { %13778 = vmatprep.mubr.msk.bf16.mxu1 %vm665_vm0, %v17183_v23 }
 0x14c   : > { %13797 = vmatmul.mubr.msk.bf16.gmra.mxu0 %vm665_vm0, %v16874_v61 }
 0x14d   : > { %13779 = vmatmul.mubr.msk.bf16.gmra.mxu1 %vm665_vm0, %v16717_v10  ;;  %13800 = vmatprep.mubr.msk.bf16.mxu0 %vm665_vm0, %v16904_v4 }
 0x14e   : > { %13782 = vmatprep.mubr.msk.bf16.mxu1 %vm665_vm0, %v16748_v21 }
 0x154   : > { %13801 = vmatmul.mubr.msk.bf16.gmra.mxu0 %vm665_vm0, %v17204_v7 }
 0x155   : > { %13783 = vmatmul.mubr.msk.bf16.gmra.mxu1 %vm665_vm0, %v16767_v27  ;;  %13804 = vmatprep.mubr.msk.bf16.mxu0 %vm665_vm0, %v16932_v16 }
 0x156   : > { %13854 = vmatprep.mubr.msk.bf16.mxu1 %vm665_vm0, %v16842_v52  ;;  %v516_v52 = vld [vmem:[%s21243_s0 + $0x138] sm:$0xff] }
 0x157   : > { %v17256_v63 = vpack.c.bf16 %v516_v52, %v16944_v20  ;;  %v17278_v20 = vpack.c.bf16 %v526_v37, %v17006_v51 }
 0x159   : > { %21486 = vst [vmem:[#allocation69_spill] sm:$0xff] %v17256_v63  ;;  %21487 = vst [vmem:[#allocation70_spill] sm:$0xff] %v17278_v20 }
 0x15c   : > { %13805 = vmatmul.mubr.msk.bf16.gmra.mxu0 %vm665_vm0, %v16936_v18 }
 0x15d   : > { %13855 = vmatmul.mubr.msk.bf16.vlgmr.msra.gmra.mxu1 %vm665_vm0, %v16870_v59  ;;  %13808 = vmatprep.mubr.msk.bf16.mxu0 %vm665_vm0, %v16966_v29 }
 0x15e   : > { %13858 = vmatprep.mubr.msk.bf16.mxu1 %vm665_vm0, %v16874_v61  ;;  %13985 = vmatpush3.bf16.msra.mxu1 %v15626_v56 }
 0x164   : > { %13809 = vmatmul.mubr.msk.bf16.gmra.mxu0 %vm665_vm0, %v17234_v34 }
 0x165   : > { %13859 = vmatmul.mubr.msk.bf16.gmra.mxu1 %vm665_vm0, %v16904_v4  ;;  %13812 = vmatprep.mubr.msk.bf16.mxu0 %vm665_vm0, %v16994_v43 }
 0x166   : > { %13862 = vmatprep.mubr.msk.bf16.mxu1 %vm665_vm0, %v16908_v6 }
 0x16c   : > { %13813 = vmatmul.mubr.msk.bf16.gmra.mxu0 %vm665_vm0, %v16998_v46 }
 0x16d   : > { %13863 = vmatmul.mubr.msk.bf16.gmra.mxu1 %vm665_vm0, %v16932_v16  ;;  %13816 = vmatprep.mubr.msk.bf16.mxu0 %vm665_vm0, %v17028_v62 }
 0x16e   : > { %13866 = vmatprep.mubr.msk.bf16.mxu1 %vm665_vm0, %v16936_v18 }
 0x174   : > { %13817 = vmatmul.mubr.msk.bf16.gmra.mxu0 %vm665_vm0, %v17256_v63 }
 0x175   : > { %13867 = vmatmul.mubr.msk.bf16.gmra.mxu1 %vm665_vm0, %v16966_v29  ;;  %13820 = vmatprep.mubr.msk.bf16.mxu0 %vm665_vm0, %v17056_v19 }
 0x176   : > { %13870 = vmatprep.mubr.msk.bf16.mxu1 %vm665_vm0, %v16970_v31 }
 0x17c   : > { %13821 = vmatmul.mubr.msk.bf16.gmra.mxu0 %vm665_vm0, %v17060_v26 }
 0x17d   : > { %13871 = vmatmul.mubr.msk.bf16.gmra.mxu1 %vm665_vm0, %v16994_v43  ;;  %13824 = vmatprep.mubr.msk.bf16.mxu0 %vm665_vm0, %v17090_v22 }
 0x17e   : > { %13874 = vmatprep.mubr.msk.bf16.mxu1 %vm665_vm0, %v16998_v46 }
 0x184   : > { %13825 = vmatmul.mubr.msk.bf16.gmra.mxu0 %vm665_vm0, %v17278_v20 }
 0x185   : > { %13875 = vmatmul.mubr.msk.bf16.gmra.mxu1 %vm665_vm0, %v17028_v62  ;;  %13828 = vmatprep.mubr.msk.bf16.mxu0 %vm665_vm0, %v17118_v35 }
 0x186   : > { %13878 = vmatprep.mubr.msk.bf16.mxu1 %vm665_vm0, %v17032_v1 }
 0x18c   : > { %v13658_v54 = vpop.f32.mrf.mxu0  ;;  %13829 = vmatmul.mubr.msk.bf16.gmra.mxu0 %vm665_vm0, %v17122_v0 }
 0x18d   : > { %v17293_v51 = vpop.f32.mrf.mxu1  ;;  %13879 = vmatmul.mubr.msk.bf16.gmra.mxu1 %vm665_vm0, %v17056_v19  ;;  %13832 = vmatprep.mubr.msk.bf16.mxu0 %vm665_vm0, %v17146_v8 }
 0x18e   : > { %21488 = vst [vmem:[#allocation71_spill] sm:$0xff] %v17293_v51  ;;  %v796_v12 = vpop.f32.mrf.mxu0  ;;  %13882 = vmatprep.mubr.msk.bf16.mxu1 %vm665_vm0, %v17060_v26 }
 0x18f   : > { %v17301_v56 = vpop.f32.mrf.mxu1 }
 0x190   : > { %21489 = vst [vmem:[#allocation72_spill] sm:$0xff] %v17301_v56  ;;  %v13659_v25 = vpop.f32.mrf.mxu0 }
 0x191   : > { %v17306_v42 = vpop.f32.mrf.mxu1 }
 0x192   : > { %21491 = vst [vmem:[#allocation74_spill] sm:$0xff] %v17306_v42  ;;  %v799_v24 = vpop.f32.mrf.mxu0 }
 0x193   : > { %v17308_v49 = vpop.f32.mrf.mxu1 }
 0x194   : > { %21492 = vst [vmem:[#allocation75_spill] sm:$0xff] %v17308_v49  ;;  %v13662_v55 = vpop.f32.mrf.mxu0  ;;  %13833 = vmatmul.mubr.msk.bf16.gmra.mxu0 %vm665_vm0, %v17304_v40 }
 0x195   : > { %v17312_v44 = vpop.f32.mrf.mxu1  ;;  %13883 = vmatmul.mubr.msk.bf16.gmra.mxu1 %vm665_vm0, %v17090_v22  ;;  %13836 = vmatprep.mubr.msk.bf16.mxu0 %vm665_vm0, %v17158_v36 }
 0x196   : > { %21493 = vst [vmem:[#allocation76_spill] sm:$0xff] %v17312_v44  ;;  %v812_v52 = vpop.f32.mrf.mxu0  ;;  %13886 = vmatprep.mubr.msk.bf16.mxu1 %vm665_vm0, %v17094_v11  ;;  %v546_v44 = vld [vmem:[%s21243_s0 + $0x228] sm:$0xff] }
 0x197   : > { %v17320_v32 = vpop.f32.mrf.mxu1  ;;  %v17342_v31 = vpack.c.bf16 %v546_v44, %v17130_v45 }
 0x198   : > { %21494 = vst [vmem:[#allocation77_spill] sm:$0xff] %v17320_v32  ;;  %v13663_v37 = vpop.f32.mrf.mxu0 }
 0x199   : > { %v17322_v47 = vpop.f32.mrf.mxu1  ;;  %21497 = vst [vmem:[#allocation80_spill] sm:$0xff] %v17342_v31 }
 0x19a   : > { %21495 = vst [vmem:[#allocation78_spill] sm:$0xff] %v17322_v47  ;;  %v815_v49 = vpop.f32.mrf.mxu0 }
 0x19b   : > { %v17324_v42 = vpop.f32.mrf.mxu1 }
 0x19c   : > { %21496 = vst [vmem:[#allocation79_spill] sm:$0xff] %v17324_v42  ;;  %v13666_v56 = vpop.f32.mrf.mxu0  ;;  %13837 = vmatmul.mubr.msk.bf16.gmra.mxu0 %vm665_vm0, %v17160_v53 }
 0x19d   : > { %v13724_v51 = vpop.f32.mrf.mxu1  ;;  %13887 = vmatmul.mubr.msk.bf16.gmra.mxu1 %vm665_vm0, %v17118_v35  ;;  %13840 = vmatprep.mubr.msk.bf16.mxu0 %vm665_vm0, %v17180_v14 }
 0x19e   : > { %v17335_v32 = vadd.f32 %v13724_v51, %v13658_v54  ;;  %v828_v47 = vpop.f32.mrf.mxu0  ;;  %13890 = vmatprep.mubr.msk.bf16.mxu1 %vm665_vm0, %v17122_v0 }
 0x19f   : > { %v1187_v42 = vpop.f32.mrf.mxu1 }
 0x1a0   : > { %v17339_v11 = vadd.f32 %v1187_v42, %v796_v12  ;;  %v13667_v1 = vpop.f32.mrf.mxu0 }
 0x1a1   : > { %v13725_v6 = vpop.f32.mrf.mxu1 }
 0x1a2   : > { %v17344_v57 = vadd.f32 %v13725_v6, %v13659_v25  ;;  %v831_v40 = vpop.f32.mrf.mxu0 }
 0x1a3   : > { %v1190_v35 = vpop.f32.mrf.mxu1 }
 0x1a4   : > { %v17346_v20 = vadd.f32 %v1190_v35, %v799_v24  ;;  %v13670_v54 = vpop.f32.mrf.mxu0  ;;  %13841 = vmatmul.mubr.msk.bf16.gmra.mxu0 %vm665_vm0, %v17342_v31  ;;  %v556_v31 = vld [vmem:[%s21243_s0 + $0x278] sm:$0xff] }
 0x1a5   : > { %v13728_v51 = vpop.f32.mrf.mxu1  ;;  %13891 = vmatmul.mubr.msk.bf16.gmra.mxu1 %vm665_vm0, %v17146_v8  ;;  %13844 = vmatprep.mubr.msk.bf16.mxu0 %vm665_vm0, %v16717_v10 }
 0x1a6   : > { %v17354_v45 = vadd.f32 %v13728_v51, %v13662_v55  ;;  %v844_v12 = vpop.f32.mrf.mxu0  ;;  %13894 = vmatprep.mubr.msk.bf16.mxu1 %vm665_vm0, %v17148_v9 }
 0x1a7   : > { %v1203_v6 = vpop.f32.mrf.mxu1 }
 0x1a8   : > { %v17358_v35 = vadd.f32 %v1203_v6, %v812_v52  ;;  %v13671_v25 = vpop.f32.mrf.mxu0 }
 0x1a9   : > { %v13729_v42 = vpop.f32.mrf.mxu1 }
 0x1aa   : > { %v17360_v24 = vadd.f32 %v13729_v42, %v13663_v37  ;;  %v847_v44 = vpop.f32.mrf.mxu0 }
 0x1ab   : > { %v1206_v8 = vpop.f32.mrf.mxu1 }
 0x1ac   : > { %v17365_v0 = vadd.f32 %v1206_v8, %v815_v49  ;;  %v13674_v55 = vpop.f32.mrf.mxu0  ;;  %13845 = vmatmul.mubr.msk.bf16.gmra.mxu0 %vm665_vm0, %v16748_v21  ;;  %v16152_v8 = vld [vmem:[%s21243_s0 + $0x270] sm:$0xff] }
 0x1ad   : > { %v13732_v51 = vpop.f32.mrf.mxu1  ;;  %13895 = vmatmul.mubr.msk.bf16.gmra.mxu1 %vm665_vm0, %v17158_v36  ;;  %13848 = vmatprep.mubr.msk.bf16.mxu0 %vm665_vm0, %v16767_v27  ;;  %v17380_v49 = vpack.c.bf16 %v556_v31, %v16152_v8 }
 0x1ae   : > { %v17373_v52 = vadd.f32 %v13732_v51, %v13666_v56  ;;  %v860_v37 = vpop.f32.mrf.mxu0  ;;  %13898 = vmatprep.mubr.msk.bf16.mxu1 %vm665_vm0, %v17160_v53 }
 0x1af   : > { %v1219_v6 = vpop.f32.mrf.mxu1  ;;  %21498 = vst [vmem:[#allocation81_spill] sm:$0xff] %v17380_v49 }
 0x1b0   : > { %v17382_v42 = vadd.f32 %v1219_v6, %v828_v47  ;;  %v13675_v9 = vpop.f32.mrf.mxu0 }
 0x1b1   : > { %v13733_v36 = vpop.f32.mrf.mxu1 }
 0x1b2   : > { %v17384_v2 = vadd.f32 %v13733_v36, %v13667_v1  ;;  %v863_v22 = vpop.f32.mrf.mxu0 }
 0x1b3   : > { %v1222_v56 = vpop.f32.mrf.mxu1 }
 0x1b4   : > { %v17386_v51 = vadd.f32 %v1222_v56, %v831_v40  ;;  %v13678_v26 = vpop.f32.mrf.mxu0  ;;  %13849 = vmatmul.mubr.msk.bf16.gmra.mxu0 %vm665_vm0, %v17380_v49 }
 0x1b5   : > { %v13736_v53 = vpop.f32.mrf.mxu1  ;;  %13899 = vmatmul.mubr.msk.bf16.gmra.mxu1 %vm665_vm0, %v17180_v14  ;;  %13920 = vmatprep.mubr.msk.bf16.mxu0 %vm665_vm0, %v16781_v33 }
 0x1b6   : > { %v17394_v31 = vadd.f32 %v13736_v53, %v13670_v54  ;;  %v876_v1 = vpop.f32.mrf.mxu0  ;;  %13902 = vmatprep.mubr.msk.bf16.mxu1 %vm665_vm0, %v17183_v23  ;;  %v17407_v53 = vld [vmem:[%s16661_s2 + $0x38] sm:$0xff]  }
 0x1b7   : > { %v1235_v36 = vpop.f32.mrf.mxu1  ;;  %14116 = vmatprep.subr.bf16.mxu1 %v17407_v53 }
 0x1b8   : > { %v17398_v40 = vadd.f32 %v1235_v36, %v844_v12  ;;  %v13679_v47 = vpop.f32.mrf.mxu0  ;;  %v16153_v12 = vld [vmem:[%s16661_s2 + $0x30] sm:$0xff]  }
 0x1b9   : > { %v13737_v6 = vpop.f32.mrf.mxu1 }
 0x1ba   : > { %v17400_v8 = vadd.f32 %v13737_v6, %v13671_v25  ;;  %v879_v56 = vpop.f32.mrf.mxu0  ;;  %v557_v25 = vld [vmem:[%s21243_s0 + $0x280] sm:$0xff] }
 0x1bb   : > { %v1238_v49 = vpop.f32.mrf.mxu1 }
 0x1bc   : > { %21499 = vst [vmem:[#allocation82_spill] sm:$0xff] %v17400_v8  ;;  %v17402_v14 = vadd.f32 %v1238_v49, %v847_v44  ;;  %v13682_v33 = vpop.f32.mrf.mxu0  ;;  %13921 = vmatmul.mubr.msk.bf16.vlgmr.msra.gmra.mxu0 %vm665_vm0, %v16801_v39  ;;  %v558_v44 = vld [vmem:[%s21243_s0 + $0x288] sm:$0xff] }
 0x1bd   : > { %v13740_v54 = vpop.f32.mrf.mxu1  ;;  %13903 = vmatmul.mubr.msk.bf16.gmra.mxu1 %vm665_vm0, %v16717_v10  ;;  %14051 = vmatpush3.bf16.msra.mxu0 %v16153_v12  ;;  %v15629_v39 = vld [vmem:[%s16661_s2 + $0x40] sm:$0xff]  }
 0x1be   : > { %21500 = vst [vmem:[#allocation83_spill] sm:$0xff] %v17402_v14  ;;  %v17418_v49 = vadd.f32 %v13740_v54, %v13674_v55  ;;  %v892_v36 = vpop.f32.mrf.mxu0  ;;  %13906 = vmatprep.mubr.msk.bf16.mxu1 %vm665_vm0, %v16748_v21  ;;  %13924 = vmatprep.mubr.msk.bf16.mxu0 %vm665_vm0, %v16805_v41  ;;  %v17430_v54 = vpack.c.bf16 %v558_v44, %v557_v25  ;;  %v17439_v41 = vld [vmem:[%s21243_s0 + $0x290] sm:$0xff] }
 0x1bf   : > { %v1251_v6 = vpop.f32.mrf.mxu1  ;;  %14182 = vmatprep.subr.bf16.mxu0 %v15629_v39  ;;  %v16154_v39 = vld [vmem:[%s21243_s0 + $0x298] sm:$0xff] }
 0x1c0   : > { %21501 = vst [vmem:[#allocation84_spill] sm:$0xff] %v17418_v49  ;;  %v17426_v12 = vadd.f32 %v1251_v6, %v860_v37  ;;  %v13683_v23 = vpop.f32.mrf.mxu0  ;;  %21502 = vst [vmem:[#allocation85_spill] sm:$0xff] %v17430_v54  ;;  %v17458_v6 = vpack.c.bf16 %v16154_v39, %v17439_v41  ;;  %v17474_v39 = vld [vmem:[%s21243_s0 + $0x2b0] sm:$0xff] }
 0x1c1   : > { %v13741_v10 = vpop.f32.mrf.mxu1 }
 0x1c2   : > { %v17428_v14 = vadd.f32 %v13741_v10, %v13675_v9  ;;  %v895_v55 = vpop.f32.mrf.mxu0  ;;  %v562_v10 = vld [vmem:[%s21243_s0 + $0x2a8] sm:$0xff]  ;;  %21506 = vst [vmem:[#allocation89_spill] sm:$0xff] %v17458_v6 }
 0x1c3   : > { %v1254_v49 = vpop.f32.mrf.mxu1 }
 0x1c4   : > { %v17432_v8 = vadd.f32 %v1254_v49, %v863_v22  ;;  %v13686_v21 = vpop.f32.mrf.mxu0  ;;  %13925 = vmatmul.mubr.msk.bf16.gmra.mxu0 %vm665_vm0, %v16835_v48 }
 0x1c5   : > { %v13744_v37 = vpop.f32.mrf.mxu1  ;;  %13907 = vmatmul.mubr.msk.bf16.gmra.mxu1 %vm665_vm0, %v16767_v27  ;;  %13928 = vmatprep.mubr.msk.bf16.mxu0 %vm665_vm0, %v16839_v50 }
 0x1c6   : > { %21503 = vst [vmem:[#allocation86_spill] sm:$0xff] %v17432_v8  ;;  %v17448_v22 = vadd.f32 %v13744_v37, %v13678_v26  ;;  %v908_v9 = vpop.f32.mrf.mxu0  ;;  %13910 = vmatprep.mubr.msk.bf16.mxu1 %vm665_vm0, %v17430_v54  ;;  %v16155_v37 = vld [vmem:[%s21243_s0 + $0x2a0] sm:$0xff] }
 0x1c7   : > { %v1267_v48 = vpop.f32.mrf.mxu1  ;;  %v17465_v54 = vpack.c.bf16 %v562_v10, %v16155_v37 }
 0x1c8   : > { %21504 = vst [vmem:[#allocation87_spill] sm:$0xff] %v17448_v22  ;;  %v17452_v25 = vadd.f32 %v1267_v48, %v876_v1  ;;  %v13687_v44 = vpop.f32.mrf.mxu0 }
 0x1c9   : > { %v13745_v49 = vpop.f32.mrf.mxu1  ;;  %21508 = vst [vmem:[#allocation91_spill] sm:$0xff] %v17465_v54 }
 0x1ca   : > { %21505 = vst [vmem:[#allocation88_spill] sm:$0xff] %v17452_v25  ;;  %v17460_v50 = vadd.f32 %v13745_v49, %v13679_v47  ;;  %v911_v26 = vpop.f32.mrf.mxu0  ;;  %v564_v47 = vld [vmem:[%s21243_s0 + $0x2b8] sm:$0xff] }
 0x1cb   : > { %v1270_v1 = vpop.f32.mrf.mxu1 }
 0x1cc   : > { %21507 = vst [vmem:[#allocation90_spill] sm:$0xff] %v17460_v50  ;;  %v17467_v48 = vadd.f32 %v1270_v1, %v879_v56  ;;  %v13690_v27 = vpop.f32.mrf.mxu0  ;;  %13929 = vmatmul.mubr.msk.bf16.gmra.mxu0 %vm665_vm0, %v16868_v58  ;;  %v17490_v50 = vpack.c.bf16 %v564_v47, %v17474_v39 }
 0x1cd   : > { %v13748_v49 = vpop.f32.mrf.mxu1  ;;  %13911 = vmatmul.mubr.msk.bf16.gmra.mxu1 %vm665_vm0, %v17458_v6  ;;  %13932 = vmatprep.mubr.msk.bf16.mxu0 %vm665_vm0, %v16872_v60 }
 0x1ce   : > { %21509 = vst [vmem:[#allocation92_spill] sm:$0xff] %v17467_v48  ;;  %v17483_v56 = vadd.f32 %v13748_v49, %v13682_v33  ;;  %v924_v10 = vpop.f32.mrf.mxu0  ;;  %13914 = vmatprep.mubr.msk.bf16.mxu1 %vm665_vm0, %v17465_v54  ;;  %21510 = vst [vmem:[#allocation93_spill] sm:$0xff] %v17490_v50 }
 0x1cf   : > { %v1283_v37 = vpop.f32.mrf.mxu1 }
 0x1d0   : > { %v17487_v1 = vadd.f32 %v1283_v37, %v892_v36  ;;  %v13691_v58 = vpop.f32.mrf.mxu0 }
 0x1d1   : > { %v13749_v48 = vpop.f32.mrf.mxu1 }
 0x1d2   : > { %v17492_v25 = vadd.f32 %v13749_v48, %v13683_v23  ;;  %v927_v6 = vpop.f32.mrf.mxu0 }
 0x1d3   : > { %v1286_v22 = vpop.f32.mrf.mxu1 }
 0x1d4   : > { %v17494_v8 = vadd.f32 %v1286_v22, %v895_v55  ;;  %v13694_v33 = vpop.f32.mrf.mxu0  ;;  %13933 = vmatmul.mubr.msk.bf16.gmra.mxu0 %vm665_vm0, %v16902_v3 }
 0x1d5   : > { %v13752_v49 = vpop.f32.mrf.mxu1  ;;  %13915 = vmatmul.mubr.msk.bf16.gmra.mxu1 %vm665_vm0, %v17490_v50  ;;  %13936 = vmatprep.mubr.msk.bf16.mxu0 %vm665_vm0, %v16906_v5 }
 0x1d6   : > { %v17502_v36 = vadd.f32 %v13752_v49, %v13686_v21  ;;  %v940_v47 = vpop.f32.mrf.mxu0  ;;  %13986 = vmatprep.mubr.msk.bf16.mxu1 %vm665_vm0, %v16870_v59 }
 0x1d7   : > { %v1299_v23 = vpop.f32.mrf.mxu1 }
 0x1d8   : > { %v17506_v55 = vadd.f32 %v1299_v23, %v908_v9  ;;  %v13695_v22 = vpop.f32.mrf.mxu0 }
 0x1d9   : > { %v13753_v48 = vpop.f32.mrf.mxu1 }
 0x1da   : > { %v17508_v37 = vadd.f32 %v13753_v48, %v13687_v44  ;;  %v943_v3 = vpop.f32.mrf.mxu0 }
 0x1db   : > { %v1302_v60 = vpop.f32.mrf.mxu1 }
 0x1dc   : > { %v17510_v54 = vadd.f32 %v1302_v60, %v911_v26  ;;  %v13698_v50 = vpop.f32.mrf.mxu0  ;;  %13937 = vmatmul.mubr.msk.bf16.gmra.mxu0 %vm665_vm0, %v16930_v15 }
 0x1dd   : > { %v13756_v21 = vpop.f32.mrf.mxu1  ;;  %13987 = vmatmul.mubr.msk.bf16.vlgmr.msra.gmra.mxu1 %vm665_vm0, %v16874_v61  ;;  %13940 = vmatprep.mubr.msk.bf16.mxu0 %vm665_vm0, %v16934_v17 }
 0x1de   : > { %v17518_v59 = vadd.f32 %v13756_v21, %v13690_v27  ;;  %v956_v9 = vpop.f32.mrf.mxu0  ;;  %13990 = vmatprep.mubr.msk.bf16.mxu1 %vm665_vm0, %v16904_v4  ;;  %14117 = vmatpush3.bf16.msra.mxu1 %v17407_v53 }
 0x1df   : > { %v1315_v60 = vpop.f32.mrf.mxu1 }
 0x1e0   : > { %v17523_v44 = vadd.f32 %v1315_v60, %v924_v10  ;;  %v13699_v26 = vpop.f32.mrf.mxu0 }
 0x1e1   : > { %v13757_v49 = vpop.f32.mrf.mxu1 }
 0x1e2   : > { %v17525_v23 = vadd.f32 %v13757_v49, %v13691_v58  ;;  %v959_v48 = vpop.f32.mrf.mxu0 }
 0x1e3   : > { %v1318_v61 = vpop.f32.mrf.mxu1 }
 0x1e4   : > { %v17527_v15 = vadd.f32 %v1318_v61, %v927_v6  ;;  %v13702_v17 = vpop.f32.mrf.mxu0  ;;  %13941 = vmatmul.mubr.msk.bf16.gmra.mxu0 %vm665_vm0, %v16964_v28 }
 0x1e5   : > { %v13760_v27 = vpop.f32.mrf.mxu1  ;;  %13991 = vmatmul.mubr.msk.bf16.gmra.mxu1 %vm665_vm0, %v17204_v7  ;;  %13944 = vmatprep.mubr.msk.bf16.mxu0 %vm665_vm0, %v16968_v30 }
 0x1e6   : > { %v17535_v4 = vadd.f32 %v13760_v27, %v13694_v33  ;;  %v972_v53 = vpop.f32.mrf.mxu0  ;;  %13994 = vmatprep.mubr.msk.bf16.mxu1 %vm665_vm0, %v16932_v16  ;;  %v21514_v27 = vld [vmem:[#allocation42_spill] sm:$0xff] }
 0x1e7   : > { %v1331_v58 = vpop.f32.mrf.mxu1 }
 0x1e8   : > { %v17539_v6 = vadd.f32 %v1331_v58, %v940_v47  ;;  %v13703_v10 = vpop.f32.mrf.mxu0 }
 0x1e9   : > { %v13761_v21 = vpop.f32.mrf.mxu1 }
 0x1ea   : > { %21511 = vst [vmem:[#allocation94_spill] sm:$0xff] %v17539_v6  ;;  %v17541_v60 = vadd.f32 %v13761_v21, %v13695_v22  ;;  %v975_v49 = vpop.f32.mrf.mxu0  ;;  %v21518_v6 = vld [vmem:[#allocation44_spill] sm:$0xff] }
 0x1eb   : > { %v1334_v61 = vpop.f32.mrf.mxu1 }
 0x1ec   : > { %21512 = vst [vmem:[#allocation95_spill] sm:$0xff] %v17541_v60  ;;  %v17543_v28 = vadd.f32 %v1334_v61, %v943_v3  ;;  %v13706_v7 = vpop.f32.mrf.mxu0  ;;  %13945 = vmatmul.mubr.msk.bf16.gmra.mxu0 %vm665_vm0, %v16992_v38 }
 0x1ed   : > { %v13764_v33 = vpop.f32.mrf.mxu1  ;;  %13995 = vmatmul.mubr.msk.bf16.gmra.mxu1 %vm665_vm0, %v16936_v18  ;;  %13948 = vmatprep.mubr.msk.bf16.mxu0 %vm665_vm0, %v21514_v27 }
 0x1ee   : > { %21513 = vst [vmem:[#allocation96_spill] sm:$0xff] %v17543_v28  ;;  %v17551_v47 = vadd.f32 %v13764_v33, %v13698_v50  ;;  %v988_v58 = vpop.f32.mrf.mxu0  ;;  %13998 = vmatprep.mubr.msk.bf16.mxu1 %vm665_vm0, %v16966_v29  ;;  %v21519_v33 = vld [vmem:[#allocation46_spill] sm:$0xff] }
 0x1ef   : > { %v1347_v22 = vpop.f32.mrf.mxu1 }
 0x1f0   : > { %v17555_v3 = vadd.f32 %v1347_v22, %v956_v9  ;;  %v13707_v21 = vpop.f32.mrf.mxu0 }
 0x1f1   : > { %v13765_v61 = vpop.f32.mrf.mxu1 }
 0x1f2   : > { %21515 = vst [vmem:[#allocation97_spill] sm:$0xff] %v17555_v3  ;;  %v17557_v30 = vadd.f32 %v13765_v61, %v13699_v26  ;;  %v991_v38 = vpop.f32.mrf.mxu0  ;;  %v21522_v3 = vld [vmem:[#allocation48_spill] sm:$0xff] }
 0x1f3   : > { %v1350_v5 = vpop.f32.mrf.mxu1 }
 0x1f4   : > { %21516 = vst [vmem:[#allocation98_spill] sm:$0xff] %v17557_v30  ;;  %v17559_v28 = vadd.f32 %v1350_v5, %v959_v48  ;;  %v13710_v60 = vpop.f32.mrf.mxu0  ;;  %13949 = vmatmul.mubr.msk.bf16.gmra.mxu0 %vm665_vm0, %v21518_v6 }
 0x1f5   : > { %v13768_v50 = vpop.f32.mrf.mxu1  ;;  %13999 = vmatmul.mubr.msk.bf16.gmra.mxu1 %vm665_vm0, %v17234_v34  ;;  %13952 = vmatprep.mubr.msk.bf16.mxu0 %vm665_vm0, %v21519_v33 }
 0x1f6   : > { %21517 = vst [vmem:[#allocation99_spill] sm:$0xff] %v17559_v28  ;;  %v17567_v9 = vadd.f32 %v13768_v50, %v13702_v17  ;;  %v1004_v22 = vpop.f32.mrf.mxu0  ;;  %14002 = vmatprep.mubr.msk.bf16.mxu1 %vm665_vm0, %v16994_v43 }
 0x1f7   : > { %v1363_v26 = vpop.f32.mrf.mxu1 }
 0x1f8   : > { %v17571_v5 = vadd.f32 %v1363_v26, %v972_v53  ;;  %v13711_v48 = vpop.f32.mrf.mxu0  ;;  %v21523_v53 = vld [vmem:[#allocation50_spill] sm:$0xff] }
 0x1f9   : > { %v13769_v61 = vpop.f32.mrf.mxu1 }
 0x1fa   : > { %v17573_v27 = vadd.f32 %v13769_v61, %v13703_v10  ;;  %v1007_v6 = vpop.f32.mrf.mxu0 }
 0x1fb   : > { %v1366_v28 = vpop.f32.mrf.mxu1 }
 0x1fc   : > { %21520 = vst [vmem:[#allocation100_spill] sm:$0xff] %v17573_v27  ;;  %v17575_v30 = vadd.f32 %v1366_v28, %v975_v49  ;;  %v13790_v34 = vpop.f32.mrf.mxu0  ;;  %13953 = vmatmul.mubr.msk.bf16.gmra.mxu0 %vm665_vm0, %v21522_v3  ;;  %v21525_v27 = vld [vmem:[#allocation52_spill] sm:$0xff] }
 0x1fd   : > { %v13772_v17 = vpop.f32.mrf.mxu1  ;;  %v17580_v50 = vadd.f32 %v13790_v34, %v17335_v32  ;;  %14003 = vmatmul.mubr.msk.bf16.gmra.mxu1 %vm665_vm0, %v16998_v46  ;;  %13956 = vmatprep.mubr.msk.bf16.mxu0 %vm665_vm0, %v21523_v53 }
 0x1fe   : > { %21521 = vst [vmem:[#allocation101_spill] sm:$0xff] %v17575_v30  ;;  %v17586_v10 = vadd.f32 %v13772_v17, %v13706_v7  ;;  %v1514_v26 = vpop.f32.mrf.mxu0  ;;  %14006 = vmatprep.mubr.msk.bf16.mxu1 %vm665_vm0, %v17028_v62 }
 0x1ff   : > { %v1379_v28 = vpop.f32.mrf.mxu1  ;;  %v17591_v49 = vadd.f32 %v1514_v26, %v17339_v11 }
 0x200   : > { %21524 = vst [vmem:[#allocation102_spill] sm:$0xff] %v17586_v10  ;;  %v17593_v61 = vadd.f32 %v1379_v28, %v988_v58  ;;  %v13791_v34 = vpop.f32.mrf.mxu0 }
 0x201   : > { %v13773_v32 = vpop.f32.mrf.mxu1  ;;  %v17596_v3 = vadd.f32 %v13791_v34, %v17344_v57 }
 0x202   : > { %v17598_v33 = vadd.f32 %v13773_v32, %v13707_v21  ;;  %v1517_v53 = vpop.f32.mrf.mxu0 }
 0x203   : > { %v1382_v7 = vpop.f32.mrf.mxu1  ;;  %v17601_v17 = vadd.f32 %v1517_v53, %v17346_v20 }
 0x204   : > { %v17603_v10 = vadd.f32 %v1382_v7, %v991_v38  ;;  %v13794_v30 = vpop.f32.mrf.mxu0  ;;  %13957 = vmatmul.mubr.msk.bf16.gmra.mxu0 %vm665_vm0, %v21525_v27  ;;  %v21538_v27 = vld [vmem:[#allocation57_spill] sm:$0xff] }
 0x205   : > { %v13776_v11 = vpop.f32.mrf.mxu1  ;;  %v17608_v58 = vadd.f32 %v13794_v30, %v17354_v45  ;;  %14007 = vmatmul.mubr.msk.bf16.gmra.mxu1 %vm665_vm0, %v17256_v63  ;;  %13960 = vmatprep.mubr.msk.bf16.mxu0 %vm665_vm0, %v17092_v13  ;;  %v21527_v63 = vld [vmem:[#allocation56_spill] sm:$0xff] }
 0x206   : > { %v17614_v57 = vadd.f32 %v13776_v11, %v13710_v60  ;;  %v1530_v20 = vpop.f32.mrf.mxu0  ;;  %14010 = vmatprep.mubr.msk.bf16.mxu1 %vm665_vm0, %v17056_v19 }
 0x207   : > { %v1395_v38 = vpop.f32.mrf.mxu1  ;;  %v17619_v21 = vadd.f32 %v1530_v20, %v17358_v35 }
 0x208   : > { %v17621_v53 = vadd.f32 %v1395_v38, %v1004_v22  ;;  %v13795_v30 = vpop.f32.mrf.mxu0 }
 0x209   : > { %v13777_v45 = vpop.f32.mrf.mxu1  ;;  %v17624_v26 = vadd.f32 %v13795_v30, %v17360_v24  ;;  %v21528_v24 = vld [vmem:[#allocation51_spill] sm:$0xff] }
 0x20a   : > { %v17626_v28 = vadd.f32 %v13777_v45, %v13711_v48  ;;  %v1533_v34 = vpop.f32.mrf.mxu0  ;;  %v21529_v48 = vld [vmem:[#allocation58_spill] sm:$0xff] }
 0x20b   : > { %v1398_v60 = vpop.f32.mrf.mxu1  ;;  %v17629_v32 = vadd.f32 %v1533_v34, %v17365_v0  ;;  %v21530_v0 = vld [vmem:[#allocation53_spill] sm:$0xff] }
 0x20c   : > { %v17631_v7 = vadd.f32 %v1398_v60, %v1007_v6  ;;  %v13798_v11 = vpop.f32.mrf.mxu0  ;;  %13961 = vmatmul.mubr.msk.bf16.gmra.mxu0 %vm665_vm0, %v21527_v63  ;;  %v21534_v63 = vld [vmem:[#allocation60_spill] sm:$0xff] }
 0x20d   : > { %v17635_v35 = vpop.f32.mrf.mxu1  ;;  %v17638_v22 = vadd.f32 %v13798_v11, %v17373_v52  ;;  %14011 = vmatmul.mubr.msk.bf16.gmra.mxu1 %vm665_vm0, %v21528_v24  ;;  %13964 = vmatprep.mubr.msk.bf16.mxu0 %vm665_vm0, %v21529_v48 }
 0x20e   : > { %21526 = vst [vmem:[#allocation103_spill] sm:$0xff] %v17631_v7  ;;  %v1546_v20 = vpop.f32.mrf.mxu0  ;;  %14014 = vmatprep.mubr.msk.bf16.mxu1 %vm665_vm0, %v21530_v0  ;;  %v21544_v7 = vld [vmem:[#allocation21_spill] sm:$0xff] }
 0x20f   : > { %v17646_v6 = vpop.f32.mrf.mxu1  ;;  %v17649_v38 = vadd.f32 %v1546_v20, %v17382_v42  ;;  %v21536_v20 = vld [vmem:[#allocation70_spill] sm:$0xff] }
 0x210   : > { %21531 = vst [vmem:[#allocation104_spill] sm:$0xff] %v17646_v6  ;;  %v13799_v30 = vpop.f32.mrf.mxu0 }
 0x211   : > { %v17651_v45 = vpop.f32.mrf.mxu1  ;;  %v17654_v52 = vadd.f32 %v13799_v30, %v17384_v2  ;;  %v21537_v2 = vld [vmem:[#allocation20_spill] sm:$0xff] }
 0x212   : > { %21532 = vst [vmem:[#allocation105_spill] sm:$0xff] %v17651_v45  ;;  %v1549_v34 = vpop.f32.mrf.mxu0  ;;  %v21543_v45 = vld [vmem:[#allocation83_spill] sm:$0xff] }
 0x213   : > { %v17656_v60 = vpop.f32.mrf.mxu1  ;;  %v17659_v11 = vadd.f32 %v1549_v34, %v17386_v51 }
 0x214   : > { %21533 = vst [vmem:[#allocation106_spill] sm:$0xff] %v17656_v60  ;;  %v13802_v48 = vpop.f32.mrf.mxu0  ;;  %13965 = vmatmul.mubr.msk.bf16.gmra.mxu0 %vm665_vm0, %v21534_v63 }
 0x215   : > { %v17663_v13 = vpop.f32.mrf.mxu1  ;;  %v17666_v42 = vadd.f32 %v13802_v48, %v17394_v31  ;;  %14015 = vmatmul.mubr.msk.bf16.gmra.mxu1 %vm665_vm0, %v21536_v20  ;;  %13968 = vmatprep.mubr.msk.bf16.mxu0 %vm665_vm0, %v21537_v2  ;;  %v21541_v31 = vld [vmem:[#allocation82_spill] sm:$0xff] }
 0x216   : > { %21535 = vst [vmem:[#allocation107_spill] sm:$0xff] %v17663_v13  ;;  %v1562_v30 = vpop.f32.mrf.mxu0  ;;  %14018 = vmatprep.mubr.msk.bf16.mxu1 %vm665_vm0, %v21538_v27 }
 0x217   : > { %v17674_v51 = vpop.f32.mrf.mxu1  ;;  %v17677_v34 = vadd.f32 %v1562_v30, %v17398_v40  ;;  %v21546_v30 = vld [vmem:[#allocation59_spill] sm:$0xff] }
 0x218   : > { %21539 = vst [vmem:[#allocation108_spill] sm:$0xff] %v17674_v51  ;;  %v13803_v63 = vpop.f32.mrf.mxu0  ;;  %v21545_v51 = vld [vmem:[#allocation84_spill] sm:$0xff] }
 0x219   : > { %v17679_v13 = vpop.f32.mrf.mxu1  ;;  %v17682_v48 = vadd.f32 %v13803_v63, %v21541_v31 }
 0x21a   : > { %21540 = vst [vmem:[#allocation109_spill] sm:$0xff] %v17679_v13  ;;  %v1565_v60 = vpop.f32.mrf.mxu0  ;;  %v21547_v13 = vld [vmem:[#allocation23_spill] sm:$0xff] }
 0x21b   : > { %v17684_v20 = vpop.f32.mrf.mxu1  ;;  %v17687_v2 = vadd.f32 %v1565_v60, %v21543_v45  ;;  %v21549_v45 = vld [vmem:[#allocation61_spill] sm:$0xff] }
 0x21c   : > { %21542 = vst [vmem:[#allocation82_spill] sm:$0xff] %v17684_v20  ;;  %v13806_v6 = vpop.f32.mrf.mxu0  ;;  %13969 = vmatmul.mubr.msk.bf16.gmra.mxu0 %vm665_vm0, %v21544_v7 }
 0x21d   : > { %v17692_v27 = vadd.f32 %v13806_v6, %v21545_v51  ;;  %v13856_v40 = vpop.f32.mrf.mxu1  ;;  %14019 = vmatmul.mubr.msk.bf16.gmra.mxu1 %vm665_vm0, %v21546_v30  ;;  %13972 = vmatprep.mubr.msk.bf16.mxu0 %vm665_vm0, %v21547_v13 }
 0x21e   : > { %v17699_v63 = vadd.f32 %v13856_v40, %v17580_v50  ;;  %v1578_v31 = vpop.f32.mrf.mxu0  ;;  %14022 = vmatprep.mubr.msk.bf16.mxu1 %vm665_vm0, %v21549_v45  ;;  %v16156_v50 = vld [vmem:[%s21243_s0 + $0x288] sm:$0xff] }
 0x21f   : > { %v17704_v60 = vadd.f32 %v1578_v31, %v17426_v12  ;;  %v1889_v7 = vpop.f32.mrf.mxu1  ;;  %v17716_v40 = vpack.c.bf16 %v17439_v41, %v16156_v50  ;;  %v21552_v31 = vld [vmem:[#allocation86_spill] sm:$0xff]  ;;  %v21556_v50 = vld [vmem:[#allocation73_spill] sm:$0xff] }
 0x220   : > { %21548 = vst [vmem:[#allocation83_spill] sm:$0xff] %v17699_v63  ;;  %v17707_v6 = vadd.f32 %v1889_v7, %v17591_v49  ;;  %v13807_v51 = vpop.f32.mrf.mxu0 }
 0x221   : > { %v17710_v20 = vadd.f32 %v13807_v51, %v17428_v14  ;;  %v13857_v30 = vpop.f32.mrf.mxu1  ;;  %21551 = vst [vmem:[#allocation110_spill] sm:$0xff] %v17716_v40  ;;  %v21554_v51 = vld [vmem:[#allocation25_spill] sm:$0xff] }
 0x222   : > { %21550 = vst [vmem:[#allocation84_spill] sm:$0xff] %v17707_v6  ;;  %v17719_v13 = vadd.f32 %v13857_v30, %v17596_v3  ;;  %v1581_v12 = vpop.f32.mrf.mxu0  ;;  %v21555_v6 = vld [vmem:[#allocation87_spill] sm:$0xff] }
 0x223   : > { %v17722_v63 = vadd.f32 %v1581_v12, %v21552_v31  ;;  %v1892_v49 = vpop.f32.mrf.mxu1  ;;  %v21559_v12 = vld [vmem:[#allocation88_spill] sm:$0xff] }
 0x224   : > { %v17725_v7 = vadd.f32 %v1892_v49, %v17601_v17  ;;  %v13810_v14 = vpop.f32.mrf.mxu0  ;;  %13973 = vmatmul.mubr.msk.bf16.gmra.mxu0 %vm665_vm0, %v21554_v51  ;;  %v21558_v17 = vld [vmem:[#allocation63_spill] sm:$0xff]  ;;  %v21561_v51 = vld [vmem:[#allocation90_spill] sm:$0xff] }
 0x225   : > { %v17730_v45 = vadd.f32 %v13810_v14, %v21555_v6  ;;  %v13860_v41 = vpop.f32.mrf.mxu1  ;;  %14023 = vmatmul.mubr.msk.bf16.gmra.mxu1 %vm665_vm0, %v21556_v50  ;;  %13976 = vmatprep.mubr.msk.bf16.mxu0 %vm665_vm0, %v17716_v40 }
 0x226   : > { %21553 = vst [vmem:[#allocation86_spill] sm:$0xff] %v17725_v7  ;;  %v17737_v3 = vadd.f32 %v13860_v41, %v17608_v58  ;;  %v1594_v30 = vpop.f32.mrf.mxu0  ;;  %14026 = vmatprep.mubr.msk.bf16.mxu1 %vm665_vm0, %v21558_v17  ;;  %v16157_v58 = vld [vmem:[%s21243_s0 + $0x2a8] sm:$0xff] }
 0x227   : > { %v17742_v31 = vadd.f32 %v1594_v30, %v21559_v12  ;;  %v1905_v49 = vpop.f32.mrf.mxu1  ;;  %v17754_v41 = vpack.c.bf16 %v17474_v39, %v16157_v58  ;;  %v21563_v12 = vld [vmem:[#allocation92_spill] sm:$0xff] }
 0x228   : > { %21557 = vst [vmem:[#allocation87_spill] sm:$0xff] %v17737_v3  ;;  %v17745_v6 = vadd.f32 %v1905_v49, %v17619_v21  ;;  %v13811_v14 = vpop.f32.mrf.mxu0 }
 0x229   : > { %v17748_v50 = vadd.f32 %v13811_v14, %v21561_v51  ;;  %v13861_v7 = vpop.f32.mrf.mxu1  ;;  %21562 = vst [vmem:[#allocation90_spill] sm:$0xff] %v17754_v41  ;;  %v17765_v51 = vld [vmem:[%s21243_s0 + $0x2c0] sm:$0xff] }
 0x22a   : > { %21560 = vst [vmem:[#allocation88_spill] sm:$0xff] %v17745_v6  ;;  %v17757_v40 = vadd.f32 %v13861_v7, %v17624_v26  ;;  %v1597_v30 = vpop.f32.mrf.mxu0  ;;  %v21564_v6 = vld [vmem:[#allocation67_spill] sm:$0xff]  ;;  %v21565_v7 = vld [vmem:[#allocation64_spill] sm:$0xff] }
 0x22b   : > { %v17760_v3 = vadd.f32 %v1597_v30, %v21563_v12  ;;  %v1908_v21 = vpop.f32.mrf.mxu1 }
 0x22c   : > { %v17768_v49 = vadd.f32 %v1908_v21, %v17629_v32  ;;  %v13814_v14 = vpop.f32.mrf.mxu0  ;;  %13977 = vmatmul.mubr.msk.bf16.gmra.mxu0 %vm665_vm0, %v21564_v6  ;;  %v21567_v32 = vld [vmem:[#allocation65_spill] sm:$0xff]  ;;  %v16158_v6 = vld [vmem:[%s21243_s0 + $0x2b8] sm:$0xff] }
 0x22d   : > { %v17773_v39 = vadd.f32 %v13814_v14, %v17483_v56  ;;  %v13864_v26 = vpop.f32.mrf.mxu1  ;;  %14027 = vmatmul.mubr.msk.bf16.gmra.mxu1 %vm665_vm0, %v21565_v7  ;;  %13980 = vmatprep.mubr.msk.bf16.mxu0 %vm665_vm0, %v17754_v41  ;;  %v17794_v41 = vpack.c.bf16 %v17765_v51, %v16158_v6 }
 0x22e   : > { %v17780_v58 = vadd.f32 %v13864_v26, %v17638_v22  ;;  %v1610_v30 = vpop.f32.mrf.mxu0  ;;  %14030 = vmatprep.mubr.msk.bf16.mxu1 %vm665_vm0, %v21567_v32 }
 0x22f   : > { %v17785_v12 = vadd.f32 %v1610_v30, %v17487_v1  ;;  %v1921_v21 = vpop.f32.mrf.mxu1  ;;  %21569 = vst [vmem:[#allocation112_spill] sm:$0xff] %v17794_v41 }
 0x230   : > { %21566 = vst [vmem:[#allocation92_spill] sm:$0xff] %v17780_v58  ;;  %v17788_v56 = vadd.f32 %v1921_v21, %v17649_v38  ;;  %v13815_v14 = vpop.f32.mrf.mxu0 }
 0x231   : > { %v17797_v22 = vadd.f32 %v13815_v14, %v17492_v25  ;;  %v13865_v26 = vpop.f32.mrf.mxu1  ;;  %v21570_v14 = vld [vmem:[#allocation80_spill] sm:$0xff] }
 0x232   : > { %21568 = vst [vmem:[#allocation111_spill] sm:$0xff] %v17788_v56  ;;  %v17800_v58 = vadd.f32 %v13865_v26, %v17654_v52  ;;  %v1613_v1 = vpop.f32.mrf.mxu0  ;;  %v21571_v52 = vld [vmem:[#allocation31_spill] sm:$0xff] }
 0x233   : > { %v17803_v30 = vadd.f32 %v1613_v1, %v17494_v8  ;;  %v1924_v38 = vpop.f32.mrf.mxu1 }
 0x234   : > { %v17806_v21 = vadd.f32 %v1924_v38, %v17659_v11  ;;  %v13818_v56 = vpop.f32.mrf.mxu0  ;;  %13981 = vmatmul.mubr.msk.bf16.gmra.mxu0 %vm665_vm0, %v17794_v41  ;;  %v21573_v11 = vld [vmem:[#allocation19_spill] sm:$0xff] }
 0x235   : > { %v17811_v6 = vadd.f32 %v13818_v56, %v17502_v36  ;;  %v13868_v25 = vpop.f32.mrf.mxu1  ;;  %14031 = vmatmul.mubr.msk.bf16.gmra.mxu1 %vm665_vm0, %v21570_v14  ;;  %14052 = vmatprep.mubr.msk.bf16.mxu0 %vm665_vm0, %v21571_v52 }
 0x236   : > { %v17818_v8 = vadd.f32 %v13868_v25, %v17666_v42  ;;  %v1626_v26 = vpop.f32.mrf.mxu0  ;;  %14034 = vmatprep.mubr.msk.bf16.mxu1 %vm665_vm0, %v21573_v11 }
 0x237   : > { %v17823_v1 = vadd.f32 %v1626_v26, %v17506_v55  ;;  %v1937_v36 = vpop.f32.mrf.mxu1 }
 0x238   : > { %21572 = vst [vmem:[#allocation31_spill] sm:$0xff] %v17818_v8  ;;  %v17826_v56 = vadd.f32 %v1937_v36, %v17677_v34  ;;  %v13819_v38 = vpop.f32.mrf.mxu0  ;;  %v21574_v36 = vld [vmem:[#allocation22_spill] sm:$0xff] }
 0x239   : > { %v17829_v14 = vadd.f32 %v13819_v38, %v17508_v37  ;;  %v13869_v52 = vpop.f32.mrf.mxu1 }
 0x23a   : > { %v17832_v42 = vadd.f32 %v13869_v52, %v17682_v48  ;;  %v1629_v25 = vpop.f32.mrf.mxu0  ;;  %v16159_v48 = vld [vmem:[%s16661_s2 + $0x40] sm:$0xff]  }
 0x23b   : > { %v17835_v41 = vadd.f32 %v1629_v25, %v17510_v54  ;;  %v1940_v8 = vpop.f32.mrf.mxu1  ;;  %v21575_v52 = vld [vmem:[#allocation24_spill] sm:$0xff] }
 0x23c   : > { %v17838_v55 = vadd.f32 %v1940_v8, %v17687_v2  ;;  %v13822_v26 = vpop.f32.mrf.mxu0  ;;  %14053 = vmatmul.mubr.msk.bf16.vlgmr.msra.gmra.mxu0 %vm665_vm0, %v16932_v16 }
 0x23d   : > { %v17843_v34 = vadd.f32 %v13822_v26, %v17518_v59  ;;  %v13872_v37 = vpop.f32.mrf.mxu1  ;;  %14035 = vmatmul.mubr.msk.bf16.gmra.mxu1 %vm665_vm0, %v21574_v36  ;;  %14183 = vmatpush3.bf16.msra.mxu0 %v16159_v48 }
 0x23e   : > { %v17849_v54 = vadd.f32 %v13872_v37, %v17692_v27  ;;  %v1642_v38 = vpop.f32.mrf.mxu0  ;;  %14038 = vmatprep.mubr.msk.bf16.mxu1 %vm665_vm0, %v21575_v52  ;;  %14056 = vmatprep.mubr.msk.bf16.mxu0 %vm665_vm0, %v16936_v18 }
 0x23f   : > { %v17856_v2 = vadd.f32 %v1642_v38, %v17523_v44  ;;  %v1953_v59 = vpop.f32.mrf.mxu1 }
 0x240   : > { %v17859_v8 = vadd.f32 %v1953_v59, %v17704_v60  ;;  %v13823_v25 = vpop.f32.mrf.mxu0  ;;  %v21578_v59 = vld [vmem:[#allocation81_spill] sm:$0xff] }
 0x241   : > { %v17862_v26 = vadd.f32 %v13823_v25, %v17525_v23  ;;  %v13873_v27 = vpop.f32.mrf.mxu1 }
 0x242   : > { %v17865_v37 = vadd.f32 %v13873_v27, %v17710_v20  ;;  %v1645_v48 = vpop.f32.mrf.mxu0  ;;  %v21579_v20 = vld [vmem:[#allocation39_spill] sm:$0xff] }
 0x243   : > { %v17868_v16 = vadd.f32 %v1645_v48, %v17527_v15  ;;  %v1956_v18 = vpop.f32.mrf.mxu1 }
 0x244   : > { %21576 = vst [vmem:[#allocation113_spill] sm:$0xff] %v17865_v37  ;;  %v17871_v44 = vadd.f32 %v1956_v18, %v17722_v63  ;;  %v13826_v38 = vpop.f32.mrf.mxu0  ;;  %14057 = vmatmul.mubr.msk.bf16.gmra.mxu0 %vm665_vm0, %v16966_v29  ;;  %v21581_v18 = vld [vmem:[#allocation89_spill] sm:$0xff]  ;;  %v21582_v63 = vld [vmem:[#allocation94_spill] sm:$0xff]  ;;  %v21584_v29 = vld [vmem:[#allocation95_spill] sm:$0xff] }
 0x245   : > { %v17876_v60 = vadd.f32 %v13826_v38, %v17535_v4  ;;  %v13876_v23 = vpop.f32.mrf.mxu1  ;;  %14039 = vmatmul.mubr.msk.bf16.gmra.mxu1 %vm665_vm0, %v21578_v59  ;;  %14060 = vmatprep.mubr.msk.bf16.mxu0 %vm665_vm0, %v21579_v20 }
 0x246   : > { %21577 = vst [vmem:[#allocation114_spill] sm:$0xff] %v17871_v44  ;;  %v17883_v15 = vadd.f32 %v13876_v23, %v17730_v45  ;;  %v1658_v25 = vpop.f32.mrf.mxu0  ;;  %14042 = vmatprep.mubr.msk.bf16.mxu1 %vm665_vm0, %v21581_v18  ;;  %v21586_v23 = vld [vmem:[#allocation96_spill] sm:$0xff] }
 0x247   : > { %v17888_v27 = vadd.f32 %v1658_v25, %v21582_v63  ;;  %v1969_v48 = vpop.f32.mrf.mxu1 }
 0x248   : > { %21580 = vst [vmem:[#allocation39_spill] sm:$0xff] %v17883_v15  ;;  %v17891_v4 = vadd.f32 %v1969_v48, %v17742_v31  ;;  %v13827_v38 = vpop.f32.mrf.mxu0  ;;  %v21588_v48 = vld [vmem:[#allocation91_spill] sm:$0xff] }
 0x249   : > { %v17894_v59 = vadd.f32 %v13827_v38, %v21584_v29  ;;  %v13877_v44 = vpop.f32.mrf.mxu1 }
 0x24a   : > { %21583 = vst [vmem:[#allocation94_spill] sm:$0xff] %v17891_v4  ;;  %v17897_v20 = vadd.f32 %v13877_v44, %v17748_v50  ;;  %v1661_v45 = vpop.f32.mrf.mxu0 }
 0x24b   : > { %v17900_v15 = vadd.f32 %v1661_v45, %v21586_v23  ;;  %v1972_v37 = vpop.f32.mrf.mxu1 }
 0x24c   : > { %21585 = vst [vmem:[#allocation95_spill] sm:$0xff] %v17897_v20  ;;  %v17903_v25 = vadd.f32 %v1972_v37, %v17760_v3  ;;  %v13830_v63 = vpop.f32.mrf.mxu0  ;;  %14061 = vmatmul.mubr.msk.bf16.gmra.mxu0 %vm665_vm0, %v16994_v43  ;;  %v21590_v3 = vld [vmem:[#allocation93_spill] sm:$0xff]  ;;  %v21594_v20 = vld [vmem:[#allocation99_spill] sm:$0xff] }
 0x24d   : > { %v17908_v31 = vadd.f32 %v13830_v63, %v17551_v47  ;;  %v13880_v29 = vpop.f32.mrf.mxu1  ;;  %14043 = vmatmul.mubr.msk.bf16.gmra.mxu1 %vm665_vm0, %v21588_v48  ;;  %14064 = vmatprep.mubr.msk.bf16.mxu0 %vm665_vm0, %v16998_v46  ;;  %v566_v37 = vld [vmem:[%s21243_s0 + $0x2c8] sm:$0xff]  ;;  %v21592_v46 = vld [vmem:[#allocation98_spill] sm:$0xff] }
 0x24e   : > { %21587 = vst [vmem:[#allocation96_spill] sm:$0xff] %v17903_v25  ;;  %v17915_v50 = vadd.f32 %v13880_v29, %v17773_v39  ;;  %v1674_v44 = vpop.f32.mrf.mxu0  ;;  %14046 = vmatprep.mubr.msk.bf16.mxu1 %vm665_vm0, %v21590_v3  ;;  %v21591_v47 = vld [vmem:[#allocation97_spill] sm:$0xff]  ;;  %v17932_v29 = vpack.c.bf16 %v566_v37, %v17765_v51 }
 0x24f   : > { %v17923_v38 = vadd.f32 %v1674_v44, %v21591_v47  ;;  %v1985_v45 = vpop.f32.mrf.mxu1 }
 0x250   : > { %21589 = vst [vmem:[#allocation115_spill] sm:$0xff] %v17915_v50  ;;  %v17926_v23 = vadd.f32 %v1985_v45, %v17785_v12  ;;  %v13831_v63 = vpop.f32.mrf.mxu0  ;;  %21593 = vst [vmem:[#allocation97_spill] sm:$0xff] %v17932_v29 }
 0x251   : > { %v17929_v43 = vadd.f32 %v13831_v63, %v21592_v46  ;;  %v13881_v39 = vpop.f32.mrf.mxu1 }
 0x252   : > { %v17935_v50 = vadd.f32 %v13881_v39, %v17797_v22  ;;  %v1677_v25 = vpop.f32.mrf.mxu0  ;;  %v21595_v22 = vld [vmem:[#allocation47_spill] sm:$0xff]  ;;  %v21597_v39 = vld [vmem:[#allocation100_spill] sm:$0xff] }
 0x253   : > { %v17938_v4 = vadd.f32 %v1677_v25, %v21594_v20  ;;  %v1988_v44 = vpop.f32.mrf.mxu1 }
 0x254   : > { %v17941_v47 = vadd.f32 %v1988_v44, %v17803_v30  ;;  %v13834_v12 = vpop.f32.mrf.mxu0  ;;  %14065 = vmatmul.mubr.msk.bf16.gmra.mxu0 %vm665_vm0, %v17028_v62  ;;  %v21596_v30 = vld [vmem:[#allocation26_spill] sm:$0xff] }
 0x255   : > { %v17946_v46 = vadd.f32 %v13834_v12, %v17567_v9  ;;  %v13884_v51 = vpop.f32.mrf.mxu1  ;;  %14047 = vmatmul.mubr.msk.bf16.gmra.mxu1 %vm665_vm0, %v17932_v29  ;;  %14068 = vmatprep.mubr.msk.bf16.mxu0 %vm665_vm0, %v21595_v22 }
 0x256   : > { %v17953_v20 = vadd.f32 %v13884_v51, %v17811_v6  ;;  %v1690_v25 = vpop.f32.mrf.mxu0  ;;  %14118 = vmatprep.mubr.msk.bf16.mxu1 %vm665_vm0, %v21596_v30  ;;  %v21598_v51 = vld [vmem:[#allocation101_spill] sm:$0xff] }
 0x257   : > { %v17958_v37 = vadd.f32 %v1690_v25, %v17571_v5  ;;  %v2001_v45 = vpop.f32.mrf.mxu1 }
 0x258   : > { %v17961_v9 = vadd.f32 %v2001_v45, %v17823_v1  ;;  %v13835_v63 = vpop.f32.mrf.mxu0  ;;  %v21599_v1 = vld [vmem:[#allocation102_spill] sm:$0xff] }
 0x259   : > { %v17964_v44 = vadd.f32 %v13835_v63, %v21597_v39  ;;  %v13885_v12 = vpop.f32.mrf.mxu1  ;;  %v21600_v39 = vld [vmem:[#allocation27_spill] sm:$0xff] }
 0x25a   : > { %v17967_v22 = vadd.f32 %v13885_v12, %v17829_v14  ;;  %v1693_v6 = vpop.f32.mrf.mxu0 }
 0x25b   : > { %v17970_v29 = vadd.f32 %v1693_v6, %v21598_v51  ;;  %v2004_v30 = vpop.f32.mrf.mxu1 }
 0x25c   : > { %v17973_v5 = vadd.f32 %v2004_v30, %v17835_v41  ;;  %v13838_v25 = vpop.f32.mrf.mxu0  ;;  %14069 = vmatmul.mubr.msk.bf16.gmra.mxu0 %vm665_vm0, %v17056_v19  ;;  %v21601_v41 = vld [vmem:[#allocation28_spill] sm:$0xff] }
 0x25d   : > { %v17978_v45 = vadd.f32 %v13838_v25, %v21599_v1  ;;  %v13888_v63 = vpop.f32.mrf.mxu1  ;;  %14119 = vmatmul.mubr.msk.bf16.vlgmr.msra.gmra.mxu1 %vm665_vm0, %v21600_v39  ;;  %14072 = vmatprep.mubr.msk.bf16.mxu0 %vm665_vm0, %v21528_v24 }
 0x25e   : > { %v17985_v14 = vadd.f32 %v13888_v63, %v17843_v34  ;;  %v1706_v12 = vpop.f32.mrf.mxu0  ;;  %14122 = vmatprep.mubr.msk.bf16.mxu1 %vm665_vm0, %v21601_v41 }
 0x25f   : > { %v17990_v6 = vadd.f32 %v1706_v12, %v17593_v61  ;;  %v2017_v51 = vpop.f32.mrf.mxu1 }
 0x260   : > { %v17993_v30 = vadd.f32 %v2017_v51, %v17856_v2  ;;  %v13839_v25 = vpop.f32.mrf.mxu0  ;;  %v21602_v51 = vld [vmem:[#allocation29_spill] sm:$0xff] }
 0x261   : > { %v17996_v1 = vadd.f32 %v13839_v25, %v17598_v33  ;;  %v13889_v39 = vpop.f32.mrf.mxu1 }
 0x262   : > { %v17999_v24 = vadd.f32 %v13889_v39, %v17862_v26  ;;  %v1709_v34 = vpop.f32.mrf.mxu0  ;;  %v21603_v26 = vld [vmem:[#allocation55_spill] sm:$0xff] }
 0x263   : > { %v18002_v63 = vadd.f32 %v1709_v34, %v17603_v10  ;;  %v2020_v41 = vpop.f32.mrf.mxu1 }
 0x264   : > { %v18005_v61 = vadd.f32 %v2020_v41, %v17868_v16  ;;  %v13842_v12 = vpop.f32.mrf.mxu0  ;;  %14073 = vmatmul.mubr.msk.bf16.gmra.mxu0 %vm665_vm0, %v21530_v0  ;;  %v21605_v16 = vld [vmem:[#allocation30_spill] sm:$0xff] }
 0x265   : > { %v18010_v2 = vadd.f32 %v13842_v12, %v17614_v57  ;;  %v13892_v33 = vpop.f32.mrf.mxu1  ;;  %14123 = vmatmul.mubr.msk.bf16.gmra.mxu1 %vm665_vm0, %v21602_v51  ;;  %14076 = vmatprep.mubr.msk.bf16.mxu0 %vm665_vm0, %v21603_v26 }
 0x266   : > { %v18017_v10 = vadd.f32 %v13892_v33, %v17876_v60  ;;  %v1722_v25 = vpop.f32.mrf.mxu0  ;;  %14126 = vmatprep.mubr.msk.bf16.mxu1 %vm665_vm0, %v21605_v16  ;;  %v21608_v33 = vld [vmem:[#allocation71_spill] sm:$0xff] }
 0x267   : > { %v18022_v39 = vadd.f32 %v1722_v25, %v17621_v53  ;;  %v2033_v34 = vpop.f32.mrf.mxu1  ;;  %v1420_v0 = vadd.f32 %v17635_v35, %v21608_v33  ;;  %v21609_v16 = vld [vmem:[#allocation103_spill] sm:$0xff]  ;;  %v21617_v33 = vld [vmem:[#allocation34_spill] sm:$0xff] }
 0x268   : > { %21604 = vst [vmem:[#allocation98_spill] sm:$0xff] %v18017_v10  ;;  %v18025_v57 = vadd.f32 %v2033_v34, %v17888_v27  ;;  %v13843_v41 = vpop.f32.mrf.mxu0  ;;  %v21611_v34 = vld [vmem:[#allocation57_spill] sm:$0xff]  ;;  %v21615_v35 = vld [vmem:[#allocation59_spill] sm:$0xff] }
 0x269   : > { %v18028_v12 = vadd.f32 %v13843_v41, %v17626_v28  ;;  %v13893_v51 = vpop.f32.mrf.mxu1  ;;  %v21612_v28 = vld [vmem:[#allocation72_spill] sm:$0xff]  ;;  %v21624_v10 = vld [vmem:[#allocation107_spill] sm:$0xff] }
 0x26a   : > { %21606 = vst [vmem:[#allocation99_spill] sm:$0xff] %v18025_v57  ;;  %v18031_v26 = vadd.f32 %v13893_v51, %v17894_v59  ;;  %v1725_v60 = vpop.f32.mrf.mxu0  ;;  %v21613_v41 = vld [vmem:[#allocation104_spill] sm:$0xff] }
 0x26b   : > { %v18036_v19 = vadd.f32 %v1725_v60, %v21609_v16  ;;  %v2036_v53 = vpop.f32.mrf.mxu1  ;;  %v1412_v62 = vadd.f32 %v21613_v41, %v21612_v28  ;;  %v21618_v16 = vld [vmem:[#allocation74_spill] sm:$0xff]  ;;  %v21620_v41 = vld [vmem:[#allocation75_spill] sm:$0xff] }
 0x26c   : > { %21607 = vst [vmem:[#allocation47_spill] sm:$0xff] %v18031_v26  ;;  %v18039_v25 = vadd.f32 %v2036_v53, %v17900_v15  ;;  %v13846_v27 = vpop.f32.mrf.mxu0  ;;  %14077 = vmatmul.mubr.msk.bf16.gmra.mxu0 %vm665_vm0, %v21611_v34  ;;  %v21614_v26 = vld [vmem:[#allocation32_spill] sm:$0xff]  ;;  %v21619_v53 = vld [vmem:[#allocation105_spill] sm:$0xff] }
 0x26d   : > { %v18045_v59 = vadd.f32 %v13846_v27, %v1420_v0  ;;  %v13896_v51 = vpop.f32.mrf.mxu1  ;;  %14127 = vmatmul.mubr.msk.bf16.gmra.mxu1 %vm665_vm0, %v21614_v26  ;;  %14080 = vmatprep.mubr.msk.bf16.mxu0 %vm665_vm0, %v21615_v35  ;;  %v1423_v34 = vadd.f32 %v21619_v53, %v21618_v16 }
 0x26e   : > { %21610 = vst [vmem:[#allocation26_spill] sm:$0xff] %v18039_v25  ;;  %v18052_v60 = vadd.f32 %v13896_v51, %v17908_v31  ;;  %v1738_v15 = vpop.f32.mrf.mxu0  ;;  %14130 = vmatprep.mubr.msk.bf16.mxu1 %vm665_vm0, %v21617_v33  ;;  %v21621_v25 = vld [vmem:[#allocation106_spill] sm:$0xff] }
 0x26f   : > { %v18058_v28 = vadd.f32 %v1738_v15, %v1412_v62  ;;  %v2049_v0 = vpop.f32.mrf.mxu1  ;;  %v1415_v35 = vadd.f32 %v21621_v25, %v21620_v41  ;;  %v21627_v25 = vld [vmem:[#allocation77_spill] sm:$0xff] }
 0x270   : > { %21616 = vst [vmem:[#allocation100_spill] sm:$0xff] %v18052_v60  ;;  %v18061_v27 = vadd.f32 %v2049_v0, %v17923_v38  ;;  %v13847_v26 = vpop.f32.mrf.mxu0  ;;  %v21623_v60 = vld [vmem:[#allocation76_spill] sm:$0xff]  ;;  %v21626_v0 = vld [vmem:[#allocation61_spill] sm:$0xff] }
 0x271   : > { %v18065_v57 = vadd.f32 %v13847_v26, %v1423_v34  ;;  %v13897_v31 = vpop.f32.mrf.mxu1  ;;  %v1436_v16 = vadd.f32 %v21624_v10, %v21623_v60  ;;  %v21628_v34 = vld [vmem:[#allocation108_spill] sm:$0xff]  ;;  %v21630_v10 = vld [vmem:[#allocation62_spill] sm:$0xff] }
 0x272   : > { %v18068_v51 = vadd.f32 %v13897_v31, %v17929_v43  ;;  %v1741_v33 = vpop.f32.mrf.mxu0  ;;  %v1428_v26 = vadd.f32 %v21628_v34, %v21627_v25  ;;  %v21629_v31 = vld [vmem:[#allocation36_spill] sm:$0xff]  ;;  %v21632_v60 = vld [vmem:[#allocation38_spill] sm:$0xff] }
 0x273   : > { %v18072_v62 = vadd.f32 %v1741_v33, %v1415_v35  ;;  %v2052_v15 = vpop.f32.mrf.mxu1  ;;  %v21633_v33 = vld [vmem:[#allocation78_spill] sm:$0xff] }
 0x274   : > { %21622 = vst [vmem:[#allocation101_spill] sm:$0xff] %v18068_v51  ;;  %v18075_v38 = vadd.f32 %v2052_v15, %v17938_v4  ;;  %v13850_v53 = vpop.f32.mrf.mxu0  ;;  %14081 = vmatmul.mubr.msk.bf16.gmra.mxu0 %vm665_vm0, %v21626_v0  ;;  %v21634_v15 = vld [vmem:[#allocation109_spill] sm:$0xff] }
 0x275   : > { %v18081_v41 = vadd.f32 %v13850_v53, %v1436_v16  ;;  %v13900_v43 = vpop.f32.mrf.mxu1  ;;  %14131 = vmatmul.mubr.msk.bf16.gmra.mxu1 %vm665_vm0, %v21629_v31  ;;  %14084 = vmatprep.mubr.msk.bf16.mxu0 %vm665_vm0, %v21630_v10  ;;  %v1439_v0 = vadd.f32 %v21634_v15, %v21633_v33  ;;  %v21635_v31 = vld [vmem:[#allocation79_spill] sm:$0xff] }
 0x276   : > { %21625 = vst [vmem:[#allocation102_spill] sm:$0xff] %v18075_v38  ;;  %v18088_v35 = vadd.f32 %v13900_v43, %v17946_v46  ;;  %v1754_v4 = vpop.f32.mrf.mxu0  ;;  %14134 = vmatprep.mubr.msk.bf16.mxu1 %vm665_vm0, %v21632_v60  ;;  %v21636_v38 = vld [vmem:[#allocation82_spill] sm:$0xff]  ;;  %v21637_v15 = vld [vmem:[#allocation83_spill] sm:$0xff] }
 0x277   : > { %v18094_v25 = vadd.f32 %v1754_v4, %v1428_v26  ;;  %v2065_v16 = vpop.f32.mrf.mxu1  ;;  %v1431_v10 = vadd.f32 %v21636_v38, %v21635_v31  ;;  %v21640_v31 = vld [vmem:[#allocation84_spill] sm:$0xff] }
 0x278   : > { %21631 = vst [vmem:[#allocation27_spill] sm:$0xff] %v18088_v35  ;;  %v18097_v53 = vadd.f32 %v2065_v16, %v17958_v37  ;;  %v13851_v34 = vpop.f32.mrf.mxu0 }
 0x279   : > { %v18101_v51 = vadd.f32 %v13851_v34, %v1439_v0  ;;  %v13901_v46 = vpop.f32.mrf.mxu1  ;;  %v21638_v0 = vld [vmem:[#allocation40_spill] sm:$0xff] }
 0x27a   : > { %v18104_v43 = vadd.f32 %v13901_v46, %v17964_v44  ;;  %v1757_v60 = vpop.f32.mrf.mxu0 }
 0x27b   : > { %v18106_v35 = vadd.f32 %v1757_v60, %v1431_v10  ;;  %v2068_v33 = vpop.f32.mrf.mxu1 }
 0x27c   : > { %v18109_v26 = vadd.f32 %v2068_v33, %v17970_v29  ;;  %v13922_v4 = vpop.f32.mrf.mxu0  ;;  %14085 = vmatmul.mubr.msk.bf16.gmra.mxu0 %vm665_vm0, %v21558_v17  ;;  %v21639_v29 = vld [vmem:[#allocation42_spill] sm:$0xff] }
 0x27d   : > { %v13904_v37 = vpop.f32.mrf.mxu1  ;;  %v18114_v38 = vadd.f32 %v13922_v4, %v21637_v15  ;;  %14135 = vmatmul.mubr.msk.bf16.gmra.mxu1 %vm665_vm0, %v21638_v0  ;;  %14088 = vmatprep.mubr.msk.bf16.mxu0 %vm665_vm0, %v21565_v7  ;;  %v21641_v0 = vld [vmem:[#allocation86_spill] sm:$0xff] }
 0x27e   : > { %v18121_v44 = vadd.f32 %v13904_v37, %v17978_v45  ;;  %v2264_v16 = vpop.f32.mrf.mxu0  ;;  %14138 = vmatprep.mubr.msk.bf16.mxu1 %vm665_vm0, %v21639_v29 }
 0x27f   : > { %v2081_v34 = vpop.f32.mrf.mxu1  ;;  %v18126_v10 = vadd.f32 %v2264_v16, %v21640_v31 }
 0x280   : > { %v18129_v46 = vadd.f32 %v2081_v34, %v17990_v6  ;;  %v13923_v60 = vpop.f32.mrf.mxu0  ;;  %v21642_v34 = vld [vmem:[#allocation87_spill] sm:$0xff] }
 0x281   : > { %v13905_v33 = vpop.f32.mrf.mxu1  ;;  %v18132_v4 = vadd.f32 %v13923_v60, %v17719_v13  ;;  %v21643_v13 = vld [vmem:[#allocation44_spill] sm:$0xff] }
 0x282   : > { %v18135_v15 = vadd.f32 %v13905_v33, %v17996_v1  ;;  %v2267_v45 = vpop.f32.mrf.mxu0  ;;  %v21644_v1 = vld [vmem:[#allocation66_spill] sm:$0xff] }
 0x283   : > { %v2084_v37 = vpop.f32.mrf.mxu1  ;;  %v18138_v7 = vadd.f32 %v2267_v45, %v21641_v0 }
 0x284   : > { %v18141_v29 = vadd.f32 %v2084_v37, %v18002_v63  ;;  %v13926_v16 = vpop.f32.mrf.mxu0  ;;  %14089 = vmatmul.mubr.msk.bf16.gmra.mxu0 %vm665_vm0, %v21567_v32  ;;  %v21645_v63 = vld [vmem:[#allocation46_spill] sm:$0xff]  ;;  %v21646_v37 = vld [vmem:[#allocation88_spill] sm:$0xff] }
 0x285   : > { %v13908_v6 = vpop.f32.mrf.mxu1  ;;  %v18146_v31 = vadd.f32 %v13926_v16, %v21642_v34  ;;  %14139 = vmatmul.mubr.msk.bf16.gmra.mxu1 %vm665_vm0, %v21643_v13  ;;  %14092 = vmatprep.mubr.msk.bf16.mxu0 %vm665_vm0, %v21644_v1 }
 0x286   : > { %v18153_v60 = vadd.f32 %v13908_v6, %v18010_v2  ;;  %v2280_v33 = vpop.f32.mrf.mxu0  ;;  %14142 = vmatprep.mubr.msk.bf16.mxu1 %vm665_vm0, %v21645_v63 }
 0x287   : > { %v2097_v45 = vpop.f32.mrf.mxu1  ;;  %v18158_v0 = vadd.f32 %v2280_v33, %v21646_v37 }
 0x288   : > { %v18161_v16 = vadd.f32 %v2097_v45, %v18022_v39  ;;  %v13927_v34 = vpop.f32.mrf.mxu0  ;;  %v21647_v45 = vld [vmem:[#allocation92_spill] sm:$0xff] }
 0x289   : > { %v13909_v32 = vpop.f32.mrf.mxu1  ;;  %v18164_v13 = vadd.f32 %v13927_v34, %v17757_v40  ;;  %v21648_v40 = vld [vmem:[#allocation48_spill] sm:$0xff]  ;;  %v21650_v34 = vld [vmem:[#allocation111_spill] sm:$0xff] }
 0x28a   : > { %v18167_v1 = vadd.f32 %v13909_v32, %v18028_v12  ;;  %v2283_v2 = vpop.f32.mrf.mxu0 }
 0x28b   : > { %v2100_v6 = vpop.f32.mrf.mxu1  ;;  %v18170_v17 = vadd.f32 %v2283_v2, %v17768_v49 }
 0x28c   : > { %v18173_v63 = vadd.f32 %v2100_v6, %v18036_v19  ;;  %v13930_v33 = vpop.f32.mrf.mxu0  ;;  %14093 = vmatmul.mubr.msk.bf16.gmra.mxu0 %vm665_vm0, %v21573_v11  ;;  %v21649_v19 = vld [vmem:[#allocation50_spill] sm:$0xff] }
 0x28d   : > { %v13912_v39 = vpop.f32.mrf.mxu1  ;;  %v18178_v37 = vadd.f32 %v13930_v33, %v21647_v45  ;;  %14143 = vmatmul.mubr.msk.bf16.gmra.mxu1 %vm665_vm0, %v21648_v40  ;;  %14096 = vmatprep.mubr.msk.bf16.mxu0 %vm665_vm0, %v21574_v36 }
 0x28e   : > { %v18185_v49 = vadd.f32 %v13912_v39, %v18045_v59  ;;  %v2296_v32 = vpop.f32.mrf.mxu0  ;;  %14146 = vmatprep.mubr.msk.bf16.mxu1 %vm665_vm0, %v21649_v19 }
 0x28f   : > { %v2113_v12 = vpop.f32.mrf.mxu1  ;;  %v18190_v2 = vadd.f32 %v2296_v32, %v21650_v34 }
 0x290   : > { %v18193_v6 = vadd.f32 %v2113_v12, %v18058_v28  ;;  %v13931_v33 = vpop.f32.mrf.mxu0  ;;  %v21651_v12 = vld [vmem:[#allocation31_spill] sm:$0xff] }
 0x291   : > { %v13913_v45 = vpop.f32.mrf.mxu1  ;;  %v18196_v40 = vadd.f32 %v13931_v33, %v17800_v58  ;;  %v21652_v58 = vld [vmem:[#allocation52_spill] sm:$0xff] }
 0x292   : > { %v18199_v36 = vadd.f32 %v13913_v45, %v18065_v57  ;;  %v2299_v59 = vpop.f32.mrf.mxu0  ;;  %v21653_v57 = vld [vmem:[#allocation85_spill] sm:$0xff] }
 0x293   : > { %v2116_v39 = vpop.f32.mrf.mxu1  ;;  %v18202_v11 = vadd.f32 %v2299_v59, %v17806_v21 }
 0x294   : > { %v18205_v19 = vadd.f32 %v2116_v39, %v18072_v62  ;;  %v13934_v32 = vpop.f32.mrf.mxu0  ;;  %14097 = vmatmul.mubr.msk.bf16.gmra.mxu0 %vm665_vm0, %v21575_v52  ;;  %v21654_v62 = vld [vmem:[#allocation54_spill] sm:$0xff] }
 0x295   : > { %v13916_v28 = vpop.f32.mrf.mxu1  ;;  %v18210_v34 = vadd.f32 %v13934_v32, %v21651_v12  ;;  %14147 = vmatmul.mubr.msk.bf16.gmra.mxu1 %vm665_vm0, %v21652_v58  ;;  %14100 = vmatprep.mubr.msk.bf16.mxu0 %vm665_vm0, %v21653_v57 }
 0x296   : > { %v18217_v21 = vadd.f32 %v13916_v28, %v18081_v41  ;;  %v2312_v33 = vpop.f32.mrf.mxu0  ;;  %14150 = vmatprep.mubr.msk.bf16.mxu1 %vm665_vm0, %v21654_v62 }
 0x297   : > { %v2129_v45 = vpop.f32.mrf.mxu1  ;;  %v18222_v59 = vadd.f32 %v2312_v33, %v17826_v56  ;;  %v21657_v33 = vld [vmem:[#allocation56_spill] sm:$0xff] }
 0x298   : > { %v18225_v39 = vadd.f32 %v2129_v45, %v18094_v25  ;;  %v13935_v32 = vpop.f32.mrf.mxu0  ;;  %v567_v45 = vld [vmem:[%s21243_s0 + $0x2d0] sm:$0xff] }
 0x299   : > { %v13917_v12 = vpop.f32.mrf.mxu1  ;;  %v18228_v58 = vadd.f32 %v13935_v32, %v17832_v42 }
 0x29a   : > { %v18231_v57 = vadd.f32 %v13917_v12, %v18101_v51  ;;  %v2315_v41 = vpop.f32.mrf.mxu0 }
 0x29b   : > { %v2132_v28 = vpop.f32.mrf.mxu1  ;;  %v18234_v52 = vadd.f32 %v2315_v41, %v17838_v55 }
 0x29c   : > { %21655 = vst [vmem:[#allocation28_spill] sm:$0xff] %v18231_v57  ;;  %v18237_v62 = vadd.f32 %v2132_v28, %v18106_v35  ;;  %v13938_v56 = vpop.f32.mrf.mxu0  ;;  %14101 = vmatmul.mubr.msk.bf16.gmra.mxu0 %vm665_vm0, %v21581_v18  ;;  %v21659_v35 = vld [vmem:[#allocation58_spill] sm:$0xff]  ;;  %v21661_v28 = vld [vmem:[#allocation113_spill] sm:$0xff] }
 0x29d   : > { %v18242_v25 = vadd.f32 %v13938_v56, %v17849_v54  ;;  %v13988_v42 = vpop.f32.mrf.mxu1  ;;  %14151 = vmatmul.mubr.msk.bf16.gmra.mxu1 %vm665_vm0, %v21657_v33  ;;  %14104 = vmatprep.mubr.msk.bf16.mxu0 %vm665_vm0, %v21588_v48  ;;  %v18259_v54 = vld [vmem:[%s21243_s0 + $0x2d8] sm:$0xff]  ;;  %v21663_v18 = vld [vmem:[#allocation114_spill] sm:$0xff]  ;;  %v21678_v57 = vld [vmem:[#allocation21_spill] sm:$0xff] }
 0x29e   : > { %21656 = vst [vmem:[#allocation29_spill] sm:$0xff] %v18237_v62  ;;  %v18249_v55 = vadd.f32 %v13988_v42, %v18114_v38  ;;  %v2328_v51 = vpop.f32.mrf.mxu0  ;;  %14154 = vmatprep.mubr.msk.bf16.mxu1 %vm665_vm0, %v21659_v35  ;;  %v2946_v33 = vpack.c.bf16 %v18259_v54, %v567_v45  ;;  %v21667_v45 = vld [vmem:[#allocation60_spill] sm:$0xff] }
 0x29f   : > { %v18262_v32 = vadd.f32 %v2328_v51, %v17859_v8  ;;  %v2627_v12 = vpop.f32.mrf.mxu1 }
 0x2a0   : > { %21658 = vst [vmem:[#allocation55_spill] sm:$0xff] %v18249_v55  ;;  %v18265_v38 = vadd.f32 %v2627_v12, %v18126_v10  ;;  %v13939_v41 = vpop.f32.mrf.mxu0  ;;  %v21666_v12 = vld [vmem:[#allocation39_spill] sm:$0xff] }
 0x2a1   : > { %v18268_v56 = vadd.f32 %v13939_v41, %v21661_v28  ;;  %v13989_v42 = vpop.f32.mrf.mxu1 }
 0x2a2   : > { %21660 = vst [vmem:[#allocation30_spill] sm:$0xff] %v18265_v38  ;;  %v18272_v35 = vadd.f32 %v13989_v42, %v18132_v4  ;;  %v2331_v48 = vpop.f32.mrf.mxu0  ;;  %v21669_v42 = vld [vmem:[#allocation20_spill] sm:$0xff] }
 0x2a3   : > { %v18275_v55 = vadd.f32 %v2331_v48, %v21663_v18  ;;  %v2630_v8 = vpop.f32.mrf.mxu1  ;;  %v18291_v18 = vld [vmem:[%s21243_s0 + $0x2e0] sm:$0xff] }
 0x2a4   : > { %21662 = vst [vmem:[#allocation71_spill] sm:$0xff] %v18272_v35  ;;  %v18278_v51 = vadd.f32 %v2630_v8, %v18138_v7  ;;  %v13942_v10 = vpop.f32.mrf.mxu0  ;;  %14105 = vmatmul.mubr.msk.bf16.gmra.mxu0 %vm665_vm0, %v21590_v3  ;;  %v18296_v7 = vld [vmem:[%s21243_s0 + $0x2e8] sm:$0xff]  ;;  %v18311_v8 = vld [vmem:[%s21243_s0 + $0x2f8] sm:$0xff]  ;;  %v21675_v35 = vld [vmem:[#allocation96_spill] sm:$0xff] }
 0x2a5   : > { %21664 = vst [vmem:[#allocation103_spill] sm:$0xff] %v18275_v55  ;;  %v18283_v41 = vadd.f32 %v13942_v10, %v21666_v12  ;;  %v13992_v28 = vpop.f32.mrf.mxu1  ;;  %14155 = vmatmul.mubr.msk.bf16.gmra.mxu1 %vm665_vm0, %v21667_v45  ;;  %14108 = vmatprep.mubr.msk.bf16.mxu0 %vm665_vm0, %v2946_v33  ;;  %v18306_v33 = vld [vmem:[%s21243_s0 + $0x2f0] sm:$0xff]  ;;  %v21673_v55 = vld [vmem:[#allocation95_spill] sm:$0xff] }
 0x2a6   : > { %21665 = vst [vmem:[#allocation72_spill] sm:$0xff] %v18278_v51  ;;  %v18299_v48 = vadd.f32 %v13992_v28, %v18146_v31  ;;  %v2344_v4 = vpop.f32.mrf.mxu0  ;;  %14158 = vmatprep.mubr.msk.bf16.mxu1 %vm665_vm0, %v21669_v42  ;;  %v21670_v10 = vld [vmem:[#allocation94_spill] sm:$0xff]  ;;  %v18321_v42 = vpack.c.bf16 %v18296_v7, %v18291_v18  ;;  %v18328_v51 = vpack.c.bf16 %v18311_v8, %v18306_v33 }
 0x2a7   : > { %v18314_v12 = vadd.f32 %v2344_v4, %v21670_v10  ;;  %v2643_v45 = vpop.f32.mrf.mxu1 }
 0x2a8   : > { %21668 = vst [vmem:[#allocation104_spill] sm:$0xff] %v18299_v48  ;;  %v18317_v31 = vadd.f32 %v2643_v45, %v18158_v0  ;;  %v13943_v28 = vpop.f32.mrf.mxu0  ;;  %21672 = vst [vmem:[#allocation34_spill] sm:$0xff] %v18321_v42 }
 0x2a9   : > { %v18324_v3 = vadd.f32 %v13943_v28, %v21673_v55  ;;  %v13993_v48 = vpop.f32.mrf.mxu1  ;;  %21674 = vst [vmem:[#allocation74_spill] sm:$0xff] %v18328_v51  ;;  %v21677_v55 = vld [vmem:[#allocation115_spill] sm:$0xff] }
 0x2aa   : > { %21671 = vst [vmem:[#allocation32_spill] sm:$0xff] %v18317_v31  ;;  %v18331_v4 = vadd.f32 %v13993_v48, %v18164_v13  ;;  %v2347_v10 = vpop.f32.mrf.mxu0  ;;  %v18351_v13 = vld [vmem:[%s21243_s0 + $0x300] sm:$0xff]  ;;  %v21679_v48 = vld [vmem:[#allocation23_spill] sm:$0xff] }
 0x2ab   : > { %v18334_v0 = vadd.f32 %v2347_v10, %v21675_v35  ;;  %v2646_v45 = vpop.f32.mrf.mxu1 }
 0x2ac   : > { %v18337_v31 = vadd.f32 %v2646_v45, %v18170_v17  ;;  %v13946_v38 = vpop.f32.mrf.mxu0  ;;  %14109 = vmatmul.mubr.msk.bf16.gmra.mxu0 %vm665_vm0, %v18321_v42  ;;  %v18356_v17 = vld [vmem:[%s21243_s0 + $0x308] sm:$0xff] }
 0x2ad   : > { %21676 = vst [vmem:[#allocation105_spill] sm:$0xff] %v18334_v0  ;;  %v18342_v28 = vadd.f32 %v13946_v38, %v21677_v55  ;;  %v13996_v62 = vpop.f32.mrf.mxu1  ;;  %14159 = vmatmul.mubr.msk.bf16.gmra.mxu1 %vm665_vm0, %v21678_v57  ;;  %14112 = vmatprep.mubr.msk.bf16.mxu0 %vm665_vm0, %v18328_v51  ;;  %v18371_v0 = vpack.c.bf16 %v18356_v17, %v18351_v13 }
 0x2ae   : > { %v18359_v38 = vadd.f32 %v13996_v62, %v18178_v37  ;;  %v2360_v35 = vpop.f32.mrf.mxu0  ;;  %14162 = vmatprep.mubr.msk.bf16.mxu1 %vm665_vm0, %v21679_v48 }
 0x2af   : > { %v18364_v57 = vadd.f32 %v2360_v35, %v17926_v23  ;;  %v2659_v10 = vpop.f32.mrf.mxu1  ;;  %21680 = vst [vmem:[#allocation75_spill] sm:$0xff] %v18371_v0 }
 0x2b0   : > { %v18367_v45 = vadd.f32 %v2659_v10, %v18190_v2  ;;  %v13947_v55 = vpop.f32.mrf.mxu0 }
 0x2b1   : > { %v18374_v51 = vadd.f32 %v13947_v55, %v17935_v50  ;;  %v13997_v37 = vpop.f32.mrf.mxu1  ;;  %v21682_v55 = vld [vmem:[#allocation25_spill] sm:$0xff] }
 0x2b2   : > { %v18377_v62 = vadd.f32 %v13997_v37, %v18196_v40  ;;  %v2363_v48 = vpop.f32.mrf.mxu0  ;;  %v21683_v40 = vld [vmem:[#allocation33_spill] sm:$0xff] }
 0x2b3   : > { %v18380_v23 = vadd.f32 %v2363_v48, %v17941_v47  ;;  %v2662_v35 = vpop.f32.mrf.mxu1 }
 0x2b4   : > { %v18383_v2 = vadd.f32 %v2662_v35, %v18202_v11  ;;  %v13950_v10 = vpop.f32.mrf.mxu0  ;;  %14113 = vmatmul.mubr.msk.bf16.gmra.mxu0 %vm665_vm0, %v18371_v0  ;;  %v21684_v11 = vld [vmem:[#allocation110_spill] sm:$0xff]  ;;  %v21686_v0 = vld [vmem:[#allocation35_spill] sm:$0xff] }
 0x2b5   : > { %21681 = vst [vmem:[#allocation106_spill] sm:$0xff] %v18380_v23  ;;  %v18388_v42 = vadd.f32 %v13950_v10, %v17953_v20  ;;  %v14000_v50 = vpop.f32.mrf.mxu1  ;;  %14163 = vmatmul.mubr.msk.bf16.gmra.mxu1 %vm665_vm0, %v21682_v55  ;;  %14184 = vmatprep.mubr.msk.bf16.mxu0 %vm665_vm0, %v21683_v40 }
 0x2b6   : > { %v18395_v47 = vadd.f32 %v14000_v50, %v18210_v34  ;;  %v2376_v37 = vpop.f32.mrf.mxu0  ;;  %14166 = vmatprep.mubr.msk.bf16.mxu1 %vm665_vm0, %v21684_v11 }
 0x2b7   : > { %v18400_v48 = vadd.f32 %v2376_v37, %v17961_v9  ;;  %v2675_v35 = vpop.f32.mrf.mxu1 }
 0x2b8   : > { %v18403_v20 = vadd.f32 %v2675_v35, %v18222_v59  ;;  %v13951_v10 = vpop.f32.mrf.mxu0  ;;  %v21687_v35 = vld [vmem:[#allocation67_spill] sm:$0xff] }
 0x2b9   : > { %v18406_v55 = vadd.f32 %v13951_v10, %v17967_v22  ;;  %v14001_v23 = vpop.f32.mrf.mxu1 }
 0x2ba   : > { %v18409_v40 = vadd.f32 %v14001_v23, %v18228_v58  ;;  %v2379_v34 = vpop.f32.mrf.mxu0  ;;  %v21688_v58 = vld [vmem:[#allocation37_spill] sm:$0xff] }
 0x2bb   : > { %v18412_v50 = vadd.f32 %v2379_v34, %v17973_v5  ;;  %v2678_v11 = vpop.f32.mrf.mxu1 }
 0x2bc   : > { %v18415_v9 = vadd.f32 %v2678_v11, %v18234_v52  ;;  %v13954_v37 = vpop.f32.mrf.mxu0  ;;  %14185 = vmatmul.mubr.msk.bf16.vlgmr.msra.gmra.mxu0 %vm665_vm0, %v21686_v0  ;;  %v21689_v52 = vld [vmem:[#allocation90_spill] sm:$0xff] }
 0x2bd   : > { %21685 = vst [vmem:[#allocation76_spill] sm:$0xff] %v18412_v50  ;;  %v18420_v59 = vadd.f32 %v13954_v37, %v17985_v14  ;;  %v14004_v22 = vpop.f32.mrf.mxu1  ;;  %14167 = vmatmul.mubr.msk.bf16.gmra.mxu1 %vm665_vm0, %v21687_v35  ;;  %14188 = vmatprep.mubr.msk.bf16.mxu0 %vm665_vm0, %v21688_v58  ;;  %v21701_v50 = vld [vmem:[#allocation43_spill] sm:$0xff] }
 0x2be   : > { %v18427_v5 = vadd.f32 %v14004_v22, %v18242_v25  ;;  %v2392_v23 = vpop.f32.mrf.mxu0  ;;  %14170 = vmatprep.mubr.msk.bf16.mxu1 %vm665_vm0, %v21689_v52  ;;  %v3321_v22 = vpack.c.bf16 %v18291_v18, %v18259_v54  ;;  %v21693_v52 = vld [vmem:[#allocation98_spill] sm:$0xff]  ;;  %v21696_v18 = vld [vmem:[#allocation99_spill] sm:$0xff] }
 0x2bf   : > { %v18432_v10 = vadd.f32 %v2392_v23, %v17993_v30  ;;  %v2691_v0 = vpop.f32.mrf.mxu1 }
 0x2c0   : > { %v18435_v14 = vadd.f32 %v2691_v0, %v18262_v32  ;;  %v13955_v34 = vpop.f32.mrf.mxu0  ;;  %v21692_v32 = vld [vmem:[#allocation68_spill] sm:$0xff] }
 0x2c1   : > { %v18438_v11 = vadd.f32 %v13955_v34, %v17999_v24  ;;  %v14005_v37 = vpop.f32.mrf.mxu1  ;;  %v21694_v34 = vld [vmem:[#allocation112_spill] sm:$0xff] }
 0x2c2   : > { %v18441_v35 = vadd.f32 %v14005_v37, %v18268_v56  ;;  %v2395_v25 = vpop.f32.mrf.mxu0  ;;  %v21695_v56 = vld [vmem:[#allocation41_spill] sm:$0xff] }
 0x2c3   : > { %v18446_v58 = vadd.f32 %v2395_v25, %v18005_v61  ;;  %v18448_v30 = vpop.f32.mrf.mxu1 }
 0x2c4   : > { %21691 = vst [vmem:[#allocation77_spill] sm:$0xff] %v18448_v30  ;;  %v13958_v23 = vpop.f32.mrf.mxu0  ;;  %14189 = vmatmul.mubr.msk.bf16.gmra.mxu0 %vm665_vm0, %v21692_v32  ;;  %v21741_v30 = vld [vmem:[#allocation19_spill] sm:$0xff] }
 0x2c5   : > { %21690 = vst [vmem:[#allocation107_spill] sm:$0xff] %v18446_v58  ;;  %v18453_v24 = vadd.f32 %v13958_v23, %v21693_v52  ;;  %v14008_v0 = vpop.f32.mrf.mxu1  ;;  %14171 = vmatmul.mubr.msk.bf16.gmra.mxu1 %vm665_vm0, %v21694_v34  ;;  %14192 = vmatprep.mubr.msk.bf16.mxu0 %vm665_vm0, %v21695_v56  ;;  %v3322_v52 = vpack.c.bf16 %v18306_v33, %v18296_v7  ;;  %v21697_v34 = vld [vmem:[#allocation47_spill] sm:$0xff]  ;;  %v21702_v7 = vld [vmem:[#allocation100_spill] sm:$0xff] }
 0x2c6   : > { %v18460_v54 = vadd.f32 %v14008_v0, %v18283_v41  ;;  %v2408_v61 = vpop.f32.mrf.mxu0  ;;  %14174 = vmatprep.mubr.msk.bf16.mxu1 %vm665_vm0, %v3321_v22  ;;  %v3323_v22 = vpack.c.bf16 %v18351_v13, %v18311_v8 }
 0x2c7   : > { %v18464_v37 = vadd.f32 %v2408_v61, %v21696_v18  ;;  %v2707_v25 = vpop.f32.mrf.mxu1  ;;  %v21698_v61 = vld [vmem:[#allocation26_spill] sm:$0xff] }
 0x2c8   : > { %v18467_v23 = vadd.f32 %v2707_v25, %v18314_v12  ;;  %v13959_v32 = vpop.f32.mrf.mxu0 }
 0x2c9   : > { %v18472_v58 = vadd.f32 %v13959_v32, %v21697_v34  ;;  %v14009_v56 = vpop.f32.mrf.mxu1  ;;  %v18499_v34 = vld [vmem:[%s21243_s0 + $0x310] sm:$0xff] }
 0x2ca   : > { %v18475_v41 = vadd.f32 %v14009_v56, %v18324_v3  ;;  %v2411_v0 = vpop.f32.mrf.mxu0  ;;  %v21703_v3 = vld [vmem:[#allocation45_spill] sm:$0xff] }
 0x2cb   : > { %v18480_v18 = vadd.f32 %v2411_v0, %v21698_v61  ;;  %v18482_v12 = vpop.f32.mrf.mxu1  ;;  %v21704_v61 = vld [vmem:[#allocation101_spill] sm:$0xff] }
 0x2cc   : > { %21700 = vst [vmem:[#allocation36_spill] sm:$0xff] %v18482_v12  ;;  %v13962_v25 = vpop.f32.mrf.mxu0  ;;  %14193 = vmatmul.mubr.msk.bf16.gmra.mxu0 %vm665_vm0, %v21701_v50 }
 0x2cd   : > { %21699 = vst [vmem:[#allocation108_spill] sm:$0xff] %v18480_v18  ;;  %v18487_v33 = vadd.f32 %v13962_v25, %v21702_v7  ;;  %v14012_v32 = vpop.f32.mrf.mxu1  ;;  %14175 = vmatmul.mubr.msk.bf16.gmra.mxu1 %vm665_vm0, %v3322_v52  ;;  %14196 = vmatprep.mubr.msk.bf16.mxu0 %vm665_vm0, %v21703_v3  ;;  %v21705_v3 = vld [vmem:[#allocation102_spill] sm:$0xff] }
 0x2ce   : > { %v18493_v8 = vadd.f32 %v14012_v32, %v18342_v28  ;;  %v2424_v13 = vpop.f32.mrf.mxu0  ;;  %14178 = vmatprep.mubr.msk.bf16.mxu1 %vm665_vm0, %v3323_v22  ;;  %v3324_v22 = vpack.c.bf16 %v18499_v34, %v18356_v17  ;;  %v21710_v17 = vld [vmem:[#allocation49_spill] sm:$0xff] }
 0x2cf   : > { %v18502_v50 = vadd.f32 %v2424_v13, %v18061_v27  ;;  %v2723_v56 = vpop.f32.mrf.mxu1 }
 0x2d0   : > { %v18505_v52 = vadd.f32 %v2723_v56, %v18364_v57  ;;  %v13963_v0 = vpop.f32.mrf.mxu0  ;;  %v21708_v57 = vld [vmem:[#allocation69_spill] sm:$0xff]  ;;  %v21709_v56 = vld [vmem:[#allocation27_spill] sm:$0xff] }
 0x2d1   : > { %v18508_v25 = vadd.f32 %v13963_v0, %v21704_v61  ;;  %v14013_v28 = vpop.f32.mrf.mxu1 }
 0x2d2   : > { %v18513_v7 = vadd.f32 %v14013_v28, %v18374_v51  ;;  %v2427_v32 = vpop.f32.mrf.mxu0 }
 0x2d3   : > { %v18516_v18 = vadd.f32 %v2427_v32, %v21705_v3  ;;  %v18518_v27 = vpop.f32.mrf.mxu1 }
 0x2d4   : > { %21707 = vst [vmem:[#allocation38_spill] sm:$0xff] %v18518_v27  ;;  %v13966_v13 = vpop.f32.mrf.mxu0  ;;  %14197 = vmatmul.mubr.msk.bf16.gmra.mxu0 %vm665_vm0, %v21708_v57 }
 0x2d5   : > { %21706 = vst [vmem:[#allocation62_spill] sm:$0xff] %v18516_v18  ;;  %v18523_v0 = vadd.f32 %v13966_v13, %v21709_v56  ;;  %v14016_v61 = vpop.f32.mrf.mxu1  ;;  %14179 = vmatmul.mubr.msk.bf16.gmra.mxu1 %vm665_vm0, %v3324_v22  ;;  %14200 = vmatprep.mubr.msk.bf16.mxu0 %vm665_vm0, %v21710_v17 }
 0x2d6   : > { %v18529_v51 = vadd.f32 %v14016_v61, %v18388_v42  ;;  %v2440_v28 = vpop.f32.mrf.mxu0 }
 0x2d7   : > { %v18532_v32 = vadd.f32 %v2440_v28, %v18097_v53  ;;  %v2739_v3 = vpop.f32.mrf.mxu1  ;;  %v21713_v28 = vld [vmem:[#allocation51_spill] sm:$0xff] }
 0x2d8   : > { %v18535_v18 = vadd.f32 %v2739_v3, %v18400_v48  ;;  %v13967_v57 = vpop.f32.mrf.mxu0 }
 0x2d9   : > { %v18538_v13 = vadd.f32 %v13967_v57, %v18104_v43  ;;  %v14017_v56 = vpop.f32.mrf.mxu1  ;;  %v21714_v43 = vld [vmem:[#allocation53_spill] sm:$0xff] }
 0x2da   : > { %v18541_v22 = vadd.f32 %v14017_v56, %v18406_v55  ;;  %v2443_v17 = vpop.f32.mrf.mxu0 }
 0x2db   : > { %v18544_v42 = vadd.f32 %v2443_v17, %v18109_v26  ;;  %v18546_v61 = vpop.f32.mrf.mxu1 }
 0x2dc   : > { %21712 = vst [vmem:[#allocation109_spill] sm:$0xff] %v18546_v61  ;;  %v13970_v53 = vpop.f32.mrf.mxu0  ;;  %14201 = vmatmul.mubr.msk.bf16.gmra.mxu0 %vm665_vm0, %v21713_v28  ;;  %v21735_v61 = vld [vmem:[#allocation71_spill] sm:$0xff] }
 0x2dd   : > { %21711 = vst [vmem:[#allocation78_spill] sm:$0xff] %v18544_v42  ;;  %v18551_v48 = vadd.f32 %v13970_v53, %v18121_v44  ;;  %v14020_v3 = vpop.f32.mrf.mxu1  ;;  %14204 = vmatprep.mubr.msk.bf16.mxu0 %vm665_vm0, %v21714_v43 }
 0x2de   : > { %v18556_v55 = vadd.f32 %v14020_v3, %v18420_v59  ;;  %v2456_v57 = vpop.f32.mrf.mxu0 }
 0x2df   : > { %v18559_v26 = vadd.f32 %v2456_v57, %v18129_v46  ;;  %v2755_v56 = vpop.f32.mrf.mxu1  ;;  %v21717_v57 = vld [vmem:[#allocation70_spill] sm:$0xff] }
 0x2e0   : > { %v18562_v17 = vadd.f32 %v2755_v56, %v18432_v10  ;;  %v13971_v42 = vpop.f32.mrf.mxu0 }
 0x2e1   : > { %v18565_v28 = vadd.f32 %v13971_v42, %v18135_v15  ;;  %v14021_v44 = vpop.f32.mrf.mxu1  ;;  %v21718_v15 = vld [vmem:[#allocation57_spill] sm:$0xff] }
 0x2e2   : > { %v18568_v53 = vadd.f32 %v14021_v44, %v18438_v11  ;;  %v2459_v43 = vpop.f32.mrf.mxu0 }
 0x2e3   : > { %v18571_v59 = vadd.f32 %v2459_v43, %v18141_v29  ;;  %v18573_v3 = vpop.f32.mrf.mxu1 }
 0x2e4   : > { %21716 = vst [vmem:[#allocation82_spill] sm:$0xff] %v18573_v3  ;;  %v13974_v46 = vpop.f32.mrf.mxu0  ;;  %14205 = vmatmul.mubr.msk.bf16.gmra.mxu0 %vm665_vm0, %v21717_v57 }
 0x2e5   : > { %21715 = vst [vmem:[#allocation79_spill] sm:$0xff] %v18571_v59  ;;  %v18578_v10 = vadd.f32 %v13974_v46, %v18153_v60  ;;  %v14024_v56 = vpop.f32.mrf.mxu1  ;;  %14208 = vmatprep.mubr.msk.bf16.mxu0 %vm665_vm0, %v21718_v15 }
 0x2e6   : > { %v18583_v11 = vadd.f32 %v14024_v56, %v18453_v24  ;;  %v2472_v42 = vpop.f32.mrf.mxu0 }
 0x2e7   : > { %v18586_v29 = vadd.f32 %v2472_v42, %v18161_v16  ;;  %v2771_v44 = vpop.f32.mrf.mxu1  ;;  %v21721_v42 = vld [vmem:[#allocation59_spill] sm:$0xff] }
 0x2e8   : > { %v18589_v43 = vadd.f32 %v2771_v44, %v18464_v37  ;;  %v13975_v59 = vpop.f32.mrf.mxu0 }
 0x2e9   : > { %v18592_v57 = vadd.f32 %v13975_v59, %v18167_v1  ;;  %v14025_v60 = vpop.f32.mrf.mxu1  ;;  %v21722_v1 = vld [vmem:[#allocation61_spill] sm:$0xff] }
 0x2ea   : > { %v18595_v46 = vadd.f32 %v14025_v60, %v18472_v58  ;;  %v2475_v15 = vpop.f32.mrf.mxu0 }
 0x2eb   : > { %v18598_v24 = vadd.f32 %v2475_v15, %v18173_v63  ;;  %v18600_v56 = vpop.f32.mrf.mxu1 }
 0x2ec   : > { %21720 = vst [vmem:[#allocation40_spill] sm:$0xff] %v18600_v56  ;;  %v13978_v16 = vpop.f32.mrf.mxu0  ;;  %14209 = vmatmul.mubr.msk.bf16.gmra.mxu0 %vm665_vm0, %v21721_v42  ;;  %v21728_v56 = vld [vmem:[#allocation29_spill] sm:$0xff] }
 0x2ed   : > { %21719 = vst [vmem:[#allocation83_spill] sm:$0xff] %v18598_v24  ;;  %v18605_v37 = vadd.f32 %v13978_v16, %v18185_v49  ;;  %v14028_v44 = vpop.f32.mrf.mxu1  ;;  %14212 = vmatprep.mubr.msk.bf16.mxu0 %vm665_vm0, %v21722_v1 }
 0x2ee   : > { %v18610_v58 = vadd.f32 %v14028_v44, %v18487_v33  ;;  %v2488_v59 = vpop.f32.mrf.mxu0 }
 0x2ef   : > { %v18613_v63 = vadd.f32 %v2488_v59, %v18193_v6  ;;  %v2787_v60 = vpop.f32.mrf.mxu1  ;;  %v21725_v59 = vld [vmem:[#allocation73_spill] sm:$0xff] }
 0x2f0   : > { %v18616_v15 = vadd.f32 %v2787_v60, %v18502_v50  ;;  %v13979_v24 = vpop.f32.mrf.mxu0 }
 0x2f1   : > { %v18619_v42 = vadd.f32 %v13979_v24, %v18199_v36  ;;  %v14029_v49 = vpop.f32.mrf.mxu1  ;;  %v21726_v36 = vld [vmem:[#allocation63_spill] sm:$0xff] }
 0x2f2   : > { %v18622_v16 = vadd.f32 %v14029_v49, %v18508_v25  ;;  %v2491_v1 = vpop.f32.mrf.mxu0 }
 0x2f3   : > { %v18625_v33 = vadd.f32 %v2491_v1, %v18205_v19  ;;  %v18627_v44 = vpop.f32.mrf.mxu1 }
 0x2f4   : > { %21724 = vst [vmem:[#allocation84_spill] sm:$0xff] %v18627_v44  ;;  %v13982_v6 = vpop.f32.mrf.mxu0  ;;  %14213 = vmatmul.mubr.msk.bf16.gmra.mxu0 %vm665_vm0, %v21725_v59  ;;  %v21727_v59 = vld [vmem:[#allocation28_spill] sm:$0xff] }
 0x2f5   : > { %21723 = vst [vmem:[#allocation42_spill] sm:$0xff] %v18625_v33  ;;  %v18632_v50 = vadd.f32 %v13982_v6, %v18217_v21  ;;  %v14032_v60 = vpop.f32.mrf.mxu1  ;;  %14216 = vmatprep.mubr.msk.bf16.mxu0 %vm665_vm0, %v21726_v36 }
 0x2f6   : > { %v18637_v25 = vadd.f32 %v14032_v60, %v18523_v0  ;;  %v2504_v24 = vpop.f32.mrf.mxu0 }
 0x2f7   : > { %v18640_v19 = vadd.f32 %v2504_v24, %v18225_v39  ;;  %v2803_v49 = vpop.f32.mrf.mxu1  ;;  %v21731_v24 = vld [vmem:[#allocation64_spill] sm:$0xff] }
 0x2f8   : > { %v18643_v1 = vadd.f32 %v2803_v49, %v18532_v32  ;;  %v13983_v33 = vpop.f32.mrf.mxu0  ;;  %v21732_v49 = vld [vmem:[#allocation55_spill] sm:$0xff] }
 0x2f9   : > { %v18646_v44 = vadd.f32 %v13983_v33, %v21727_v59  ;;  %v14033_v21 = vpop.f32.mrf.mxu1  ;;  %v21733_v33 = vld [vmem:[#allocation65_spill] sm:$0xff] }
 0x2fa   : > { %v18649_v6 = vadd.f32 %v14033_v21, %v18538_v13  ;;  %v2507_v36 = vpop.f32.mrf.mxu0 }
 0x2fb   : > { %v18652_v0 = vadd.f32 %v2507_v36, %v21728_v56  ;;  %v18654_v60 = vpop.f32.mrf.mxu1  ;;  %v21734_v56 = vld [vmem:[#allocation30_spill] sm:$0xff] }
 0x2fc   : > { %21730 = vst [vmem:[#allocation87_spill] sm:$0xff] %v18654_v60  ;;  %v14054_v39 = vpop.f32.mrf.mxu0  ;;  %14217 = vmatmul.mubr.msk.bf16.gmra.mxu0 %vm665_vm0, %v21731_v24 }
 0x2fd   : > { %21729 = vst [vmem:[#allocation86_spill] sm:$0xff] %v18652_v0  ;;  %v14036_v32 = vpop.f32.mrf.mxu1  ;;  %v18659_v3 = vadd.f32 %v14054_v39, %v21732_v49  ;;  %14220 = vmatprep.mubr.msk.bf16.mxu0 %vm665_vm0, %v21733_v33 }
 0x2fe   : > { %v18664_v13 = vadd.f32 %v14036_v32, %v18551_v48  ;;  %v3002_v59 = vpop.f32.mrf.mxu0  ;;  %v21738_v48 = vld [vmem:[#allocation72_spill] sm:$0xff] }
 0x2ff   : > { %v2819_v21 = vpop.f32.mrf.mxu1  ;;  %v18667_v36 = vadd.f32 %v3002_v59, %v21734_v56  ;;  %v21739_v59 = vld [vmem:[#allocation80_spill] sm:$0xff] }
 0x300   : > { %v18670_v0 = vadd.f32 %v2819_v21, %v18559_v26  ;;  %v14055_v60 = vpop.f32.mrf.mxu0  ;;  %v21740_v21 = vld [vmem:[#allocation104_spill] sm:$0xff] }
 0x301   : > { %v14037_v24 = vpop.f32.mrf.mxu1  ;;  %v18673_v27 = vadd.f32 %v14055_v60, %v21735_v61 }
 0x302   : > { %v18676_v39 = vadd.f32 %v14037_v24, %v18565_v28  ;;  %v3005_v49 = vpop.f32.mrf.mxu0  ;;  %v21742_v24 = vld [vmem:[#allocation32_spill] sm:$0xff] }
 0x303   : > { %21736 = vst [vmem:[#allocation44_spill] sm:$0xff] %v18673_v27  ;;  %v18678_v33 = vpop.f32.mrf.mxu1  ;;  %v18681_v32 = vadd.f32 %v3005_v49, %v21738_v48 }
 0x304   : > { %21737 = vst [vmem:[#allocation66_spill] sm:$0xff] %v18678_v33  ;;  %v14058_v12 = vpop.f32.mrf.mxu0  ;;  %14221 = vmatmul.mubr.msk.bf16.gmra.mxu0 %vm665_vm0, %v21739_v59 }
 0x305   : > { %v14040_v26 = vpop.f32.mrf.mxu1  ;;  %v18686_v56 = vadd.f32 %v14058_v12, %v21740_v21  ;;  %14224 = vmatprep.mubr.msk.bf16.mxu0 %vm665_vm0, %v21741_v30 }
 0x306   : > { %v18691_v61 = vadd.f32 %v14040_v26, %v18578_v10  ;;  %v3018_v28 = vpop.f32.mrf.mxu0 }
 0x307   : > { %v2835_v60 = vpop.f32.mrf.mxu1  ;;  %v18694_v33 = vadd.f32 %v3018_v28, %v21742_v24  ;;  %v21744_v28 = vld [vmem:[#allocation22_spill] sm:$0xff]  ;;  %v21745_v24 = vld [vmem:[#allocation24_spill] sm:$0xff] }
 0x308   : > { %v18697_v49 = vadd.f32 %v2835_v60, %v18586_v29  ;;  %v14059_v48 = vpop.f32.mrf.mxu0 }
 0x309   : > { %v14041_v59 = vpop.f32.mrf.mxu1  ;;  %v18700_v27 = vadd.f32 %v14059_v48, %v18331_v4 }
 0x30a   : > { %v18703_v12 = vadd.f32 %v14041_v59, %v18592_v57  ;;  %v3021_v30 = vpop.f32.mrf.mxu0 }
 0x30b   : > { %v18705_v21 = vpop.f32.mrf.mxu1  ;;  %v18708_v10 = vadd.f32 %v3021_v30, %v18337_v31 }
 0x30c   : > { %21743 = vst [vmem:[#allocation46_spill] sm:$0xff] %v18705_v21  ;;  %v14062_v26 = vpop.f32.mrf.mxu0  ;;  %14225 = vmatmul.mubr.msk.bf16.gmra.mxu0 %vm665_vm0, %v21744_v28 }
 0x30d   : > { %v14044_v29 = vpop.f32.mrf.mxu1  ;;  %v18713_v60 = vadd.f32 %v14062_v26, %v18359_v38  ;;  %14228 = vmatprep.mubr.msk.bf16.mxu0 %vm665_vm0, %v21745_v24 }
 0x30e   : > { %v18718_v4 = vadd.f32 %v14044_v29, %v18605_v37  ;;  %v3034_v57 = vpop.f32.mrf.mxu0 }
 0x30f   : > { %v2851_v48 = vpop.f32.mrf.mxu1  ;;  %v18721_v59 = vadd.f32 %v3034_v57, %v18367_v45  ;;  %v21747_v45 = vld [vmem:[#allocation81_spill] sm:$0xff] }
 0x310   : > { %v18724_v31 = vadd.f32 %v2851_v48, %v18613_v63  ;;  %v14063_v30 = vpop.f32.mrf.mxu0  ;;  %v21748_v48 = vld [vmem:[#allocation89_spill] sm:$0xff] }
 0x311   : > { %v14045_v28 = vpop.f32.mrf.mxu1  ;;  %v18727_v21 = vadd.f32 %v14063_v30, %v18377_v62 }
 0x312   : > { %v18730_v38 = vadd.f32 %v14045_v28, %v18619_v42  ;;  %v3037_v26 = vpop.f32.mrf.mxu0 }
 0x313   : > { %v18732_v24 = vpop.f32.mrf.mxu1  ;;  %v18735_v37 = vadd.f32 %v3037_v26, %v18383_v2 }
 0x314   : > { %21746 = vst [vmem:[#allocation88_spill] sm:$0xff] %v18732_v24  ;;  %v14066_v29 = vpop.f32.mrf.mxu0  ;;  %14229 = vmatmul.mubr.msk.bf16.gmra.mxu0 %vm665_vm0, %v21747_v45 }
 0x315   : > { %v14048_v63 = vpop.f32.mrf.mxu1  ;;  %v18740_v57 = vadd.f32 %v14066_v29, %v18395_v47  ;;  %14232 = vmatprep.mubr.msk.bf16.mxu0 %vm665_vm0, %v21748_v48 }
 0x316   : > { %v18745_v62 = vadd.f32 %v14048_v63, %v18632_v50  ;;  %v3050_v42 = vpop.f32.mrf.mxu0 }
 0x317   : > { %v2867_v30 = vpop.f32.mrf.mxu1  ;;  %v18748_v28 = vadd.f32 %v3050_v42, %v18403_v20  ;;  %v21751_v20 = vld [vmem:[#allocation91_spill] sm:$0xff] }
 0x318   : > { %v18751_v2 = vadd.f32 %v2867_v30, %v18640_v19  ;;  %v14067_v26 = vpop.f32.mrf.mxu0 }
 0x319   : > { %v14049_v45 = vpop.f32.mrf.mxu1  ;;  %v18754_v24 = vadd.f32 %v14067_v26, %v18409_v40  ;;  %v21753_v40 = vld [vmem:[#allocation93_spill] sm:$0xff] }
 0x31a   : > { %v18757_v47 = vadd.f32 %v14049_v45, %v18646_v44  ;;  %v3053_v29 = vpop.f32.mrf.mxu0 }
 0x31b   : > { %21749 = vst [vmem:[#allocation92_spill] sm:$0xff] %v18754_v24  ;;  %v18759_v48 = vpop.f32.mrf.mxu1  ;;  %v18762_v50 = vadd.f32 %v3053_v29, %v18415_v9 }
 0x31c   : > { %21750 = vst [vmem:[#allocation48_spill] sm:$0xff] %v18759_v48  ;;  %v14070_v63 = vpop.f32.mrf.mxu0  ;;  %14233 = vmatmul.mubr.msk.bf16.gmra.mxu0 %vm665_vm0, %v21751_v20  ;;  %v21757_v48 = vld [vmem:[#allocation97_spill] sm:$0xff] }
 0x31d   : > { %v18767_v19 = vadd.f32 %v14070_v63, %v18427_v5  ;;  %v18769_v42 = vpop.f32.mrf.mxu1  ;;  %14236 = vmatprep.mubr.msk.bf16.mxu0 %vm665_vm0, %v21753_v40 }
 0x31e   : > { %v3066_v44 = vpop.f32.mrf.mxu0 }
 0x31f   : > { %21752 = vst [vmem:[#allocation50_spill] sm:$0xff] %v18767_v19  ;;  %v18774_v30 = vadd.f32 %v3066_v44, %v18435_v14  ;;  %v18776_v26 = vpop.f32.mrf.mxu1  ;;  %v21759_v44 = vld [vmem:[#allocation34_spill] sm:$0xff] }
 0x320   : > { %v14071_v9 = vpop.f32.mrf.mxu0 }
 0x321   : > { %21754 = vst [vmem:[#allocation111_spill] sm:$0xff] %v18774_v30  ;;  %v18779_v45 = vadd.f32 %v14071_v9, %v18441_v35  ;;  %v18781_v29 = vpop.f32.mrf.mxu1 }
 0x322   : > { %v18783_v20 = vpop.f32.mrf.mxu0 }
 0x323   : > { %21755 = vst [vmem:[#allocation31_spill] sm:$0xff] %v18779_v45  ;;  %21756 = vst [vmem:[#allocation52_spill] sm:$0xff] %v18783_v20  ;;  %v18785_v5 = vpop.f32.mrf.mxu1 }
 0x324   : > { %v14074_v63 = vpop.f32.mrf.mxu0  ;;  %14237 = vmatmul.mubr.msk.bf16.gmra.mxu0 %vm665_vm0, %v21757_v48 }
 0x325   : > { %v18790_v40 = vadd.f32 %v14074_v63, %v18460_v54  ;;  %v18792_v14 = vpop.f32.mrf.mxu1  ;;  %14240 = vmatprep.mubr.msk.bf16.mxu0 %vm665_vm0, %v21759_v44 }
 0x326   : > { %v3082_v35 = vpop.f32.mrf.mxu0 }
 0x327   : > { %21758 = vst [vmem:[#allocation85_spill] sm:$0xff] %v18790_v40  ;;  %v18797_v9 = vadd.f32 %v3082_v35, %v18467_v23  ;;  %v18799_v45 = vpop.f32.mrf.mxu1  ;;  %v21763_v40 = vld [vmem:[#allocation74_spill] sm:$0xff]  ;;  %v21765_v35 = vld [vmem:[#allocation75_spill] sm:$0xff] }
 0x328   : > { %v14075_v19 = vpop.f32.mrf.mxu0 }
 0x329   : > { %21760 = vst [vmem:[#allocation54_spill] sm:$0xff] %v18797_v9  ;;  %v18802_v20 = vadd.f32 %v14075_v19, %v18475_v41  ;;  %v18804_v30 = vpop.f32.mrf.mxu1  ;;  %v576_v41 = vld [vmem:[%s21243_s0 + $0x318] sm:$0xff] }
 0x32a   : > { %v18806_v48 = vpop.f32.mrf.mxu0 }
 0x32b   : > { %21761 = vst [vmem:[#allocation56_spill] sm:$0xff] %v18802_v20  ;;  %21762 = vst [vmem:[#allocation58_spill] sm:$0xff] %v18806_v48  ;;  %v18808_v54 = vpop.f32.mrf.mxu1 }
 0x32c   : > { %v14078_v63 = vpop.f32.mrf.mxu0  ;;  %14241 = vmatmul.mubr.msk.bf16.gmra.mxu0 %vm665_vm0, %v21763_v40  ;;  %v3696_v40 = vpack.c.bf16 %v576_v41, %v18499_v34 }
 0x32d   : > { %v18813_v44 = vadd.f32 %v14078_v63, %v18493_v8  ;;  %v18815_v23 = vpop.f32.mrf.mxu1  ;;  %14244 = vmatprep.mubr.msk.bf16.mxu0 %vm665_vm0, %v21765_v35 }
 0x32e   : > { %v3098_v19 = vpop.f32.mrf.mxu0 }
 0x32f   : > { %21764 = vst [vmem:[#allocation113_spill] sm:$0xff] %v18813_v44  ;;  %v18823_v20 = vadd.f32 %v3098_v19, %v18505_v52  ;;  %v18825_v48 = vpop.f32.mrf.mxu1 }
 0x330   : > { %v14079_v9 = vpop.f32.mrf.mxu0 }
 0x331   : > { %21766 = vst [vmem:[#allocation114_spill] sm:$0xff] %v18823_v20  ;;  %v18829_v8 = vadd.f32 %v14079_v9, %v18513_v7  ;;  %v18831_v63 = vpop.f32.mrf.mxu1 }
 0x332   : > { %v18833_v44 = vpop.f32.mrf.mxu0 }
 0x333   : > { %21767 = vst [vmem:[#allocation39_spill] sm:$0xff] %v18829_v8  ;;  %21768 = vst [vmem:[#allocation60_spill] sm:$0xff] %v18833_v44  ;;  %v18835_v35 = vpop.f32.mrf.mxu1 }
 0x334   : > { %v14082_v24 = vpop.f32.mrf.mxu0  ;;  %14245 = vmatmul.mubr.msk.bf16.gmra.mxu0 %vm665_vm0, %v3696_v40 }
 0x335   : > { %v18839_v52 = vadd.f32 %v14082_v24, %v18529_v51  ;;  %v18841_v19 = vpop.f32.mrf.mxu1 }
 0x336   : > { %v3114_v20 = vpop.f32.mrf.mxu0 }
 0x337   : > { %21769 = vst [vmem:[#allocation20_spill] sm:$0xff] %v18839_v52  ;;  %v18844_v34 = vadd.f32 %v3114_v20, %v18535_v18  ;;  %v18846_v7 = vpop.f32.mrf.mxu1 }
 0x338   : > { %v14083_v9 = vpop.f32.mrf.mxu0 }
 0x339   : > { %21770 = vst [vmem:[#allocation94_spill] sm:$0xff] %v18844_v34  ;;  %v18849_v41 = vadd.f32 %v14083_v9, %v18541_v22  ;;  %v18851_v8 = vpop.f32.mrf.mxu1 }
 0x33a   : > { %21772 = vst [vmem:[#allocation96_spill] sm:$0xff] %v18851_v8  ;;  %v18853_v44 = vpop.f32.mrf.mxu0 }
 0x33b   : > { %21771 = vst [vmem:[#allocation95_spill] sm:$0xff] %v18849_v41  ;;  %21773 = vst [vmem:[#allocation115_spill] sm:$0xff] %v18853_v44  ;;  %v18855_v40 = vpop.f32.mrf.mxu1 }
 0x33c   : > { %v14086_v51 = vpop.f32.mrf.mxu0 }
 0x33d   : > { %v18858_v24 = vadd.f32 %v14086_v51, %v18556_v55  ;;  %v18860_v52 = vpop.f32.mrf.mxu1 }
 0x33e   : > { %v3130_v18 = vpop.f32.mrf.mxu0 }
 0x33f   : > { %21774 = vst [vmem:[#allocation21_spill] sm:$0xff] %v18858_v24  ;;  %v18863_v20 = vadd.f32 %v3130_v18, %v18562_v17  ;;  %v18865_v34 = vpop.f32.mrf.mxu1 }
 0x340   : > { %v14087_v22 = vpop.f32.mrf.mxu0 }
 0x341   : > { %21775 = vst [vmem:[#allocation23_spill] sm:$0xff] %v18863_v20  ;;  %v18868_v9 = vadd.f32 %v14087_v22, %v18568_v53  ;;  %v18870_v41 = vpop.f32.mrf.mxu1 }
 0x342   : > { %v18872_v44 = vpop.f32.mrf.mxu0 }
 0x343   : > { %21776 = vst [vmem:[#allocation25_spill] sm:$0xff] %v18868_v9  ;;  %21777 = vst [vmem:[#allocation33_spill] sm:$0xff] %v18872_v44  ;;  %v18877_v51 = vpop.f32.mrf.mxu1 }
 0x344   : > { %v14090_v8 = vpop.f32.mrf.mxu0 }
 0x345   : > { %v18875_v55 = vadd.f32 %v14090_v8, %v18583_v11  ;;  %v18885_v53 = vpop.f32.mrf.mxu1 }
 0x346   : > { %v3146_v24 = vpop.f32.mrf.mxu0 }
 0x347   : > { %21778 = vst [vmem:[#allocation110_spill] sm:$0xff] %v18875_v55  ;;  %v18880_v17 = vadd.f32 %v3146_v24, %v18589_v43  ;;  %v18892_v11 = vpop.f32.mrf.mxu1 }
 0x348   : > { %v14091_v18 = vpop.f32.mrf.mxu0 }
 0x349   : > { %v18883_v20 = vadd.f32 %v14091_v18, %v18595_v46  ;;  %v18900_v46 = vpop.f32.mrf.mxu1 }
 0x34a   : > { %v18887_v22 = vpop.f32.mrf.mxu0 }
 0x34b   : > { %21779 = vst [vmem:[#allocation35_spill] sm:$0xff] %v18883_v20  ;;  %21780 = vst [vmem:[#allocation67_spill] sm:$0xff] %v18887_v22 }
 0x34c   : > { %v14094_v9 = vpop.f32.mrf.mxu0 }
 0x34d   : > { %v18890_v44 = vadd.f32 %v14094_v9, %v18610_v58  ;;  %v18907_v58 = vpop.f32.mrf.mxu1 }
 0x34e   : > { %v3162_v8 = vpop.f32.mrf.mxu0 }
 0x34f   : > { %21781 = vst [vmem:[#allocation37_spill] sm:$0xff] %v18890_v44  ;;  %v18895_v55 = vadd.f32 %v3162_v8, %v18616_v15 }
 0x350   : > { %v14095_v43 = vpop.f32.mrf.mxu0 }
 0x351   : > { %v18898_v24 = vadd.f32 %v14095_v43, %v18622_v16  ;;  %v18915_v16 = vpop.f32.mrf.mxu1 }
 0x352   : > { %v18902_v18 = vpop.f32.mrf.mxu0 }
 0x353   : > { %21782 = vst [vmem:[#allocation90_spill] sm:$0xff] %v18898_v24  ;;  %21783 = vst [vmem:[#allocation68_spill] sm:$0xff] %v18902_v18 }
 0x354   : > { %v14098_v20 = vpop.f32.mrf.mxu0 }
 0x355   : > { %v18905_v22 = vadd.f32 %v14098_v20, %v18637_v25  ;;  %v18922_v25 = vpop.f32.mrf.mxu1 }
 0x356   : > { %v3178_v9 = vpop.f32.mrf.mxu0 }
 0x357   : > { %21784 = vst [vmem:[#allocation98_spill] sm:$0xff] %v18905_v22  ;;  %v18910_v44 = vadd.f32 %v3178_v9, %v18643_v1 }
 0x358   : > { %v14099_v15 = vpop.f32.mrf.mxu0 }
 0x359   : > { %21785 = vst [vmem:[#allocation112_spill] sm:$0xff] %v18910_v44  ;;  %v18913_v8 = vadd.f32 %v14099_v15, %v18649_v6  ;;  %v18930_v6 = vpop.f32.mrf.mxu1 }
 0x35a   : > { %v18917_v43 = vpop.f32.mrf.mxu0 }
 0x35b   : > { %21786 = vst [vmem:[#allocation41_spill] sm:$0xff] %v18913_v8  ;;  %21787 = vst [vmem:[#allocation99_spill] sm:$0xff] %v18917_v43 }
 0x35c   : > { %v14102_v24 = vpop.f32.mrf.mxu0 }
 0x35d   : > { %v18920_v18 = vadd.f32 %v14102_v24, %v18664_v13  ;;  %v18937_v13 = vpop.f32.mrf.mxu1 }
 0x35e   : > { %v3194_v20 = vpop.f32.mrf.mxu0 }
 0x35f   : > { %21788 = vst [vmem:[#allocation47_spill] sm:$0xff] %v18920_v18  ;;  %v18925_v22 = vadd.f32 %v3194_v20, %v18670_v0 }
 0x360   : > { %v14103_v1 = vpop.f32.mrf.mxu0 }
 0x361   : > { %21789 = vst [vmem:[#allocation26_spill] sm:$0xff] %v18925_v22  ;;  %v18928_v9 = vadd.f32 %v14103_v1, %v18676_v39  ;;  %v18945_v39 = vpop.f32.mrf.mxu1 }
 0x362   : > { %v18932_v15 = vpop.f32.mrf.mxu0 }
 0x363   : > { %21790 = vst [vmem:[#allocation43_spill] sm:$0xff] %v18928_v9  ;;  %21791 = vst [vmem:[#allocation100_spill] sm:$0xff] %v18932_v15 }
 0x364   : > { %v14106_v8 = vpop.f32.mrf.mxu0 }
 0x365   : > { %v18935_v43 = vadd.f32 %v14106_v8, %v18691_v61  ;;  %v18952_v61 = vpop.f32.mrf.mxu1 }
 0x366   : > { %v3210_v24 = vpop.f32.mrf.mxu0 }
 0x367   : > { %21792 = vst [vmem:[#allocation45_spill] sm:$0xff] %v18935_v43  ;;  %v18940_v18 = vadd.f32 %v3210_v24, %v18697_v49 }
 0x368   : > { %v14107_v0 = vpop.f32.mrf.mxu0 }
 0x369   : > { %21793 = vst [vmem:[#allocation101_spill] sm:$0xff] %v18940_v18  ;;  %v18943_v20 = vadd.f32 %v14107_v0, %v18703_v12  ;;  %v18960_v12 = vpop.f32.mrf.mxu1 }
 0x36a   : > { %v18947_v1 = vpop.f32.mrf.mxu0 }
 0x36b   : > { %21794 = vst [vmem:[#allocation102_spill] sm:$0xff] %v18943_v20  ;;  %21795 = vst [vmem:[#allocation69_spill] sm:$0xff] %v18947_v1 }
 0x36c   : > { %v14110_v9 = vpop.f32.mrf.mxu0 }
 0x36d   : > { %v18950_v15 = vadd.f32 %v14110_v9, %v18718_v4  ;;  %v18967_v4 = vpop.f32.mrf.mxu1 }
 0x36e   : > { %v3226_v8 = vpop.f32.mrf.mxu0 }
 0x36f   : > { %21796 = vst [vmem:[#allocation27_spill] sm:$0xff] %v18950_v15  ;;  %v18955_v43 = vadd.f32 %v3226_v8, %v18724_v31 }
 0x370   : > { %v14111_v49 = vpop.f32.mrf.mxu0 }
 0x371   : > { %21797 = vst [vmem:[#allocation49_spill] sm:$0xff] %v18955_v43  ;;  %v18958_v24 = vadd.f32 %v14111_v49, %v18730_v38  ;;  %v18975_v38 = vpop.f32.mrf.mxu1 }
 0x372   : > { %v18962_v0 = vpop.f32.mrf.mxu0 }
 0x373   : > { %21798 = vst [vmem:[#allocation51_spill] sm:$0xff] %v18958_v24  ;;  %21799 = vst [vmem:[#allocation53_spill] sm:$0xff] %v18962_v0  ;;  %v18979_v0 = vpop.f32.mrf.mxu1 }
 0x374   : > { %v14114_v20 = vpop.f32.mrf.mxu0 }
 0x375   : > { %v18965_v1 = vadd.f32 %v14114_v20, %v18745_v62  ;;  %v3632_v62 = vadd.f32 %v18776_v26, %v18667_v36  ;;  %v3636_v36 = vadd.f32 %v18799_v45, %v18694_v33  ;;  %v3637_v33 = vadd.f32 %v18808_v54, %v18708_v10 }
 0x376   : > { %v3242_v9 = vpop.f32.mrf.mxu0  ;;  %v3640_v10 = vadd.f32 %v18825_v48, %v18721_v59  ;;  %v3641_v59 = vadd.f32 %v18835_v35, %v18735_v37  ;;  %v3644_v37 = vadd.f32 %v18846_v7, %v18748_v28  ;;  %v3645_v28 = vadd.f32 %v18855_v40, %v18762_v50  ;;  %v21811_v40 = vld [vmem:[#allocation111_spill] sm:$0xff] }
 0x377   : > { %21800 = vst [vmem:[#allocation70_spill] sm:$0xff] %v18965_v1  ;;  %v18970_v15 = vadd.f32 %v3242_v9, %v18751_v2  ;;  %v3634_v2 = vadd.f32 %v18769_v42, %v18659_v3  ;;  %v3633_v9 = vadd.f32 %v18785_v5, %v18681_v32  ;;  %v21804_v1 = vld [vmem:[#allocation44_spill] sm:$0xff] }
 0x378   : > { %v14115_v31 = vpop.f32.mrf.mxu0 }
 0x379   : > { %21801 = vst [vmem:[#allocation57_spill] sm:$0xff] %v18970_v15  ;;  %v18973_v8 = vadd.f32 %v14115_v31, %v18757_v47  ;;  %v18987_v31 = vpop.f32.mrf.mxu1  ;;  %v3635_v15 = vadd.f32 %v18781_v29, %v21804_v1 }
 0x37a   : > { %v18977_v49 = vpop.f32.mrf.mxu0 }
 0x37b   : > { %21802 = vst [vmem:[#allocation59_spill] sm:$0xff] %v18973_v8  ;;  %21803 = vst [vmem:[#allocation61_spill] sm:$0xff] %v18977_v49  ;;  %v18997_v42 = vpop.f32.mrf.mxu1 }
 0x37c   : > { %v14186_v24 = vpop.f32.mrf.mxu0 }
 0x37d   : > { %v3997_v49 = vadd.f32 %v14186_v24, %v3634_v2  ;;  %v3638_v24 = vadd.f32 %v18792_v14, %v18686_v56 }
 0x37e   : > { %v3740_v43 = vpop.f32.mrf.mxu0 }
 0x37f   : > { %v3995_v47 = vadd.f32 %v3740_v43, %v3632_v62  ;;  %v18999_v5 = vmax.f32 %v3997_v49, 0.0 }
 0x380   : > { %v14187_v20 = vpop.f32.mrf.mxu0 }
 0x381   : > { %v18993_v26 = vmax.f32 %v3995_v47, 0.0  ;;  %v3998_v44 = vadd.f32 %v14187_v20, %v3635_v15  ;;  %v3639_v15 = vadd.f32 %v18804_v30, %v18700_v27 }
 0x382   : > { %v3743_v8 = vpop.f32.mrf.mxu0 }
 0x383   : > { %v3996_v18 = vadd.f32 %v3743_v8, %v3633_v9  ;;  %v19007_v45 = vmax.f32 %v3998_v44, 0.0  ;;  %v19012_v8 = vpop.f32.mrf.mxu1 }
 0x384   : > { %v14190_v22 = vpop.f32.mrf.mxu0 }
 0x385   : > { %v18995_v3 = vmax.f32 %v3996_v18, 0.0  ;;  %v4001_v62 = vadd.f32 %v14190_v22, %v3638_v24  ;;  %v19022_v47 = vpop.f32.mrf.mxu1 }
 0x386   : > { %v3756_v32 = vpop.f32.mrf.mxu0 }
 0x387   : > { %21805 = vst [vmem:[#allocation73_spill] sm:$0xff] %v18995_v3  ;;  %v4123_v43 = vadd.f32 %v18995_v3, %v18993_v26  ;;  %v3999_v29 = vadd.f32 %v3756_v32, %v3636_v36  ;;  %v19024_v30 = vmax.f32 %v4001_v62, 0.0  ;;  %v19036_v24 = vpop.f32.mrf.mxu1 }
 0x388   : > { %v14191_v1 = vpop.f32.mrf.mxu0 }
 0x389   : > { %v4124_v18 = vadd.f32 %v4123_v43, %v18999_v5  ;;  %v19014_v20 = vmax.f32 %v3999_v29, 0.0  ;;  %v4002_v54 = vadd.f32 %v14191_v1, %v3639_v15  ;;  %21806 = vst [vmem:[#allocation63_spill] sm:$0xff] %v19024_v30  ;;  %v3642_v43 = vadd.f32 %v18815_v23, %v18713_v60 }
 0x38a   : > { %v3759_v49 = vpop.f32.mrf.mxu0  ;;  %v3643_v1 = vadd.f32 %v18831_v63, %v18727_v21 }
 0x38b   : > { %v4125_v2 = vadd.f32 %v4124_v18, %v19007_v45  ;;  %v4000_v9 = vadd.f32 %v3759_v49, %v3637_v33  ;;  %v19031_v48 = vmax.f32 %v4002_v54, 0.0  ;;  %v3646_v54 = vadd.f32 %v18841_v19, %v18740_v57  ;;  %v21809_v57 = vld [vmem:[#allocation103_spill] sm:$0xff]  ;;  %v21810_v19 = vld [vmem:[#allocation77_spill] sm:$0xff] }
 0x38c   : > { %v14194_v56 = vpop.f32.mrf.mxu0 }
 0x38d   : > { %v4126_v14 = vadd.f32 %v4125_v2, %v19014_v20  ;;  %v19020_v44 = vmax.f32 %v4000_v9, 0.0  ;;  %v4005_v18 = vadd.f32 %v14194_v56, %v3642_v43  ;;  %v19046_v9 = vpop.f32.mrf.mxu1 }
 0x38e   : > { %v3772_v27 = vpop.f32.mrf.mxu0 }
 0x38f   : > { %v4127_v22 = vadd.f32 %v4126_v14, %v19020_v44  ;;  %v4003_v36 = vadd.f32 %v3772_v27, %v3640_v10  ;;  %v19048_v63 = vmax.f32 %v4005_v18, 0.0  ;;  %v19060_v43 = vpop.f32.mrf.mxu1 }
 0x390   : > { %v14195_v32 = vpop.f32.mrf.mxu0 }
 0x391   : > { %v4128_v29 = vadd.f32 %v4127_v22, %v19024_v30  ;;  %v19038_v15 = vmax.f32 %v4003_v36, 0.0  ;;  %v4006_v35 = vadd.f32 %v14195_v32, %v3643_v1  ;;  %v21807_v22 = vld [vmem:[#allocation92_spill] sm:$0xff] }
 0x392   : > { %v3775_v33 = vpop.f32.mrf.mxu0  ;;  %v21808_v36 = vld [vmem:[#allocation96_spill] sm:$0xff] }
 0x393   : > { %v4129_v49 = vadd.f32 %v4128_v29, %v19031_v48  ;;  %v4004_v62 = vadd.f32 %v3775_v33, %v3641_v59  ;;  %v19055_v7 = vmax.f32 %v4006_v35, 0.0  ;;  %v3647_v32 = vadd.f32 %v21808_v36, %v21807_v22  ;;  %v21813_v36 = vld [vmem:[#allocation50_spill] sm:$0xff] }
 0x394   : > { %v14198_v60 = vpop.f32.mrf.mxu0 }
 0x395   : > { %v4130_v23 = vadd.f32 %v4129_v49, %v19038_v15  ;;  %v19044_v2 = vmax.f32 %v4004_v62, 0.0  ;;  %v4009_v29 = vadd.f32 %v14198_v60, %v3646_v54  ;;  %v2899_v49 = vadd.f32 %v21810_v19, %v21809_v57 }
 0x396   : > { %v3788_v21 = vpop.f32.mrf.mxu0  ;;  %v3648_v62 = vadd.f32 %v18865_v34, %v21811_v40 }
 0x397   : > { %v4131_v56 = vadd.f32 %v4130_v23, %v19044_v2  ;;  %v4007_v10 = vadd.f32 %v3788_v21, %v3644_v37  ;;  %v19072_v21 = vpop.f32.mrf.mxu1  ;;  %v19075_v54 = vmax.f32 %v4009_v29, 0.0 }
 0x398   : > { %v14199_v14 = vpop.f32.mrf.mxu0 }
 0x399   : > { %v4132_v27 = vadd.f32 %v4131_v56, %v19048_v63  ;;  %v19062_v1 = vmax.f32 %v4007_v10, 0.0  ;;  %v4010_v23 = vadd.f32 %v14199_v14, %v3647_v32  ;;  %v21812_v56 = vld [vmem:[#allocation52_spill] sm:$0xff]  ;;  %v21814_v32 = vld [vmem:[#allocation31_spill] sm:$0xff]  ;;  %v19086_v57 = vpop.f32.mrf.mxu1 }
 0x39a   : > { %v3791_v59 = vpop.f32.mrf.mxu0  ;;  %v3274_v10 = vadd.f32 %v21812_v56, %v2899_v49 }
 0x39b   : > { %v4133_v33 = vadd.f32 %v4132_v27, %v19055_v7  ;;  %v4008_v18 = vadd.f32 %v3791_v59, %v3645_v28  ;;  %v3650_v59 = vadd.f32 %v18860_v52, %v21813_v36  ;;  %v21816_v52 = vld [vmem:[#allocation36_spill] sm:$0xff]  ;;  %v19098_v36 = vpop.f32.mrf.mxu1 }
 0x39c   : > { %v14202_v50 = vpop.f32.mrf.mxu0  ;;  %v3649_v34 = vadd.f32 %v18877_v51, %v3274_v10 }
 0x39d   : > { %v4134_v37 = vadd.f32 %v4133_v33, %v19062_v1  ;;  %v19070_v35 = vmax.f32 %v4008_v18, 0.0  ;;  %v19081_v33 = vmax.f32 %v4010_v23, 0.0  ;;  %v3651_v18 = vadd.f32 %v18870_v41, %v21814_v32  ;;  %v21817_v23 = vld [vmem:[#allocation54_spill] sm:$0xff] }
 0x39e   : > { %v3804_v60 = vpop.f32.mrf.mxu0  ;;  %v4013_v19 = vadd.f32 %v14202_v50, %v3650_v59  ;;  %v3652_v56 = vadd.f32 %v18892_v11, %v21817_v23  ;;  %v19112_v23 = vpop.f32.mrf.mxu1 }
 0x39f   : > { %v4135_v28 = vadd.f32 %v4134_v37, %v19070_v35  ;;  %v4011_v27 = vadd.f32 %v3804_v60, %v3648_v62  ;;  %v21815_v37 = vld [vmem:[#allocation105_spill] sm:$0xff] }
 0x3a0   : > { %v14203_v22 = vpop.f32.mrf.mxu0  ;;  %v2903_v60 = vadd.f32 %v21816_v52, %v21815_v37  ;;  %v19101_v32 = vmax.f32 %v4013_v19, 0.0  ;;  %v21821_v37 = vld [vmem:[#allocation85_spill] sm:$0xff] }
 0x3a1   : > { %v4136_v14 = vadd.f32 %v4135_v28, %v19075_v54  ;;  %v19088_v49 = vmax.f32 %v4011_v27, 0.0  ;;  %v4014_v28 = vadd.f32 %v14203_v22, %v3651_v18  ;;  %v21819_v27 = vld [vmem:[#allocation58_spill] sm:$0xff]  ;;  %v3654_v52 = vadd.f32 %v18885_v53, %v21821_v37  ;;  %v21822_v18 = vld [vmem:[#allocation56_spill] sm:$0xff] }
 0x3a2   : > { %v3807_v29 = vpop.f32.mrf.mxu0  ;;  %v3278_v59 = vadd.f32 %v21819_v27, %v2903_v60  ;;  %21820 = vst [vmem:[#allocation29_spill] sm:$0xff] %v19101_v32  ;;  %v21824_v53 = vld [vmem:[#allocation38_spill] sm:$0xff] }
 0x3a3   : > { %v4137_v40 = vadd.f32 %v4136_v14, %v19081_v33  ;;  %v4012_v62 = vadd.f32 %v3807_v29, %v3649_v34 }
 0x3a4   : > { %v14206_v51 = vpop.f32.mrf.mxu0  ;;  %v3653_v11 = vadd.f32 %v18907_v58, %v3278_v59 }
 0x3a5   : > { %v4138_v10 = vadd.f32 %v4137_v40, %v19088_v49  ;;  %v19096_v41 = vmax.f32 %v4012_v62, 0.0  ;;  %v19107_v40 = vmax.f32 %v4014_v28, 0.0  ;;  %v3655_v62 = vadd.f32 %v18900_v46, %v21822_v18  ;;  %v21825_v28 = vld [vmem:[#allocation114_spill] sm:$0xff]  ;;  %v19124_v18 = vpop.f32.mrf.mxu1 }
 0x3a6   : > { %v3820_v50 = vpop.f32.mrf.mxu0  ;;  %v4017_v60 = vadd.f32 %v14206_v51, %v3654_v52  ;;  %v3656_v59 = vadd.f32 %v18922_v25, %v21825_v28 }
 0x3a7   : > { %21818 = vst [vmem:[#allocation28_spill] sm:$0xff] %v19096_v41  ;;  %v4139_v34 = vadd.f32 %v4138_v10, %v19096_v41  ;;  %v4015_v14 = vadd.f32 %v3820_v50, %v3652_v56  ;;  %v21823_v50 = vld [vmem:[#allocation106_spill] sm:$0xff]  ;;  %v19138_v28 = vpop.f32.mrf.mxu1 }
 0x3a8   : > { %v14207_v29 = vpop.f32.mrf.mxu0  ;;  %v2907_v37 = vadd.f32 %v21824_v53, %v21823_v50  ;;  %v19127_v41 = vmax.f32 %v4017_v60, 0.0  ;;  %v21829_v50 = vld [vmem:[#allocation113_spill] sm:$0xff] }
 0x3a9   : > { %v4140_v22 = vadd.f32 %v4139_v34, %v19101_v32  ;;  %v19114_v27 = vmax.f32 %v4015_v14, 0.0  ;;  %v4018_v32 = vadd.f32 %v14207_v29, %v3655_v62  ;;  %v21827_v14 = vld [vmem:[#allocation60_spill] sm:$0xff]  ;;  %v3658_v53 = vadd.f32 %v18915_v16, %v21829_v50  ;;  %v21830_v62 = vld [vmem:[#allocation39_spill] sm:$0xff]  ;;  %v21833_v16 = vld [vmem:[#allocation109_spill] sm:$0xff] }
 0x3aa   : > { %v3823_v19 = vpop.f32.mrf.mxu0  ;;  %v3282_v52 = vadd.f32 %v21827_v14, %v2907_v37  ;;  %21828 = vst [vmem:[#allocation55_spill] sm:$0xff] %v19127_v41 }
 0x3ab   : > { %v4141_v56 = vadd.f32 %v4140_v22, %v19107_v40  ;;  %v4016_v10 = vadd.f32 %v3823_v19, %v3653_v11 }
 0x3ac   : > { %v14210_v58 = vpop.f32.mrf.mxu0  ;;  %v3657_v25 = vadd.f32 %v18937_v13, %v3282_v52 }
 0x3ad   : > { %v4142_v34 = vadd.f32 %v4141_v56, %v19114_v27  ;;  %v19122_v46 = vmax.f32 %v4016_v10, 0.0  ;;  %v19133_v56 = vmax.f32 %v4018_v32, 0.0  ;;  %v3659_v10 = vadd.f32 %v18930_v6, %v21830_v62  ;;  %v21834_v32 = vld [vmem:[#allocation94_spill] sm:$0xff]  ;;  %v19150_v62 = vpop.f32.mrf.mxu1 }
 0x3ae   : > { %v3836_v51 = vpop.f32.mrf.mxu0  ;;  %v4021_v37 = vadd.f32 %v14210_v58, %v3658_v53  ;;  %v3660_v52 = vadd.f32 %v18952_v61, %v21834_v32 }
 0x3af   : > { %21826 = vst [vmem:[#allocation64_spill] sm:$0xff] %v19122_v46  ;;  %v4143_v11 = vadd.f32 %v4142_v34, %v19122_v46  ;;  %v4019_v22 = vadd.f32 %v3836_v51, %v3656_v59  ;;  %v21832_v51 = vld [vmem:[#allocation76_spill] sm:$0xff]  ;;  %v19164_v32 = vpop.f32.mrf.mxu1 }
 0x3b0   : > { %v14211_v19 = vpop.f32.mrf.mxu0  ;;  %v2911_v50 = vadd.f32 %v21833_v16, %v21832_v51  ;;  %v19153_v46 = vmax.f32 %v4021_v37, 0.0  ;;  %v21838_v51 = vld [vmem:[#allocation20_spill] sm:$0xff] }
 0x3b1   : > { %v4144_v29 = vadd.f32 %v4143_v11, %v19127_v41  ;;  %v19140_v14 = vmax.f32 %v4019_v22, 0.0  ;;  %v4022_v41 = vadd.f32 %v14211_v19, %v3659_v10  ;;  %v21836_v22 = vld [vmem:[#allocation115_spill] sm:$0xff]  ;;  %v3662_v16 = vadd.f32 %v18945_v39, %v21838_v51  ;;  %v21841_v39 = vld [vmem:[#allocation82_spill] sm:$0xff] }
 0x3b2   : > { %v3839_v60 = vpop.f32.mrf.mxu0  ;;  %v3286_v53 = vadd.f32 %v21836_v22, %v2911_v50  ;;  %21837 = vst [vmem:[#allocation71_spill] sm:$0xff] %v19153_v46  ;;  %v21839_v10 = vld [vmem:[#allocation95_spill] sm:$0xff] }
 0x3b3   : > { %21831 = vst [vmem:[#allocation65_spill] sm:$0xff] %v19140_v14  ;;  %v4145_v59 = vadd.f32 %v4144_v29, %v19133_v56  ;;  %v4020_v34 = vadd.f32 %v3839_v60, %v3657_v25 }
 0x3b4   : > { %v14214_v13 = vpop.f32.mrf.mxu0  ;;  %v3661_v61 = vadd.f32 %v18967_v4, %v3286_v53 }
 0x3b5   : > { %v4146_v11 = vadd.f32 %v4145_v59, %v19140_v14  ;;  %v19148_v6 = vmax.f32 %v4020_v34, 0.0  ;;  %v19159_v59 = vmax.f32 %v4022_v41, 0.0  ;;  %v3663_v34 = vadd.f32 %v18960_v12, %v21839_v10  ;;  %v21842_v41 = vld [vmem:[#allocation23_spill] sm:$0xff]  ;;  %v19176_v10 = vpop.f32.mrf.mxu1 }
 0x3b6   : > { %v3852_v58 = vpop.f32.mrf.mxu0  ;;  %v4025_v50 = vadd.f32 %v14214_v13, %v3662_v16  ;;  %v3664_v53 = vadd.f32 %v18979_v0, %v21842_v41 }
 0x3b7   : > { %21835 = vst [vmem:[#allocation30_spill] sm:$0xff] %v19148_v6  ;;  %v4147_v25 = vadd.f32 %v4146_v11, %v19148_v6  ;;  %v4023_v29 = vadd.f32 %v3852_v58, %v3660_v52  ;;  %v21840_v58 = vld [vmem:[#allocation107_spill] sm:$0xff]  ;;  %v19190_v41 = vpop.f32.mrf.mxu1 }
 0x3b8   : > { %v14215_v60 = vpop.f32.mrf.mxu0  ;;  %v2915_v51 = vadd.f32 %v21841_v39, %v21840_v58  ;;  %v19179_v6 = vmax.f32 %v4025_v50, 0.0  ;;  %v21845_v58 = vld [vmem:[#allocation21_spill] sm:$0xff] }
 0x3b9   : > { %v4148_v19 = vadd.f32 %v4147_v25, %v19153_v46  ;;  %v19166_v22 = vmax.f32 %v4023_v29, 0.0  ;;  %v4026_v46 = vadd.f32 %v14215_v60, %v3663_v34  ;;  %v21843_v29 = vld [vmem:[#allocation33_spill] sm:$0xff]  ;;  %v3666_v39 = vadd.f32 %v18975_v38, %v21845_v58  ;;  %v21848_v38 = vld [vmem:[#allocation40_spill] sm:$0xff] }
 0x3ba   : > { %v3855_v37 = vpop.f32.mrf.mxu0  ;;  %v3290_v16 = vadd.f32 %v21843_v29, %v2915_v51  ;;  %21844 = vst [vmem:[#allocation72_spill] sm:$0xff] %v19179_v6  ;;  %v21846_v34 = vld [vmem:[#allocation25_spill] sm:$0xff] }
 0x3bb   : > { %v4149_v52 = vadd.f32 %v4148_v19, %v19159_v59  ;;  %v4024_v11 = vadd.f32 %v3855_v37, %v3661_v61 }
 0x3bc   : > { %v14218_v4 = vpop.f32.mrf.mxu0  ;;  %v3665_v0 = vadd.f32 %v18997_v42, %v3290_v16 }
 0x3bd   : > { %v4150_v25 = vadd.f32 %v4149_v52, %v19166_v22  ;;  %v19174_v12 = vmax.f32 %v4024_v11, 0.0  ;;  %v19185_v52 = vmax.f32 %v4026_v46, 0.0  ;;  %v3667_v11 = vadd.f32 %v18987_v31, %v21846_v34  ;;  %v19202_v34 = vpop.f32.mrf.mxu1 }
 0x3be   : > { %v3868_v13 = vpop.f32.mrf.mxu0  ;;  %v4029_v51 = vadd.f32 %v14218_v4, %v3666_v39  ;;  %v3668_v46 = vadd.f32 %v19022_v47, %v18880_v17 }
 0x3bf   : > { %v4151_v61 = vadd.f32 %v4150_v25, %v19174_v12  ;;  %v4027_v19 = vadd.f32 %v3868_v13, %v3664_v53  ;;  %v21847_v13 = vld [vmem:[#allocation108_spill] sm:$0xff] }
 0x3c0   : > { %v14219_v37 = vpop.f32.mrf.mxu0  ;;  %v2919_v58 = vadd.f32 %v21848_v38, %v21847_v13  ;;  %v21852_v13 = vld [vmem:[#allocation110_spill] sm:$0xff] }
 0x3c1   : > { %v4152_v60 = vadd.f32 %v4151_v61, %v19179_v6  ;;  %v19192_v29 = vmax.f32 %v4027_v19, 0.0  ;;  %v4030_v61 = vadd.f32 %v14219_v37, %v3667_v11  ;;  %v21850_v19 = vld [vmem:[#allocation67_spill] sm:$0xff]  ;;  %v19205_v6 = vmax.f32 %v4029_v51, 0.0 }
 0x3c2   : > { %v3871_v50 = vpop.f32.mrf.mxu0  ;;  %v3294_v39 = vadd.f32 %v21850_v19, %v2919_v58  ;;  %v3670_v38 = vadd.f32 %v19012_v8, %v21852_v13  ;;  %v21854_v11 = vld [vmem:[#allocation35_spill] sm:$0xff]  ;;  %v21856_v8 = vld [vmem:[#allocation84_spill] sm:$0xff] }
 0x3c3   : > { %v4153_v53 = vadd.f32 %v4152_v60, %v19185_v52  ;;  %v4028_v25 = vadd.f32 %v3871_v50, %v3665_v0  ;;  %21851 = vst [vmem:[#allocation104_spill] sm:$0xff] %v19205_v6  ;;  %v19211_v47 = vmax.f32 %v4030_v61, 0.0  ;;  %v3672_v61 = vadd.f32 %v19072_v21, %v18895_v55 }
 0x3c4   : > { %v14222_v42 = vpop.f32.mrf.mxu0  ;;  %v3669_v17 = vadd.f32 %v19046_v9, %v3294_v39 }
 0x3c5   : > { %v4154_v16 = vadd.f32 %v4153_v53, %v19192_v29  ;;  %v19200_v31 = vmax.f32 %v4028_v25, 0.0  ;;  %21853 = vst [vmem:[#allocation19_spill] sm:$0xff] %v19211_v47  ;;  %v3671_v53 = vadd.f32 %v19036_v24, %v21854_v11  ;;  %v19216_v25 = vpop.f32.mrf.mxu1  ;;  %v4033_v58 = vadd.f32 %v14222_v42, %v3670_v38 }
 0x3c6   : > { %v3884_v4 = vpop.f32.mrf.mxu0 }
 0x3c7   : > { %21849 = vst [vmem:[#allocation80_spill] sm:$0xff] %v19200_v31  ;;  %v4155_v0 = vadd.f32 %v4154_v16, %v19200_v31  ;;  %v4031_v60 = vadd.f32 %v3884_v4, %v3668_v46  ;;  %v21855_v4 = vld [vmem:[#allocation62_spill] sm:$0xff]  ;;  %v19228_v11 = vpop.f32.mrf.mxu1 }
 0x3c8   : > { %v14223_v50 = vpop.f32.mrf.mxu0  ;;  %v2923_v13 = vadd.f32 %v21856_v8, %v21855_v4  ;;  %v21860_v4 = vld [vmem:[#allocation37_spill] sm:$0xff] }
 0x3c9   : > { %v4156_v37 = vadd.f32 %v4155_v0, %v19205_v6  ;;  %v19218_v19 = vmax.f32 %v4031_v60, 0.0  ;;  %v4034_v0 = vadd.f32 %v14223_v50, %v3671_v53  ;;  %v21858_v60 = vld [vmem:[#allocation68_spill] sm:$0xff]  ;;  %v19231_v6 = vmax.f32 %v4033_v58, 0.0  ;;  %v21862_v53 = vld [vmem:[#allocation90_spill] sm:$0xff] }
 0x3ca   : > { %v3887_v51 = vpop.f32.mrf.mxu0  ;;  %v3298_v38 = vadd.f32 %v21858_v60, %v2923_v13  ;;  %v3674_v8 = vadd.f32 %v19060_v43, %v21860_v4  ;;  %v21865_v43 = vld [vmem:[#allocation87_spill] sm:$0xff] }
 0x3cb   : > { %v4157_v46 = vadd.f32 %v4156_v37, %v19211_v47  ;;  %v4032_v16 = vadd.f32 %v3887_v51, %v3669_v17  ;;  %21859 = vst [vmem:[#allocation22_spill] sm:$0xff] %v19231_v6  ;;  %v19237_v21 = vmax.f32 %v4034_v0, 0.0  ;;  %v21866_v0 = vld [vmem:[#allocation112_spill] sm:$0xff] }
 0x3cc   : > { %v14226_v9 = vpop.f32.mrf.mxu0  ;;  %v3673_v55 = vadd.f32 %v19098_v36, %v3298_v38  ;;  %v3676_v38 = vadd.f32 %v19124_v18, %v21866_v0 }
 0x3cd   : > { %v4158_v39 = vadd.f32 %v4157_v46, %v19218_v19  ;;  %v19226_v24 = vmax.f32 %v4032_v16, 0.0  ;;  %21861 = vst [vmem:[#allocation24_spill] sm:$0xff] %v19237_v21  ;;  %v3675_v46 = vadd.f32 %v19086_v57, %v21862_v53  ;;  %v19242_v16 = vpop.f32.mrf.mxu1  ;;  %v4037_v13 = vadd.f32 %v14226_v9, %v3674_v8  ;;  %v21868_v9 = vld [vmem:[#allocation99_spill] sm:$0xff] }
 0x3ce   : > { %v3900_v42 = vpop.f32.mrf.mxu0 }
 0x3cf   : > { %21857 = vst [vmem:[#allocation32_spill] sm:$0xff] %v19226_v24  ;;  %v4159_v17 = vadd.f32 %v4158_v39, %v19226_v24  ;;  %v4035_v37 = vadd.f32 %v3900_v42, %v3672_v61  ;;  %v21864_v42 = vld [vmem:[#allocation78_spill] sm:$0xff]  ;;  %v3588_v53 = vpop.f32.mrf.mxu1  ;;  %v19255_v8 = vmax.f32 %v4037_v13, 0.0 }
 0x3d0   : > { %v14227_v51 = vpop.f32.mrf.mxu0  ;;  %v2927_v4 = vadd.f32 %v21865_v43, %v21864_v42  ;;  %v21870_v42 = vld [vmem:[#allocation98_spill] sm:$0xff] }
 0x3d1   : > { %v4160_v50 = vadd.f32 %v4159_v17, %v19231_v6  ;;  %v19244_v60 = vmax.f32 %v4035_v37, 0.0  ;;  %v4038_v6 = vadd.f32 %v14227_v51, %v3675_v46  ;;  %21869 = vst [vmem:[#allocation91_spill] sm:$0xff] %v19255_v8  ;;  %v3678_v43 = vadd.f32 %v19112_v23, %v21870_v42  ;;  %v21872_v46 = vld [vmem:[#allocation41_spill] sm:$0xff]  ;;  %v21875_v23 = vld [vmem:[#allocation66_spill] sm:$0xff] }
 0x3d2   : > { %v3903_v58 = vpop.f32.mrf.mxu0  ;;  %v3302_v37 = vadd.f32 %v21868_v9, %v2927_v4 }
 0x3d3   : > { %21863 = vst [vmem:[#allocation81_spill] sm:$0xff] %v19244_v60  ;;  %v4161_v61 = vadd.f32 %v4160_v50, %v19237_v21  ;;  %v4036_v39 = vadd.f32 %v3903_v58, %v3673_v55  ;;  %v19261_v0 = vmax.f32 %v4038_v6, 0.0  ;;  %v21876_v6 = vld [vmem:[#allocation26_spill] sm:$0xff] }
 0x3d4   : > { %v14230_v36 = vpop.f32.mrf.mxu0  ;;  %v3677_v18 = vadd.f32 %v19150_v62, %v3302_v37  ;;  %v3680_v37 = vadd.f32 %v19176_v10, %v21876_v6 }
 0x3d5   : > { %v4162_v17 = vadd.f32 %v4161_v61, %v19244_v60  ;;  %v19252_v57 = vmax.f32 %v4036_v39, 0.0  ;;  %21871 = vst [vmem:[#allocation93_spill] sm:$0xff] %v19261_v0  ;;  %v3679_v61 = vadd.f32 %v19138_v28, %v21872_v46  ;;  %v19266_v39 = vpop.f32.mrf.mxu1  ;;  %v4041_v4 = vadd.f32 %v14230_v36, %v3678_v43  ;;  %v21878_v36 = vld [vmem:[#allocation100_spill] sm:$0xff] }
 0x3d6   : > { %v3916_v24 = vpop.f32.mrf.mxu0 }
 0x3d7   : > { %21867 = vst [vmem:[#allocation89_spill] sm:$0xff] %v19252_v57  ;;  %v4163_v55 = vadd.f32 %v4162_v17, %v19252_v57  ;;  %v4039_v50 = vadd.f32 %v3916_v24, %v3676_v38  ;;  %v21874_v17 = vld [vmem:[#allocation79_spill] sm:$0xff]  ;;  %v3601_v46 = vpop.f32.mrf.mxu1  ;;  %v19279_v43 = vmax.f32 %v4041_v4, 0.0 }
 0x3d8   : > { %v14231_v58 = vpop.f32.mrf.mxu0  ;;  %v2931_v42 = vadd.f32 %v21875_v23, %v21874_v17  ;;  %v21880_v17 = vld [vmem:[#allocation47_spill] sm:$0xff] }
 0x3d9   : > { %v4164_v51 = vadd.f32 %v4163_v55, %v19255_v8  ;;  %v19268_v9 = vmax.f32 %v4039_v50, 0.0  ;;  %v4042_v8 = vadd.f32 %v14231_v58, %v3679_v61  ;;  %21879 = vst [vmem:[#allocation74_spill] sm:$0xff] %v19279_v43  ;;  %v3682_v23 = vadd.f32 %v19164_v32, %v21880_v17  ;;  %v21882_v61 = vld [vmem:[#allocation43_spill] sm:$0xff] }
 0x3da   : > { %v3919_v13 = vpop.f32.mrf.mxu0  ;;  %v3306_v50 = vadd.f32 %v21878_v36, %v2931_v42 }
 0x3db   : > { %21873 = vst [vmem:[#allocation97_spill] sm:$0xff] %v19268_v9  ;;  %v4165_v24 = vadd.f32 %v4164_v51, %v19261_v0  ;;  %v4040_v38 = vadd.f32 %v3919_v13, %v3677_v18  ;;  %v19285_v6 = vmax.f32 %v4042_v8, 0.0 }
 0x3dc   : > { %v14234_v62 = vpop.f32.mrf.mxu0  ;;  %v3681_v10 = vadd.f32 %v19202_v34, %v3306_v50  ;;  %v21886_v34 = vld [vmem:[#allocation101_spill] sm:$0xff] }
 0x3dd   : > { %v4166_v55 = vadd.f32 %v4165_v24, %v19268_v9  ;;  %v19276_v28 = vmax.f32 %v4040_v38, 0.0  ;;  %21881 = vst [vmem:[#allocation75_spill] sm:$0xff] %v19285_v6  ;;  %v3683_v24 = vadd.f32 %v19190_v41, %v21882_v61  ;;  %v14177_v38 = vpop.f32.mrf.mxu1  ;;  %v4045_v4 = vadd.f32 %v14234_v62, %v3682_v23  ;;  %v21888_v62 = vld [vmem:[#allocation69_spill] sm:$0xff] }
 0x3de   : > { %v3932_v57 = vpop.f32.mrf.mxu0  ;;  %v3684_v8 = vadd.f32 %v19228_v11, %v21886_v34 }
 0x3df   : > { %21877 = vst [vmem:[#allocation34_spill] sm:$0xff] %v19276_v28  ;;  %v4167_v18 = vadd.f32 %v4166_v55, %v19276_v28  ;;  %v4043_v51 = vadd.f32 %v3932_v57, %v3680_v37  ;;  %v21884_v55 = vld [vmem:[#allocation83_spill] sm:$0xff]  ;;  %v21885_v28 = vld [vmem:[#allocation46_spill] sm:$0xff]  ;;  %v3604_v41 = vpop.f32.mrf.mxu1  ;;  %v19301_v23 = vmax.f32 %v4045_v4, 0.0 }
 0x3e0   : > { %v14235_v13 = vpop.f32.mrf.mxu0  ;;  %v2935_v32 = vadd.f32 %v21885_v28, %v21884_v55  ;;  %v21890_v28 = vld [vmem:[#allocation45_spill] sm:$0xff] }
 0x3e1   : > { %v4168_v58 = vadd.f32 %v4167_v18, %v19279_v43  ;;  %v19290_v36 = vmax.f32 %v4043_v51, 0.0  ;;  %v4046_v18 = vadd.f32 %v14235_v13, %v3683_v24  ;;  %21889 = vst [vmem:[#allocation96_spill] sm:$0xff] %v19301_v23  ;;  %v3686_v55 = vadd.f32 %v19216_v25, %v21890_v28  ;;  %v21891_v24 = vld [vmem:[#allocation102_spill] sm:$0xff] }
 0x3e2   : > { %v3935_v42 = vpop.f32.mrf.mxu0  ;;  %v3310_v51 = vadd.f32 %v21888_v62, %v2935_v32  ;;  %v21894_v62 = vld [vmem:[#allocation88_spill] sm:$0xff] }
 0x3e3   : > { %21883 = vst [vmem:[#allocation44_spill] sm:$0xff] %v19290_v36  ;;  %v4169_v57 = vadd.f32 %v4168_v58, %v19285_v6  ;;  %v4044_v37 = vadd.f32 %v3935_v42, %v3681_v10  ;;  %v19306_v11 = vmax.f32 %v4046_v18, 0.0 }
 0x3e4   : > { %v14238_v17 = vpop.f32.mrf.mxu0  ;;  %v3685_v6 = vadd.f32 %v3588_v53, %v3310_v51  ;;  %v21895_v53 = vld [vmem:[#allocation49_spill] sm:$0xff] }
 0x3e5   : > { %v4170_v50 = vadd.f32 %v4169_v57, %v19290_v36  ;;  %v19298_v43 = vmax.f32 %v4044_v37, 0.0  ;;  %v3687_v57 = vadd.f32 %v19242_v16, %v21891_v24  ;;  %v14180_v37 = vpop.f32.mrf.mxu1  ;;  %v4049_v32 = vadd.f32 %v14238_v17, %v3686_v55 }
 0x3e6   : > { %v3948_v61 = vpop.f32.mrf.mxu0  ;;  %v3688_v18 = vadd.f32 %v3601_v46, %v21895_v53 }
 0x3e7   : > { %21887 = vst [vmem:[#allocation92_spill] sm:$0xff] %v19298_v43  ;;  %v4171_v10 = vadd.f32 %v4170_v50, %v19298_v43  ;;  %v4047_v58 = vadd.f32 %v3948_v61, %v3684_v8  ;;  %v21893_v61 = vld [vmem:[#allocation42_spill] sm:$0xff]  ;;  %v3617_v16 = vpop.f32.mrf.mxu1 }
 0x3e8   : > { %v14239_v42 = vpop.f32.mrf.mxu0  ;;  %v2939_v43 = vadd.f32 %v21894_v62, %v21893_v61 }
 0x3e9   : > { %v4172_v13 = vadd.f32 %v4171_v10, %v19301_v23  ;;  %v19311_v4 = vmax.f32 %v4047_v58, 0.0  ;;  %v4050_v10 = vadd.f32 %v14239_v42, %v3687_v57  ;;  %v21897_v23 = vld [vmem:[#allocation53_spill] sm:$0xff]  ;;  %v19321_v58 = vmax.f32 %v4049_v32, 0.0  ;;  %v21899_v57 = vld [vmem:[#allocation51_spill] sm:$0xff] }
 0x3ea   : > { %v3951_v34 = vpop.f32.mrf.mxu0  ;;  %v3314_v17 = vadd.f32 %v21897_v23, %v2939_v43 }
 0x3eb   : > { %21892 = vst [vmem:[#allocation103_spill] sm:$0xff] %v19311_v4  ;;  %v4173_v50 = vadd.f32 %v4172_v13, %v19306_v11  ;;  %v4048_v8 = vadd.f32 %v3951_v34, %v3685_v6  ;;  %v21898_v34 = vld [vmem:[#allocation27_spill] sm:$0xff]  ;;  %v19326_v46 = vmax.f32 %v4050_v10, 0.0 }
 0x3ec   : > { %v14242_v25 = vpop.f32.mrf.mxu0  ;;  %v3690_v61 = vadd.f32 %v19266_v39, %v21898_v34  ;;  %v3689_v62 = vadd.f32 %v3604_v41, %v3314_v17 }
 0x3ed   : > { %v4174_v51 = vadd.f32 %v4173_v50, %v19311_v4  ;;  %v19318_v28 = vmax.f32 %v4048_v8, 0.0  ;;  %v3691_v50 = vadd.f32 %v14177_v38, %v21899_v57  ;;  %v14181_v8 = vpop.f32.mrf.mxu1  ;;  %v21903_v38 = vld [vmem:[#allocation61_spill] sm:$0xff] }
 0x3ee   : > { %v3964_v24 = vpop.f32.mrf.mxu0  ;;  %v4053_v4 = vadd.f32 %v14242_v25, %v3690_v61  ;;  %v21904_v57 = vld [vmem:[#allocation57_spill] sm:$0xff] }
 0x3ef   : > { %21896 = vst [vmem:[#allocation77_spill] sm:$0xff] %v19318_v28  ;;  %v4175_v55 = vadd.f32 %v4174_v51, %v19318_v28  ;;  %v4051_v6 = vadd.f32 %v3964_v24, %v3688_v18  ;;  %v21900_v51 = vld [vmem:[#allocation86_spill] sm:$0xff]  ;;  %v21901_v24 = vld [vmem:[#allocation48_spill] sm:$0xff]  ;;  %v3620_v17 = vpop.f32.mrf.mxu1  ;;  %v3692_v25 = vadd.f32 %v3617_v16, %v21904_v57  ;;  %v21909_v57 = vld [vmem:[#allocation59_spill] sm:$0xff] }
 0x3f0   : > { %v14243_v13 = vpop.f32.mrf.mxu0  ;;  %v2943_v28 = vadd.f32 %v21901_v24, %v21900_v51 }
 0x3f1   : > { %v4176_v42 = vadd.f32 %v4175_v55, %v19321_v58  ;;  %v19330_v43 = vmax.f32 %v4051_v6, 0.0  ;;  %v4054_v41 = vadd.f32 %v14243_v13, %v3691_v50  ;;  %v19340_v6 = vmax.f32 %v4053_v4, 0.0 }
 0x3f2   : > { %v3967_v53 = vpop.f32.mrf.mxu0  ;;  %v3318_v34 = vadd.f32 %v21903_v38, %v2943_v28  ;;  %v21908_v28 = vld [vmem:[#allocation70_spill] sm:$0xff] }
 0x3f3   : > { %v4177_v23 = vadd.f32 %v4176_v42, %v19326_v46  ;;  %v4052_v32 = vadd.f32 %v3967_v53, %v3689_v62  ;;  %21905 = vst [vmem:[#allocation52_spill] sm:$0xff] %v19340_v6  ;;  %v19343_v53 = vmax.f32 %v4054_v41, 0.0  ;;  %v3694_v38 = vadd.f32 %v14180_v37, %v21908_v28 }
 0x3f4   : > { %v14246_v18 = vpop.f32.mrf.mxu0  ;;  %v3693_v42 = vadd.f32 %v3620_v17, %v3318_v34  ;;  %v3695_v17 = vadd.f32 %v14181_v8, %v21909_v57 }
 0x3f5   : > { %v4178_v39 = vadd.f32 %v4177_v23, %v19330_v43  ;;  %v19336_v10 = vmax.f32 %v4052_v32, 0.0  ;;  %21906 = vst [vmem:[#allocation50_spill] sm:$0xff] %v19343_v53 }
 0x3f6   : > { %v3980_v55 = vpop.f32.mrf.mxu0 }
 0x3f7   : > { %21902 = vst [vmem:[#allocation111_spill] sm:$0xff] %v19336_v10  ;;  %v4179_v61 = vadd.f32 %v4178_v39, %v19336_v10  ;;  %v4055_v23 = vadd.f32 %v3980_v55, %v3692_v25  ;;  %v4057_v39 = vadd.f32 %v14246_v18, %v3694_v38 }
 0x3f8   : > { %v14247_v62 = vpop.f32.mrf.mxu0 }
 0x3f9   : > { %v4180_v51 = vadd.f32 %v4179_v61, %v19340_v6  ;;  %v19347_v24 = vmax.f32 %v4055_v23, 0.0  ;;  %v19355_v34 = vmax.f32 %v4057_v39, 0.0  ;;  %v4058_v55 = vadd.f32 %v14247_v62, %v3695_v17 }
 0x3fa   : > { %v3983_v13 = vpop.f32.mrf.mxu0 }
 0x3fb   : > { %v4181_v50 = vadd.f32 %v4180_v51, %v19343_v53  ;;  %v4056_v32 = vadd.f32 %v3983_v13, %v3693_v42  ;;  %21907 = vst [vmem:[#allocation31_spill] sm:$0xff] %v19347_v24  ;;  %21910 = vst [vmem:[#allocation105_spill] sm:$0xff] %v19355_v34  ;;  %v19358_v61 = vmax.f32 %v4058_v55, 0.0 }
 0x3fd   : > { %v4182_v4 = vadd.f32 %v4181_v50, %v19347_v24  ;;  %v19351_v16 = vmax.f32 %v4056_v32, 0.0  ;;  %21911 = vst [vmem:[#allocation36_spill] sm:$0xff] %v19358_v61 }
 0x3ff   : > { %v4183_v41 = vadd.f32 %v4182_v4, %v19351_v16 }
 0x401   : > { %v4184_v25 = vadd.f32 %v4183_v41, %v19355_v34 }
 0x403   : > { %v4185_v42 = vadd.f32 %v4184_v25, %v19358_v61 }
 0x405   : > { %v4186_v51 = vrot.slane %v4185_v42, 4 }
 0x407   : > { %v4187_v37 = vadd.f32 %v4186_v51, %v4185_v42 }
 0x409   : > { %v4188_v23 = vrot.slane %v4187_v37, 2 }
 0x40b   : > { %v4189_v13 = vadd.f32 %v4188_v23, %v4187_v37 }
 0x40d   : > { %v4190_v50 = vrot.slane %v4189_v13, 1 }
 0x40f   : > { %v4191_v32 = vadd.f32 %v4190_v50, %v4189_v13 }
 0x411   : > { %v19361_v18 = vmul.f32 0.001953125, %v4191_v32 }
 0x413   : > { %v4194_v8 = vsub.f32 %v18993_v26, %v19361_v18  ;;  %v4195_v62 = vsub.f32 %v18995_v3, %v19361_v18  ;;  %v4196_v28 = vsub.f32 %v18999_v5, %v19361_v18  ;;  %v4197_v39 = vsub.f32 %v19007_v45, %v19361_v18 }
 0x414   : > { %v4198_v57 = vsub.f32 %v19014_v20, %v19361_v18  ;;  %v4199_v55 = vsub.f32 %v19020_v44, %v19361_v18  ;;  %v4200_v51 = vsub.f32 %v19024_v30, %v19361_v18  ;;  %v4201_v13 = vsub.f32 %v19031_v48, %v19361_v18 }
 0x415   : > { %v4258_v38 = vmul.f32 %v4194_v8, %v4194_v8  ;;  %v4259_v4 = vmul.f32 %v4195_v62, %v4195_v62  ;;  %v4260_v17 = vmul.f32 %v4196_v28, %v4196_v28  ;;  %v4261_v25 = vmul.f32 %v4197_v39, %v4197_v39 }
 0x416   : > { %v4262_v37 = vmul.f32 %v4198_v57, %v4198_v57  ;;  %v4263_v50 = vmul.f32 %v4199_v55, %v4199_v55  ;;  %v4202_v8 = vsub.f32 %v19038_v15, %v19361_v18  ;;  %v4264_v62 = vmul.f32 %v4200_v51, %v4200_v51 }
 0x417   : > { %v4322_v41 = vadd.f32 %v4259_v4, %v4258_v38  ;;  %v4203_v38 = vsub.f32 %v19044_v2, %v19361_v18  ;;  %v4265_v4 = vmul.f32 %v4201_v13, %v4201_v13 }
 0x418   : > { %v4266_v57 = vmul.f32 %v4202_v8, %v4202_v8 }
 0x419   : > { %v4323_v42 = vadd.f32 %v4322_v41, %v4260_v17  ;;  %v4204_v17 = vsub.f32 %v19048_v63, %v19361_v18  ;;  %v4267_v55 = vmul.f32 %v4203_v38, %v4203_v38 }
 0x41b   : > { %v4324_v23 = vadd.f32 %v4323_v42, %v4261_v25  ;;  %v4205_v25 = vsub.f32 %v19055_v7, %v19361_v18  ;;  %v4268_v51 = vmul.f32 %v4204_v17, %v4204_v17 }
 0x41d   : > { %v4325_v32 = vadd.f32 %v4324_v23, %v4262_v37  ;;  %v4206_v37 = vsub.f32 %v19062_v1, %v19361_v18  ;;  %v4269_v13 = vmul.f32 %v4205_v25, %v4205_v25 }
 0x41f   : > { %v4326_v28 = vadd.f32 %v4325_v32, %v4263_v50  ;;  %v4207_v50 = vsub.f32 %v19070_v35, %v19361_v18  ;;  %v4270_v8 = vmul.f32 %v4206_v37, %v4206_v37 }
 0x421   : > { %v4327_v39 = vadd.f32 %v4326_v28, %v4264_v62  ;;  %v4208_v62 = vsub.f32 %v19075_v54, %v19361_v18  ;;  %v4271_v38 = vmul.f32 %v4207_v50, %v4207_v50 }
 0x423   : > { %v4328_v41 = vadd.f32 %v4327_v39, %v4265_v4  ;;  %v4209_v4 = vsub.f32 %v19081_v33, %v19361_v18  ;;  %v4272_v17 = vmul.f32 %v4208_v62, %v4208_v62 }
 0x425   : > { %v4329_v42 = vadd.f32 %v4328_v41, %v4266_v57  ;;  %v4210_v57 = vsub.f32 %v19088_v49, %v19361_v18  ;;  %v4273_v25 = vmul.f32 %v4209_v4, %v4209_v4 }
 0x427   : > { %v4330_v23 = vadd.f32 %v4329_v42, %v4267_v55  ;;  %v21912_v55 = vld [vmem:[#allocation28_spill] sm:$0xff]  ;;  %v4274_v37 = vmul.f32 %v4210_v57, %v4210_v57 }
 0x428   : > { %v4211_v42 = vsub.f32 %v21912_v55, %v19361_v18 }
 0x429   : > { %v4331_v32 = vadd.f32 %v4330_v23, %v4268_v51  ;;  %v21913_v23 = vld [vmem:[#allocation29_spill] sm:$0xff] }
 0x42a   : > { %v4212_v30 = vsub.f32 %v21913_v23, %v19361_v18  ;;  %v4275_v50 = vmul.f32 %v4211_v42, %v4211_v42 }
 0x42b   : > { %v4332_v28 = vadd.f32 %v4331_v32, %v4269_v13  ;;  %v4213_v32 = vsub.f32 %v19107_v40, %v19361_v18 }
 0x42c   : > { %v4276_v62 = vmul.f32 %v4212_v30, %v4212_v30  ;;  %v4218_v30 = vsub.f32 %v19140_v14, %v19361_v18  ;;  %v4222_v14 = vsub.f32 %v19166_v22, %v19361_v18 }
 0x42d   : > { %v4333_v39 = vadd.f32 %v4332_v28, %v4270_v8  ;;  %v4214_v28 = vsub.f32 %v19114_v27, %v19361_v18  ;;  %v4277_v4 = vmul.f32 %v4213_v32, %v4213_v32  ;;  %v21916_v32 = vld [vmem:[#allocation30_spill] sm:$0xff] }
 0x42f   : > { %v4334_v41 = vadd.f32 %v4333_v39, %v4271_v38  ;;  %v21914_v39 = vld [vmem:[#allocation64_spill] sm:$0xff]  ;;  %v4278_v57 = vmul.f32 %v4214_v28, %v4214_v28  ;;  %v21917_v28 = vld [vmem:[#allocation71_spill] sm:$0xff] }
 0x430   : > { %v4215_v3 = vsub.f32 %v21914_v39, %v19361_v18 }
 0x431   : > { %v4335_v51 = vadd.f32 %v4334_v41, %v4272_v17  ;;  %v21915_v41 = vld [vmem:[#allocation55_spill] sm:$0xff] }
 0x432   : > { %v4216_v23 = vsub.f32 %v21915_v41, %v19361_v18  ;;  %v4279_v42 = vmul.f32 %v4215_v3, %v4215_v3  ;;  %v4221_v3 = vsub.f32 %v19159_v59, %v19361_v18 }
 0x433   : > { %v4336_v13 = vadd.f32 %v4335_v51, %v4273_v25  ;;  %v4217_v51 = vsub.f32 %v19133_v56, %v19361_v18 }
 0x435   : > { %v4337_v8 = vadd.f32 %v4336_v13, %v4274_v37  ;;  %v4280_v13 = vmul.f32 %v4216_v23, %v4216_v23 }
 0x437   : > { %v4338_v38 = vadd.f32 %v4337_v8, %v4275_v50  ;;  %v4219_v8 = vsub.f32 %v21916_v32, %v19361_v18 }
 0x439   : > { %v4339_v17 = vadd.f32 %v4338_v38, %v4276_v62  ;;  %v4281_v62 = vmul.f32 %v4217_v51, %v4217_v51  ;;  %v15636_v51 = vld [vmem:[%s16677_s9 + $0x138] sm:$0xff]  }
 0x43b   : > { %v4340_v25 = vadd.f32 %v4339_v17, %v4277_v4  ;;  %v4220_v4 = vsub.f32 %v21917_v28, %v19361_v18  ;;  %v4282_v17 = vmul.f32 %v4218_v30, %v4218_v30  ;;  %v4223_v30 = vsub.f32 %v19174_v12, %v19361_v18 }
 0x43d   : > { %v4341_v37 = vadd.f32 %v4340_v25, %v4278_v57  ;;  %v4283_v57 = vmul.f32 %v4219_v8, %v4219_v8  ;;  %v4284_v23 = vmul.f32 %v4220_v4, %v4220_v4 }
 0x43f   : > { %v4342_v50 = vadd.f32 %v4341_v37, %v4279_v42  ;;  %v15630_v37 = vld [vmem:[%s16677_s9 + $0x38] sm:$0xff]  }
 0x441   : > { %v4343_v38 = vadd.f32 %v4342_v50, %v4280_v13  ;;  %v21410_v13 = vmov 0.0   ;;  %v4285_v50 = vmul.f32 %v4221_v3, %v4221_v3  ;;  %v4287_v3 = vmul.f32 %v4223_v30, %v4223_v30 }
 0x442   : > { %14248 = vmatprep.subr.bf16.mxu1 %v21410_v13  ;;  %14328 = vmatprep.subr.bf16.mxu0 %v21410_v13 }
 0x443   : > { %v4344_v41 = vadd.f32 %v4343_v38, %v4281_v62  ;;  %14249 = vmatpush3.bf16.msra.mxu1 %v15630_v37  ;;  %14329 = vmatpush3.bf16.msra.mxu0 %v15636_v51  ;;  %v4286_v38 = vmul.f32 %v4222_v14, %v4222_v14  ;;  %v15632_v51 = vld [vmem:[%s16677_s9 + $0x28] sm:$0xff]  }
 0x444   : > { %14250 = vmatprep.subr.bf16.mxu1 %v21410_v13  ;;  %14330 = vmatprep.subr.bf16.mxu0 %v21410_v13 }
 0x445   : > { %v4345_v25 = vadd.f32 %v4344_v41, %v4282_v17  ;;  %v21918_v41 = vld [vmem:[#allocation72_spill] sm:$0xff]  ;;  %14264 = vmatprep.mubr.msk.bf16.mxu1 %vm16385_vm1, %v21410_v13  ;;  %14344 = vmatprep.mubr.msk.bf16.mxu0 %vm16385_vm1, %v21410_v13 }
 0x446   : > { %v4224_v62 = vsub.f32 %v21918_v41, %v19361_v18  ;;  %v15631_v17 = vld [vmem:[%s16677_s9 + $0x30] sm:$0xff]  }
 0x447   : > { %v4346_v42 = vadd.f32 %v4345_v25, %v4283_v57  ;;  %v15638_v57 = vld [vmem:[%s16677_s9 + $0x130] sm:$0xff]   ;;  %v4225_v25 = vsub.f32 %v19185_v52, %v19361_v18  ;;  %14251 = vmatpush3.bf16.msra.mxu1 %v15631_v17 }
 0x448   : > { %14331 = vmatpush3.bf16.msra.mxu0 %v15638_v57  ;;  %14252 = vmatprep.subr.bf16.mxu1 %v21410_v13  ;;  %v4288_v14 = vmul.f32 %v4224_v62, %v4224_v62 }
 0x449   : > { %v4347_v8 = vadd.f32 %v4346_v42, %v4284_v23  ;;  %14332 = vmatprep.subr.bf16.mxu0 %v21410_v13  ;;  %v4226_v42 = vsub.f32 %v19192_v29, %v19361_v18  ;;  %v4289_v30 = vmul.f32 %v4225_v25, %v4225_v25 }
 0x44b   : > { %v4348_v4 = vadd.f32 %v4347_v8, %v4285_v50  ;;  %v15639_v50 = vld [vmem:[%s16677_s9 + $0x128] sm:$0xff]   ;;  %v4227_v8 = vsub.f32 %v19200_v31, %v19361_v18  ;;  %14253 = vmatpush3.bf16.msra.mxu1 %v15632_v51  ;;  %v4290_v62 = vmul.f32 %v4226_v42, %v4226_v42  ;;  %v4229_v31 = vsub.f32 %v19211_v47, %v19361_v18 }
 0x44c   : > { %14333 = vmatpush3.bf16.msra.mxu0 %v15639_v50  ;;  %14254 = vmatprep.subr.bf16.mxu1 %v21410_v13  ;;  %v15634_v50 = vld [vmem:[%s16677_s9 + $0x18] sm:$0xff]  }
 0x44d   : > { %v4349_v23 = vadd.f32 %v4348_v4, %v4286_v38  ;;  %14334 = vmatprep.subr.bf16.mxu0 %v21410_v13  ;;  %v21919_v4 = vld [vmem:[#allocation104_spill] sm:$0xff]  ;;  %v4291_v25 = vmul.f32 %v4227_v8, %v4227_v8  ;;  %v4293_v8 = vmul.f32 %v4229_v31, %v4229_v31 }
 0x44e   : > { %v4228_v17 = vsub.f32 %v21919_v4, %v19361_v18 }
 0x44f   : > { %v4350_v37 = vadd.f32 %v4349_v23, %v4287_v3  ;;  %v15633_v3 = vld [vmem:[%s16677_s9 + $0x20] sm:$0xff]  }
 0x450   : > { %v15640_v23 = vld [vmem:[%s16677_s9 + $0x120] sm:$0xff]   ;;  %14255 = vmatpush3.bf16.msra.mxu1 %v15633_v3  ;;  %v4292_v42 = vmul.f32 %v4228_v17, %v4228_v17 }
 0x451   : > { %v4351_v38 = vadd.f32 %v4350_v37, %v4288_v14  ;;  %14335 = vmatpush3.bf16.msra.mxu0 %v15640_v23  ;;  %14256 = vmatprep.subr.bf16.mxu1 %v21410_v13  ;;  %v4230_v37 = vsub.f32 %v19218_v19, %v19361_v18 }
 0x452   : > { %14336 = vmatprep.subr.bf16.mxu0 %v21410_v13 }
 0x453   : > { %v4352_v57 = vadd.f32 %v4351_v38, %v4289_v30  ;;  %v15641_v30 = vld [vmem:[%s16677_s9 + $0x118] sm:$0xff]   ;;  %v21920_v38 = vld [vmem:[#allocation32_spill] sm:$0xff]  ;;  %v4294_v17 = vmul.f32 %v4230_v37, %v4230_v37 }
 0x454   : > { %v4231_v47 = vsub.f32 %v21920_v38, %v19361_v18  ;;  %14257 = vmatpush3.bf16.msra.mxu1 %v15634_v50  ;;  %v4233_v38 = vsub.f32 %v19237_v21, %v19361_v18 }
 0x455   : > { %v4353_v14 = vadd.f32 %v4352_v57, %v4290_v62  ;;  %14337 = vmatpush3.bf16.msra.mxu0 %v15641_v30  ;;  %14258 = vmatprep.subr.bf16.mxu1 %v21410_v13  ;;  %v21921_v57 = vld [vmem:[#allocation22_spill] sm:$0xff]  ;;  %v15637_v30 = vld [vmem:[%s16677_s9 + $0x8] sm:$0xff]  }
 0x456   : > { %14338 = vmatprep.subr.bf16.mxu0 %v21410_v13  ;;  %v4232_v3 = vsub.f32 %v21921_v57, %v19361_v18  ;;  %v4295_v31 = vmul.f32 %v4231_v47, %v4231_v47  ;;  %v4297_v47 = vmul.f32 %v4233_v38, %v4233_v38  ;;  %v4238_v38 = vsub.f32 %v19268_v9, %v19361_v18 }
 0x457   : > { %v4354_v51 = vadd.f32 %v4353_v14, %v4291_v25  ;;  %v15635_v25 = vld [vmem:[%s16677_s9 + $0x10] sm:$0xff]  }
 0x458   : > { %v15643_v14 = vld [vmem:[%s16677_s9 + $0x110] sm:$0xff]   ;;  %14259 = vmatpush3.bf16.msra.mxu1 %v15635_v25  ;;  %v4296_v37 = vmul.f32 %v4232_v3, %v4232_v3  ;;  %v15642_v3 = vld [vmem:[%s16677_s9] sm:$0xff]  }
 0x459   : > { %v4355_v62 = vadd.f32 %v4354_v51, %v4292_v42  ;;  %14339 = vmatpush3.bf16.msra.mxu0 %v15643_v14  ;;  %14260 = vmatprep.subr.bf16.mxu1 %v21410_v13  ;;  %v4234_v51 = vsub.f32 %v19244_v60, %v19361_v18 }
 0x45a   : > { %14340 = vmatprep.subr.bf16.mxu0 %v21410_v13 }
 0x45b   : > { %v4356_v23 = vadd.f32 %v4355_v62, %v4293_v8  ;;  %v15644_v8 = vld [vmem:[%s16677_s9 + $0x108] sm:$0xff]   ;;  %v21922_v62 = vld [vmem:[#allocation89_spill] sm:$0xff]  ;;  %v4298_v14 = vmul.f32 %v4234_v51, %v4234_v51 }
 0x45c   : > { %v4235_v21 = vsub.f32 %v21922_v62, %v19361_v18  ;;  %14261 = vmatpush3.bf16.msra.mxu1 %v15637_v30 }
 0x45d   : > { %v4357_v42 = vadd.f32 %v4356_v23, %v4294_v17  ;;  %14341 = vmatpush3.bf16.msra.mxu0 %v15644_v8  ;;  %14262 = vmatprep.subr.bf16.mxu1 %v21410_v13  ;;  %v21923_v23 = vld [vmem:[#allocation91_spill] sm:$0xff]  ;;  %v21925_v8 = vld [vmem:[#allocation74_spill] sm:$0xff] }
 0x45e   : > { %14342 = vmatprep.subr.bf16.mxu0 %v21410_v13  ;;  %v4236_v25 = vsub.f32 %v21923_v23, %v19361_v18  ;;  %v4299_v57 = vmul.f32 %v4235_v21, %v4235_v21  ;;  %v21924_v21 = vld [vmem:[#allocation34_spill] sm:$0xff] }
 0x45f   : > { %v4358_v50 = vadd.f32 %v4357_v42, %v4295_v31  ;;  %v15645_v31 = vld [vmem:[%s16677_s9 + $0x100] sm:$0xff]   ;;  %v4237_v42 = vsub.f32 %v19261_v0, %v19361_v18  ;;  %v21927_v0 = vld [vmem:[#allocation92_spill] sm:$0xff] }
 0x460   : > { %14263 = vmatpush3.bf16.msra.mxu1 %v15642_v3 }
 0x461   : > { %v4359_v17 = vadd.f32 %v4358_v50, %v4296_v37  ;;  %14343 = vmatpush3.bf16.msra.mxu0 %v15645_v31  ;;  %14268 = vmatprep.subr.bf16.mxu1 %v21410_v13  ;;  %v4300_v37 = vmul.f32 %v4236_v25, %v4236_v25  ;;  %v4301_v51 = vmul.f32 %v4237_v42, %v4237_v42  ;;  %v21926_v25 = vld [vmem:[#allocation75_spill] sm:$0xff] }
 0x462   : > { %14368 = vmatprep.subr.bf16.mxu0 %v21410_v13  ;;  %v4242_v31 = vsub.f32 %v19290_v36, %v19361_v18 }
 0x463   : > { %v4360_v60 = vadd.f32 %v4359_v17, %v4297_v47  ;;  %v4240_v47 = vsub.f32 %v21925_v8, %v19361_v18  ;;  %v4302_v17 = vmul.f32 %v4238_v38, %v4238_v38 }
 0x464   : > { %v4306_v38 = vmul.f32 %v4242_v31, %v4242_v31 }
 0x465   : > { %v4361_v62 = vadd.f32 %v4360_v60, %v4298_v14  ;;  %v4239_v60 = vsub.f32 %v21924_v21, %v19361_v18  ;;  %v4304_v9 = vmul.f32 %v4240_v47, %v4240_v47  ;;  %v4243_v21 = vsub.f32 %v21927_v0, %v19361_v18 }
 0x467   : > { %v4362_v50 = vadd.f32 %v4361_v62, %v4299_v57  ;;  %v4241_v57 = vsub.f32 %v21926_v25, %v19361_v18  ;;  %v4303_v62 = vmul.f32 %v4239_v60, %v4239_v60  ;;  %v4307_v60 = vmul.f32 %v4243_v21, %v4243_v21 }
 0x469   : > { %v4363_v30 = vadd.f32 %v4362_v50, %v4300_v37  ;;  %v4305_v42 = vmul.f32 %v4241_v57, %v4241_v57  ;;  %v21928_v50 = vld [vmem:[#allocation96_spill] sm:$0xff] }
 0x46a   : > { %v4244_v8 = vsub.f32 %v21928_v50, %v19361_v18 }
 0x46b   : > { %v4364_v14 = vadd.f32 %v4363_v30, %v4301_v51  ;;  %v4245_v30 = vsub.f32 %v19306_v11, %v19361_v18 }
 0x46c   : > { %v4308_v47 = vmul.f32 %v4244_v8, %v4244_v8 }
 0x46d   : > { %v4365_v3 = vadd.f32 %v4364_v14, %v4302_v17  ;;  %v21929_v14 = vld [vmem:[#allocation103_spill] sm:$0xff]  ;;  %v4309_v57 = vmul.f32 %v4245_v30, %v4245_v30 }
 0x46e   : > { %v4246_v36 = vsub.f32 %v21929_v14, %v19361_v18 }
 0x46f   : > { %v4366_v13 = vadd.f32 %v4365_v3, %v4303_v62  ;;  %v21930_v3 = vld [vmem:[#allocation77_spill] sm:$0xff] }
 0x470   : > { %v4247_v0 = vsub.f32 %v21930_v3, %v19361_v18  ;;  %v4310_v31 = vmul.f32 %v4246_v36, %v4246_v36 }
 0x471   : > { %v4367_v37 = vadd.f32 %v4366_v13, %v4304_v9  ;;  %v4248_v13 = vsub.f32 %v19321_v58, %v19361_v18 }
 0x472   : > { %v4311_v21 = vmul.f32 %v4247_v0, %v4247_v0 }
 0x473   : > { %v4368_v51 = vadd.f32 %v4367_v37, %v4305_v42  ;;  %v4249_v37 = vsub.f32 %v19326_v46, %v19361_v18  ;;  %v4312_v8 = vmul.f32 %v4248_v13, %v4248_v13 }
 0x475   : > { %v4369_v17 = vadd.f32 %v4368_v51, %v4306_v38  ;;  %v4250_v51 = vsub.f32 %v19330_v43, %v19361_v18  ;;  %v4313_v30 = vmul.f32 %v4249_v37, %v4249_v37 }
 0x477   : > { %v4370_v62 = vadd.f32 %v4369_v17, %v4307_v60  ;;  %v4251_v17 = vsub.f32 %v19336_v10, %v19361_v18  ;;  %v4314_v36 = vmul.f32 %v4250_v51, %v4250_v51 }
 0x479   : > { %v4371_v9 = vadd.f32 %v4370_v62, %v4308_v47  ;;  %v4252_v62 = vsub.f32 %v19340_v6, %v19361_v18  ;;  %v4315_v0 = vmul.f32 %v4251_v17, %v4251_v17 }
 0x47b   : > { %v4372_v42 = vadd.f32 %v4371_v9, %v4309_v57  ;;  %v4253_v9 = vsub.f32 %v19343_v53, %v19361_v18  ;;  %v4316_v13 = vmul.f32 %v4252_v62, %v4252_v62 }
 0x47d   : > { %v4373_v38 = vadd.f32 %v4372_v42, %v4310_v31  ;;  %v4254_v42 = vsub.f32 %v19347_v24, %v19361_v18  ;;  %v4317_v37 = vmul.f32 %v4253_v9, %v4253_v9 }
 0x47f   : > { %v4374_v60 = vadd.f32 %v4373_v38, %v4311_v21  ;;  %v4255_v38 = vsub.f32 %v19351_v16, %v19361_v18  ;;  %v4318_v51 = vmul.f32 %v4254_v42, %v4254_v42 }
 0x481   : > { %v4375_v47 = vadd.f32 %v4374_v60, %v4312_v8  ;;  %v4256_v60 = vsub.f32 %v19355_v34, %v19361_v18  ;;  %v4319_v17 = vmul.f32 %v4255_v38, %v4255_v38 }
 0x483   : > { %v4376_v57 = vadd.f32 %v4375_v47, %v4313_v30  ;;  %v4257_v47 = vsub.f32 %v19358_v61, %v19361_v18  ;;  %v4392_v61 = vld [vmem:[%s16669_s4] sm:$0x3]  ;;  %s11820_s4 = sshll.u32 %s22000_s28, 3 }
 0x484   : > { %s475_s19 = scalar_lea.vmem %s21250_s7, %s11820_s4 }
 0x485   : > { %v4377_v31 = vadd.f32 %v4376_v57, %v4314_v36  ;;  %v4320_v57 = vmul.f32 %v4256_v60, %v4256_v60  ;;  %v4321_v62 = vmul.f32 %v4257_v47, %v4257_v47 }
 0x487   : > { %v4378_v21 = vadd.f32 %v4377_v31, %v4315_v0 }
 0x489   : > { %v4379_v8 = vadd.f32 %v4378_v21, %v4316_v13 }
 0x48b   : > { %v4380_v30 = vadd.f32 %v4379_v8, %v4317_v37  ;;  %v4401_v37 = vlaneseq }
 0x48d   : > { %v4381_v36 = vadd.f32 %v4380_v30, %v4318_v51  ;;  %v4402_v8 = vshrl.u32 %v4401_v37, 7 }
 0x48f   : > { %v4382_v24 = vadd.f32 %v4381_v36, %v4319_v17  ;;  %v4403_v38 = vsub.s32 0, %v4402_v8  ;;  %v4471_v17 = vsub.s32 1, %v4402_v8  ;;  %v21942_v8 = vld [vmem:[#allocation80_spill] sm:$0xff] }
 0x491   : > { %v4383_v0 = vadd.f32 %v4382_v24, %v4320_v57 }
 0x493   : > { %v4384_v31 = vadd.f32 %v4383_v0, %v4321_v62  ;;  %v21939_v0 = vld [vmem:[#allocation29_spill] sm:$0xff] }
 0x495   : > { %v4385_v53 = vrot.slane %v4384_v31, 4 }
 0x497   : > { %v4386_v6 = vadd.f32 %v4385_v53, %v4384_v31  ;;  %v21940_v31 = vld [vmem:[#allocation55_spill] sm:$0xff] }
 0x499   : > { %v4387_v9 = vrot.slane %v4386_v6, 2 }
 0x49b   : > { %v4388_v13 = vadd.f32 %v4387_v9, %v4386_v6 }
 0x49d   : > { %v4389_v21 = vrot.slane %v4388_v13, 1 }
 0x49f   : > { %v4390_v10 = vadd.f32 %v4389_v21, %v4388_v13  ;;  %v21941_v13 = vld [vmem:[#allocation65_spill] sm:$0xff] }
 0x4a1   : > { %v4391_v34 = vmul.f32 0.001953125, %v4390_v10 }
 0x4a3   : > { %v4393_v42 = vadd.f32 1e-05, %v4391_v34 }
 0x4a5   : > { %16150 = vrsqrt.f32 %v4393_v42 }
 0x4b2   : > { %v16151_v51 = vpop.eup %16150 }
 0x4b3   : > { %v4395_v60 = vmul.f32 %v16151_v51, %v4392_v61  ;;  %v21944_v51 = vld [vmem:[#allocation32_spill] sm:$0xff] }
 0x4b5   : > { %v4396_v30 = vmul.f32 %v4395_v60, %v19361_v18  ;;  %v19531_v47 = vrot.slane %v4395_v60, %v4403_v38  ;;  %v21943_v38 = vld [vmem:[#allocation19_spill] sm:$0xff]  ;;  %v21945_v60 = vld [vmem:[#allocation22_spill] sm:$0xff] }
 0x4b7   : > { %21931 = vst [vmem:[#allocation54_spill] sm:$0xff] %v19531_v47  ;;  %v4398_v24 = vrot.slane %v4396_v30, 7  ;;  %v4466_v6 = vmul.f32 %v19531_v47, %v19351_v16  ;;  %v19537_v10 = vmul.f32 %v19531_v47, %v18993_v26  ;;  %v4407_v34 = vmul.f32 %v19531_v47, %v18999_v5  ;;  %v21946_v30 = vld [vmem:[#allocation24_spill] sm:$0xff] }
 0x4b8   : > { %v19543_v36 = vmul.f32 %v19531_v47, %v19007_v45  ;;  %v19547_v18 = vmul.f32 %v19531_v47, %v19014_v20  ;;  %v19551_v57 = vmul.f32 %v19531_v47, %v19020_v44  ;;  %v19555_v26 = vmul.f32 %v19531_v47, %v19031_v48 }
 0x4b9   : > { %v4400_v53 = vsub.f32 %v4392_v61, %v4398_v24  ;;  %v19559_v16 = vmul.f32 %v19531_v47, %v19038_v15  ;;  %v19563_v5 = vmul.f32 %v19531_v47, %v19044_v2  ;;  %v4415_v20 = vmul.f32 %v19531_v47, %v19048_v63  ;;  %v21947_v24 = vld [vmem:[#allocation81_spill] sm:$0xff] }
 0x4ba   : > { %21932 = vst [vmem:[#allocation58_spill] sm:$0xff] %v19543_v36  ;;  %21933 = vst [vmem:[#allocation85_spill] sm:$0xff] %v19547_v18  ;;  %v4416_v44 = vmul.f32 %v19531_v47, %v19055_v7  ;;  %v4417_v48 = vmul.f32 %v19531_v47, %v19062_v1  ;;  %v4418_v61 = vmul.f32 %v19531_v47, %v19070_v35  ;;  %v21959_v18 = vld [vmem:[#allocation105_spill] sm:$0xff]  ;;  %v21960_v36 = vld [vmem:[#allocation36_spill] sm:$0xff] }
 0x4bb   : > { %21934 = vst [vmem:[#allocation56_spill] sm:$0xff] %v19551_v57  ;;  %21935 = vst [vmem:[#allocation106_spill] sm:$0xff] %v19555_v26  ;;  %v19565_v45 = vrot.slane %v4400_v53, %v4471_v17  ;;  %v4419_v15 = vmul.f32 %v19531_v47, %v19075_v54  ;;  %v4420_v2 = vmul.f32 %v19531_v47, %v19081_v33  ;;  %v21957_v26 = vld [vmem:[#allocation50_spill] sm:$0xff]  ;;  %v21958_v57 = vld [vmem:[#allocation31_spill] sm:$0xff] }
 0x4bc   : > { %21936 = vst [vmem:[#allocation38_spill] sm:$0xff] %v19559_v16  ;;  %21937 = vst [vmem:[#allocation114_spill] sm:$0xff] %v19563_v5  ;;  %v4421_v62 = vmul.f32 %v19531_v47, %v19088_v49  ;;  %v4422_v7 = vmul.f32 %v19531_v47, %v21912_v55  ;;  %v4423_v1 = vmul.f32 %v19531_v47, %v21939_v0  ;;  %v21949_v0 = vld [vmem:[#allocation93_spill] sm:$0xff]  ;;  %v21955_v5 = vld [vmem:[#allocation111_spill] sm:$0xff] }
 0x4bd   : > { %v19582_v63 = vadd.f32 %v19565_v45, %v4466_v6  ;;  %v4424_v35 = vmul.f32 %v19531_v47, %v19107_v40  ;;  %v4425_v54 = vmul.f32 %v19531_v47, %v19114_v27  ;;  %v4426_v33 = vmul.f32 %v19531_v47, %v21914_v39  ;;  %v21948_v6 = vld [vmem:[#allocation89_spill] sm:$0xff]  ;;  %v21956_v16 = vld [vmem:[#allocation52_spill] sm:$0xff] }
 0x4be   : > { %v4427_v49 = vmul.f32 %v19531_v47, %v21940_v31  ;;  %v4428_v9 = vmul.f32 %v19531_v47, %v19133_v56  ;;  %v4429_v55 = vmul.f32 %v19531_v47, %v21941_v13  ;;  %v4430_v21 = vmul.f32 %v19531_v47, %v21916_v32  ;;  %v21950_v31 = vld [vmem:[#allocation97_spill] sm:$0xff] }
 0x4bf   : > { %21938 = vst [vmem:[#allocation60_spill] sm:$0xff] %v19582_v63  ;;  %v4431_v40 = vmul.f32 %v19531_v47, %v21917_v28  ;;  %v4432_v27 = vmul.f32 %v19531_v47, %v19159_v59  ;;  %v4433_v39 = vmul.f32 %v19531_v47, %v19166_v22  ;;  %v4434_v42 = vmul.f32 %v19531_v47, %v19174_v12  ;;  %v21954_v63 = vld [vmem:[#allocation92_spill] sm:$0xff] }
 0x4c0   : > { %v4435_v56 = vmul.f32 %v19531_v47, %v21918_v41  ;;  %v4436_v37 = vmul.f32 %v19531_v47, %v19185_v52  ;;  %v4437_v32 = vmul.f32 %v19531_v47, %v19192_v29  ;;  %v4438_v28 = vmul.f32 %v19531_v47, %v21942_v8  ;;  %v21951_v8 = vld [vmem:[#allocation34_spill] sm:$0xff] }
 0x4c1   : > { %v4439_v59 = vmul.f32 %v19531_v47, %v21919_v4  ;;  %v4440_v22 = vmul.f32 %v19531_v47, %v21943_v38  ;;  %v4441_v12 = vmul.f32 %v19531_v47, %v19218_v19  ;;  %v4442_v41 = vmul.f32 %v19531_v47, %v21944_v51  ;;  %v21952_v51 = vld [vmem:[#allocation74_spill] sm:$0xff] }
 0x4c2   : > { %v4443_v52 = vmul.f32 %v19531_v47, %v21945_v60  ;;  %v4444_v29 = vmul.f32 %v19531_v47, %v21946_v30  ;;  %v4445_v17 = vmul.f32 %v19531_v47, %v21947_v24  ;;  %v4446_v4 = vmul.f32 %v19531_v47, %v21948_v6  ;;  %v21953_v24 = vld [vmem:[#allocation44_spill] sm:$0xff] }
 0x4c3   : > { %v4447_v53 = vmul.f32 %v19531_v47, %v21923_v23  ;;  %v4448_v19 = vmul.f32 %v19531_v47, %v21949_v0  ;;  %v4449_v13 = vmul.f32 %v19531_v47, %v21950_v31  ;;  %v4450_v38 = vmul.f32 %v19531_v47, %v21951_v8 }
 0x4c4   : > { %v4451_v60 = vmul.f32 %v19531_v47, %v21952_v51  ;;  %v4452_v30 = vmul.f32 %v19531_v47, %v21926_v25  ;;  %v4453_v6 = vmul.f32 %v19531_v47, %v21953_v24  ;;  %v4454_v23 = vmul.f32 %v19531_v47, %v21954_v63 }
 0x4c5   : > { %v4455_v0 = vmul.f32 %v19531_v47, %v21928_v50  ;;  %v4456_v31 = vmul.f32 %v19531_v47, %v19306_v11  ;;  %v4457_v8 = vmul.f32 %v19531_v47, %v21929_v14  ;;  %v4458_v51 = vmul.f32 %v19531_v47, %v21930_v3 }
 0x4c6   : > { %v4459_v25 = vmul.f32 %v19531_v47, %v19321_v58  ;;  %v4460_v24 = vmul.f32 %v19531_v47, %v19326_v46  ;;  %v4461_v63 = vmul.f32 %v19531_v47, %v19330_v43  ;;  %v4462_v50 = vmul.f32 %v19531_v47, %v21955_v5 }
 0x4c7   : > { %v4463_v11 = vmul.f32 %v19531_v47, %v21956_v16  ;;  %v4464_v14 = vmul.f32 %v19531_v47, %v21957_v26  ;;  %v4465_v3 = vmul.f32 %v19531_v47, %v21958_v57  ;;  %v4467_v58 = vmul.f32 %v19531_v47, %v21959_v18  ;;  %v21963_v16 = vld [vmem:[#allocation58_spill] sm:$0xff]  ;;  %v21965_v57 = vld [vmem:[#allocation85_spill] sm:$0xff] }
 0x4c8   : > { %v4468_v46 = vmul.f32 %v19531_v47, %v21960_v36  ;;  %v19677_v43 = vadd.f32 %v19565_v45, %v4407_v34  ;;  %v19681_v5 = vadd.f32 %v19565_v45, %v19537_v10  ;;  %v19685_v26 = vadd.f32 %v19565_v45, %v21963_v16  ;;  %v21967_v36 = vld [vmem:[#allocation56_spill] sm:$0xff]  ;;  %v21968_v34 = vld [vmem:[#allocation106_spill] sm:$0xff] }
 0x4c9   : > { %v19689_v18 = vadd.f32 %v19565_v45, %v21965_v57  ;;  %v19693_v47 = vadd.f32 %v19565_v45, %v21967_v36  ;;  %v21970_v10 = vld [vmem:[#allocation38_spill] sm:$0xff]  ;;  %v19708_v57 = vadd.f32 %v19565_v45, %v4415_v20  ;;  %v19714_v36 = vadd.f32 %v19565_v45, %v4417_v48 }
 0x4ca   : > { %21961 = vst [vmem:[#allocation113_spill] sm:$0xff] %v19677_v43  ;;  %21962 = vst [vmem:[#allocation39_spill] sm:$0xff] %v19681_v5  ;;  %v19697_v43 = vadd.f32 %v19565_v45, %v21968_v34  ;;  %v19701_v5 = vadd.f32 %v19565_v45, %v21970_v10  ;;  %v21971_v16 = vld [vmem:[#allocation114_spill] sm:$0xff]  ;;  %v19717_v34 = vadd.f32 %v19565_v45, %v4418_v61 }
 0x4cb   : > { %21964 = vst [vmem:[#allocation76_spill] sm:$0xff] %v19685_v26  ;;  %21966 = vst [vmem:[#allocation109_spill] sm:$0xff] %v19689_v18  ;;  %v19705_v26 = vadd.f32 %v19565_v45, %v21971_v16  ;;  %v19711_v18 = vadd.f32 %v19565_v45, %v4416_v44  ;;  %v19723_v10 = vadd.f32 %v19565_v45, %v4420_v2 }
 0x4cc   : > { %21969 = vst [vmem:[#allocation94_spill] sm:$0xff] %v19697_v43  ;;  %v19720_v43 = vadd.f32 %v19565_v45, %v4419_v15  ;;  %v19726_v16 = vadd.f32 %v19565_v45, %v4421_v62  ;;  %v19729_v20 = vadd.f32 %v19565_v45, %v4422_v7  ;;  %v19732_v44 = vadd.f32 %v19565_v45, %v4423_v1 }
 0x4cd   : > { %v19735_v48 = vadd.f32 %v19565_v45, %v4424_v35  ;;  %v19738_v61 = vadd.f32 %v19565_v45, %v4425_v54  ;;  %v19741_v15 = vadd.f32 %v19565_v45, %v4426_v33  ;;  %v19744_v2 = vadd.f32 %v19565_v45, %v4427_v49 }
 0x4ce   : > { %v19747_v62 = vadd.f32 %v19565_v45, %v4428_v9  ;;  %v19750_v7 = vadd.f32 %v19565_v45, %v4429_v55  ;;  %v19753_v1 = vadd.f32 %v19565_v45, %v4430_v21  ;;  %v19756_v35 = vadd.f32 %v19565_v45, %v4431_v40 }
 0x4cf   : > { %v19759_v54 = vadd.f32 %v19565_v45, %v4432_v27  ;;  %v19762_v33 = vadd.f32 %v19565_v45, %v4433_v39  ;;  %v19765_v49 = vadd.f32 %v19565_v45, %v4434_v42  ;;  %v19768_v9 = vadd.f32 %v19565_v45, %v4435_v56 }
 0x4d0   : > { %v19771_v55 = vadd.f32 %v19565_v45, %v4436_v37  ;;  %v19774_v21 = vadd.f32 %v19565_v45, %v4437_v32  ;;  %v19777_v40 = vadd.f32 %v19565_v45, %v4438_v28  ;;  %v19780_v27 = vadd.f32 %v19565_v45, %v4439_v59 }
 0x4d1   : > { %v19783_v39 = vadd.f32 %v19565_v45, %v4440_v22  ;;  %v19786_v42 = vadd.f32 %v19565_v45, %v4441_v12  ;;  %v19789_v56 = vadd.f32 %v19565_v45, %v4442_v41  ;;  %v19792_v37 = vadd.f32 %v19565_v45, %v4443_v52 }
 0x4d2   : > { %v19795_v32 = vadd.f32 %v19565_v45, %v4444_v29  ;;  %v19798_v28 = vadd.f32 %v19565_v45, %v4445_v17  ;;  %v19801_v59 = vadd.f32 %v19565_v45, %v4446_v4  ;;  %v19804_v22 = vadd.f32 %v19565_v45, %v4447_v53 }
 0x4d3   : > { %v19807_v12 = vadd.f32 %v19565_v45, %v4448_v19  ;;  %v19810_v41 = vadd.f32 %v19565_v45, %v4449_v13  ;;  %v19813_v52 = vadd.f32 %v19565_v45, %v4450_v38  ;;  %v19816_v29 = vadd.f32 %v19565_v45, %v4451_v60 }
 0x4d4   : > { %v19819_v17 = vadd.f32 %v19565_v45, %v4452_v30  ;;  %v19822_v4 = vadd.f32 %v19565_v45, %v4453_v6  ;;  %v19825_v53 = vadd.f32 %v19565_v45, %v4454_v23  ;;  %v19828_v19 = vadd.f32 %v19565_v45, %v4455_v0 }
 0x4d5   : > { %v19831_v13 = vadd.f32 %v19565_v45, %v4456_v31  ;;  %v19834_v38 = vadd.f32 %v19565_v45, %v4457_v8  ;;  %v19837_v60 = vadd.f32 %v19565_v45, %v4458_v51  ;;  %v19840_v30 = vadd.f32 %v19565_v45, %v4459_v25 }
 0x4d6   : > { %v19843_v6 = vadd.f32 %v19565_v45, %v4460_v24  ;;  %v19846_v23 = vadd.f32 %v19565_v45, %v4461_v63  ;;  %v19849_v0 = vadd.f32 %v19565_v45, %v4462_v50  ;;  %v19852_v31 = vadd.f32 %v19565_v45, %v4463_v11  ;;  %v15646_v63 = vld [vmem:[%s16677_s9 + $0x78] sm:$0xff]   ;;  %v21978_v50 = vld [vmem:[#allocation39_spill] sm:$0xff] }
 0x4d7   : > { %v19855_v8 = vadd.f32 %v19565_v45, %v4464_v14  ;;  %v19858_v51 = vadd.f32 %v19565_v45, %v4465_v3  ;;  %v19861_v25 = vadd.f32 %v19565_v45, %v4467_v58  ;;  %v19864_v24 = vadd.f32 %v19565_v45, %v4468_v46  ;;  %v21979_v11 = vld [vmem:[#allocation109_spill] sm:$0xff]  ;;  %v15650_v46 = vld [vmem:[%s16677_s9 + $0x68] sm:$0xff]  }
 0x4d8   : > { %21972 = vst [vmem:[#allocation115_spill] sm:$0xff] %v19843_v6  ;;  %21973 = vst [vmem:[#allocation20_spill] sm:$0xff] %v19849_v0  ;;  %v12708_v0 = vpack.c.bf16 %v21978_v50, %v21978_v50  ;;  %v12712_v6 = vpack.c.bf16 %v21979_v11, %v21979_v11  ;;  %v15647_v14 = vld [vmem:[%s16677_s9 + $0x1b8] sm:$0xff]   ;;  %v15648_v3 = vld [vmem:[%s16677_s9 + $0x70] sm:$0xff]  }
 0x4d9   : > { %21974 = vst [vmem:[#allocation95_spill] sm:$0xff] %v19855_v8  ;;  %21975 = vst [vmem:[#allocation107_spill] sm:$0xff] %v19858_v51  ;;  %v15649_v58 = vld [vmem:[%s16677_s9 + $0x1b0] sm:$0xff]   ;;  %v21980_v8 = vmov 0.0   ;;  %v15651_v50 = vld [vmem:[%s16677_s9 + $0x1a8] sm:$0xff]  }
 0x4da   : > { %21976 = vst [vmem:[#allocation82_spill] sm:$0xff] %v19861_v25  ;;  %21977 = vst [vmem:[#allocation23_spill] sm:$0xff] %v19864_v24  ;;  %14265 = vmatmul.mubr.bf16.vlgmr.msra.gmra.mxu1 %v12708_v0  ;;  %14345 = vmatmul.mubr.bf16.vlgmr.msra.gmra.mxu0 %v12712_v6  ;;  %v15652_v6 = vld [vmem:[%s16677_s9 + $0x60] sm:$0xff]   ;;  %v15655_v11 = vld [vmem:[%s16677_s9 + $0x198] sm:$0xff]  }
 0x4db   : > { %14269 = vmatpush3.bf16.msra.mxu1 %v15646_v63  ;;  %14369 = vmatpush3.bf16.msra.mxu0 %v15647_v14  ;;  %v15653_v0 = vld [vmem:[%s16677_s9 + $0x1a0] sm:$0xff]   ;;  %v15654_v63 = vld [vmem:[%s16677_s9 + $0x58] sm:$0xff]   ;;  %v15656_v14 = vld [vmem:[%s16677_s9 + $0x50] sm:$0xff]  }
 0x4dc   : > { %14270 = vmatprep.subr.bf16.mxu1 %v21980_v8  ;;  %14370 = vmatprep.subr.bf16.mxu0 %v21980_v8  ;;  %v15660_v24 = vld [vmem:[%s16677_s9 + $0x40] sm:$0xff]   ;;  %v15662_v51 = vld [vmem:[%s16677_s9 + $0xb8] sm:$0xff]  }
 0x4dd   : > { %14284 = vmatprep.mubr.msk.bf16.mxu1 %vm16385_vm1, %v21980_v8  ;;  %14384 = vmatprep.mubr.msk.bf16.mxu0 %vm16385_vm1, %v21980_v8 }
 0x4df   : > { %14271 = vmatpush3.bf16.msra.mxu1 %v15648_v3  ;;  %14371 = vmatpush3.bf16.msra.mxu0 %v15649_v58  ;;  %v15657_v3 = vld [vmem:[%s16677_s9 + $0x190] sm:$0xff]   ;;  %v15658_v58 = vld [vmem:[%s16677_s9 + $0x48] sm:$0xff]  }
 0x4e0   : > { %14272 = vmatprep.subr.bf16.mxu1 %v21980_v8  ;;  %14372 = vmatprep.subr.bf16.mxu0 %v21980_v8 }
 0x4e3   : > { %14273 = vmatpush3.bf16.msra.mxu1 %v15650_v46  ;;  %14373 = vmatpush3.bf16.msra.mxu0 %v15651_v50  ;;  %v15659_v46 = vld [vmem:[%s16677_s9 + $0x188] sm:$0xff]   ;;  %v21981_v50 = vld [vmem:[#allocation73_spill] sm:$0xff] }
 0x4e4   : > { %14274 = vmatprep.subr.bf16.mxu1 %v21980_v8  ;;  %14374 = vmatprep.subr.bf16.mxu0 %v21980_v8 }
 0x4e7   : > { %14275 = vmatpush3.bf16.msra.mxu1 %v15652_v6  ;;  %14375 = vmatpush3.bf16.msra.mxu0 %v15653_v0  ;;  %v21982_v6 = vld [vmem:[#allocation54_spill] sm:$0xff] }
 0x4e8   : > { %14276 = vmatprep.subr.bf16.mxu1 %v21980_v8  ;;  %14376 = vmatprep.subr.bf16.mxu0 %v21980_v8  ;;  %v4406_v0 = vmul.f32 %v21982_v6, %v21981_v50 }
 0x4ea   : > { %v4474_v25 = vadd.f32 %v19565_v45, %v4406_v0  ;;  %v15669_v0 = vld [vmem:[%s16677_s9 + $0x220] sm:$0xff]  }
 0x4eb   : > { %14277 = vmatpush3.bf16.msra.mxu1 %v15654_v63  ;;  %14377 = vmatpush3.bf16.msra.mxu0 %v15655_v11  ;;  %v21983_v63 = vld [vmem:[#allocation63_spill] sm:$0xff] }
 0x4ec   : > { %14278 = vmatprep.subr.bf16.mxu1 %v21980_v8  ;;  %14378 = vmatprep.subr.bf16.mxu0 %v21980_v8  ;;  %v4411_v11 = vmul.f32 %v21982_v6, %v21983_v63  ;;  %v12709_v50 = vpack.c.bf16 %v4474_v25, %v4474_v25  ;;  %v15666_v25 = vld [vmem:[%s16677_s9 + $0xa8] sm:$0xff]   ;;  %v15670_v63 = vld [vmem:[%s16677_s9 + $0x98] sm:$0xff]  }
 0x4ef   : > { %14279 = vmatpush3.bf16.msra.mxu1 %v15656_v14  ;;  %14379 = vmatpush3.bf16.msra.mxu0 %v15657_v3  ;;  %v15661_v14 = vld [vmem:[%s16677_s9 + $0x180] sm:$0xff]   ;;  %v4479_v3 = vadd.f32 %v19565_v45, %v4411_v11  ;;  %v15664_v45 = vld [vmem:[%s16677_s9 + $0xb0] sm:$0xff]   ;;  %v15671_v11 = vld [vmem:[%s16677_s9 + $0x218] sm:$0xff]  }
 0x4f0   : > { %14280 = vmatprep.subr.bf16.mxu1 %v21980_v8  ;;  %14380 = vmatprep.subr.bf16.mxu0 %v21980_v8 }
 0x4f1   : > { %v12714_v6 = vpack.c.bf16 %v4479_v3, %v4479_v3  ;;  %v15673_v3 = vld [vmem:[%s16677_s9 + $0x210] sm:$0xff]  }
 0x4f3   : > { %14281 = vmatpush3.bf16.msra.mxu1 %v15658_v58  ;;  %14381 = vmatpush3.bf16.msra.mxu0 %v15659_v46  ;;  %v15663_v58 = vld [vmem:[%s16677_s9 + $0x238] sm:$0xff]   ;;  %v15668_v46 = vld [vmem:[%s16677_s9 + $0xa0] sm:$0xff]  }
 0x4f4   : > { %14282 = vmatprep.subr.bf16.mxu1 %v21980_v8  ;;  %14382 = vmatprep.subr.bf16.mxu0 %v21980_v8 }
 0x4f7   : > { %14283 = vmatpush3.bf16.msra.mxu1 %v15660_v24  ;;  %14383 = vmatpush3.bf16.msra.mxu0 %v15661_v14  ;;  %v15665_v24 = vld [vmem:[%s16677_s9 + $0x230] sm:$0xff]  }
 0x4f8   : > { %14288 = vmatprep.subr.bf16.mxu1 %v21980_v8  ;;  %14408 = vmatprep.subr.bf16.mxu0 %v21980_v8  ;;  %v15672_v14 = vld [vmem:[%s16677_s9 + $0x90] sm:$0xff]  }
 0x4fa   : > { %14285 = vmatmul.mubr.bf16.vlgmr.msra.gmra.mxu1 %v12709_v50  ;;  %14385 = vmatmul.mubr.bf16.vlgmr.msra.gmra.mxu0 %v12714_v6  ;;  %v15674_v50 = vld [vmem:[%s16677_s9 + $0x88] sm:$0xff]   ;;  %v15676_v6 = vld [vmem:[%s16677_s9 + $0x80] sm:$0xff]  }
 0x4fb   : > { %14289 = vmatpush3.bf16.msra.mxu1 %v15662_v51  ;;  %14409 = vmatpush3.bf16.msra.mxu0 %v15663_v58  ;;  %v15667_v51 = vld [vmem:[%s16677_s9 + $0x228] sm:$0xff]  }
 0x4fc   : > { %14290 = vmatprep.subr.bf16.mxu1 %v21980_v8  ;;  %14410 = vmatprep.subr.bf16.mxu0 %v21980_v8  ;;  %v15675_v58 = vld [vmem:[%s16677_s9 + $0x208] sm:$0xff]  }
 0x4fd   : > { %14304 = vmatprep.mubr.msk.bf16.mxu1 %vm16385_vm1, %v21980_v8  ;;  %14424 = vmatprep.mubr.msk.bf16.mxu0 %vm16385_vm1, %v21980_v8 }
 0x4ff   : > { %14291 = vmatpush3.bf16.msra.mxu1 %v15664_v45  ;;  %14411 = vmatpush3.bf16.msra.mxu0 %v15665_v24  ;;  %v15677_v45 = vld [vmem:[%s16677_s9 + $0x200] sm:$0xff]   ;;  %v15678_v24 = vld [vmem:[%s16677_s9 + $0xf8] sm:$0xff]  }
 0x500   : > { %14292 = vmatprep.subr.bf16.mxu1 %v21980_v8  ;;  %14412 = vmatprep.subr.bf16.mxu0 %v21980_v8 }
 0x503   : > { %14293 = vmatpush3.bf16.msra.mxu1 %v15666_v25  ;;  %14413 = vmatpush3.bf16.msra.mxu0 %v15667_v51  ;;  %v21984_v25 = vld [vmem:[#allocation113_spill] sm:$0xff] }
 0x504   : > { %14294 = vmatprep.subr.bf16.mxu1 %v21980_v8  ;;  %14414 = vmatprep.subr.bf16.mxu0 %v21980_v8  ;;  %v12710_v51 = vpack.c.bf16 %v21984_v25, %v21984_v25  ;;  %v15690_v25 = vld [vmem:[%s16677_s9 + $0xc8] sm:$0xff]  }
 0x507   : > { %14295 = vmatpush3.bf16.msra.mxu1 %v15668_v46  ;;  %14415 = vmatpush3.bf16.msra.mxu0 %v15669_v0  ;;  %v15679_v46 = vld [vmem:[%s16677_s9 + $0x2b8] sm:$0xff]   ;;  %v12716_v0 = vpack.c.bf16 %v19701_v5, %v19701_v5  ;;  %v15682_v5 = vld [vmem:[%s16677_s9 + $0xe8] sm:$0xff]  }
 0x508   : > { %14296 = vmatprep.subr.bf16.mxu1 %v21980_v8  ;;  %14416 = vmatprep.subr.bf16.mxu0 %v21980_v8 }
 0x50b   : > { %14297 = vmatpush3.bf16.msra.mxu1 %v15670_v63  ;;  %14417 = vmatpush3.bf16.msra.mxu0 %v15671_v11  ;;  %v15680_v63 = vld [vmem:[%s16677_s9 + $0xf0] sm:$0xff]  }
 0x50c   : > { %14298 = vmatprep.subr.bf16.mxu1 %v21980_v8  ;;  %14418 = vmatprep.subr.bf16.mxu0 %v21980_v8  ;;  %v15681_v11 = vld [vmem:[%s16677_s9 + $0x2b0] sm:$0xff]  }
 0x50f   : > { %14299 = vmatpush3.bf16.msra.mxu1 %v15672_v14  ;;  %14419 = vmatpush3.bf16.msra.mxu0 %v15673_v3  ;;  %v15683_v14 = vld [vmem:[%s16677_s9 + $0x2a8] sm:$0xff]   ;;  %v15684_v3 = vld [vmem:[%s16677_s9 + $0xe0] sm:$0xff]  }
 0x510   : > { %14300 = vmatprep.subr.bf16.mxu1 %v21980_v8  ;;  %14420 = vmatprep.subr.bf16.mxu0 %v21980_v8 }
 0x513   : > { %14301 = vmatpush3.bf16.msra.mxu1 %v15674_v50  ;;  %14421 = vmatpush3.bf16.msra.mxu0 %v15675_v58  ;;  %v15685_v50 = vld [vmem:[%s16677_s9 + $0x2a0] sm:$0xff]   ;;  %v15686_v58 = vld [vmem:[%s16677_s9 + $0xd8] sm:$0xff]  }
 0x514   : > { %14302 = vmatprep.subr.bf16.mxu1 %v21980_v8  ;;  %14422 = vmatprep.subr.bf16.mxu0 %v21980_v8 }
 0x517   : > { %14303 = vmatpush3.bf16.msra.mxu1 %v15676_v6  ;;  %14423 = vmatpush3.bf16.msra.mxu0 %v15677_v45  ;;  %v15687_v6 = vld [vmem:[%s16677_s9 + $0x298] sm:$0xff]   ;;  %v15688_v45 = vld [vmem:[%s16677_s9 + $0xd0] sm:$0xff]  }
 0x518   : > { %14308 = vmatprep.subr.bf16.mxu1 %v21980_v8  ;;  %14448 = vmatprep.subr.bf16.mxu0 %v21980_v8 }
 0x51a   : > { %14305 = vmatmul.mubr.bf16.vlgmr.msra.gmra.mxu1 %v12710_v51  ;;  %14425 = vmatmul.mubr.bf16.vlgmr.msra.gmra.mxu0 %v12716_v0  ;;  %v15691_v51 = vld [vmem:[%s16677_s9 + $0x288] sm:$0xff]   ;;  %v15693_v0 = vld [vmem:[%s16677_s9 + $0x280] sm:$0xff]  }
 0x51b   : > { %14309 = vmatpush3.bf16.msra.mxu1 %v15678_v24  ;;  %14449 = vmatpush3.bf16.msra.mxu0 %v15679_v46  ;;  %v15689_v24 = vld [vmem:[%s16677_s9 + $0x290] sm:$0xff]   ;;  %v15692_v46 = vld [vmem:[%s16677_s9 + $0xc0] sm:$0xff]  }
 0x51c   : > { %14310 = vmatprep.subr.bf16.mxu1 %v21980_v8  ;;  %14450 = vmatprep.subr.bf16.mxu0 %v21980_v8 }
 0x51d   : > { %14324 = vmatprep.mubr.msk.bf16.mxu1 %vm16385_vm1, %v21980_v8  ;;  %14464 = vmatprep.mubr.msk.bf16.mxu0 %vm16385_vm1, %v21980_v8 }
 0x51f   : > { %14311 = vmatpush3.bf16.msra.mxu1 %v15680_v63  ;;  %14451 = vmatpush3.bf16.msra.mxu0 %v15681_v11  ;;  %v15694_v63 = vld [vmem:[%s16677_s9 + $0x178] sm:$0xff]   ;;  %v21985_v11 = vld [vmem:[#allocation76_spill] sm:$0xff] }
 0x520   : > { %14312 = vmatprep.subr.bf16.mxu1 %v21980_v8  ;;  %14452 = vmatprep.subr.bf16.mxu0 %v21980_v8 }
 0x523   : > { %14313 = vmatpush3.bf16.msra.mxu1 %v15682_v5  ;;  %14453 = vmatpush3.bf16.msra.mxu0 %v15683_v14  ;;  %v12711_v5 = vpack.c.bf16 %v21985_v11, %v21985_v11  ;;  %v15695_v14 = vld [vmem:[%s16677_s9 + $0x338] sm:$0xff]   ;;  %v15707_v11 = vld [vmem:[%s16677_s9 + $0x308] sm:$0xff]  }
 0x524   : > { %14314 = vmatprep.subr.bf16.mxu1 %v21980_v8  ;;  %14454 = vmatprep.subr.bf16.mxu0 %v21980_v8 }
 0x527   : > { %14315 = vmatpush3.bf16.msra.mxu1 %v15684_v3  ;;  %14455 = vmatpush3.bf16.msra.mxu0 %v15685_v50  ;;  %v12718_v3 = vpack.c.bf16 %v19708_v57, %v19708_v57  ;;  %v15696_v50 = vld [vmem:[%s16677_s9 + $0x170] sm:$0xff]   ;;  %v15698_v57 = vld [vmem:[%s16677_s9 + $0x168] sm:$0xff]  }
 0x528   : > { %14316 = vmatprep.subr.bf16.mxu1 %v21980_v8  ;;  %14456 = vmatprep.subr.bf16.mxu0 %v21980_v8 }
 0x52b   : > { %14317 = vmatpush3.bf16.msra.mxu1 %v15686_v58  ;;  %14457 = vmatpush3.bf16.msra.mxu0 %v15687_v6  ;;  %v15697_v58 = vld [vmem:[%s16677_s9 + $0x330] sm:$0xff]   ;;  %v15699_v6 = vld [vmem:[%s16677_s9 + $0x328] sm:$0xff]  }
 0x52c   : > { %14318 = vmatprep.subr.bf16.mxu1 %v21980_v8  ;;  %14458 = vmatprep.subr.bf16.mxu0 %v21980_v8 }
 0x52f   : > { %14319 = vmatpush3.bf16.msra.mxu1 %v15688_v45  ;;  %14459 = vmatpush3.bf16.msra.mxu0 %v15689_v24  ;;  %v15700_v45 = vld [vmem:[%s16677_s9 + $0x160] sm:$0xff]  }
 0x530   : > { %14320 = vmatprep.subr.bf16.mxu1 %v21980_v8  ;;  %14460 = vmatprep.subr.bf16.mxu0 %v21980_v8  ;;  %v15701_v24 = vld [vmem:[%s16677_s9 + $0x320] sm:$0xff]  }
 0x533   : > { %14321 = vmatpush3.bf16.msra.mxu1 %v15690_v25  ;;  %14461 = vmatpush3.bf16.msra.mxu0 %v15691_v51  ;;  %v15702_v25 = vld [vmem:[%s16677_s9 + $0x158] sm:$0xff]  }
 0x534   : > { %14322 = vmatprep.subr.bf16.mxu1 %v21980_v8  ;;  %14462 = vmatprep.subr.bf16.mxu0 %v21980_v8  ;;  %v15703_v51 = vld [vmem:[%s16677_s9 + $0x318] sm:$0xff]  }
 0x537   : > { %14323 = vmatpush3.bf16.msra.mxu1 %v15692_v46  ;;  %14463 = vmatpush3.bf16.msra.mxu0 %v15693_v0  ;;  %v15704_v46 = vld [vmem:[%s16677_s9 + $0x150] sm:$0xff]  }
 0x538   : > { %14348 = vmatprep.subr.bf16.mxu1 %v21980_v8  ;;  %14488 = vmatprep.subr.bf16.mxu0 %v21980_v8  ;;  %v15705_v0 = vld [vmem:[%s16677_s9 + $0x310] sm:$0xff]  }
 0x53a   : > { %14325 = vmatmul.mubr.bf16.vlgmr.msra.gmra.mxu1 %v12711_v5  ;;  %14465 = vmatmul.mubr.bf16.vlgmr.msra.gmra.mxu0 %v12718_v3  ;;  %v15708_v5 = vld [vmem:[%s16677_s9 + $0x140] sm:$0xff]   ;;  %v15710_v3 = vld [vmem:[%s16677_s9 + $0x1f8] sm:$0xff]  }
 0x53b   : > { %14349 = vmatpush3.bf16.msra.mxu1 %v15694_v63  ;;  %14489 = vmatpush3.bf16.msra.mxu0 %v15695_v14  ;;  %v15706_v63 = vld [vmem:[%s16677_s9 + $0x148] sm:$0xff]   ;;  %v15709_v14 = vld [vmem:[%s16677_s9 + $0x300] sm:$0xff]  }
 0x53c   : > { %14350 = vmatprep.subr.bf16.mxu1 %v21980_v8  ;;  %14490 = vmatprep.subr.bf16.mxu0 %v21980_v8 }
 0x53d   : > { %14364 = vmatprep.mubr.msk.bf16.mxu1 %vm16385_vm1, %v21980_v8  ;;  %14504 = vmatprep.mubr.msk.bf16.mxu0 %vm16385_vm1, %v21980_v8 }
 0x53f   : > { %14351 = vmatpush3.bf16.msra.mxu1 %v15696_v50  ;;  %14491 = vmatpush3.bf16.msra.mxu0 %v15697_v58  ;;  %v12713_v50 = vpack.c.bf16 %v19693_v47, %v19693_v47  ;;  %v15711_v58 = vld [vmem:[%s16677_s9 + $0x3b8] sm:$0xff]   ;;  %v15713_v47 = vld [vmem:[%s16677_s9 + $0x3b0] sm:$0xff]  }
 0x540   : > { %14352 = vmatprep.subr.bf16.mxu1 %v21980_v8  ;;  %14492 = vmatprep.subr.bf16.mxu0 %v21980_v8 }
 0x543   : > { %14353 = vmatpush3.bf16.msra.mxu1 %v15698_v57  ;;  %14493 = vmatpush3.bf16.msra.mxu0 %v15699_v6  ;;  %v12720_v57 = vpack.c.bf16 %v19714_v36, %v19714_v36  ;;  %v15712_v6 = vld [vmem:[%s16677_s9 + $0x1f0] sm:$0xff]   ;;  %v15714_v36 = vld [vmem:[%s16677_s9 + $0x1e8] sm:$0xff]  }
 0x544   : > { %14354 = vmatprep.subr.bf16.mxu1 %v21980_v8  ;;  %14494 = vmatprep.subr.bf16.mxu0 %v21980_v8 }
 0x547   : > { %14355 = vmatpush3.bf16.msra.mxu1 %v15700_v45  ;;  %14495 = vmatpush3.bf16.msra.mxu0 %v15701_v24  ;;  %v15715_v45 = vld [vmem:[%s16677_s9 + $0x3a8] sm:$0xff]   ;;  %v15716_v24 = vld [vmem:[%s16677_s9 + $0x1e0] sm:$0xff]  }
 0x548   : > { %14356 = vmatprep.subr.bf16.mxu1 %v21980_v8  ;;  %14496 = vmatprep.subr.bf16.mxu0 %v21980_v8 }
 0x54b   : > { %14357 = vmatpush3.bf16.msra.mxu1 %v15702_v25  ;;  %14497 = vmatpush3.bf16.msra.mxu0 %v15703_v51  ;;  %v15717_v25 = vld [vmem:[%s16677_s9 + $0x3a0] sm:$0xff]   ;;  %v15718_v51 = vld [vmem:[%s16677_s9 + $0x1d8] sm:$0xff]  }
 0x54c   : > { %14358 = vmatprep.subr.bf16.mxu1 %v21980_v8  ;;  %14498 = vmatprep.subr.bf16.mxu0 %v21980_v8 }
 0x54f   : > { %14359 = vmatpush3.bf16.msra.mxu1 %v15704_v46  ;;  %14499 = vmatpush3.bf16.msra.mxu0 %v15705_v0  ;;  %v15719_v46 = vld [vmem:[%s16677_s9 + $0x398] sm:$0xff]   ;;  %v15720_v0 = vld [vmem:[%s16677_s9 + $0x1d0] sm:$0xff]  }
 0x550   : > { %14360 = vmatprep.subr.bf16.mxu1 %v21980_v8  ;;  %14500 = vmatprep.subr.bf16.mxu0 %v21980_v8 }
 0x553   : > { %14361 = vmatpush3.bf16.msra.mxu1 %v15706_v63  ;;  %14501 = vmatpush3.bf16.msra.mxu0 %v15707_v11  ;;  %v15721_v63 = vld [vmem:[%s16677_s9 + $0x390] sm:$0xff]   ;;  %v15722_v11 = vld [vmem:[%s16677_s9 + $0x1c8] sm:$0xff]  }
 0x554   : > { %14362 = vmatprep.subr.bf16.mxu1 %v21980_v8  ;;  %14502 = vmatprep.subr.bf16.mxu0 %v21980_v8 }
 0x557   : > { %14363 = vmatpush3.bf16.msra.mxu1 %v15708_v5  ;;  %14503 = vmatpush3.bf16.msra.mxu0 %v15709_v14  ;;  %v15723_v5 = vld [vmem:[%s16677_s9 + $0x388] sm:$0xff]   ;;  %v15724_v14 = vld [vmem:[%s16677_s9 + $0x1c0] sm:$0xff]  }
 0x558   : > { %14388 = vmatprep.subr.bf16.mxu1 %v21980_v8  ;;  %14528 = vmatprep.subr.bf16.mxu0 %v21980_v8 }
 0x55a   : > { %14365 = vmatmul.mubr.bf16.vlgmr.msra.gmra.mxu1 %v12713_v50  ;;  %14505 = vmatmul.mubr.bf16.vlgmr.msra.gmra.mxu0 %v12720_v57  ;;  %v15726_v50 = vld [vmem:[%s16677_s9 + $0x278] sm:$0xff]  }
 0x55b   : > { %14389 = vmatpush3.bf16.msra.mxu1 %v15710_v3  ;;  %14529 = vmatpush3.bf16.msra.mxu0 %v15711_v58  ;;  %v15725_v3 = vld [vmem:[%s16677_s9 + $0x380] sm:$0xff]  }
 0x55c   : > { %14390 = vmatprep.subr.bf16.mxu1 %v21980_v8  ;;  %14530 = vmatprep.subr.bf16.mxu0 %v21980_v8  ;;  %v21986_v58 = vld [vmem:[#allocation94_spill] sm:$0xff] }
 0x55d   : > { %14404 = vmatprep.mubr.msk.bf16.mxu1 %vm16385_vm1, %v21980_v8  ;;  %14544 = vmatprep.mubr.msk.bf16.mxu0 %vm16385_vm1, %v21980_v8  ;;  %v12715_v57 = vpack.c.bf16 %v21986_v58, %v21986_v58  ;;  %v15742_v58 = vld [vmem:[%s16677_s9 + $0x2f8] sm:$0xff]  }
 0x55f   : > { %14391 = vmatpush3.bf16.msra.mxu1 %v15712_v6  ;;  %14531 = vmatpush3.bf16.msra.mxu0 %v15713_v47  ;;  %v15727_v6 = vld [vmem:[%s16677_s9 + $0x438] sm:$0xff]   ;;  %v12722_v47 = vpack.c.bf16 %v19720_v43, %v19720_v43  ;;  %v15730_v43 = vld [vmem:[%s16677_s9 + $0x268] sm:$0xff]  }
 0x560   : > { %14392 = vmatprep.subr.bf16.mxu1 %v21980_v8  ;;  %14532 = vmatprep.subr.bf16.mxu0 %v21980_v8 }
 0x563   : > { %14393 = vmatpush3.bf16.msra.mxu1 %v15714_v36  ;;  %14533 = vmatpush3.bf16.msra.mxu0 %v15715_v45  ;;  %v15728_v36 = vld [vmem:[%s16677_s9 + $0x270] sm:$0xff]  }
 0x564   : > { %14394 = vmatprep.subr.bf16.mxu1 %v21980_v8  ;;  %14534 = vmatprep.subr.bf16.mxu0 %v21980_v8  ;;  %v15729_v45 = vld [vmem:[%s16677_s9 + $0x430] sm:$0xff]  }
 0x567   : > { %14395 = vmatpush3.bf16.msra.mxu1 %v15716_v24  ;;  %14535 = vmatpush3.bf16.msra.mxu0 %v15717_v25  ;;  %v15731_v24 = vld [vmem:[%s16677_s9 + $0x428] sm:$0xff]   ;;  %v15732_v25 = vld [vmem:[%s16677_s9 + $0x260] sm:$0xff]  }
 0x568   : > { %14396 = vmatprep.subr.bf16.mxu1 %v21980_v8  ;;  %14536 = vmatprep.subr.bf16.mxu0 %v21980_v8 }
 0x56b   : > { %14397 = vmatpush3.bf16.msra.mxu1 %v15718_v51  ;;  %14537 = vmatpush3.bf16.msra.mxu0 %v15719_v46  ;;  %v15733_v51 = vld [vmem:[%s16677_s9 + $0x420] sm:$0xff]   ;;  %v15734_v46 = vld [vmem:[%s16677_s9 + $0x258] sm:$0xff]  }
 0x56c   : > { %14398 = vmatprep.subr.bf16.mxu1 %v21980_v8  ;;  %14538 = vmatprep.subr.bf16.mxu0 %v21980_v8 }
 0x56f   : > { %14399 = vmatpush3.bf16.msra.mxu1 %v15720_v0  ;;  %14539 = vmatpush3.bf16.msra.mxu0 %v15721_v63  ;;  %v15735_v0 = vld [vmem:[%s16677_s9 + $0x418] sm:$0xff]   ;;  %v15736_v63 = vld [vmem:[%s16677_s9 + $0x250] sm:$0xff]  }
 0x570   : > { %14400 = vmatprep.subr.bf16.mxu1 %v21980_v8  ;;  %14540 = vmatprep.subr.bf16.mxu0 %v21980_v8 }
 0x573   : > { %14401 = vmatpush3.bf16.msra.mxu1 %v15722_v11  ;;  %14541 = vmatpush3.bf16.msra.mxu0 %v15723_v5  ;;  %v15737_v11 = vld [vmem:[%s16677_s9 + $0x410] sm:$0xff]   ;;  %v15738_v5 = vld [vmem:[%s16677_s9 + $0x248] sm:$0xff]  }
 0x574   : > { %14402 = vmatprep.subr.bf16.mxu1 %v21980_v8  ;;  %14542 = vmatprep.subr.bf16.mxu0 %v21980_v8 }
 0x577   : > { %14403 = vmatpush3.bf16.msra.mxu1 %v15724_v14  ;;  %14543 = vmatpush3.bf16.msra.mxu0 %v15725_v3  ;;  %v15739_v14 = vld [vmem:[%s16677_s9 + $0x408] sm:$0xff]   ;;  %v15740_v3 = vld [vmem:[%s16677_s9 + $0x240] sm:$0xff]  }
 0x578   : > { %14428 = vmatprep.subr.bf16.mxu1 %v21980_v8  ;;  %14568 = vmatprep.subr.bf16.mxu0 %v21980_v8 }
 0x57a   : > { %14405 = vmatmul.mubr.bf16.vlgmr.msra.gmra.mxu1 %v12715_v57  ;;  %14545 = vmatmul.mubr.bf16.vlgmr.msra.gmra.mxu0 %v12722_v47  ;;  %v12717_v57 = vpack.c.bf16 %v19705_v26, %v19705_v26  ;;  %v12724_v47 = vpack.c.bf16 %v19726_v16, %v19726_v16  ;;  %v15744_v26 = vld [vmem:[%s16677_s9 + $0x2f0] sm:$0xff]  }
 0x57b   : > { %14429 = vmatpush3.bf16.msra.mxu1 %v15726_v50  ;;  %14569 = vmatpush3.bf16.msra.mxu0 %v15727_v6  ;;  %v15741_v50 = vld [vmem:[%s16677_s9 + $0x400] sm:$0xff]   ;;  %v15743_v6 = vld [vmem:[%s16677_s9 + $0x4b8] sm:$0xff]  }
 0x57c   : > { %14430 = vmatprep.subr.bf16.mxu1 %v21980_v8  ;;  %14570 = vmatprep.subr.bf16.mxu0 %v21980_v8 }
 0x57d   : > { %14444 = vmatprep.mubr.msk.bf16.mxu1 %vm16385_vm1, %v21980_v8  ;;  %14584 = vmatprep.mubr.msk.bf16.mxu0 %vm16385_vm1, %v21980_v8 }
 0x57f   : > { %14431 = vmatpush3.bf16.msra.mxu1 %v15728_v36  ;;  %14571 = vmatpush3.bf16.msra.mxu0 %v15729_v45 }
 0x580   : > { %14432 = vmatprep.subr.bf16.mxu1 %v21980_v8  ;;  %14572 = vmatprep.subr.bf16.mxu0 %v21980_v8 }
 0x583   : > { %14433 = vmatpush3.bf16.msra.mxu1 %v15730_v43  ;;  %14573 = vmatpush3.bf16.msra.mxu0 %v15731_v24  ;;  %v15745_v24 = vld [vmem:[%s16677_s9 + $0x4b0] sm:$0xff]  }
 0x584   : > { %14434 = vmatprep.subr.bf16.mxu1 %v21980_v8  ;;  %14574 = vmatprep.subr.bf16.mxu0 %v21980_v8 }
 0x587   : > { %14435 = vmatpush3.bf16.msra.mxu1 %v15732_v25  ;;  %14575 = vmatpush3.bf16.msra.mxu0 %v15733_v51 }
 0x588   : > { %14436 = vmatprep.subr.bf16.mxu1 %v21980_v8  ;;  %14576 = vmatprep.subr.bf16.mxu0 %v21980_v8 }
 0x58b   : > { %14437 = vmatpush3.bf16.msra.mxu1 %v15734_v46  ;;  %14577 = vmatpush3.bf16.msra.mxu0 %v15735_v0  ;;  %v15746_v0 = vld [vmem:[%s16677_s9 + $0x2e8] sm:$0xff]  }
 0x58c   : > { %14438 = vmatprep.subr.bf16.mxu1 %v21980_v8  ;;  %14578 = vmatprep.subr.bf16.mxu0 %v21980_v8 }
 0x58f   : > { %14439 = vmatpush3.bf16.msra.mxu1 %v15736_v63  ;;  %14579 = vmatpush3.bf16.msra.mxu0 %v15737_v11  ;;  %v15747_v63 = vld [vmem:[%s16677_s9 + $0x4a8] sm:$0xff]  }
 0x590   : > { %14440 = vmatprep.subr.bf16.mxu1 %v21980_v8  ;;  %14580 = vmatprep.subr.bf16.mxu0 %v21980_v8 }
 0x593   : > { %14441 = vmatpush3.bf16.msra.mxu1 %v15738_v5  ;;  %14581 = vmatpush3.bf16.msra.mxu0 %v15739_v14  ;;  %v15748_v5 = vld [vmem:[%s16677_s9 + $0x2e0] sm:$0xff]  }
 0x594   : > { %14442 = vmatprep.subr.bf16.mxu1 %v21980_v8  ;;  %14582 = vmatprep.subr.bf16.mxu0 %v21980_v8  ;;  %v15749_v14 = vld [vmem:[%s16677_s9 + $0x4a0] sm:$0xff]  }
 0x597   : > { %14443 = vmatpush3.bf16.msra.mxu1 %v15740_v3  ;;  %14583 = vmatpush3.bf16.msra.mxu0 %v15741_v50  ;;  %v15750_v3 = vld [vmem:[%s16677_s9 + $0x2d8] sm:$0xff]  }
 0x598   : > { %14468 = vmatprep.subr.bf16.mxu1 %v21980_v8  ;;  %14608 = vmatprep.subr.bf16.mxu0 %v21980_v8  ;;  %v15751_v50 = vld [vmem:[%s16677_s9 + $0x498] sm:$0xff]  }
 0x59a   : > { %v20114_v36 = vpop.f32.mrf.mxu1  ;;  %14445 = vmatmul.mubr.bf16.vlgmr.msra.gmra.mxu1 %v12717_v57  ;;  %14585 = vmatmul.mubr.bf16.vlgmr.msra.gmra.mxu0 %v12724_v47  ;;  %v20116_v45 = vpop.f32.mrf.mxu0  ;;  %v15753_v57 = vld [vmem:[%s16677_s9 + $0x490] sm:$0xff]   ;;  %v15755_v47 = vld [vmem:[%s16677_s9 + $0x488] sm:$0xff]  }
 0x59b   : > { %14469 = vmatpush3.bf16.msra.mxu1 %v15742_v58  ;;  %14609 = vmatpush3.bf16.msra.mxu0 %v15743_v6  ;;  %v15752_v58 = vld [vmem:[%s16677_s9 + $0x2d0] sm:$0xff]   ;;  %v15754_v6 = vld [vmem:[%s16677_s9 + $0x2c8] sm:$0xff]  }
 0x59c   : > { %v14266_v43 = vpop.f32.mrf.mxu1  ;;  %14470 = vmatprep.subr.bf16.mxu1 %v21980_v8  ;;  %v14346_v25 = vpop.f32.mrf.mxu0  ;;  %14610 = vmatprep.subr.bf16.mxu0 %v21980_v8 }
 0x59d   : > { %14484 = vmatprep.mubr.msk.bf16.mxu1 %vm16385_vm1, %v21980_v8  ;;  %14624 = vmatprep.mubr.msk.bf16.mxu0 %vm16385_vm1, %v21980_v8  ;;  %v15756_v43 = vld [vmem:[%s16677_s9 + $0x2c0] sm:$0xff]   ;;  %v12719_v25 = vpack.c.bf16 %v19711_v18, %v19711_v18  ;;  %v15760_v18 = vld [vmem:[%s16677_s9 + $0x370] sm:$0xff]  }
 0x59e   : > { %v5903_v16 = vpop.f32.mrf.mxu1  ;;  %v6255_v51 = vpop.f32.mrf.mxu0 }
 0x59f   : > { %14471 = vmatpush3.bf16.msra.mxu1 %v15744_v26  ;;  %14611 = vmatpush3.bf16.msra.mxu0 %v15745_v24  ;;  %v15757_v26 = vld [vmem:[%s16677_s9 + $0x480] sm:$0xff]   ;;  %v15758_v24 = vld [vmem:[%s16677_s9 + $0x378] sm:$0xff]   ;;  %v12726_v51 = vpack.c.bf16 %v19732_v44, %v19732_v44 }
 0x5a0   : > { %v14267_v46 = vpop.f32.mrf.mxu1  ;;  %14472 = vmatprep.subr.bf16.mxu1 %v21980_v8  ;;  %v14347_v11 = vpop.f32.mrf.mxu0  ;;  %14612 = vmatprep.subr.bf16.mxu0 %v21980_v8  ;;  %v15759_v16 = vld [vmem:[%s16677_s9 + $0x538] sm:$0xff]  }
 0x5a3   : > { %14473 = vmatpush3.bf16.msra.mxu1 %v15746_v0  ;;  %14613 = vmatpush3.bf16.msra.mxu0 %v15747_v63 }
 0x5a4   : > { %14474 = vmatprep.subr.bf16.mxu1 %v21980_v8  ;;  %14614 = vmatprep.subr.bf16.mxu0 %v21980_v8 }
 0x5a7   : > { %14475 = vmatpush3.bf16.msra.mxu1 %v15748_v5  ;;  %14615 = vmatpush3.bf16.msra.mxu0 %v15749_v14  ;;  %v15761_v5 = vld [vmem:[%s16677_s9 + $0x530] sm:$0xff]  }
 0x5a8   : > { %14476 = vmatprep.subr.bf16.mxu1 %v21980_v8  ;;  %14616 = vmatprep.subr.bf16.mxu0 %v21980_v8 }
 0x5ab   : > { %14477 = vmatpush3.bf16.msra.mxu1 %v15750_v3  ;;  %14617 = vmatpush3.bf16.msra.mxu0 %v15751_v50  ;;  %v15762_v3 = vld [vmem:[%s16677_s9 + $0x368] sm:$0xff]  }
 0x5ac   : > { %14478 = vmatprep.subr.bf16.mxu1 %v21980_v8  ;;  %14618 = vmatprep.subr.bf16.mxu0 %v21980_v8 }
 0x5af   : > { %14479 = vmatpush3.bf16.msra.mxu1 %v15752_v58  ;;  %14619 = vmatpush3.bf16.msra.mxu0 %v15753_v57  ;;  %v15763_v58 = vld [vmem:[%s16677_s9 + $0x528] sm:$0xff]  }
 0x5b0   : > { %14480 = vmatprep.subr.bf16.mxu1 %v21980_v8  ;;  %14620 = vmatprep.subr.bf16.mxu0 %v21980_v8 }
 0x5b3   : > { %14481 = vmatpush3.bf16.msra.mxu1 %v15754_v6  ;;  %14621 = vmatpush3.bf16.msra.mxu0 %v15755_v47  ;;  %v15764_v6 = vld [vmem:[%s16677_s9 + $0x360] sm:$0xff]  }
 0x5b4   : > { %14482 = vmatprep.subr.bf16.mxu1 %v21980_v8  ;;  %14622 = vmatprep.subr.bf16.mxu0 %v21980_v8  ;;  %v15765_v47 = vld [vmem:[%s16677_s9 + $0x520] sm:$0xff]  }
 0x5b7   : > { %14483 = vmatpush3.bf16.msra.mxu1 %v15756_v43  ;;  %14623 = vmatpush3.bf16.msra.mxu0 %v15757_v26  ;;  %v15766_v43 = vld [vmem:[%s16677_s9 + $0x358] sm:$0xff]  }
 0x5b8   : > { %14508 = vmatprep.subr.bf16.mxu1 %v21980_v8  ;;  %14648 = vmatprep.subr.bf16.mxu0 %v21980_v8  ;;  %v15767_v26 = vld [vmem:[%s16677_s9 + $0x518] sm:$0xff]  }
 0x5ba   : > { %v5988_v46 = vpop.f32.mrf.mxu1  ;;  %14485 = vmatmul.mubr.bf16.vlgmr.msra.gmra.mxu1 %v12719_v25  ;;  %v20161_v63 = vpop.f32.mrf.mxu0  ;;  %14625 = vmatmul.mubr.bf16.vlgmr.msra.gmra.mxu0 %v12726_v51  ;;  %v15769_v25 = vld [vmem:[%s16677_s9 + $0x510] sm:$0xff]   ;;  %v15771_v51 = vld [vmem:[%s16677_s9 + $0x508] sm:$0xff]  }
 0x5bb   : > { %v20159_v0 = vadd.f32 %v5988_v46, %v20114_v36  ;;  %14509 = vmatpush3.bf16.msra.mxu1 %v15758_v24  ;;  %14649 = vmatpush3.bf16.msra.mxu0 %v15759_v16  ;;  %v15768_v24 = vld [vmem:[%s16677_s9 + $0x350] sm:$0xff]   ;;  %v15770_v16 = vld [vmem:[%s16677_s9 + $0x348] sm:$0xff]   ;;  %v15772_v46 = vld [vmem:[%s16677_s9 + $0x340] sm:$0xff]  }
 0x5bc   : > { %v14286_v11 = vpop.f32.mrf.mxu1  ;;  %14510 = vmatprep.subr.bf16.mxu1 %v21980_v8  ;;  %v14386_v44 = vpop.f32.mrf.mxu0  ;;  %14650 = vmatprep.subr.bf16.mxu0 %v21980_v8 }
 0x5bd   : > { %14524 = vmatprep.mubr.msk.bf16.mxu1 %vm16385_vm1, %v21980_v8  ;;  %14664 = vmatprep.mubr.msk.bf16.mxu0 %vm16385_vm1, %v21980_v8  ;;  %v15774_v11 = vld [vmem:[%s16677_s9 + $0x3f8] sm:$0xff]  }
 0x5be   : > { %v5991_v36 = vpop.f32.mrf.mxu1  ;;  %v6431_v14 = vpop.f32.mrf.mxu0  ;;  %v15775_v44 = vld [vmem:[%s16677_s9 + $0x5b8] sm:$0xff]  }
 0x5bf   : > { %14511 = vmatpush3.bf16.msra.mxu1 %v15760_v18  ;;  %14651 = vmatpush3.bf16.msra.mxu0 %v15761_v5  ;;  %v15773_v18 = vld [vmem:[%s16677_s9 + $0x500] sm:$0xff]   ;;  %v12721_v5 = vpack.c.bf16 %v19717_v34, %v19717_v34  ;;  %v12728_v36 = vpack.c.bf16 %v19738_v61, %v19738_v61  ;;  %v15776_v34 = vld [vmem:[%s16677_s9 + $0x3f0] sm:$0xff]  }
 0x5c0   : > { %v14287_v50 = vpop.f32.mrf.mxu1  ;;  %14512 = vmatprep.subr.bf16.mxu1 %v21980_v8  ;;  %v14387_v57 = vpop.f32.mrf.mxu0  ;;  %14652 = vmatprep.subr.bf16.mxu0 %v21980_v8 }
 0x5c1   : > { %v15777_v57 = vld [vmem:[%s16677_s9 + $0x5b0] sm:$0xff]  }
 0x5c3   : > { %14513 = vmatpush3.bf16.msra.mxu1 %v15762_v3  ;;  %14653 = vmatpush3.bf16.msra.mxu0 %v15763_v58 }
 0x5c4   : > { %14514 = vmatprep.subr.bf16.mxu1 %v21980_v8  ;;  %14654 = vmatprep.subr.bf16.mxu0 %v21980_v8 }
 0x5c7   : > { %14515 = vmatpush3.bf16.msra.mxu1 %v15764_v6  ;;  %14655 = vmatpush3.bf16.msra.mxu0 %v15765_v47  ;;  %v15778_v47 = vld [vmem:[%s16677_s9 + $0x3e8] sm:$0xff]  }
 0x5c8   : > { %14516 = vmatprep.subr.bf16.mxu1 %v21980_v8  ;;  %14656 = vmatprep.subr.bf16.mxu0 %v21980_v8 }
 0x5cb   : > { %14517 = vmatpush3.bf16.msra.mxu1 %v15766_v43  ;;  %14657 = vmatpush3.bf16.msra.mxu0 %v15767_v26  ;;  %v15779_v26 = vld [vmem:[%s16677_s9 + $0x5a8] sm:$0xff]  }
 0x5cc   : > { %14518 = vmatprep.subr.bf16.mxu1 %v21980_v8  ;;  %14658 = vmatprep.subr.bf16.mxu0 %v21980_v8 }
 0x5cf   : > { %14519 = vmatpush3.bf16.msra.mxu1 %v15768_v24  ;;  %14659 = vmatpush3.bf16.msra.mxu0 %v15769_v25  ;;  %v15780_v25 = vld [vmem:[%s16677_s9 + $0x3e0] sm:$0xff]  }
 0x5d0   : > { %14520 = vmatprep.subr.bf16.mxu1 %v21980_v8  ;;  %14660 = vmatprep.subr.bf16.mxu0 %v21980_v8 }
 0x5d3   : > { %14521 = vmatpush3.bf16.msra.mxu1 %v15770_v16  ;;  %14661 = vmatpush3.bf16.msra.mxu0 %v15771_v51  ;;  %v15781_v16 = vld [vmem:[%s16677_s9 + $0x5a0] sm:$0xff]   ;;  %v15782_v51 = vld [vmem:[%s16677_s9 + $0x3d8] sm:$0xff]  }
 0x5d4   : > { %14522 = vmatprep.subr.bf16.mxu1 %v21980_v8  ;;  %14662 = vmatprep.subr.bf16.mxu0 %v21980_v8 }
 0x5d7   : > { %14523 = vmatpush3.bf16.msra.mxu1 %v15772_v46  ;;  %14663 = vmatpush3.bf16.msra.mxu0 %v15773_v18  ;;  %v15783_v46 = vld [vmem:[%s16677_s9 + $0x598] sm:$0xff]   ;;  %v15784_v18 = vld [vmem:[%s16677_s9 + $0x3d0] sm:$0xff]  }
 0x5d8   : > { %14548 = vmatprep.subr.bf16.mxu1 %v21980_v8  ;;  %14688 = vmatprep.subr.bf16.mxu0 %v21980_v8 }
 0x5da   : > { %v6076_v14 = vpop.f32.mrf.mxu1  ;;  %14525 = vmatmul.mubr.bf16.vlgmr.msra.gmra.mxu1 %v12721_v5  ;;  %v20206_v50 = vpop.f32.mrf.mxu0  ;;  %14665 = vmatmul.mubr.bf16.vlgmr.msra.gmra.mxu0 %v12728_v36  ;;  %v15786_v5 = vld [vmem:[%s16677_s9 + $0x3c8] sm:$0xff]   ;;  %v15788_v36 = vld [vmem:[%s16677_s9 + $0x3c0] sm:$0xff]  }
 0x5db   : > { %v20204_v3 = vadd.f32 %v20159_v0, %v6076_v14  ;;  %14549 = vmatpush3.bf16.msra.mxu1 %v15774_v11  ;;  %14689 = vmatpush3.bf16.msra.mxu0 %v15775_v44  ;;  %v15785_v11 = vld [vmem:[%s16677_s9 + $0x590] sm:$0xff]   ;;  %v15787_v44 = vld [vmem:[%s16677_s9 + $0x588] sm:$0xff]   ;;  %v15789_v14 = vld [vmem:[%s16677_s9 + $0x580] sm:$0xff]  }
 0x5dc   : > { %v14306_v58 = vpop.f32.mrf.mxu1  ;;  %14550 = vmatprep.subr.bf16.mxu1 %v21980_v8  ;;  %v14426_v61 = vpop.f32.mrf.mxu0  ;;  %14690 = vmatprep.subr.bf16.mxu0 %v21980_v8 }
 0x5dd   : > { %14564 = vmatprep.mubr.msk.bf16.mxu1 %vm16385_vm1, %v21980_v8  ;;  %14704 = vmatprep.mubr.msk.bf16.mxu0 %vm16385_vm1, %v21980_v8  ;;  %v12723_v58 = vpack.c.bf16 %v19723_v10, %v19723_v10  ;;  %v12730_v61 = vpack.c.bf16 %v19744_v2, %v19744_v2  ;;  %v15792_v10 = vld [vmem:[%s16677_s9 + $0x470] sm:$0xff]  }
 0x5de   : > { %v6079_v0 = vpop.f32.mrf.mxu1  ;;  %v6607_v6 = vpop.f32.mrf.mxu0 }
 0x5df   : > { %14551 = vmatpush3.bf16.msra.mxu1 %v15776_v34  ;;  %14691 = vmatpush3.bf16.msra.mxu0 %v15777_v57  ;;  %v15790_v34 = vld [vmem:[%s16677_s9 + $0x478] sm:$0xff]  }
 0x5e0   : > { %v14307_v43 = vpop.f32.mrf.mxu1  ;;  %14552 = vmatprep.subr.bf16.mxu1 %v21980_v8  ;;  %v14427_v24 = vpop.f32.mrf.mxu0  ;;  %14692 = vmatprep.subr.bf16.mxu0 %v21980_v8  ;;  %v15791_v57 = vld [vmem:[%s16677_s9 + $0x638] sm:$0xff]  }
 0x5e3   : > { %14553 = vmatpush3.bf16.msra.mxu1 %v15778_v47  ;;  %14693 = vmatpush3.bf16.msra.mxu0 %v15779_v26  ;;  %v15793_v26 = vld [vmem:[%s16677_s9 + $0x630] sm:$0xff]  }
 0x5e4   : > { %14554 = vmatprep.subr.bf16.mxu1 %v21980_v8  ;;  %14694 = vmatprep.subr.bf16.mxu0 %v21980_v8 }
 0x5e7   : > { %14555 = vmatpush3.bf16.msra.mxu1 %v15780_v25  ;;  %14695 = vmatpush3.bf16.msra.mxu0 %v15781_v16  ;;  %v15794_v25 = vld [vmem:[%s16677_s9 + $0x468] sm:$0xff]  }
 0x5e8   : > { %14556 = vmatprep.subr.bf16.mxu1 %v21980_v8  ;;  %14696 = vmatprep.subr.bf16.mxu0 %v21980_v8 }
 0x5eb   : > { %14557 = vmatpush3.bf16.msra.mxu1 %v15782_v51  ;;  %14697 = vmatpush3.bf16.msra.mxu0 %v15783_v46  ;;  %v15795_v51 = vld [vmem:[%s16677_s9 + $0x628] sm:$0xff]  }
 0x5ec   : > { %14558 = vmatprep.subr.bf16.mxu1 %v21980_v8  ;;  %14698 = vmatprep.subr.bf16.mxu0 %v21980_v8 }
 0x5ef   : > { %14559 = vmatpush3.bf16.msra.mxu1 %v15784_v18  ;;  %14699 = vmatpush3.bf16.msra.mxu0 %v15785_v11  ;;  %v15796_v18 = vld [vmem:[%s16677_s9 + $0x460] sm:$0xff]  }
 0x5f0   : > { %14560 = vmatprep.subr.bf16.mxu1 %v21980_v8  ;;  %14700 = vmatprep.subr.bf16.mxu0 %v21980_v8  ;;  %v15797_v11 = vld [vmem:[%s16677_s9 + $0x620] sm:$0xff]  }
 0x5f3   : > { %14561 = vmatpush3.bf16.msra.mxu1 %v15786_v5  ;;  %14701 = vmatpush3.bf16.msra.mxu0 %v15787_v44  ;;  %v15798_v5 = vld [vmem:[%s16677_s9 + $0x458] sm:$0xff]  }
 0x5f4   : > { %14562 = vmatprep.subr.bf16.mxu1 %v21980_v8  ;;  %14702 = vmatprep.subr.bf16.mxu0 %v21980_v8  ;;  %v15799_v44 = vld [vmem:[%s16677_s9 + $0x618] sm:$0xff]  }
 0x5f7   : > { %14563 = vmatpush3.bf16.msra.mxu1 %v15788_v36  ;;  %14703 = vmatpush3.bf16.msra.mxu0 %v15789_v14  ;;  %v15800_v36 = vld [vmem:[%s16677_s9 + $0x450] sm:$0xff]  }
 0x5f8   : > { %14588 = vmatprep.subr.bf16.mxu1 %v21980_v8  ;;  %14728 = vmatprep.subr.bf16.mxu0 %v21980_v8  ;;  %v15801_v14 = vld [vmem:[%s16677_s9 + $0x610] sm:$0xff]  }
 0x5fa   : > { %v6164_v0 = vpop.f32.mrf.mxu1  ;;  %14565 = vmatmul.mubr.bf16.vlgmr.msra.gmra.mxu1 %v12723_v58  ;;  %v20249_v47 = vpop.f32.mrf.mxu0  ;;  %14705 = vmatmul.mubr.bf16.vlgmr.msra.gmra.mxu0 %v12730_v61  ;;  %v15803_v58 = vld [vmem:[%s16677_s9 + $0x608] sm:$0xff]   ;;  %v15805_v61 = vld [vmem:[%s16677_s9 + $0x600] sm:$0xff]  }
 0x5fb   : > { %v11452_v6 = vadd.f32 %v20204_v3, %v6164_v0  ;;  %14589 = vmatpush3.bf16.msra.mxu1 %v15790_v34  ;;  %14729 = vmatpush3.bf16.msra.mxu0 %v15791_v57  ;;  %v15802_v34 = vld [vmem:[%s16677_s9 + $0x448] sm:$0xff]   ;;  %v15804_v57 = vld [vmem:[%s16677_s9 + $0x440] sm:$0xff]   ;;  %v15806_v0 = vld [vmem:[%s16677_s9 + $0x4f8] sm:$0xff]  }
 0x5fc   : > { %v14326_v43 = vpop.f32.mrf.mxu1  ;;  %14590 = vmatprep.subr.bf16.mxu1 %v21980_v8  ;;  %v14466_v2 = vpop.f32.mrf.mxu0  ;;  %14730 = vmatprep.subr.bf16.mxu0 %v21980_v8 }
 0x5fd   : > { %14604 = vmatprep.mubr.msk.bf16.mxu1 %vm16385_vm1, %v21980_v8  ;;  %14744 = vmatprep.mubr.msk.bf16.mxu0 %vm16385_vm1, %v21980_v8  ;;  %v15807_v43 = vld [vmem:[%s16677_s9 + $0x6b8] sm:$0xff]   ;;  %v11453_v2 = vadd.f32 %v11452_v6, %v20116_v45 }
 0x5fe   : > { %v6167_v3 = vpop.f32.mrf.mxu1  ;;  %v6783_v24 = vpop.f32.mrf.mxu0 }
 0x5ff   : > { %14591 = vmatpush3.bf16.msra.mxu1 %v15792_v10  ;;  %14731 = vmatpush3.bf16.msra.mxu0 %v15793_v26  ;;  %v12725_v10 = vpack.c.bf16 %v19729_v20, %v19729_v20  ;;  %v12732_v26 = vpack.c.bf16 %v19750_v7, %v19750_v7  ;;  %v15808_v20 = vld [vmem:[%s16677_s9 + $0x4f0] sm:$0xff]  }
 0x600   : > { %v14327_v16 = vpop.f32.mrf.mxu1  ;;  %14592 = vmatprep.subr.bf16.mxu1 %v21980_v8  ;;  %v14467_v46 = vpop.f32.mrf.mxu0  ;;  %14732 = vmatprep.subr.bf16.mxu0 %v21980_v8 }
 0x601   : > { %v15810_v46 = vld [vmem:[%s16677_s9 + $0x4e8] sm:$0xff]  }
 0x603   : > { %14593 = vmatpush3.bf16.msra.mxu1 %v15794_v25  ;;  %14733 = vmatpush3.bf16.msra.mxu0 %v15795_v51  ;;  %v15809_v51 = vld [vmem:[%s16677_s9 + $0x6b0] sm:$0xff]  }
 0x604   : > { %14594 = vmatprep.subr.bf16.mxu1 %v21980_v8  ;;  %14734 = vmatprep.subr.bf16.mxu0 %v21980_v8 }
 0x607   : > { %14595 = vmatpush3.bf16.msra.mxu1 %v15796_v18  ;;  %14735 = vmatpush3.bf16.msra.mxu0 %v15797_v11  ;;  %v15811_v11 = vld [vmem:[%s16677_s9 + $0x6a8] sm:$0xff]  }
 0x608   : > { %14596 = vmatprep.subr.bf16.mxu1 %v21980_v8  ;;  %14736 = vmatprep.subr.bf16.mxu0 %v21980_v8 }
 0x60b   : > { %14597 = vmatpush3.bf16.msra.mxu1 %v15798_v5  ;;  %14737 = vmatpush3.bf16.msra.mxu0 %v15799_v44  ;;  %v15812_v44 = vld [vmem:[%s16677_s9 + $0x4e0] sm:$0xff]  }
 0x60c   : > { %14598 = vmatprep.subr.bf16.mxu1 %v21980_v8  ;;  %14738 = vmatprep.subr.bf16.mxu0 %v21980_v8 }
 0x60f   : > { %14599 = vmatpush3.bf16.msra.mxu1 %v15800_v36  ;;  %14739 = vmatpush3.bf16.msra.mxu0 %v15801_v14  ;;  %v15813_v36 = vld [vmem:[%s16677_s9 + $0x6a0] sm:$0xff]   ;;  %v15814_v14 = vld [vmem:[%s16677_s9 + $0x4d8] sm:$0xff]  }
 0x610   : > { %14600 = vmatprep.subr.bf16.mxu1 %v21980_v8  ;;  %14740 = vmatprep.subr.bf16.mxu0 %v21980_v8 }
 0x613   : > { %14601 = vmatpush3.bf16.msra.mxu1 %v15802_v34  ;;  %14741 = vmatpush3.bf16.msra.mxu0 %v15803_v58  ;;  %v15815_v34 = vld [vmem:[%s16677_s9 + $0x698] sm:$0xff]   ;;  %v15816_v58 = vld [vmem:[%s16677_s9 + $0x4d0] sm:$0xff]  }
 0x614   : > { %14602 = vmatprep.subr.bf16.mxu1 %v21980_v8  ;;  %14742 = vmatprep.subr.bf16.mxu0 %v21980_v8 }
 0x617   : > { %14603 = vmatpush3.bf16.msra.mxu1 %v15804_v57  ;;  %14743 = vmatpush3.bf16.msra.mxu0 %v15805_v61  ;;  %v15817_v57 = vld [vmem:[%s16677_s9 + $0x690] sm:$0xff]   ;;  %v15818_v61 = vld [vmem:[%s16677_s9 + $0x4c8] sm:$0xff]  }
 0x618   : > { %14628 = vmatprep.subr.bf16.mxu1 %v21980_v8  ;;  %14768 = vmatprep.subr.bf16.mxu0 %v21980_v8 }
 0x61a   : > { %v6340_v3 = vpop.f32.mrf.mxu1  ;;  %14605 = vmatmul.mubr.bf16.vlgmr.msra.gmra.mxu1 %v12725_v10  ;;  %v20292_v25 = vpop.f32.mrf.mxu0  ;;  %14745 = vmatmul.mubr.bf16.vlgmr.msra.gmra.mxu0 %v12732_v26  ;;  %v15820_v10 = vld [vmem:[%s16677_s9 + $0x4c0] sm:$0xff]   ;;  %v15822_v26 = vld [vmem:[%s16677_s9 + $0x578] sm:$0xff]  }
 0x61b   : > { %v11454_v24 = vadd.f32 %v11453_v2, %v6340_v3  ;;  %14629 = vmatpush3.bf16.msra.mxu1 %v15806_v0  ;;  %14769 = vmatpush3.bf16.msra.mxu0 %v15807_v43  ;;  %v15819_v0 = vld [vmem:[%s16677_s9 + $0x688] sm:$0xff]   ;;  %v15821_v43 = vld [vmem:[%s16677_s9 + $0x680] sm:$0xff]   ;;  %v12727_v2 = vpack.c.bf16 %v19735_v48, %v19735_v48  ;;  %v15823_v3 = vld [vmem:[%s16677_s9 + $0x738] sm:$0xff]  }
 0x61c   : > { %v14366_v16 = vpop.f32.mrf.mxu1  ;;  %14630 = vmatprep.subr.bf16.mxu1 %v21980_v8  ;;  %v14506_v7 = vpop.f32.mrf.mxu0  ;;  %14770 = vmatprep.subr.bf16.mxu0 %v21980_v8  ;;  %v15824_v48 = vld [vmem:[%s16677_s9 + $0x570] sm:$0xff]  }
 0x61d   : > { %14644 = vmatprep.mubr.msk.bf16.mxu1 %vm16385_vm1, %v21980_v8  ;;  %14784 = vmatprep.mubr.msk.bf16.mxu0 %vm16385_vm1, %v21980_v8  ;;  %v11455_v16 = vadd.f32 %v11454_v24, %v20161_v63 }
 0x61e   : > { %v6343_v45 = vpop.f32.mrf.mxu1  ;;  %v6959_v6 = vpop.f32.mrf.mxu0 }
 0x61f   : > { %14631 = vmatpush3.bf16.msra.mxu1 %v15808_v20  ;;  %14771 = vmatpush3.bf16.msra.mxu0 %v15809_v51  ;;  %v12734_v20 = vpack.c.bf16 %v19756_v35, %v19756_v35 }
 0x620   : > { %v14367_v18 = vpop.f32.mrf.mxu1  ;;  %14632 = vmatprep.subr.bf16.mxu1 %v21980_v8  ;;  %v14507_v5 = vpop.f32.mrf.mxu0  ;;  %14772 = vmatprep.subr.bf16.mxu0 %v21980_v8 }
 0x621   : > { %v15826_v18 = vld [vmem:[%s16677_s9 + $0x568] sm:$0xff]  }
 0x622   : > { %v15827_v5 = vld [vmem:[%s16677_s9 + $0x728] sm:$0xff]  }
 0x623   : > { %14633 = vmatpush3.bf16.msra.mxu1 %v15810_v46  ;;  %14773 = vmatpush3.bf16.msra.mxu0 %v15811_v11  ;;  %v15825_v46 = vld [vmem:[%s16677_s9 + $0x730] sm:$0xff]  }
 0x624   : > { %14634 = vmatprep.subr.bf16.mxu1 %v21980_v8  ;;  %14774 = vmatprep.subr.bf16.mxu0 %v21980_v8 }
 0x627   : > { %14635 = vmatpush3.bf16.msra.mxu1 %v15812_v44  ;;  %14775 = vmatpush3.bf16.msra.mxu0 %v15813_v36  ;;  %v15828_v36 = vld [vmem:[%s16677_s9 + $0x560] sm:$0xff]  }
 0x628   : > { %14636 = vmatprep.subr.bf16.mxu1 %v21980_v8  ;;  %14776 = vmatprep.subr.bf16.mxu0 %v21980_v8 }
 0x62b   : > { %14637 = vmatpush3.bf16.msra.mxu1 %v15814_v14  ;;  %14777 = vmatpush3.bf16.msra.mxu0 %v15815_v34  ;;  %v15829_v14 = vld [vmem:[%s16677_s9 + $0x720] sm:$0xff]   ;;  %v15830_v34 = vld [vmem:[%s16677_s9 + $0x558] sm:$0xff]  }
 0x62c   : > { %14638 = vmatprep.subr.bf16.mxu1 %v21980_v8  ;;  %14778 = vmatprep.subr.bf16.mxu0 %v21980_v8 }
 0x62f   : > { %14639 = vmatpush3.bf16.msra.mxu1 %v15816_v58  ;;  %14779 = vmatpush3.bf16.msra.mxu0 %v15817_v57  ;;  %v15831_v58 = vld [vmem:[%s16677_s9 + $0x718] sm:$0xff]   ;;  %v15832_v57 = vld [vmem:[%s16677_s9 + $0x550] sm:$0xff]  }
 0x630   : > { %14640 = vmatprep.subr.bf16.mxu1 %v21980_v8  ;;  %14780 = vmatprep.subr.bf16.mxu0 %v21980_v8 }
 0x633   : > { %14641 = vmatpush3.bf16.msra.mxu1 %v15818_v61  ;;  %14781 = vmatpush3.bf16.msra.mxu0 %v15819_v0  ;;  %v15833_v61 = vld [vmem:[%s16677_s9 + $0x710] sm:$0xff]   ;;  %v15834_v0 = vld [vmem:[%s16677_s9 + $0x548] sm:$0xff]  }
 0x634   : > { %14642 = vmatprep.subr.bf16.mxu1 %v21980_v8  ;;  %14782 = vmatprep.subr.bf16.mxu0 %v21980_v8 }
 0x637   : > { %14643 = vmatpush3.bf16.msra.mxu1 %v15820_v10  ;;  %14783 = vmatpush3.bf16.msra.mxu0 %v15821_v43  ;;  %v15835_v10 = vld [vmem:[%s16677_s9 + $0x708] sm:$0xff]   ;;  %v15836_v43 = vld [vmem:[%s16677_s9 + $0x540] sm:$0xff]  }
 0x638   : > { %14668 = vmatprep.subr.bf16.mxu1 %v21980_v8  ;;  %14808 = vmatprep.subr.bf16.mxu0 %v21980_v8 }
 0x63a   : > { %v6516_v51 = vpop.f32.mrf.mxu1  ;;  %14645 = vmatmul.mubr.bf16.vlgmr.msra.gmra.mxu1 %v12727_v2  ;;  %v20335_v45 = vpop.f32.mrf.mxu0  ;;  %14785 = vmatmul.mubr.bf16.vlgmr.msra.gmra.mxu0 %v12734_v20  ;;  %v15838_v2 = vld [vmem:[%s16677_s9 + $0x5f8] sm:$0xff]  }
 0x63b   : > { %v11456_v7 = vadd.f32 %v11455_v16, %v6516_v51  ;;  %14669 = vmatpush3.bf16.msra.mxu1 %v15822_v26  ;;  %14809 = vmatpush3.bf16.msra.mxu0 %v15823_v3  ;;  %v15837_v26 = vld [vmem:[%s16677_s9 + $0x700] sm:$0xff]   ;;  %v12729_v3 = vpack.c.bf16 %v19741_v15, %v19741_v15  ;;  %v15839_v20 = vld [vmem:[%s16677_s9 + $0x7b8] sm:$0xff]   ;;  %v12736_v16 = vpack.c.bf16 %v19762_v33, %v19762_v33  ;;  %v15840_v15 = vld [vmem:[%s16677_s9 + $0x5f0] sm:$0xff]  }
 0x63c   : > { %v14406_v6 = vpop.f32.mrf.mxu1  ;;  %14670 = vmatprep.subr.bf16.mxu1 %v21980_v8  ;;  %v14546_v35 = vpop.f32.mrf.mxu0  ;;  %14810 = vmatprep.subr.bf16.mxu0 %v21980_v8 }
 0x63d   : > { %14684 = vmatprep.mubr.msk.bf16.mxu1 %vm16385_vm1, %v21980_v8  ;;  %14824 = vmatprep.mubr.msk.bf16.mxu0 %vm16385_vm1, %v21980_v8  ;;  %v11457_v51 = vadd.f32 %v11456_v7, %v20206_v50 }
 0x63e   : > { %v6519_v63 = vpop.f32.mrf.mxu1  ;;  %v7135_v24 = vpop.f32.mrf.mxu0 }
 0x63f   : > { %14671 = vmatpush3.bf16.msra.mxu1 %v15824_v48  ;;  %14811 = vmatpush3.bf16.msra.mxu0 %v15825_v46  ;;  %v15841_v63 = vld [vmem:[%s16677_s9 + $0x7b0] sm:$0xff]   ;;  %v15842_v24 = vld [vmem:[%s16677_s9 + $0x5e8] sm:$0xff]  }
 0x640   : > { %v14407_v11 = vpop.f32.mrf.mxu1  ;;  %14672 = vmatprep.subr.bf16.mxu1 %v21980_v8  ;;  %v14547_v44 = vpop.f32.mrf.mxu0  ;;  %14812 = vmatprep.subr.bf16.mxu0 %v21980_v8 }
 0x641   : > { %v15843_v11 = vld [vmem:[%s16677_s9 + $0x7a8] sm:$0xff]   ;;  %v15844_v44 = vld [vmem:[%s16677_s9 + $0x5e0] sm:$0xff]  }
 0x643   : > { %14673 = vmatpush3.bf16.msra.mxu1 %v15826_v18  ;;  %14813 = vmatpush3.bf16.msra.mxu0 %v15827_v5 }
 0x644   : > { %14674 = vmatprep.subr.bf16.mxu1 %v21980_v8  ;;  %14814 = vmatprep.subr.bf16.mxu0 %v21980_v8 }
 0x647   : > { %14675 = vmatpush3.bf16.msra.mxu1 %v15828_v36  ;;  %14815 = vmatpush3.bf16.msra.mxu0 %v15829_v14  ;;  %v15845_v36 = vld [vmem:[%s16677_s9 + $0x7a0] sm:$0xff]   ;;  %v15846_v14 = vld [vmem:[%s16677_s9 + $0x5d8] sm:$0xff]  }
 0x648   : > { %14676 = vmatprep.subr.bf16.mxu1 %v21980_v8  ;;  %14816 = vmatprep.subr.bf16.mxu0 %v21980_v8 }
 0x64b   : > { %14677 = vmatpush3.bf16.msra.mxu1 %v15830_v34  ;;  %14817 = vmatpush3.bf16.msra.mxu0 %v15831_v58  ;;  %v15847_v34 = vld [vmem:[%s16677_s9 + $0x798] sm:$0xff]   ;;  %v15848_v58 = vld [vmem:[%s16677_s9 + $0x5d0] sm:$0xff]  }
 0x64c   : > { %14678 = vmatprep.subr.bf16.mxu1 %v21980_v8  ;;  %14818 = vmatprep.subr.bf16.mxu0 %v21980_v8 }
 0x64f   : > { %14679 = vmatpush3.bf16.msra.mxu1 %v15832_v57  ;;  %14819 = vmatpush3.bf16.msra.mxu0 %v15833_v61  ;;  %v15849_v57 = vld [vmem:[%s16677_s9 + $0x790] sm:$0xff]   ;;  %v15850_v61 = vld [vmem:[%s16677_s9 + $0x5c8] sm:$0xff]  }
 0x650   : > { %14680 = vmatprep.subr.bf16.mxu1 %v21980_v8  ;;  %14820 = vmatprep.subr.bf16.mxu0 %v21980_v8 }
 0x653   : > { %14681 = vmatpush3.bf16.msra.mxu1 %v15834_v0  ;;  %14821 = vmatpush3.bf16.msra.mxu0 %v15835_v10  ;;  %v15851_v0 = vld [vmem:[%s16677_s9 + $0x788] sm:$0xff]   ;;  %v15852_v10 = vld [vmem:[%s16677_s9 + $0x5c0] sm:$0xff]  }
 0x654   : > { %14682 = vmatprep.subr.bf16.mxu1 %v21980_v8  ;;  %14822 = vmatprep.subr.bf16.mxu0 %v21980_v8 }
 0x657   : > { %14683 = vmatpush3.bf16.msra.mxu1 %v15836_v43  ;;  %14823 = vmatpush3.bf16.msra.mxu0 %v15837_v26  ;;  %v15853_v43 = vld [vmem:[%s16677_s9 + $0x780] sm:$0xff]   ;;  %v15854_v26 = vld [vmem:[%s16677_s9 + $0x678] sm:$0xff]  }
 0x658   : > { %14708 = vmatprep.subr.bf16.mxu1 %v21980_v8  ;;  %14848 = vmatprep.subr.bf16.mxu0 %v21980_v8 }
 0x65a   : > { %v6692_v48 = vpop.f32.mrf.mxu1  ;;  %14685 = vmatmul.mubr.bf16.vlgmr.msra.gmra.mxu1 %v12729_v3  ;;  %v20378_v46 = vpop.f32.mrf.mxu0  ;;  %14825 = vmatmul.mubr.bf16.vlgmr.msra.gmra.mxu0 %v12736_v16  ;;  %v15855_v3 = vld [vmem:[%s16677_s9 + $0x838] sm:$0xff]  }
 0x65b   : > { %v11458_v6 = vadd.f32 %v11457_v51, %v6692_v48  ;;  %14709 = vmatpush3.bf16.msra.mxu1 %v15838_v2  ;;  %14849 = vmatpush3.bf16.msra.mxu0 %v15839_v20  ;;  %v12731_v2 = vpack.c.bf16 %v19747_v62, %v19747_v62  ;;  %v12738_v20 = vpack.c.bf16 %v19768_v9, %v19768_v9  ;;  %v15856_v62 = vld [vmem:[%s16677_s9 + $0x670] sm:$0xff]  }
 0x65c   : > { %v14446_v35 = vpop.f32.mrf.mxu1  ;;  %14710 = vmatprep.subr.bf16.mxu1 %v21980_v8  ;;  %v14586_v33 = vpop.f32.mrf.mxu0  ;;  %14850 = vmatprep.subr.bf16.mxu0 %v21980_v8 }
 0x65d   : > { %14724 = vmatprep.mubr.msk.bf16.mxu1 %vm16385_vm1, %v21980_v8  ;;  %14864 = vmatprep.mubr.msk.bf16.mxu0 %vm16385_vm1, %v21980_v8  ;;  %v11459_v16 = vadd.f32 %v11458_v6, %v20249_v47  ;;  %v15858_v33 = vld [vmem:[%s16677_s9 + $0x668] sm:$0xff]  }
 0x65e   : > { %v6695_v50 = vpop.f32.mrf.mxu1  ;;  %v7311_v7 = vpop.f32.mrf.mxu0 }
 0x65f   : > { %14711 = vmatpush3.bf16.msra.mxu1 %v15840_v15  ;;  %14851 = vmatpush3.bf16.msra.mxu0 %v15841_v63  ;;  %v15857_v63 = vld [vmem:[%s16677_s9 + $0x830] sm:$0xff]   ;;  %v15859_v7 = vld [vmem:[%s16677_s9 + $0x828] sm:$0xff]  }
 0x660   : > { %v14447_v18 = vpop.f32.mrf.mxu1  ;;  %14712 = vmatprep.subr.bf16.mxu1 %v21980_v8  ;;  %v14587_v5 = vpop.f32.mrf.mxu0  ;;  %14852 = vmatprep.subr.bf16.mxu0 %v21980_v8 }
 0x661   : > { %v15860_v18 = vld [vmem:[%s16677_s9 + $0x660] sm:$0xff]   ;;  %v15862_v5 = vld [vmem:[%s16677_s9 + $0x658] sm:$0xff]  }
 0x663   : > { %14713 = vmatpush3.bf16.msra.mxu1 %v15842_v24  ;;  %14853 = vmatpush3.bf16.msra.mxu0 %v15843_v11  ;;  %v15861_v11 = vld [vmem:[%s16677_s9 + $0x820] sm:$0xff]  }
 0x664   : > { %14714 = vmatprep.subr.bf16.mxu1 %v21980_v8  ;;  %14854 = vmatprep.subr.bf16.mxu0 %v21980_v8 }
 0x667   : > { %14715 = vmatpush3.bf16.msra.mxu1 %v15844_v44  ;;  %14855 = vmatpush3.bf16.msra.mxu0 %v15845_v36  ;;  %v15863_v44 = vld [vmem:[%s16677_s9 + $0x818] sm:$0xff]   ;;  %v15864_v36 = vld [vmem:[%s16677_s9 + $0x650] sm:$0xff]  }
 0x668   : > { %14716 = vmatprep.subr.bf16.mxu1 %v21980_v8  ;;  %14856 = vmatprep.subr.bf16.mxu0 %v21980_v8 }
 0x66b   : > { %14717 = vmatpush3.bf16.msra.mxu1 %v15846_v14  ;;  %14857 = vmatpush3.bf16.msra.mxu0 %v15847_v34  ;;  %v15865_v14 = vld [vmem:[%s16677_s9 + $0x810] sm:$0xff]   ;;  %v15866_v34 = vld [vmem:[%s16677_s9 + $0x648] sm:$0xff]  }
 0x66c   : > { %14718 = vmatprep.subr.bf16.mxu1 %v21980_v8  ;;  %14858 = vmatprep.subr.bf16.mxu0 %v21980_v8 }
 0x66f   : > { %14719 = vmatpush3.bf16.msra.mxu1 %v15848_v58  ;;  %14859 = vmatpush3.bf16.msra.mxu0 %v15849_v57  ;;  %v15867_v58 = vld [vmem:[%s16677_s9 + $0x808] sm:$0xff]   ;;  %v15868_v57 = vld [vmem:[%s16677_s9 + $0x640] sm:$0xff]  }
 0x670   : > { %14720 = vmatprep.subr.bf16.mxu1 %v21980_v8  ;;  %14860 = vmatprep.subr.bf16.mxu0 %v21980_v8 }
 0x673   : > { %14721 = vmatpush3.bf16.msra.mxu1 %v15850_v61  ;;  %14861 = vmatpush3.bf16.msra.mxu0 %v15851_v0  ;;  %v15869_v61 = vld [vmem:[%s16677_s9 + $0x800] sm:$0xff]   ;;  %v15870_v0 = vld [vmem:[%s16677_s9 + $0x6f8] sm:$0xff]  }
 0x674   : > { %14722 = vmatprep.subr.bf16.mxu1 %v21980_v8  ;;  %14862 = vmatprep.subr.bf16.mxu0 %v21980_v8 }
 0x677   : > { %14723 = vmatpush3.bf16.msra.mxu1 %v15852_v10  ;;  %14863 = vmatpush3.bf16.msra.mxu0 %v15853_v43  ;;  %v12733_v10 = vpack.c.bf16 %v19753_v1, %v19753_v1  ;;  %v15871_v43 = vld [vmem:[%s16677_s9 + $0x8b8] sm:$0xff]   ;;  %v15872_v1 = vld [vmem:[%s16677_s9 + $0x6f0] sm:$0xff]  }
 0x678   : > { %14748 = vmatprep.subr.bf16.mxu1 %v21980_v8  ;;  %14888 = vmatprep.subr.bf16.mxu0 %v21980_v8 }
 0x67a   : > { %v6868_v51 = vpop.f32.mrf.mxu1  ;;  %14725 = vmatmul.mubr.bf16.vlgmr.msra.gmra.mxu1 %v12731_v2  ;;  %v20421_v15 = vpop.f32.mrf.mxu0  ;;  %14865 = vmatmul.mubr.bf16.vlgmr.msra.gmra.mxu0 %v12738_v20 }
 0x67b   : > { %v11460_v48 = vadd.f32 %v11459_v16, %v6868_v51  ;;  %14749 = vmatpush3.bf16.msra.mxu1 %v15854_v26  ;;  %14889 = vmatpush3.bf16.msra.mxu0 %v15855_v3  ;;  %v12740_v26 = vpack.c.bf16 %v19774_v21, %v19774_v21 }
 0x67c   : > { %v14486_v35 = vpop.f32.mrf.mxu1  ;;  %14750 = vmatprep.subr.bf16.mxu1 %v21980_v8  ;;  %v14626_v9 = vpop.f32.mrf.mxu0  ;;  %14890 = vmatprep.subr.bf16.mxu0 %v21980_v8 }
 0x67d   : > { %14764 = vmatprep.mubr.msk.bf16.mxu1 %vm16385_vm1, %v21980_v8  ;;  %14904 = vmatprep.mubr.msk.bf16.mxu0 %vm16385_vm1, %v21980_v8  ;;  %v11461_v2 = vadd.f32 %v11460_v48, %v20292_v25  ;;  %v15874_v35 = vld [vmem:[%s16677_s9 + $0x6e8] sm:$0xff]  }
 0x67e   : > { %v6871_v47 = vpop.f32.mrf.mxu1  ;;  %v7487_v6 = vpop.f32.mrf.mxu0  ;;  %v15875_v9 = vld [vmem:[%s16677_s9 + $0x8a8] sm:$0xff]  }
 0x67f   : > { %14751 = vmatpush3.bf16.msra.mxu1 %v15856_v62  ;;  %14891 = vmatpush3.bf16.msra.mxu0 %v15857_v63  ;;  %v15873_v62 = vld [vmem:[%s16677_s9 + $0x8b0] sm:$0xff]   ;;  %v15876_v6 = vld [vmem:[%s16677_s9 + $0x6e0] sm:$0xff]  }
 0x680   : > { %v14487_v50 = vpop.f32.mrf.mxu1  ;;  %14752 = vmatprep.subr.bf16.mxu1 %v21980_v8  ;;  %v14627_v24 = vpop.f32.mrf.mxu0  ;;  %14892 = vmatprep.subr.bf16.mxu0 %v21980_v8 }
 0x681   : > { %v15878_v50 = vld [vmem:[%s16677_s9 + $0x6d8] sm:$0xff]   ;;  %v15880_v24 = vld [vmem:[%s16677_s9 + $0x6d0] sm:$0xff]  }
 0x683   : > { %14753 = vmatpush3.bf16.msra.mxu1 %v15858_v33  ;;  %14893 = vmatpush3.bf16.msra.mxu0 %v15859_v7  ;;  %v15877_v33 = vld [vmem:[%s16677_s9 + $0x8a0] sm:$0xff]   ;;  %v15879_v7 = vld [vmem:[%s16677_s9 + $0x898] sm:$0xff]  }
 0x684   : > { %14754 = vmatprep.subr.bf16.mxu1 %v21980_v8  ;;  %14894 = vmatprep.subr.bf16.mxu0 %v21980_v8 }
 0x687   : > { %14755 = vmatpush3.bf16.msra.mxu1 %v15860_v18  ;;  %14895 = vmatpush3.bf16.msra.mxu0 %v15861_v11  ;;  %v15881_v18 = vld [vmem:[%s16677_s9 + $0x890] sm:$0xff]   ;;  %v15882_v11 = vld [vmem:[%s16677_s9 + $0x6c8] sm:$0xff]  }
 0x688   : > { %14756 = vmatprep.subr.bf16.mxu1 %v21980_v8  ;;  %14896 = vmatprep.subr.bf16.mxu0 %v21980_v8 }
 0x68b   : > { %14757 = vmatpush3.bf16.msra.mxu1 %v15862_v5  ;;  %14897 = vmatpush3.bf16.msra.mxu0 %v15863_v44  ;;  %v15883_v5 = vld [vmem:[%s16677_s9 + $0x888] sm:$0xff]   ;;  %v15884_v44 = vld [vmem:[%s16677_s9 + $0x6c0] sm:$0xff]  }
 0x68c   : > { %14758 = vmatprep.subr.bf16.mxu1 %v21980_v8  ;;  %14898 = vmatprep.subr.bf16.mxu0 %v21980_v8 }
 0x68f   : > { %14759 = vmatpush3.bf16.msra.mxu1 %v15864_v36  ;;  %14899 = vmatpush3.bf16.msra.mxu0 %v15865_v14  ;;  %v15885_v36 = vld [vmem:[%s16677_s9 + $0x880] sm:$0xff]   ;;  %v15886_v14 = vld [vmem:[%s16677_s9 + $0x778] sm:$0xff]  }
 0x690   : > { %14760 = vmatprep.subr.bf16.mxu1 %v21980_v8  ;;  %14900 = vmatprep.subr.bf16.mxu0 %v21980_v8 }
 0x693   : > { %14761 = vmatpush3.bf16.msra.mxu1 %v15866_v34  ;;  %14901 = vmatpush3.bf16.msra.mxu0 %v15867_v58  ;;  %v12735_v34 = vpack.c.bf16 %v19759_v54, %v19759_v54  ;;  %v15887_v58 = vld [vmem:[%s16677_s9 + $0x938] sm:$0xff]   ;;  %v15888_v54 = vld [vmem:[%s16677_s9 + $0x770] sm:$0xff]  }
 0x694   : > { %14762 = vmatprep.subr.bf16.mxu1 %v21980_v8  ;;  %14902 = vmatprep.subr.bf16.mxu0 %v21980_v8 }
 0x697   : > { %14763 = vmatpush3.bf16.msra.mxu1 %v15868_v57  ;;  %14903 = vmatpush3.bf16.msra.mxu0 %v15869_v61  ;;  %v12742_v57 = vpack.c.bf16 %v19780_v27, %v19780_v27 }
 0x698   : > { %14788 = vmatprep.subr.bf16.mxu1 %v21980_v8  ;;  %14928 = vmatprep.subr.bf16.mxu0 %v21980_v8 }
 0x69a   : > { %v7044_v3 = vpop.f32.mrf.mxu1  ;;  %14765 = vmatmul.mubr.bf16.vlgmr.msra.gmra.mxu1 %v12733_v10  ;;  %v20464_v16 = vpop.f32.mrf.mxu0  ;;  %14905 = vmatmul.mubr.bf16.vlgmr.msra.gmra.mxu0 %v12740_v26 }
 0x69b   : > { %v11462_v20 = vadd.f32 %v11461_v2, %v7044_v3  ;;  %14789 = vmatpush3.bf16.msra.mxu1 %v15870_v0  ;;  %14929 = vmatpush3.bf16.msra.mxu0 %v15871_v43  ;;  %v15889_v2 = vld [vmem:[%s16677_s9 + $0x930] sm:$0xff]  }
 0x69c   : > { %v14526_v51 = vpop.f32.mrf.mxu1  ;;  %14790 = vmatprep.subr.bf16.mxu1 %v21980_v8  ;;  %v14666_v21 = vpop.f32.mrf.mxu0  ;;  %14930 = vmatprep.subr.bf16.mxu0 %v21980_v8 }
 0x69d   : > { %14804 = vmatprep.mubr.msk.bf16.mxu1 %vm16385_vm1, %v21980_v8  ;;  %14944 = vmatprep.mubr.msk.bf16.mxu0 %vm16385_vm1, %v21980_v8  ;;  %v11463_v61 = vadd.f32 %v11462_v20, %v20335_v45  ;;  %v15890_v20 = vld [vmem:[%s16677_s9 + $0x768] sm:$0xff]   ;;  %v15892_v21 = vld [vmem:[%s16677_s9 + $0x760] sm:$0xff]  }
 0x69e   : > { %v7047_v25 = vpop.f32.mrf.mxu1  ;;  %v7663_v48 = vpop.f32.mrf.mxu0  ;;  %v15891_v51 = vld [vmem:[%s16677_s9 + $0x928] sm:$0xff]  }
 0x69f   : > { %14791 = vmatpush3.bf16.msra.mxu1 %v15872_v1  ;;  %14931 = vmatpush3.bf16.msra.mxu0 %v15873_v62  ;;  %v15893_v25 = vld [vmem:[%s16677_s9 + $0x920] sm:$0xff]   ;;  %v15894_v48 = vld [vmem:[%s16677_s9 + $0x758] sm:$0xff]  }
 0x6a0   : > { %v14527_v63 = vpop.f32.mrf.mxu1  ;;  %14792 = vmatprep.subr.bf16.mxu1 %v21980_v8  ;;  %v14667_v47 = vpop.f32.mrf.mxu0  ;;  %14932 = vmatprep.subr.bf16.mxu0 %v21980_v8 }
 0x6a1   : > { %v15896_v63 = vld [vmem:[%s16677_s9 + $0x750] sm:$0xff]   ;;  %v15898_v47 = vld [vmem:[%s16677_s9 + $0x748] sm:$0xff]  }
 0x6a3   : > { %14793 = vmatpush3.bf16.msra.mxu1 %v15874_v35  ;;  %14933 = vmatpush3.bf16.msra.mxu0 %v15875_v9  ;;  %v15895_v35 = vld [vmem:[%s16677_s9 + $0x918] sm:$0xff]   ;;  %v15897_v9 = vld [vmem:[%s16677_s9 + $0x910] sm:$0xff]  }
 0x6a4   : > { %14794 = vmatprep.subr.bf16.mxu1 %v21980_v8  ;;  %14934 = vmatprep.subr.bf16.mxu0 %v21980_v8 }
 0x6a7   : > { %14795 = vmatpush3.bf16.msra.mxu1 %v15876_v6  ;;  %14935 = vmatpush3.bf16.msra.mxu0 %v15877_v33  ;;  %v15899_v6 = vld [vmem:[%s16677_s9 + $0x908] sm:$0xff]   ;;  %v15900_v33 = vld [vmem:[%s16677_s9 + $0x740] sm:$0xff]  }
 0x6a8   : > { %14796 = vmatprep.subr.bf16.mxu1 %v21980_v8  ;;  %14936 = vmatprep.subr.bf16.mxu0 %v21980_v8 }
 0x6ab   : > { %14797 = vmatpush3.bf16.msra.mxu1 %v15878_v50  ;;  %14937 = vmatpush3.bf16.msra.mxu0 %v15879_v7  ;;  %v15901_v50 = vld [vmem:[%s16677_s9 + $0x900] sm:$0xff]   ;;  %v15902_v7 = vld [vmem:[%s16677_s9 + $0x7f8] sm:$0xff]  }
 0x6ac   : > { %14798 = vmatprep.subr.bf16.mxu1 %v21980_v8  ;;  %14938 = vmatprep.subr.bf16.mxu0 %v21980_v8 }
 0x6af   : > { %14799 = vmatpush3.bf16.msra.mxu1 %v15880_v24  ;;  %14939 = vmatpush3.bf16.msra.mxu0 %v15881_v18  ;;  %v12737_v24 = vpack.c.bf16 %v19765_v49, %v19765_v49  ;;  %v15903_v18 = vld [vmem:[%s16677_s9 + $0x9b8] sm:$0xff]   ;;  %v15904_v49 = vld [vmem:[%s16677_s9 + $0x7f0] sm:$0xff]  }
 0x6b0   : > { %14800 = vmatprep.subr.bf16.mxu1 %v21980_v8  ;;  %14940 = vmatprep.subr.bf16.mxu0 %v21980_v8 }
 0x6b3   : > { %14801 = vmatpush3.bf16.msra.mxu1 %v15882_v11  ;;  %14941 = vmatpush3.bf16.msra.mxu0 %v15883_v5  ;;  %v12744_v11 = vpack.c.bf16 %v19786_v42, %v19786_v42 }
 0x6b4   : > { %14802 = vmatprep.subr.bf16.mxu1 %v21980_v8  ;;  %14942 = vmatprep.subr.bf16.mxu0 %v21980_v8 }
 0x6b7   : > { %14803 = vmatpush3.bf16.msra.mxu1 %v15884_v44  ;;  %14943 = vmatpush3.bf16.msra.mxu0 %v15885_v36 }
 0x6b8   : > { %14828 = vmatprep.subr.bf16.mxu1 %v21980_v8  ;;  %14968 = vmatprep.subr.bf16.mxu0 %v21980_v8 }
 0x6ba   : > { %v7220_v0 = vpop.f32.mrf.mxu1  ;;  %14805 = vmatmul.mubr.bf16.vlgmr.msra.gmra.mxu1 %v12735_v34  ;;  %v20507_v43 = vpop.f32.mrf.mxu0  ;;  %14945 = vmatmul.mubr.bf16.vlgmr.msra.gmra.mxu0 %v12742_v57 }
 0x6bb   : > { %v11464_v10 = vadd.f32 %v11463_v61, %v7220_v0  ;;  %14829 = vmatpush3.bf16.msra.mxu1 %v15886_v14  ;;  %14969 = vmatpush3.bf16.msra.mxu0 %v15887_v58  ;;  %v15905_v58 = vld [vmem:[%s16677_s9 + $0x9b0] sm:$0xff]   ;;  %v15906_v61 = vld [vmem:[%s16677_s9 + $0x7e8] sm:$0xff]  }
 0x6bc   : > { %v14566_v26 = vpop.f32.mrf.mxu1  ;;  %14830 = vmatprep.subr.bf16.mxu1 %v21980_v8  ;;  %v14706_v27 = vpop.f32.mrf.mxu0  ;;  %14970 = vmatprep.subr.bf16.mxu0 %v21980_v8 }
 0x6bd   : > { %14844 = vmatprep.mubr.msk.bf16.mxu1 %vm16385_vm1, %v21980_v8  ;;  %14984 = vmatprep.mubr.msk.bf16.mxu0 %vm16385_vm1, %v21980_v8  ;;  %v11465_v5 = vadd.f32 %v11464_v10, %v20378_v46  ;;  %v15907_v10 = vld [vmem:[%s16677_s9 + $0x9a8] sm:$0xff]   ;;  %v15908_v26 = vld [vmem:[%s16677_s9 + $0x7e0] sm:$0xff]   ;;  %v15910_v27 = vld [vmem:[%s16677_s9 + $0x7d8] sm:$0xff]  }
 0x6be   : > { %v7223_v45 = vpop.f32.mrf.mxu1  ;;  %v7839_v3 = vpop.f32.mrf.mxu0 }
 0x6bf   : > { %14831 = vmatpush3.bf16.msra.mxu1 %v15888_v54  ;;  %14971 = vmatpush3.bf16.msra.mxu0 %v15889_v2  ;;  %v15909_v2 = vld [vmem:[%s16677_s9 + $0x9a0] sm:$0xff]   ;;  %v15911_v45 = vld [vmem:[%s16677_s9 + $0x998] sm:$0xff]   ;;  %v15912_v3 = vld [vmem:[%s16677_s9 + $0x7d0] sm:$0xff]  }
 0x6c0   : > { %v14567_v1 = vpop.f32.mrf.mxu1  ;;  %14832 = vmatprep.subr.bf16.mxu1 %v21980_v8  ;;  %v14707_v62 = vpop.f32.mrf.mxu0  ;;  %14972 = vmatprep.subr.bf16.mxu0 %v21980_v8 }
 0x6c1   : > { %v15914_v1 = vld [vmem:[%s16677_s9 + $0x7c8] sm:$0xff]   ;;  %v15916_v62 = vld [vmem:[%s16677_s9 + $0x7c0] sm:$0xff]  }
 0x6c3   : > { %14833 = vmatpush3.bf16.msra.mxu1 %v15890_v20  ;;  %14973 = vmatpush3.bf16.msra.mxu0 %v15891_v51  ;;  %v15913_v20 = vld [vmem:[%s16677_s9 + $0x990] sm:$0xff]   ;;  %v15915_v51 = vld [vmem:[%s16677_s9 + $0x988] sm:$0xff]  }
 0x6c4   : > { %14834 = vmatprep.subr.bf16.mxu1 %v21980_v8  ;;  %14974 = vmatprep.subr.bf16.mxu0 %v21980_v8 }
 0x6c7   : > { %14835 = vmatpush3.bf16.msra.mxu1 %v15892_v21  ;;  %14975 = vmatpush3.bf16.msra.mxu0 %v15893_v25  ;;  %v15917_v21 = vld [vmem:[%s16677_s9 + $0x980] sm:$0xff]   ;;  %v15918_v25 = vld [vmem:[%s16677_s9 + $0x878] sm:$0xff]  }
 0x6c8   : > { %14836 = vmatprep.subr.bf16.mxu1 %v21980_v8  ;;  %14976 = vmatprep.subr.bf16.mxu0 %v21980_v8 }
 0x6cb   : > { %14837 = vmatpush3.bf16.msra.mxu1 %v15894_v48  ;;  %14977 = vmatpush3.bf16.msra.mxu0 %v15895_v35  ;;  %v12739_v48 = vpack.c.bf16 %v19771_v55, %v19771_v55  ;;  %v15919_v35 = vld [vmem:[%s16677_s9 + $0xa38] sm:$0xff]   ;;  %v15920_v55 = vld [vmem:[%s16677_s9 + $0x870] sm:$0xff]  }
 0x6cc   : > { %14838 = vmatprep.subr.bf16.mxu1 %v21980_v8  ;;  %14978 = vmatprep.subr.bf16.mxu0 %v21980_v8 }
 0x6cf   : > { %14839 = vmatpush3.bf16.msra.mxu1 %v15896_v63  ;;  %14979 = vmatpush3.bf16.msra.mxu0 %v15897_v9  ;;  %v12746_v63 = vpack.c.bf16 %v19792_v37, %v19792_v37 }
 0x6d0   : > { %14840 = vmatprep.subr.bf16.mxu1 %v21980_v8  ;;  %14980 = vmatprep.subr.bf16.mxu0 %v21980_v8 }
 0x6d3   : > { %14841 = vmatpush3.bf16.msra.mxu1 %v15898_v47  ;;  %14981 = vmatpush3.bf16.msra.mxu0 %v15899_v6 }
 0x6d4   : > { %14842 = vmatprep.subr.bf16.mxu1 %v21980_v8  ;;  %14982 = vmatprep.subr.bf16.mxu0 %v21980_v8 }
 0x6d7   : > { %14843 = vmatpush3.bf16.msra.mxu1 %v15900_v33  ;;  %14983 = vmatpush3.bf16.msra.mxu0 %v15901_v50 }
 0x6d8   : > { %14868 = vmatprep.subr.bf16.mxu1 %v21980_v8  ;;  %15008 = vmatprep.subr.bf16.mxu0 %v21980_v8 }
 0x6da   : > { %v7396_v44 = vpop.f32.mrf.mxu1  ;;  %14845 = vmatmul.mubr.bf16.vlgmr.msra.gmra.mxu1 %v12737_v24  ;;  %v20550_v14 = vpop.f32.mrf.mxu0  ;;  %14985 = vmatmul.mubr.bf16.vlgmr.msra.gmra.mxu0 %v12744_v11 }
 0x6db   : > { %v11466_v36 = vadd.f32 %v11465_v5, %v7396_v44  ;;  %14869 = vmatpush3.bf16.msra.mxu1 %v15902_v7  ;;  %15009 = vmatpush3.bf16.msra.mxu0 %v15903_v18  ;;  %v15921_v7 = vld [vmem:[%s16677_s9 + $0xa30] sm:$0xff]   ;;  %v15922_v18 = vld [vmem:[%s16677_s9 + $0x868] sm:$0xff]  }
 0x6dc   : > { %v14606_v34 = vpop.f32.mrf.mxu1  ;;  %14870 = vmatprep.subr.bf16.mxu1 %v21980_v8  ;;  %v14746_v42 = vpop.f32.mrf.mxu0  ;;  %15010 = vmatprep.subr.bf16.mxu0 %v21980_v8  ;;  %v15923_v5 = vld [vmem:[%s16677_s9 + $0xa28] sm:$0xff]  }
 0x6dd   : > { %14884 = vmatprep.mubr.msk.bf16.mxu1 %vm16385_vm1, %v21980_v8  ;;  %15024 = vmatprep.mubr.msk.bf16.mxu0 %vm16385_vm1, %v21980_v8  ;;  %v11467_v9 = vadd.f32 %v11466_v36, %v20421_v15  ;;  %v15924_v36 = vld [vmem:[%s16677_s9 + $0x860] sm:$0xff]   ;;  %v15926_v34 = vld [vmem:[%s16677_s9 + $0x858] sm:$0xff]   ;;  %v15928_v42 = vld [vmem:[%s16677_s9 + $0x850] sm:$0xff]  }
 0x6de   : > { %v7399_v46 = vpop.f32.mrf.mxu1  ;;  %v8015_v57 = vpop.f32.mrf.mxu0 }
 0x6df   : > { %14871 = vmatpush3.bf16.msra.mxu1 %v15904_v49  ;;  %15011 = vmatpush3.bf16.msra.mxu0 %v15905_v58  ;;  %v15925_v49 = vld [vmem:[%s16677_s9 + $0xa20] sm:$0xff]   ;;  %v15927_v58 = vld [vmem:[%s16677_s9 + $0xa18] sm:$0xff]   ;;  %v15929_v46 = vld [vmem:[%s16677_s9 + $0xa10] sm:$0xff]  }
 0x6e0   : > { %v14607_v0 = vpop.f32.mrf.mxu1  ;;  %14872 = vmatprep.subr.bf16.mxu1 %v21980_v8  ;;  %v14747_v54 = vpop.f32.mrf.mxu0  ;;  %15012 = vmatprep.subr.bf16.mxu0 %v21980_v8  ;;  %v15930_v57 = vld [vmem:[%s16677_s9 + $0x848] sm:$0xff]  }
 0x6e1   : > { %v15932_v0 = vld [vmem:[%s16677_s9 + $0x840] sm:$0xff]   ;;  %v15934_v54 = vld [vmem:[%s16677_s9 + $0x8f8] sm:$0xff]  }
 0x6e3   : > { %14873 = vmatpush3.bf16.msra.mxu1 %v15906_v61  ;;  %15013 = vmatpush3.bf16.msra.mxu0 %v15907_v10  ;;  %v15931_v61 = vld [vmem:[%s16677_s9 + $0xa08] sm:$0xff]   ;;  %v15933_v10 = vld [vmem:[%s16677_s9 + $0xa00] sm:$0xff]  }
 0x6e4   : > { %14874 = vmatprep.subr.bf16.mxu1 %v21980_v8  ;;  %15014 = vmatprep.subr.bf16.mxu0 %v21980_v8 }
 0x6e7   : > { %14875 = vmatpush3.bf16.msra.mxu1 %v15908_v26  ;;  %15015 = vmatpush3.bf16.msra.mxu0 %v15909_v2  ;;  %v12741_v26 = vpack.c.bf16 %v19777_v40, %v19777_v40  ;;  %v15935_v2 = vld [vmem:[%s16677_s9 + $0xab8] sm:$0xff]   ;;  %v15936_v40 = vld [vmem:[%s16677_s9 + $0x8f0] sm:$0xff]  }
 0x6e8   : > { %14876 = vmatprep.subr.bf16.mxu1 %v21980_v8  ;;  %15016 = vmatprep.subr.bf16.mxu0 %v21980_v8 }
 0x6eb   : > { %14877 = vmatpush3.bf16.msra.mxu1 %v15910_v27  ;;  %15017 = vmatpush3.bf16.msra.mxu0 %v15911_v45  ;;  %v12748_v27 = vpack.c.bf16 %v19798_v28, %v19798_v28 }
 0x6ec   : > { %14878 = vmatprep.subr.bf16.mxu1 %v21980_v8  ;;  %15018 = vmatprep.subr.bf16.mxu0 %v21980_v8 }
 0x6ef   : > { %14879 = vmatpush3.bf16.msra.mxu1 %v15912_v3  ;;  %15019 = vmatpush3.bf16.msra.mxu0 %v15913_v20 }
 0x6f0   : > { %14880 = vmatprep.subr.bf16.mxu1 %v21980_v8  ;;  %15020 = vmatprep.subr.bf16.mxu0 %v21980_v8 }
 0x6f3   : > { %14881 = vmatpush3.bf16.msra.mxu1 %v15914_v1  ;;  %15021 = vmatpush3.bf16.msra.mxu0 %v15915_v51 }
 0x6f4   : > { %14882 = vmatprep.subr.bf16.mxu1 %v21980_v8  ;;  %15022 = vmatprep.subr.bf16.mxu0 %v21980_v8 }
 0x6f7   : > { %14883 = vmatpush3.bf16.msra.mxu1 %v15916_v62  ;;  %15023 = vmatpush3.bf16.msra.mxu0 %v15917_v21  ;;  %v15937_v62 = vld [vmem:[%s16677_s9 + $0xab0] sm:$0xff]  }
 0x6f8   : > { %14908 = vmatprep.subr.bf16.mxu1 %v21980_v8  ;;  %15048 = vmatprep.subr.bf16.mxu0 %v21980_v8 }
 0x6fa   : > { %v7572_v47 = vpop.f32.mrf.mxu1  ;;  %14885 = vmatmul.mubr.bf16.vlgmr.msra.gmra.mxu1 %v12739_v48  ;;  %v20593_v33 = vpop.f32.mrf.mxu0  ;;  %15025 = vmatmul.mubr.bf16.vlgmr.msra.gmra.mxu0 %v12746_v63 }
 0x6fb   : > { %v11468_v6 = vadd.f32 %v11467_v9, %v7572_v47  ;;  %14909 = vmatpush3.bf16.msra.mxu1 %v15918_v25  ;;  %15049 = vmatpush3.bf16.msra.mxu0 %v15919_v35  ;;  %v15938_v25 = vld [vmem:[%s16677_s9 + $0x8e8] sm:$0xff]   ;;  %v15940_v9 = vld [vmem:[%s16677_s9 + $0x8e0] sm:$0xff]  }
 0x6fc   : > { %v14646_v50 = vpop.f32.mrf.mxu1  ;;  %14910 = vmatprep.subr.bf16.mxu1 %v21980_v8  ;;  %v14786_v37 = vpop.f32.mrf.mxu0  ;;  %15050 = vmatprep.subr.bf16.mxu0 %v21980_v8  ;;  %v15939_v35 = vld [vmem:[%s16677_s9 + $0xaa8] sm:$0xff]   ;;  %v15941_v47 = vld [vmem:[%s16677_s9 + $0xaa0] sm:$0xff]  }
 0x6fd   : > { %14924 = vmatprep.mubr.msk.bf16.mxu1 %vm16385_vm1, %v21980_v8  ;;  %15064 = vmatprep.mubr.msk.bf16.mxu0 %vm16385_vm1, %v21980_v8  ;;  %v11469_v45 = vadd.f32 %v11468_v6, %v20464_v16  ;;  %v15942_v6 = vld [vmem:[%s16677_s9 + $0x8d8] sm:$0xff]   ;;  %v15944_v50 = vld [vmem:[%s16677_s9 + $0x8d0] sm:$0xff]   ;;  %v15946_v37 = vld [vmem:[%s16677_s9 + $0x8c8] sm:$0xff]  }
 0x6fe   : > { %v7575_v15 = vpop.f32.mrf.mxu1  ;;  %v8191_v24 = vpop.f32.mrf.mxu0 }
 0x6ff   : > { %14911 = vmatpush3.bf16.msra.mxu1 %v15920_v55  ;;  %15051 = vmatpush3.bf16.msra.mxu0 %v15921_v7  ;;  %v15943_v55 = vld [vmem:[%s16677_s9 + $0xa98] sm:$0xff]   ;;  %v15945_v7 = vld [vmem:[%s16677_s9 + $0xa90] sm:$0xff]   ;;  %v15947_v15 = vld [vmem:[%s16677_s9 + $0xa88] sm:$0xff]  }
 0x700   : > { %v14647_v11 = vpop.f32.mrf.mxu1  ;;  %14912 = vmatprep.subr.bf16.mxu1 %v21980_v8  ;;  %v14787_v44 = vpop.f32.mrf.mxu0  ;;  %15052 = vmatprep.subr.bf16.mxu0 %v21980_v8  ;;  %v15948_v24 = vld [vmem:[%s16677_s9 + $0x8c0] sm:$0xff]  }
 0x701   : > { %v15950_v11 = vld [vmem:[%s16677_s9 + $0x978] sm:$0xff]  }
 0x702   : > { %v15951_v44 = vld [vmem:[%s16677_s9 + $0xb38] sm:$0xff]  }
 0x703   : > { %14913 = vmatpush3.bf16.msra.mxu1 %v15922_v18  ;;  %15053 = vmatpush3.bf16.msra.mxu0 %v15923_v5  ;;  %v15949_v18 = vld [vmem:[%s16677_s9 + $0xa80] sm:$0xff]   ;;  %v12743_v5 = vpack.c.bf16 %v19783_v39, %v19783_v39  ;;  %v15952_v39 = vld [vmem:[%s16677_s9 + $0x970] sm:$0xff]  }
 0x704   : > { %14914 = vmatprep.subr.bf16.mxu1 %v21980_v8  ;;  %15054 = vmatprep.subr.bf16.mxu0 %v21980_v8 }
 0x707   : > { %14915 = vmatpush3.bf16.msra.mxu1 %v15924_v36  ;;  %15055 = vmatpush3.bf16.msra.mxu0 %v15925_v49  ;;  %v12750_v36 = vpack.c.bf16 %v19804_v22, %v19804_v22 }
 0x708   : > { %14916 = vmatprep.subr.bf16.mxu1 %v21980_v8  ;;  %15056 = vmatprep.subr.bf16.mxu0 %v21980_v8 }
 0x70b   : > { %14917 = vmatpush3.bf16.msra.mxu1 %v15926_v34  ;;  %15057 = vmatpush3.bf16.msra.mxu0 %v15927_v58 }
 0x70c   : > { %14918 = vmatprep.subr.bf16.mxu1 %v21980_v8  ;;  %15058 = vmatprep.subr.bf16.mxu0 %v21980_v8 }
 0x70f   : > { %14919 = vmatpush3.bf16.msra.mxu1 %v15928_v42  ;;  %15059 = vmatpush3.bf16.msra.mxu0 %v15929_v46 }
 0x710   : > { %14920 = vmatprep.subr.bf16.mxu1 %v21980_v8  ;;  %15060 = vmatprep.subr.bf16.mxu0 %v21980_v8 }
 0x713   : > { %14921 = vmatpush3.bf16.msra.mxu1 %v15930_v57  ;;  %15061 = vmatpush3.bf16.msra.mxu0 %v15931_v61  ;;  %v15953_v57 = vld [vmem:[%s16677_s9 + $0xb30] sm:$0xff]  }
 0x714   : > { %14922 = vmatprep.subr.bf16.mxu1 %v21980_v8  ;;  %15062 = vmatprep.subr.bf16.mxu0 %v21980_v8 }
 0x717   : > { %14923 = vmatpush3.bf16.msra.mxu1 %v15932_v0  ;;  %15063 = vmatpush3.bf16.msra.mxu0 %v15933_v10  ;;  %v15954_v0 = vld [vmem:[%s16677_s9 + $0x968] sm:$0xff]  }
 0x718   : > { %14948 = vmatprep.subr.bf16.mxu1 %v21980_v8  ;;  %15088 = vmatprep.subr.bf16.mxu0 %v21980_v8 }
 0x71a   : > { %v7748_v3 = vpop.f32.mrf.mxu1  ;;  %14925 = vmatmul.mubr.bf16.vlgmr.msra.gmra.mxu1 %v12741_v26  ;;  %v20636_v1 = vpop.f32.mrf.mxu0  ;;  %15065 = vmatmul.mubr.bf16.vlgmr.msra.gmra.mxu0 %v12748_v27  ;;  %v15957_v27 = vld [vmem:[%s16677_s9 + $0xb20] sm:$0xff]  }
 0x71b   : > { %v11470_v20 = vadd.f32 %v11469_v45, %v7748_v3  ;;  %14949 = vmatpush3.bf16.msra.mxu1 %v15934_v54  ;;  %15089 = vmatpush3.bf16.msra.mxu0 %v15935_v2  ;;  %v15955_v54 = vld [vmem:[%s16677_s9 + $0xb28] sm:$0xff]   ;;  %v15956_v2 = vld [vmem:[%s16677_s9 + $0x960] sm:$0xff]   ;;  %v15958_v45 = vld [vmem:[%s16677_s9 + $0x958] sm:$0xff]  }
 0x71c   : > { %v14686_v51 = vpop.f32.mrf.mxu1  ;;  %14950 = vmatprep.subr.bf16.mxu1 %v21980_v8  ;;  %v14826_v28 = vpop.f32.mrf.mxu0  ;;  %15090 = vmatprep.subr.bf16.mxu0 %v21980_v8  ;;  %v15959_v3 = vld [vmem:[%s16677_s9 + $0xb18] sm:$0xff]  }
 0x71d   : > { %14964 = vmatprep.mubr.msk.bf16.mxu1 %vm16385_vm1, %v21980_v8  ;;  %15104 = vmatprep.mubr.msk.bf16.mxu0 %vm16385_vm1, %v21980_v8  ;;  %v11471_v49 = vadd.f32 %v11470_v20, %v20507_v43  ;;  %v15960_v20 = vld [vmem:[%s16677_s9 + $0x950] sm:$0xff]   ;;  %v15962_v51 = vld [vmem:[%s16677_s9 + $0x948] sm:$0xff]   ;;  %v15964_v28 = vld [vmem:[%s16677_s9 + $0x940] sm:$0xff]  }
 0x71e   : > { %v7751_v16 = vpop.f32.mrf.mxu1  ;;  %v8367_v21 = vpop.f32.mrf.mxu0 }
 0x71f   : > { %14951 = vmatpush3.bf16.msra.mxu1 %v15936_v40  ;;  %15091 = vmatpush3.bf16.msra.mxu0 %v15937_v62  ;;  %v15961_v40 = vld [vmem:[%s16677_s9 + $0xb10] sm:$0xff]   ;;  %v15963_v62 = vld [vmem:[%s16677_s9 + $0xb08] sm:$0xff]   ;;  %v15965_v16 = vld [vmem:[%s16677_s9 + $0xb00] sm:$0xff]  }
 0x720   : > { %v14687_v48 = vpop.f32.mrf.mxu1  ;;  %14952 = vmatprep.subr.bf16.mxu1 %v21980_v8  ;;  %v14827_v63 = vpop.f32.mrf.mxu0  ;;  %15092 = vmatprep.subr.bf16.mxu0 %v21980_v8  ;;  %v15966_v21 = vld [vmem:[%s16677_s9 + $0x9f8] sm:$0xff]  }
 0x721   : > { %v15967_v48 = vld [vmem:[%s16677_s9 + $0xbb8] sm:$0xff]  }
 0x723   : > { %14953 = vmatpush3.bf16.msra.mxu1 %v15938_v25  ;;  %15093 = vmatpush3.bf16.msra.mxu0 %v15939_v35  ;;  %v12745_v25 = vpack.c.bf16 %v19789_v56, %v19789_v56  ;;  %v12752_v35 = vpack.c.bf16 %v19810_v41, %v19810_v41  ;;  %v15968_v56 = vld [vmem:[%s16677_s9 + $0x9f0] sm:$0xff]  }
 0x724   : > { %14954 = vmatprep.subr.bf16.mxu1 %v21980_v8  ;;  %15094 = vmatprep.subr.bf16.mxu0 %v21980_v8 }
 0x727   : > { %14955 = vmatpush3.bf16.msra.mxu1 %v15940_v9  ;;  %15095 = vmatpush3.bf16.msra.mxu0 %v15941_v47 }
 0x728   : > { %14956 = vmatprep.subr.bf16.mxu1 %v21980_v8  ;;  %15096 = vmatprep.subr.bf16.mxu0 %v21980_v8 }
 0x72b   : > { %14957 = vmatpush3.bf16.msra.mxu1 %v15942_v6  ;;  %15097 = vmatpush3.bf16.msra.mxu0 %v15943_v55 }
 0x72c   : > { %14958 = vmatprep.subr.bf16.mxu1 %v21980_v8  ;;  %15098 = vmatprep.subr.bf16.mxu0 %v21980_v8 }
 0x72f   : > { %14959 = vmatpush3.bf16.msra.mxu1 %v15944_v50  ;;  %15099 = vmatpush3.bf16.msra.mxu0 %v15945_v7  ;;  %v15969_v50 = vld [vmem:[%s16677_s9 + $0xbb0] sm:$0xff]  }
 0x730   : > { %14960 = vmatprep.subr.bf16.mxu1 %v21980_v8  ;;  %15100 = vmatprep.subr.bf16.mxu0 %v21980_v8 }
 0x733   : > { %14961 = vmatpush3.bf16.msra.mxu1 %v15946_v37  ;;  %15101 = vmatpush3.bf16.msra.mxu0 %v15947_v15  ;;  %v15970_v37 = vld [vmem:[%s16677_s9 + $0x9e8] sm:$0xff]  }
 0x734   : > { %14962 = vmatprep.subr.bf16.mxu1 %v21980_v8  ;;  %15102 = vmatprep.subr.bf16.mxu0 %v21980_v8 }
 0x737   : > { %14963 = vmatpush3.bf16.msra.mxu1 %v15948_v24  ;;  %15103 = vmatpush3.bf16.msra.mxu0 %v15949_v18  ;;  %v15971_v24 = vld [vmem:[%s16677_s9 + $0xba8] sm:$0xff]  }
 0x738   : > { %14988 = vmatprep.subr.bf16.mxu1 %v21980_v8  ;;  %15128 = vmatprep.subr.bf16.mxu0 %v21980_v8 }
 0x73a   : > { %v7924_v34 = vpop.f32.mrf.mxu1  ;;  %14965 = vmatmul.mubr.bf16.vlgmr.msra.gmra.mxu1 %v12743_v5  ;;  %v20679_v42 = vpop.f32.mrf.mxu0  ;;  %15105 = vmatmul.mubr.bf16.vlgmr.msra.gmra.mxu0 %v12750_v36  ;;  %v15973_v5 = vld [vmem:[%s16677_s9 + $0xba0] sm:$0xff]   ;;  %v15975_v36 = vld [vmem:[%s16677_s9 + $0xb98] sm:$0xff]  }
 0x73b   : > { %v11472_v58 = vadd.f32 %v11471_v49, %v7924_v34  ;;  %14989 = vmatpush3.bf16.msra.mxu1 %v15950_v11  ;;  %15129 = vmatpush3.bf16.msra.mxu0 %v15951_v44  ;;  %v15972_v11 = vld [vmem:[%s16677_s9 + $0x9e0] sm:$0xff]   ;;  %v15974_v44 = vld [vmem:[%s16677_s9 + $0x9d8] sm:$0xff]   ;;  %v15976_v49 = vld [vmem:[%s16677_s9 + $0x9d0] sm:$0xff]  }
 0x73c   : > { %v14726_v46 = vpop.f32.mrf.mxu1  ;;  %14990 = vmatprep.subr.bf16.mxu1 %v21980_v8  ;;  %v14866_v22 = vpop.f32.mrf.mxu0  ;;  %15130 = vmatprep.subr.bf16.mxu0 %v21980_v8  ;;  %v15977_v34 = vld [vmem:[%s16677_s9 + $0xb90] sm:$0xff]  }
 0x73d   : > { %15004 = vmatprep.mubr.msk.bf16.mxu1 %vm16385_vm1, %v21980_v8  ;;  %15144 = vmatprep.mubr.msk.bf16.mxu0 %vm16385_vm1, %v21980_v8  ;;  %v11473_v63 = vadd.f32 %v11472_v58, %v20550_v14  ;;  %v15978_v58 = vld [vmem:[%s16677_s9 + $0x9c8] sm:$0xff]   ;;  %v15980_v46 = vld [vmem:[%s16677_s9 + $0x9c0] sm:$0xff]   ;;  %v15982_v22 = vld [vmem:[%s16677_s9 + $0xa78] sm:$0xff]  }
 0x73e   : > { %v7927_v43 = vpop.f32.mrf.mxu1  ;;  %v8543_v61 = vpop.f32.mrf.mxu0 }
 0x73f   : > { %14991 = vmatpush3.bf16.msra.mxu1 %v15952_v39  ;;  %15131 = vmatpush3.bf16.msra.mxu0 %v15953_v57  ;;  %v15979_v39 = vld [vmem:[%s16677_s9 + $0xb88] sm:$0xff]   ;;  %v15981_v57 = vld [vmem:[%s16677_s9 + $0xb80] sm:$0xff]   ;;  %v12747_v43 = vpack.c.bf16 %v19795_v32, %v19795_v32  ;;  %v15983_v61 = vld [vmem:[%s16677_s9 + $0xc38] sm:$0xff]  }
 0x740   : > { %v14727_v10 = vpop.f32.mrf.mxu1  ;;  %14992 = vmatprep.subr.bf16.mxu1 %v21980_v8  ;;  %v14867_v26 = vpop.f32.mrf.mxu0  ;;  %15132 = vmatprep.subr.bf16.mxu0 %v21980_v8  ;;  %v15984_v32 = vld [vmem:[%s16677_s9 + $0xa70] sm:$0xff]  }
 0x743   : > { %14993 = vmatpush3.bf16.msra.mxu1 %v15954_v0  ;;  %15133 = vmatpush3.bf16.msra.mxu0 %v15955_v54  ;;  %v12754_v0 = vpack.c.bf16 %v19816_v29, %v19816_v29 }
 0x744   : > { %14994 = vmatprep.subr.bf16.mxu1 %v21980_v8  ;;  %15134 = vmatprep.subr.bf16.mxu0 %v21980_v8 }
 0x747   : > { %14995 = vmatpush3.bf16.msra.mxu1 %v15956_v2  ;;  %15135 = vmatpush3.bf16.msra.mxu0 %v15957_v27 }
 0x748   : > { %14996 = vmatprep.subr.bf16.mxu1 %v21980_v8  ;;  %15136 = vmatprep.subr.bf16.mxu0 %v21980_v8 }
 0x74b   : > { %14997 = vmatpush3.bf16.msra.mxu1 %v15958_v45  ;;  %15137 = vmatpush3.bf16.msra.mxu0 %v15959_v3  ;;  %v15985_v45 = vld [vmem:[%s16677_s9 + $0xc30] sm:$0xff]  }
 0x74c   : > { %14998 = vmatprep.subr.bf16.mxu1 %v21980_v8  ;;  %15138 = vmatprep.subr.bf16.mxu0 %v21980_v8 }
 0x74f   : > { %14999 = vmatpush3.bf16.msra.mxu1 %v15960_v20  ;;  %15139 = vmatpush3.bf16.msra.mxu0 %v15961_v40  ;;  %v15986_v20 = vld [vmem:[%s16677_s9 + $0xa68] sm:$0xff]  }
 0x750   : > { %15000 = vmatprep.subr.bf16.mxu1 %v21980_v8  ;;  %15140 = vmatprep.subr.bf16.mxu0 %v21980_v8 }
 0x753   : > { %15001 = vmatpush3.bf16.msra.mxu1 %v15962_v51  ;;  %15141 = vmatpush3.bf16.msra.mxu0 %v15963_v62  ;;  %v15987_v51 = vld [vmem:[%s16677_s9 + $0xc28] sm:$0xff]  }
 0x754   : > { %15002 = vmatprep.subr.bf16.mxu1 %v21980_v8  ;;  %15142 = vmatprep.subr.bf16.mxu0 %v21980_v8 }
 0x757   : > { %15003 = vmatpush3.bf16.msra.mxu1 %v15964_v28  ;;  %15143 = vmatpush3.bf16.msra.mxu0 %v15965_v16  ;;  %v15988_v28 = vld [vmem:[%s16677_s9 + $0xa60] sm:$0xff]  }
 0x758   : > { %15028 = vmatprep.subr.bf16.mxu1 %v21980_v8  ;;  %15168 = vmatprep.subr.bf16.mxu0 %v21980_v8  ;;  %v15989_v16 = vld [vmem:[%s16677_s9 + $0xc20] sm:$0xff]  }
 0x75a   : > { %v8100_v9 = vpop.f32.mrf.mxu1  ;;  %15005 = vmatmul.mubr.bf16.vlgmr.msra.gmra.mxu1 %v12745_v25  ;;  %v20722_v6 = vpop.f32.mrf.mxu0  ;;  %15145 = vmatmul.mubr.bf16.vlgmr.msra.gmra.mxu0 %v12752_v35  ;;  %v15991_v25 = vld [vmem:[%s16677_s9 + $0xc18] sm:$0xff]   ;;  %v15993_v35 = vld [vmem:[%s16677_s9 + $0xc10] sm:$0xff]  }
 0x75b   : > { %v11474_v47 = vadd.f32 %v11473_v63, %v8100_v9  ;;  %15029 = vmatpush3.bf16.msra.mxu1 %v15966_v21  ;;  %15169 = vmatpush3.bf16.msra.mxu0 %v15967_v48  ;;  %v15990_v21 = vld [vmem:[%s16677_s9 + $0xa58] sm:$0xff]   ;;  %v15992_v48 = vld [vmem:[%s16677_s9 + $0xa50] sm:$0xff]   ;;  %v15994_v63 = vld [vmem:[%s16677_s9 + $0xa48] sm:$0xff]  }
 0x75c   : > { %v14766_v55 = vpop.f32.mrf.mxu1  ;;  %15030 = vmatprep.subr.bf16.mxu1 %v21980_v8  ;;  %v14906_v41 = vpop.f32.mrf.mxu0  ;;  %15170 = vmatprep.subr.bf16.mxu0 %v21980_v8  ;;  %v15995_v9 = vld [vmem:[%s16677_s9 + $0xc08] sm:$0xff]  }
 0x75d   : > { %15044 = vmatprep.mubr.msk.bf16.mxu1 %vm16385_vm1, %v21980_v8  ;;  %15184 = vmatprep.mubr.msk.bf16.mxu0 %vm16385_vm1, %v21980_v8  ;;  %v11475_v10 = vadd.f32 %v11474_v47, %v20593_v33  ;;  %v15996_v47 = vld [vmem:[%s16677_s9 + $0xa40] sm:$0xff]   ;;  %v15998_v55 = vld [vmem:[%s16677_s9 + $0xaf8] sm:$0xff]  }
 0x75e   : > { %v8103_v14 = vpop.f32.mrf.mxu1  ;;  %v8719_v7 = vpop.f32.mrf.mxu0  ;;  %v15999_v41 = vld [vmem:[%s16677_s9 + $0xcb8] sm:$0xff]  }
 0x75f   : > { %15031 = vmatpush3.bf16.msra.mxu1 %v15968_v56  ;;  %15171 = vmatpush3.bf16.msra.mxu0 %v15969_v50  ;;  %v15997_v56 = vld [vmem:[%s16677_s9 + $0xc00] sm:$0xff]   ;;  %v12749_v50 = vpack.c.bf16 %v19801_v59, %v19801_v59  ;;  %v12756_v14 = vpack.c.bf16 %v19822_v4, %v19822_v4  ;;  %v16000_v59 = vld [vmem:[%s16677_s9 + $0xaf0] sm:$0xff]  }
 0x760   : > { %v14767_v15 = vpop.f32.mrf.mxu1  ;;  %15032 = vmatprep.subr.bf16.mxu1 %v21980_v8  ;;  %v14907_v18 = vpop.f32.mrf.mxu0  ;;  %15172 = vmatprep.subr.bf16.mxu0 %v21980_v8 }
 0x763   : > { %15033 = vmatpush3.bf16.msra.mxu1 %v15970_v37  ;;  %15173 = vmatpush3.bf16.msra.mxu0 %v15971_v24 }
 0x764   : > { %15034 = vmatprep.subr.bf16.mxu1 %v21980_v8  ;;  %15174 = vmatprep.subr.bf16.mxu0 %v21980_v8 }
 0x767   : > { %15035 = vmatpush3.bf16.msra.mxu1 %v15972_v11  ;;  %15175 = vmatpush3.bf16.msra.mxu0 %v15973_v5  ;;  %v16001_v11 = vld [vmem:[%s16677_s9 + $0xcb0] sm:$0xff]  }
 0x768   : > { %15036 = vmatprep.subr.bf16.mxu1 %v21980_v8  ;;  %15176 = vmatprep.subr.bf16.mxu0 %v21980_v8 }
 0x76b   : > { %15037 = vmatpush3.bf16.msra.mxu1 %v15974_v44  ;;  %15177 = vmatpush3.bf16.msra.mxu0 %v15975_v36  ;;  %v16002_v44 = vld [vmem:[%s16677_s9 + $0xae8] sm:$0xff]  }
 0x76c   : > { %15038 = vmatprep.subr.bf16.mxu1 %v21980_v8  ;;  %15178 = vmatprep.subr.bf16.mxu0 %v21980_v8 }
 0x76f   : > { %15039 = vmatpush3.bf16.msra.mxu1 %v15976_v49  ;;  %15179 = vmatpush3.bf16.msra.mxu0 %v15977_v34  ;;  %v16003_v49 = vld [vmem:[%s16677_s9 + $0xca8] sm:$0xff]  }
 0x770   : > { %15040 = vmatprep.subr.bf16.mxu1 %v21980_v8  ;;  %15180 = vmatprep.subr.bf16.mxu0 %v21980_v8 }
 0x773   : > { %15041 = vmatpush3.bf16.msra.mxu1 %v15978_v58  ;;  %15181 = vmatpush3.bf16.msra.mxu0 %v15979_v39  ;;  %v16004_v58 = vld [vmem:[%s16677_s9 + $0xae0] sm:$0xff]  }
 0x774   : > { %15042 = vmatprep.subr.bf16.mxu1 %v21980_v8  ;;  %15182 = vmatprep.subr.bf16.mxu0 %v21980_v8  ;;  %v16005_v39 = vld [vmem:[%s16677_s9 + $0xca0] sm:$0xff]  }
 0x777   : > { %15043 = vmatpush3.bf16.msra.mxu1 %v15980_v46  ;;  %15183 = vmatpush3.bf16.msra.mxu0 %v15981_v57  ;;  %v16006_v46 = vld [vmem:[%s16677_s9 + $0xad8] sm:$0xff]  }
 0x778   : > { %15068 = vmatprep.subr.bf16.mxu1 %v21980_v8  ;;  %15208 = vmatprep.subr.bf16.mxu0 %v21980_v8  ;;  %v16007_v57 = vld [vmem:[%s16677_s9 + $0xc98] sm:$0xff]  }
 0x77a   : > { %v8276_v54 = vpop.f32.mrf.mxu1  ;;  %15045 = vmatmul.mubr.bf16.vlgmr.msra.gmra.mxu1 %v12747_v43  ;;  %v20765_v2 = vpop.f32.mrf.mxu0  ;;  %15185 = vmatmul.mubr.bf16.vlgmr.msra.gmra.mxu0 %v12754_v0  ;;  %v16009_v43 = vld [vmem:[%s16677_s9 + $0xc90] sm:$0xff]   ;;  %v16011_v0 = vld [vmem:[%s16677_s9 + $0xc88] sm:$0xff]  }
 0x77b   : > { %v11476_v26 = vadd.f32 %v11475_v10, %v8276_v54  ;;  %15069 = vmatpush3.bf16.msra.mxu1 %v15982_v22  ;;  %15209 = vmatpush3.bf16.msra.mxu0 %v15983_v61  ;;  %v16008_v22 = vld [vmem:[%s16677_s9 + $0xad0] sm:$0xff]   ;;  %v16010_v61 = vld [vmem:[%s16677_s9 + $0xac8] sm:$0xff]   ;;  %v16012_v10 = vld [vmem:[%s16677_s9 + $0xac0] sm:$0xff]  }
 0x77c   : > { %v14806_v27 = vpop.f32.mrf.mxu1  ;;  %15070 = vmatprep.subr.bf16.mxu1 %v21980_v8  ;;  %v14946_v29 = vpop.f32.mrf.mxu0  ;;  %15210 = vmatprep.subr.bf16.mxu0 %v21980_v8  ;;  %v16013_v54 = vld [vmem:[%s16677_s9 + $0xc80] sm:$0xff]  }
 0x77d   : > { %15084 = vmatprep.mubr.msk.bf16.mxu1 %vm16385_vm1, %v21980_v8  ;;  %15224 = vmatprep.mubr.msk.bf16.mxu0 %vm16385_vm1, %v21980_v8  ;;  %v11477_v7 = vadd.f32 %v11476_v26, %v20636_v1  ;;  %v16014_v26 = vld [vmem:[%s16677_s9 + $0xb78] sm:$0xff]  }
 0x77e   : > { %v8279_v33 = vpop.f32.mrf.mxu1  ;;  %v8895_v3 = vpop.f32.mrf.mxu0  ;;  %v16015_v27 = vld [vmem:[%s16677_s9 + $0xd38] sm:$0xff]  }
 0x77f   : > { %15071 = vmatpush3.bf16.msra.mxu1 %v15984_v32  ;;  %15211 = vmatpush3.bf16.msra.mxu0 %v15985_v45  ;;  %v12751_v32 = vpack.c.bf16 %v19807_v12, %v19807_v12  ;;  %v12758_v45 = vpack.c.bf16 %v19828_v19, %v19828_v19  ;;  %v16016_v12 = vld [vmem:[%s16677_s9 + $0xb70] sm:$0xff]  }
 0x780   : > { %v14807_v40 = vpop.f32.mrf.mxu1  ;;  %15072 = vmatprep.subr.bf16.mxu1 %v21980_v8  ;;  %v14947_v62 = vpop.f32.mrf.mxu0  ;;  %15212 = vmatprep.subr.bf16.mxu0 %v21980_v8 }
 0x783   : > { %15073 = vmatpush3.bf16.msra.mxu1 %v15986_v20  ;;  %15213 = vmatpush3.bf16.msra.mxu0 %v15987_v51  ;;  %v16017_v51 = vld [vmem:[%s16677_s9 + $0xd30] sm:$0xff]  }
 0x784   : > { %15074 = vmatprep.subr.bf16.mxu1 %v21980_v8  ;;  %15214 = vmatprep.subr.bf16.mxu0 %v21980_v8 }
 0x787   : > { %15075 = vmatpush3.bf16.msra.mxu1 %v15988_v28  ;;  %15215 = vmatpush3.bf16.msra.mxu0 %v15989_v16  ;;  %v16018_v28 = vld [vmem:[%s16677_s9 + $0xb68] sm:$0xff]  }
 0x788   : > { %15076 = vmatprep.subr.bf16.mxu1 %v21980_v8  ;;  %15216 = vmatprep.subr.bf16.mxu0 %v21980_v8 }
 0x78b   : > { %15077 = vmatpush3.bf16.msra.mxu1 %v15990_v21  ;;  %15217 = vmatpush3.bf16.msra.mxu0 %v15991_v25  ;;  %v16019_v21 = vld [vmem:[%s16677_s9 + $0xd28] sm:$0xff]  }
 0x78c   : > { %15078 = vmatprep.subr.bf16.mxu1 %v21980_v8  ;;  %15218 = vmatprep.subr.bf16.mxu0 %v21980_v8 }
 0x78f   : > { %15079 = vmatpush3.bf16.msra.mxu1 %v15992_v48  ;;  %15219 = vmatpush3.bf16.msra.mxu0 %v15993_v35  ;;  %v16020_v48 = vld [vmem:[%s16677_s9 + $0xb60] sm:$0xff]  }
 0x790   : > { %15080 = vmatprep.subr.bf16.mxu1 %v21980_v8  ;;  %15220 = vmatprep.subr.bf16.mxu0 %v21980_v8  ;;  %v16021_v35 = vld [vmem:[%s16677_s9 + $0xd20] sm:$0xff]  }
 0x793   : > { %15081 = vmatpush3.bf16.msra.mxu1 %v15994_v63  ;;  %15221 = vmatpush3.bf16.msra.mxu0 %v15995_v9  ;;  %v16022_v63 = vld [vmem:[%s16677_s9 + $0xb58] sm:$0xff]  }
 0x794   : > { %15082 = vmatprep.subr.bf16.mxu1 %v21980_v8  ;;  %15222 = vmatprep.subr.bf16.mxu0 %v21980_v8  ;;  %v16023_v9 = vld [vmem:[%s16677_s9 + $0xd18] sm:$0xff]  }
 0x797   : > { %15083 = vmatpush3.bf16.msra.mxu1 %v15996_v47  ;;  %15223 = vmatpush3.bf16.msra.mxu0 %v15997_v56  ;;  %v16024_v47 = vld [vmem:[%s16677_s9 + $0xb50] sm:$0xff]  }
 0x798   : > { %15108 = vmatprep.subr.bf16.mxu1 %v21980_v8  ;;  %15248 = vmatprep.subr.bf16.mxu0 %v21980_v8  ;;  %v16025_v56 = vld [vmem:[%s16677_s9 + $0xd10] sm:$0xff]  }
 0x79a   : > { %v8452_v37 = vpop.f32.mrf.mxu1  ;;  %15085 = vmatmul.mubr.bf16.vlgmr.msra.gmra.mxu1 %v12749_v50  ;;  %v20808_v24 = vpop.f32.mrf.mxu0  ;;  %15225 = vmatmul.mubr.bf16.vlgmr.msra.gmra.mxu0 %v12756_v14  ;;  %v16027_v50 = vld [vmem:[%s16677_s9 + $0xd08] sm:$0xff]   ;;  %v16029_v14 = vld [vmem:[%s16677_s9 + $0xd00] sm:$0xff]  }
 0x79b   : > { %v11478_v15 = vadd.f32 %v11477_v7, %v8452_v37  ;;  %15109 = vmatpush3.bf16.msra.mxu1 %v15998_v55  ;;  %15249 = vmatpush3.bf16.msra.mxu0 %v15999_v41  ;;  %v16026_v55 = vld [vmem:[%s16677_s9 + $0xb48] sm:$0xff]   ;;  %v16028_v41 = vld [vmem:[%s16677_s9 + $0xb40] sm:$0xff]   ;;  %v16030_v7 = vld [vmem:[%s16677_s9 + $0xbf8] sm:$0xff]   ;;  %v12753_v37 = vpack.c.bf16 %v19813_v52, %v19813_v52 }
 0x79c   : > { %v14846_v18 = vpop.f32.mrf.mxu1  ;;  %15110 = vmatprep.subr.bf16.mxu1 %v21980_v8  ;;  %v14986_v4 = vpop.f32.mrf.mxu0  ;;  %15250 = vmatprep.subr.bf16.mxu0 %v21980_v8  ;;  %v16032_v52 = vld [vmem:[%s16677_s9 + $0xbf0] sm:$0xff]  }
 0x79d   : > { %15124 = vmatprep.mubr.msk.bf16.mxu1 %vm16385_vm1, %v21980_v8  ;;  %15264 = vmatprep.mubr.msk.bf16.mxu0 %vm16385_vm1, %v21980_v8  ;;  %v11479_v29 = vadd.f32 %v11478_v15, %v20679_v42  ;;  %v16031_v15 = vld [vmem:[%s16677_s9 + $0xdb8] sm:$0xff]  }
 0x79e   : > { %v8455_v1 = vpop.f32.mrf.mxu1  ;;  %v9071_v5 = vpop.f32.mrf.mxu0 }
 0x79f   : > { %15111 = vmatpush3.bf16.msra.mxu1 %v16000_v59  ;;  %15251 = vmatpush3.bf16.msra.mxu0 %v16001_v11  ;;  %v12760_v59 = vpack.c.bf16 %v19834_v38, %v19834_v38 }
 0x7a0   : > { %v14847_v36 = vpop.f32.mrf.mxu1  ;;  %15112 = vmatprep.subr.bf16.mxu1 %v21980_v8  ;;  %v14987_v34 = vpop.f32.mrf.mxu0  ;;  %15252 = vmatprep.subr.bf16.mxu0 %v21980_v8 }
 0x7a3   : > { %15113 = vmatpush3.bf16.msra.mxu1 %v16002_v44  ;;  %15253 = vmatpush3.bf16.msra.mxu0 %v16003_v49  ;;  %v16033_v44 = vld [vmem:[%s16677_s9 + $0xdb0] sm:$0xff]   ;;  %v16034_v49 = vld [vmem:[%s16677_s9 + $0xbe8] sm:$0xff]  }
 0x7a4   : > { %15114 = vmatprep.subr.bf16.mxu1 %v21980_v8  ;;  %15254 = vmatprep.subr.bf16.mxu0 %v21980_v8 }
 0x7a7   : > { %15115 = vmatpush3.bf16.msra.mxu1 %v16004_v58  ;;  %15255 = vmatpush3.bf16.msra.mxu0 %v16005_v39  ;;  %v16035_v58 = vld [vmem:[%s16677_s9 + $0xda8] sm:$0xff]  }
 0x7a8   : > { %15116 = vmatprep.subr.bf16.mxu1 %v21980_v8  ;;  %15256 = vmatprep.subr.bf16.mxu0 %v21980_v8 }
 0x7ab   : > { %15117 = vmatpush3.bf16.msra.mxu1 %v16006_v46  ;;  %15257 = vmatpush3.bf16.msra.mxu0 %v16007_v57  ;;  %v16036_v46 = vld [vmem:[%s16677_s9 + $0xbe0] sm:$0xff]  }
 0x7ac   : > { %15118 = vmatprep.subr.bf16.mxu1 %v21980_v8  ;;  %15258 = vmatprep.subr.bf16.mxu0 %v21980_v8  ;;  %v16037_v57 = vld [vmem:[%s16677_s9 + $0xda0] sm:$0xff]  }
 0x7af   : > { %15119 = vmatpush3.bf16.msra.mxu1 %v16008_v22  ;;  %15259 = vmatpush3.bf16.msra.mxu0 %v16009_v43  ;;  %v16038_v22 = vld [vmem:[%s16677_s9 + $0xbd8] sm:$0xff]  }
 0x7b0   : > { %15120 = vmatprep.subr.bf16.mxu1 %v21980_v8  ;;  %15260 = vmatprep.subr.bf16.mxu0 %v21980_v8  ;;  %v16039_v43 = vld [vmem:[%s16677_s9 + $0xd98] sm:$0xff]  }
 0x7b3   : > { %15121 = vmatpush3.bf16.msra.mxu1 %v16010_v61  ;;  %15261 = vmatpush3.bf16.msra.mxu0 %v16011_v0  ;;  %v16040_v61 = vld [vmem:[%s16677_s9 + $0xbd0] sm:$0xff]  }
 0x7b4   : > { %15122 = vmatprep.subr.bf16.mxu1 %v21980_v8  ;;  %15262 = vmatprep.subr.bf16.mxu0 %v21980_v8  ;;  %v16041_v0 = vld [vmem:[%s16677_s9 + $0xd90] sm:$0xff]  }
 0x7b7   : > { %15123 = vmatpush3.bf16.msra.mxu1 %v16012_v10  ;;  %15263 = vmatpush3.bf16.msra.mxu0 %v16013_v54  ;;  %v16042_v10 = vld [vmem:[%s16677_s9 + $0xbc8] sm:$0xff]  }
 0x7b8   : > { %15148 = vmatprep.subr.bf16.mxu1 %v21980_v8  ;;  %15288 = vmatprep.subr.bf16.mxu0 %v21980_v8  ;;  %v16043_v54 = vld [vmem:[%s16677_s9 + $0xd88] sm:$0xff]  }
 0x7ba   : > { %v8628_v33 = vpop.f32.mrf.mxu1  ;;  %15125 = vmatmul.mubr.bf16.vlgmr.msra.gmra.mxu1 %v12751_v32  ;;  %v20851_v20 = vpop.f32.mrf.mxu0  ;;  %15265 = vmatmul.mubr.bf16.vlgmr.msra.gmra.mxu0 %v12758_v45  ;;  %v16045_v32 = vld [vmem:[%s16677_s9 + $0xd80] sm:$0xff]   ;;  %v12755_v45 = vpack.c.bf16 %v19819_v17, %v19819_v17  ;;  %v16048_v17 = vld [vmem:[%s16677_s9 + $0xc70] sm:$0xff]  }
 0x7bb   : > { %v11480_v3 = vadd.f32 %v11479_v29, %v8628_v33  ;;  %15149 = vmatpush3.bf16.msra.mxu1 %v16014_v26  ;;  %15289 = vmatpush3.bf16.msra.mxu0 %v16015_v27  ;;  %v16044_v26 = vld [vmem:[%s16677_s9 + $0xbc0] sm:$0xff]   ;;  %v16046_v27 = vld [vmem:[%s16677_s9 + $0xc78] sm:$0xff]   ;;  %v12762_v33 = vpack.c.bf16 %v19840_v30, %v19840_v30 }
 0x7bc   : > { %v14886_v40 = vpop.f32.mrf.mxu1  ;;  %15150 = vmatprep.subr.bf16.mxu1 %v21980_v8  ;;  %v15026_v19 = vpop.f32.mrf.mxu0  ;;  %15290 = vmatprep.subr.bf16.mxu0 %v21980_v8  ;;  %v16047_v29 = vld [vmem:[%s16677_s9 + $0xe38] sm:$0xff]  }
 0x7bd   : > { %15164 = vmatprep.mubr.msk.bf16.mxu1 %vm16385_vm1, %v21980_v8  ;;  %15304 = vmatprep.mubr.msk.bf16.mxu0 %vm16385_vm1, %v21980_v8  ;;  %v11481_v18 = vadd.f32 %v11480_v3, %v20722_v6 }
 0x7be   : > { %v8631_v42 = vpop.f32.mrf.mxu1  ;;  %v9247_v62 = vpop.f32.mrf.mxu0 }
 0x7bf   : > { %15151 = vmatpush3.bf16.msra.mxu1 %v16016_v12  ;;  %15291 = vmatpush3.bf16.msra.mxu0 %v16017_v51  ;;  %v16049_v42 = vld [vmem:[%s16677_s9 + $0xe30] sm:$0xff]  }
 0x7c0   : > { %v14887_v16 = vpop.f32.mrf.mxu1  ;;  %15152 = vmatprep.subr.bf16.mxu1 %v21980_v8  ;;  %v15027_v25 = vpop.f32.mrf.mxu0  ;;  %15292 = vmatprep.subr.bf16.mxu0 %v21980_v8 }
 0x7c3   : > { %15153 = vmatpush3.bf16.msra.mxu1 %v16018_v28  ;;  %15293 = vmatpush3.bf16.msra.mxu0 %v16019_v21  ;;  %v16050_v28 = vld [vmem:[%s16677_s9 + $0xc68] sm:$0xff]  }
 0x7c4   : > { %15154 = vmatprep.subr.bf16.mxu1 %v21980_v8  ;;  %15294 = vmatprep.subr.bf16.mxu0 %v21980_v8  ;;  %v16051_v21 = vld [vmem:[%s16677_s9 + $0xe28] sm:$0xff]  }
 0x7c7   : > { %15155 = vmatpush3.bf16.msra.mxu1 %v16020_v48  ;;  %15295 = vmatpush3.bf16.msra.mxu0 %v16021_v35  ;;  %v16052_v48 = vld [vmem:[%s16677_s9 + $0xc60] sm:$0xff]  }
 0x7c8   : > { %15156 = vmatprep.subr.bf16.mxu1 %v21980_v8  ;;  %15296 = vmatprep.subr.bf16.mxu0 %v21980_v8  ;;  %v16053_v35 = vld [vmem:[%s16677_s9 + $0xe20] sm:$0xff]  }
 0x7cb   : > { %15157 = vmatpush3.bf16.msra.mxu1 %v16022_v63  ;;  %15297 = vmatpush3.bf16.msra.mxu0 %v16023_v9  ;;  %v16054_v63 = vld [vmem:[%s16677_s9 + $0xc58] sm:$0xff]  }
 0x7cc   : > { %15158 = vmatprep.subr.bf16.mxu1 %v21980_v8  ;;  %15298 = vmatprep.subr.bf16.mxu0 %v21980_v8  ;;  %v16055_v9 = vld [vmem:[%s16677_s9 + $0xe18] sm:$0xff]  }
 0x7cf   : > { %15159 = vmatpush3.bf16.msra.mxu1 %v16024_v47  ;;  %15299 = vmatpush3.bf16.msra.mxu0 %v16025_v56  ;;  %v16056_v47 = vld [vmem:[%s16677_s9 + $0xc50] sm:$0xff]  }
 0x7d0   : > { %15160 = vmatprep.subr.bf16.mxu1 %v21980_v8  ;;  %15300 = vmatprep.subr.bf16.mxu0 %v21980_v8  ;;  %v16057_v56 = vld [vmem:[%s16677_s9 + $0xe10] sm:$0xff]  }
 0x7d3   : > { %15161 = vmatpush3.bf16.msra.mxu1 %v16026_v55  ;;  %15301 = vmatpush3.bf16.msra.mxu0 %v16027_v50  ;;  %v16058_v55 = vld [vmem:[%s16677_s9 + $0xc48] sm:$0xff]  }
 0x7d4   : > { %15162 = vmatprep.subr.bf16.mxu1 %v21980_v8  ;;  %15302 = vmatprep.subr.bf16.mxu0 %v21980_v8  ;;  %v16059_v50 = vld [vmem:[%s16677_s9 + $0xe08] sm:$0xff]  }
 0x7d7   : > { %15163 = vmatpush3.bf16.msra.mxu1 %v16028_v41  ;;  %15303 = vmatpush3.bf16.msra.mxu0 %v16029_v14  ;;  %v16060_v41 = vld [vmem:[%s16677_s9 + $0xc40] sm:$0xff]  }
 0x7d8   : > { %15188 = vmatprep.subr.bf16.mxu1 %v21980_v8  ;;  %15328 = vmatprep.subr.bf16.mxu0 %v21980_v8  ;;  %v16061_v14 = vld [vmem:[%s16677_s9 + $0xe00] sm:$0xff]  }
 0x7da   : > { %v8804_v11 = vpop.f32.mrf.mxu1  ;;  %15165 = vmatmul.mubr.bf16.vlgmr.msra.gmra.mxu1 %v12753_v37  ;;  %v20894_v1 = vpop.f32.mrf.mxu0  ;;  %15305 = vmatmul.mubr.bf16.vlgmr.msra.gmra.mxu0 %v12760_v59  ;;  %v12757_v37 = vpack.c.bf16 %v19825_v53, %v19825_v53  ;;  %v12764_v59 = vpack.c.bf16 %v19846_v23, %v19846_v23  ;;  %v16064_v53 = vld [vmem:[%s16677_s9 + $0xcf0] sm:$0xff]  }
 0x7db   : > { %v11482_v4 = vadd.f32 %v11481_v18, %v8804_v11  ;;  %15189 = vmatpush3.bf16.msra.mxu1 %v16030_v7  ;;  %15329 = vmatpush3.bf16.msra.mxu0 %v16031_v15  ;;  %v16062_v7 = vld [vmem:[%s16677_s9 + $0xcf8] sm:$0xff]  }
 0x7dc   : > { %v14926_v5 = vpop.f32.mrf.mxu1  ;;  %15190 = vmatprep.subr.bf16.mxu1 %v21980_v8  ;;  %v15066_v38 = vpop.f32.mrf.mxu0  ;;  %15330 = vmatprep.subr.bf16.mxu0 %v21980_v8  ;;  %v16063_v15 = vld [vmem:[%s16677_s9 + $0xeb8] sm:$0xff]  }
 0x7dd   : > { %15204 = vmatprep.mubr.msk.bf16.mxu1 %vm16385_vm1, %v21980_v8  ;;  %15344 = vmatprep.mubr.msk.bf16.mxu0 %vm16385_vm1, %v21980_v8  ;;  %v11483_v3 = vadd.f32 %v11482_v4, %v20765_v2 }
 0x7de   : > { %v8807_v6 = vpop.f32.mrf.mxu1  ;;  %v9423_v36 = vpop.f32.mrf.mxu0 }
 0x7df   : > { %15191 = vmatpush3.bf16.msra.mxu1 %v16032_v52  ;;  %15331 = vmatpush3.bf16.msra.mxu0 %v16033_v44  ;;  %v16065_v44 = vld [vmem:[%s16677_s9 + $0xeb0] sm:$0xff]   ;;  %v16066_v6 = vld [vmem:[%s16677_s9 + $0xce8] sm:$0xff]  }
 0x7e0   : > { %v14927_v34 = vpop.f32.mrf.mxu1  ;;  %15192 = vmatprep.subr.bf16.mxu1 %v21980_v8  ;;  %v15067_v39 = vpop.f32.mrf.mxu0  ;;  %15332 = vmatprep.subr.bf16.mxu0 %v21980_v8 }
 0x7e1   : > { %v16069_v39 = vld [vmem:[%s16677_s9 + $0xea0] sm:$0xff]  }
 0x7e3   : > { %15193 = vmatpush3.bf16.msra.mxu1 %v16034_v49  ;;  %15333 = vmatpush3.bf16.msra.mxu0 %v16035_v58  ;;  %v16067_v49 = vld [vmem:[%s16677_s9 + $0xea8] sm:$0xff]   ;;  %v16068_v58 = vld [vmem:[%s16677_s9 + $0xce0] sm:$0xff]  }
 0x7e4   : > { %15194 = vmatprep.subr.bf16.mxu1 %v21980_v8  ;;  %15334 = vmatprep.subr.bf16.mxu0 %v21980_v8 }
 0x7e7   : > { %15195 = vmatpush3.bf16.msra.mxu1 %v16036_v46  ;;  %15335 = vmatpush3.bf16.msra.mxu0 %v16037_v57  ;;  %v16070_v46 = vld [vmem:[%s16677_s9 + $0xcd8] sm:$0xff]  }
 0x7e8   : > { %15196 = vmatprep.subr.bf16.mxu1 %v21980_v8  ;;  %15336 = vmatprep.subr.bf16.mxu0 %v21980_v8  ;;  %v16071_v57 = vld [vmem:[%s16677_s9 + $0xe98] sm:$0xff]  }
 0x7eb   : > { %15197 = vmatpush3.bf16.msra.mxu1 %v16038_v22  ;;  %15337 = vmatpush3.bf16.msra.mxu0 %v16039_v43  ;;  %v16072_v22 = vld [vmem:[%s16677_s9 + $0xcd0] sm:$0xff]  }
 0x7ec   : > { %15198 = vmatprep.subr.bf16.mxu1 %v21980_v8  ;;  %15338 = vmatprep.subr.bf16.mxu0 %v21980_v8  ;;  %v16073_v43 = vld [vmem:[%s16677_s9 + $0xe90] sm:$0xff]  }
 0x7ef   : > { %15199 = vmatpush3.bf16.msra.mxu1 %v16040_v61  ;;  %15339 = vmatpush3.bf16.msra.mxu0 %v16041_v0  ;;  %v16074_v61 = vld [vmem:[%s16677_s9 + $0xcc8] sm:$0xff]  }
 0x7f0   : > { %15200 = vmatprep.subr.bf16.mxu1 %v21980_v8  ;;  %15340 = vmatprep.subr.bf16.mxu0 %v21980_v8  ;;  %v16075_v0 = vld [vmem:[%s16677_s9 + $0xe88] sm:$0xff]  }
 0x7f3   : > { %15201 = vmatpush3.bf16.msra.mxu1 %v16042_v10  ;;  %15341 = vmatpush3.bf16.msra.mxu0 %v16043_v54  ;;  %v16076_v10 = vld [vmem:[%s16677_s9 + $0xcc0] sm:$0xff]  }
 0x7f4   : > { %15202 = vmatprep.subr.bf16.mxu1 %v21980_v8  ;;  %15342 = vmatprep.subr.bf16.mxu0 %v21980_v8  ;;  %v16077_v54 = vld [vmem:[%s16677_s9 + $0xe80] sm:$0xff]  }
 0x7f7   : > { %15203 = vmatpush3.bf16.msra.mxu1 %v16044_v26  ;;  %15343 = vmatpush3.bf16.msra.mxu0 %v16045_v32  ;;  %v16078_v26 = vld [vmem:[%s16677_s9 + $0xd78] sm:$0xff]   ;;  %v12759_v32 = vpack.c.bf16 %v19831_v13, %v19831_v13  ;;  %v16080_v13 = vld [vmem:[%s16677_s9 + $0xd70] sm:$0xff]  }
 0x7f8   : > { %15228 = vmatprep.subr.bf16.mxu1 %v21980_v8  ;;  %15368 = vmatprep.subr.bf16.mxu0 %v21980_v8 }
 0x7fa   : > { %v8980_v12 = vpop.f32.mrf.mxu1  ;;  %15205 = vmatmul.mubr.bf16.vlgmr.msra.gmra.mxu1 %v12755_v45  ;;  %v20937_v51 = vpop.f32.mrf.mxu0  ;;  %15345 = vmatmul.mubr.bf16.vlgmr.msra.gmra.mxu0 %v12762_v33  ;;  %v12766_v45 = vpack.c.bf16 %v19852_v31, %v19852_v31 }
 0x7fb   : > { %v11484_v40 = vadd.f32 %v11483_v3, %v8980_v12  ;;  %15229 = vmatpush3.bf16.msra.mxu1 %v16046_v27  ;;  %15369 = vmatpush3.bf16.msra.mxu0 %v16047_v29  ;;  %v16079_v27 = vld [vmem:[%s16677_s9 + $0xf38] sm:$0xff]  }
 0x7fc   : > { %v14966_v19 = vpop.f32.mrf.mxu1  ;;  %15230 = vmatprep.subr.bf16.mxu1 %v21980_v8  ;;  %v15106_v30 = vpop.f32.mrf.mxu0  ;;  %15370 = vmatprep.subr.bf16.mxu0 %v21980_v8 }
 0x7fd   : > { %15244 = vmatprep.mubr.msk.bf16.mxu1 %vm16385_vm1, %v21980_v8  ;;  %15384 = vmatprep.mubr.msk.bf16.mxu0 %vm16385_vm1, %v21980_v8  ;;  %v11485_v18 = vadd.f32 %v11484_v40, %v20808_v24 }
 0x7fe   : > { %v8983_v2 = vpop.f32.mrf.mxu1  ;;  %v9599_v62 = vpop.f32.mrf.mxu0 }
 0x7ff   : > { %15231 = vmatpush3.bf16.msra.mxu1 %v16048_v17  ;;  %15371 = vmatpush3.bf16.msra.mxu0 %v16049_v42  ;;  %v16081_v17 = vld [vmem:[%s16677_s9 + $0xf30] sm:$0xff]   ;;  %v16082_v42 = vld [vmem:[%s16677_s9 + $0xd68] sm:$0xff]  }
 0x800   : > { %v14967_v16 = vpop.f32.mrf.mxu1  ;;  %15232 = vmatprep.subr.bf16.mxu1 %v21980_v8  ;;  %v15107_v25 = vpop.f32.mrf.mxu0  ;;  %15372 = vmatprep.subr.bf16.mxu0 %v21980_v8  ;;  %v16083_v2 = vld [vmem:[%s16677_s9 + $0xf28] sm:$0xff]  }
 0x801   : > { %v16085_v16 = vld [vmem:[%s16677_s9 + $0xf20] sm:$0xff]   ;;  %v16087_v25 = vld [vmem:[%s16677_s9 + $0xf18] sm:$0xff]  }
 0x803   : > { %15233 = vmatpush3.bf16.msra.mxu1 %v16050_v28  ;;  %15373 = vmatpush3.bf16.msra.mxu0 %v16051_v21  ;;  %v16084_v28 = vld [vmem:[%s16677_s9 + $0xd60] sm:$0xff]   ;;  %v16086_v21 = vld [vmem:[%s16677_s9 + $0xd58] sm:$0xff]  }
 0x804   : > { %15234 = vmatprep.subr.bf16.mxu1 %v21980_v8  ;;  %15374 = vmatprep.subr.bf16.mxu0 %v21980_v8 }
 0x807   : > { %15235 = vmatpush3.bf16.msra.mxu1 %v16052_v48  ;;  %15375 = vmatpush3.bf16.msra.mxu0 %v16053_v35  ;;  %v16088_v48 = vld [vmem:[%s16677_s9 + $0xd50] sm:$0xff]  }
 0x808   : > { %15236 = vmatprep.subr.bf16.mxu1 %v21980_v8  ;;  %15376 = vmatprep.subr.bf16.mxu0 %v21980_v8  ;;  %v16089_v35 = vld [vmem:[%s16677_s9 + $0xf10] sm:$0xff]  }
 0x80b   : > { %15237 = vmatpush3.bf16.msra.mxu1 %v16054_v63  ;;  %15377 = vmatpush3.bf16.msra.mxu0 %v16055_v9  ;;  %v16090_v63 = vld [vmem:[%s16677_s9 + $0xd48] sm:$0xff]  }
 0x80c   : > { %15238 = vmatprep.subr.bf16.mxu1 %v21980_v8  ;;  %15378 = vmatprep.subr.bf16.mxu0 %v21980_v8  ;;  %v16091_v9 = vld [vmem:[%s16677_s9 + $0xf08] sm:$0xff]  }
 0x80f   : > { %15239 = vmatpush3.bf16.msra.mxu1 %v16056_v47  ;;  %15379 = vmatpush3.bf16.msra.mxu0 %v16057_v56  ;;  %v16092_v47 = vld [vmem:[%s16677_s9 + $0xd40] sm:$0xff]  }
 0x810   : > { %15240 = vmatprep.subr.bf16.mxu1 %v21980_v8  ;;  %15380 = vmatprep.subr.bf16.mxu0 %v21980_v8  ;;  %v16093_v56 = vld [vmem:[%s16677_s9 + $0xf00] sm:$0xff]  }
 0x813   : > { %15241 = vmatpush3.bf16.msra.mxu1 %v16058_v55  ;;  %15381 = vmatpush3.bf16.msra.mxu0 %v16059_v50  ;;  %v16094_v55 = vld [vmem:[%s16677_s9 + $0xdf8] sm:$0xff]   ;;  %v12761_v50 = vpack.c.bf16 %v19837_v60, %v19837_v60  ;;  %v16096_v60 = vld [vmem:[%s16677_s9 + $0xdf0] sm:$0xff]  }
 0x814   : > { %15242 = vmatprep.subr.bf16.mxu1 %v21980_v8  ;;  %15382 = vmatprep.subr.bf16.mxu0 %v21980_v8 }
 0x817   : > { %15243 = vmatpush3.bf16.msra.mxu1 %v16060_v41  ;;  %15383 = vmatpush3.bf16.msra.mxu0 %v16061_v14  ;;  %v16095_v41 = vld [vmem:[%s16677_s9 + $0xfb8] sm:$0xff]   ;;  %v21987_v14 = vld [vmem:[#allocation107_spill] sm:$0xff] }
 0x818   : > { %15268 = vmatprep.subr.bf16.mxu1 %v21980_v8  ;;  %15408 = vmatprep.subr.bf16.mxu0 %v21980_v8 }
 0x81a   : > { %v9156_v11 = vpop.f32.mrf.mxu1  ;;  %15245 = vmatmul.mubr.bf16.vlgmr.msra.gmra.mxu1 %v12757_v37  ;;  %v20980_v52 = vpop.f32.mrf.mxu0  ;;  %15385 = vmatmul.mubr.bf16.vlgmr.msra.gmra.mxu0 %v12764_v59 }
 0x81b   : > { %v11486_v4 = vadd.f32 %v11485_v18, %v9156_v11  ;;  %15269 = vmatpush3.bf16.msra.mxu1 %v16062_v7  ;;  %15409 = vmatpush3.bf16.msra.mxu0 %v16063_v15  ;;  %v12768_v7 = vpack.c.bf16 %v21987_v14, %v21987_v14 }
 0x81c   : > { %v15006_v5 = vpop.f32.mrf.mxu1  ;;  %15270 = vmatprep.subr.bf16.mxu1 %v21980_v8  ;;  %v15146_v23 = vpop.f32.mrf.mxu0  ;;  %15410 = vmatprep.subr.bf16.mxu0 %v21980_v8 }
 0x81d   : > { %15284 = vmatprep.mubr.msk.bf16.mxu1 %vm16385_vm1, %v21980_v8  ;;  %15424 = vmatprep.mubr.msk.bf16.mxu0 %vm16385_vm1, %v21980_v8  ;;  %v11487_v29 = vadd.f32 %v11486_v4, %v20851_v20  ;;  %v16097_v4 = vld [vmem:[%s16677_s9 + $0xfb0] sm:$0xff]  }
 0x81e   : > { %v9159_v24 = vpop.f32.mrf.mxu1  ;;  %v9775_v38 = vpop.f32.mrf.mxu0 }
 0x81f   : > { %15271 = vmatpush3.bf16.msra.mxu1 %v16064_v53  ;;  %15411 = vmatpush3.bf16.msra.mxu0 %v16065_v44  ;;  %v16098_v44 = vld [vmem:[%s16677_s9 + $0xde8] sm:$0xff]  }
 0x820   : > { %v15007_v36 = vpop.f32.mrf.mxu1  ;;  %15272 = vmatprep.subr.bf16.mxu1 %v21980_v8  ;;  %v15147_v34 = vpop.f32.mrf.mxu0  ;;  %15412 = vmatprep.subr.bf16.mxu0 %v21980_v8  ;;  %v16099_v24 = vld [vmem:[%s16677_s9 + $0xfa8] sm:$0xff]  }
 0x821   : > { %v16101_v36 = vld [vmem:[%s16677_s9 + $0xfa0] sm:$0xff]   ;;  %v16103_v34 = vld [vmem:[%s16677_s9 + $0xf98] sm:$0xff]  }
 0x823   : > { %15273 = vmatpush3.bf16.msra.mxu1 %v16066_v6  ;;  %15413 = vmatpush3.bf16.msra.mxu0 %v16067_v49  ;;  %v16100_v6 = vld [vmem:[%s16677_s9 + $0xde0] sm:$0xff]   ;;  %v16102_v49 = vld [vmem:[%s16677_s9 + $0xdd8] sm:$0xff]  }
 0x824   : > { %15274 = vmatprep.subr.bf16.mxu1 %v21980_v8  ;;  %15414 = vmatprep.subr.bf16.mxu0 %v21980_v8 }
 0x827   : > { %15275 = vmatpush3.bf16.msra.mxu1 %v16068_v58  ;;  %15415 = vmatpush3.bf16.msra.mxu0 %v16069_v39  ;;  %v16104_v58 = vld [vmem:[%s16677_s9 + $0xdd0] sm:$0xff]  }
 0x828   : > { %15276 = vmatprep.subr.bf16.mxu1 %v21980_v8  ;;  %15416 = vmatprep.subr.bf16.mxu0 %v21980_v8  ;;  %v16105_v39 = vld [vmem:[%s16677_s9 + $0xf90] sm:$0xff]  }
 0x82b   : > { %15277 = vmatpush3.bf16.msra.mxu1 %v16070_v46  ;;  %15417 = vmatpush3.bf16.msra.mxu0 %v16071_v57  ;;  %v16106_v46 = vld [vmem:[%s16677_s9 + $0xdc8] sm:$0xff]  }
 0x82c   : > { %15278 = vmatprep.subr.bf16.mxu1 %v21980_v8  ;;  %15418 = vmatprep.subr.bf16.mxu0 %v21980_v8  ;;  %v16107_v57 = vld [vmem:[%s16677_s9 + $0xf88] sm:$0xff]  }
 0x82f   : > { %15279 = vmatpush3.bf16.msra.mxu1 %v16072_v22  ;;  %15419 = vmatpush3.bf16.msra.mxu0 %v16073_v43  ;;  %v16108_v22 = vld [vmem:[%s16677_s9 + $0xdc0] sm:$0xff]  }
 0x830   : > { %15280 = vmatprep.subr.bf16.mxu1 %v21980_v8  ;;  %15420 = vmatprep.subr.bf16.mxu0 %v21980_v8  ;;  %v16109_v43 = vld [vmem:[%s16677_s9 + $0xf80] sm:$0xff]  }
 0x833   : > { %15281 = vmatpush3.bf16.msra.mxu1 %v16074_v61  ;;  %15421 = vmatpush3.bf16.msra.mxu0 %v16075_v0  ;;  %v16110_v61 = vld [vmem:[%s16677_s9 + $0xe78] sm:$0xff]   ;;  %v21988_v0 = vld [vmem:[#allocation115_spill] sm:$0xff] }
 0x834   : > { %15282 = vmatprep.subr.bf16.mxu1 %v21980_v8  ;;  %15422 = vmatprep.subr.bf16.mxu0 %v21980_v8 }
 0x837   : > { %15283 = vmatpush3.bf16.msra.mxu1 %v16076_v10  ;;  %15423 = vmatpush3.bf16.msra.mxu0 %v16077_v54  ;;  %v12763_v10 = vpack.c.bf16 %v21988_v0, %v21988_v0  ;;  %v21989_v54 = vld [vmem:[#allocation82_spill] sm:$0xff]  ;;  %v21992_v0 = vld [vmem:[#allocation60_spill] sm:$0xff] }
 0x838   : > { %15308 = vmatprep.subr.bf16.mxu1 %v21980_v8  ;;  %15448 = vmatprep.subr.bf16.mxu0 %v21980_v8 }
 0x83a   : > { %v9332_v33 = vpop.f32.mrf.mxu1  ;;  %15285 = vmatmul.mubr.bf16.vlgmr.msra.gmra.mxu1 %v12759_v32  ;;  %v21023_v12 = vpop.f32.mrf.mxu0  ;;  %15425 = vmatmul.mubr.bf16.vlgmr.msra.gmra.mxu0 %v12766_v45 }
 0x83b   : > { %v11488_v3 = vadd.f32 %v11487_v29, %v9332_v33  ;;  %15309 = vmatpush3.bf16.msra.mxu1 %v16078_v26  ;;  %15449 = vmatpush3.bf16.msra.mxu0 %v16079_v27  ;;  %v12770_v26 = vpack.c.bf16 %v21989_v54, %v21989_v54  ;;  %v16111_v33 = vld [vmem:[%s16677_s9 + $0xe70] sm:$0xff]  }
 0x83c   : > { %v15046_v40 = vpop.f32.mrf.mxu1  ;;  %15310 = vmatprep.subr.bf16.mxu1 %v21980_v8  ;;  %v15186_v31 = vpop.f32.mrf.mxu0  ;;  %15450 = vmatprep.subr.bf16.mxu0 %v21980_v8 }
 0x83d   : > { %15324 = vmatprep.mubr.msk.bf16.mxu1 %vm16385_vm1, %v21980_v8  ;;  %15464 = vmatprep.mubr.msk.bf16.mxu0 %vm16385_vm1, %v21980_v8  ;;  %v11489_v37 = vadd.f32 %v11488_v3, %v20894_v1 }
 0x83e   : > { %v9335_v20 = vpop.f32.mrf.mxu1  ;;  %v9951_v19 = vpop.f32.mrf.mxu0 }
 0x83f   : > { %15311 = vmatpush3.bf16.msra.mxu1 %v16080_v13  ;;  %15451 = vmatpush3.bf16.msra.mxu0 %v16081_v17  ;;  %v16112_v17 = vld [vmem:[%s16677_s9 + $0xe68] sm:$0xff]   ;;  %v16113_v19 = vld [vmem:[%s16677_s9 + $0xe60] sm:$0xff]  }
 0x840   : > { %v15047_v30 = vpop.f32.mrf.mxu1  ;;  %15312 = vmatprep.subr.bf16.mxu1 %v21980_v8  ;;  %v15187_v62 = vpop.f32.mrf.mxu0  ;;  %15452 = vmatprep.subr.bf16.mxu0 %v21980_v8 }
 0x841   : > { %v16115_v30 = vld [vmem:[%s16677_s9 + $0xe50] sm:$0xff]   ;;  %v16117_v62 = vld [vmem:[%s16677_s9 + $0xe40] sm:$0xff]  }
 0x843   : > { %15313 = vmatpush3.bf16.msra.mxu1 %v16082_v42  ;;  %15453 = vmatpush3.bf16.msra.mxu0 %v16083_v2  ;;  %v16114_v42 = vld [vmem:[%s16677_s9 + $0xe58] sm:$0xff]   ;;  %v16116_v2 = vld [vmem:[%s16677_s9 + $0xe48] sm:$0xff]  }
 0x844   : > { %15314 = vmatprep.subr.bf16.mxu1 %v21980_v8  ;;  %15454 = vmatprep.subr.bf16.mxu0 %v21980_v8 }
 0x847   : > { %15315 = vmatpush3.bf16.msra.mxu1 %v16084_v28  ;;  %15455 = vmatpush3.bf16.msra.mxu0 %v16085_v16  ;;  %v16118_v28 = vld [vmem:[%s16677_s9 + $0xef8] sm:$0xff]   ;;  %v21990_v16 = vld [vmem:[#allocation20_spill] sm:$0xff] }
 0x848   : > { %15316 = vmatprep.subr.bf16.mxu1 %v21980_v8  ;;  %15456 = vmatprep.subr.bf16.mxu0 %v21980_v8 }
 0x84b   : > { %15317 = vmatpush3.bf16.msra.mxu1 %v16086_v21  ;;  %15457 = vmatpush3.bf16.msra.mxu0 %v16087_v25  ;;  %v12765_v21 = vpack.c.bf16 %v21990_v16, %v21990_v16 }
 0x84c   : > { %15318 = vmatprep.subr.bf16.mxu1 %v21980_v8  ;;  %15458 = vmatprep.subr.bf16.mxu0 %v21980_v8 }
 0x84f   : > { %15319 = vmatpush3.bf16.msra.mxu1 %v16088_v48  ;;  %15459 = vmatpush3.bf16.msra.mxu0 %v16089_v35 }
 0x850   : > { %15320 = vmatprep.subr.bf16.mxu1 %v21980_v8  ;;  %15460 = vmatprep.subr.bf16.mxu0 %v21980_v8 }
 0x853   : > { %15321 = vmatpush3.bf16.msra.mxu1 %v16090_v63  ;;  %15461 = vmatpush3.bf16.msra.mxu0 %v16091_v9  ;;  %v16119_v9 = vld [vmem:[%s16677_s9 + $0xef0] sm:$0xff]  }
 0x854   : > { %15322 = vmatprep.subr.bf16.mxu1 %v21980_v8  ;;  %15462 = vmatprep.subr.bf16.mxu0 %v21980_v8 }
 0x857   : > { %15323 = vmatpush3.bf16.msra.mxu1 %v16092_v47  ;;  %15463 = vmatpush3.bf16.msra.mxu0 %v16093_v56 }
 0x858   : > { %15348 = vmatprep.subr.bf16.mxu1 %v21980_v8  ;;  %15488 = vmatprep.subr.bf16.mxu0 %v21980_v8 }
 0x85a   : > { %v9508_v15 = vpop.f32.mrf.mxu1  ;;  %15325 = vmatmul.mubr.bf16.vlgmr.msra.gmra.mxu1 %v12761_v50  ;;  %v21066_v18 = vpop.f32.mrf.mxu0  ;;  %15465 = vmatmul.mubr.bf16.vlgmr.msra.gmra.mxu0 %v12768_v7  ;;  %v16121_v7 = vld [vmem:[%s16677_s9 + $0xee0] sm:$0xff]  }
 0x85b   : > { %v11490_v59 = vadd.f32 %v11489_v37, %v9508_v15  ;;  %15349 = vmatpush3.bf16.msra.mxu1 %v16094_v55  ;;  %15489 = vmatpush3.bf16.msra.mxu0 %v16095_v41  ;;  %v16122_v37 = vld [vmem:[%s16677_s9 + $0xed8] sm:$0xff]   ;;  %v16123_v15 = vld [vmem:[%s16677_s9 + $0xed0] sm:$0xff]  }
 0x85c   : > { %v15086_v11 = vpop.f32.mrf.mxu1  ;;  %15350 = vmatprep.subr.bf16.mxu1 %v21980_v8  ;;  %v15226_v53 = vpop.f32.mrf.mxu0  ;;  %15490 = vmatprep.subr.bf16.mxu0 %v21980_v8 }
 0x85d   : > { %15364 = vmatprep.mubr.msk.bf16.mxu1 %vm16385_vm1, %v21980_v8  ;;  %15504 = vmatprep.mubr.msk.bf16.mxu0 %vm16385_vm1, %v21980_v8  ;;  %v11491_v32 = vadd.f32 %v11490_v59, %v20937_v51  ;;  %v16124_v59 = vld [vmem:[%s16677_s9 + $0xec8] sm:$0xff]   ;;  %v16126_v11 = vld [vmem:[%s16677_s9 + $0xf78] sm:$0xff]  }
 0x85e   : > { %v9511_v1 = vpop.f32.mrf.mxu1  ;;  %v10127_v5 = vpop.f32.mrf.mxu0 }
 0x85f   : > { %15351 = vmatpush3.bf16.msra.mxu1 %v16096_v60  ;;  %15491 = vmatpush3.bf16.msra.mxu0 %v16097_v4  ;;  %v16125_v60 = vld [vmem:[%s16677_s9 + $0xec0] sm:$0xff]  }
 0x860   : > { %v15087_v23 = vpop.f32.mrf.mxu1  ;;  %15352 = vmatprep.subr.bf16.mxu1 %v21980_v8  ;;  %v15227_v38 = vpop.f32.mrf.mxu0  ;;  %15492 = vmatprep.subr.bf16.mxu0 %v21980_v8  ;;  %v21991_v4 = vld [vmem:[#allocation95_spill] sm:$0xff] }
 0x861   : > { %v12767_v53 = vpack.c.bf16 %v21991_v4, %v21991_v4  ;;  %v16143_v4 = vld [vmem:[%s16679_s29 + $0x30] sm:$0xff]  }
 0x863   : > { %15353 = vmatpush3.bf16.msra.mxu1 %v16098_v44  ;;  %15493 = vmatpush3.bf16.msra.mxu0 %v16099_v24  ;;  %v16127_v24 = vld [vmem:[%s16677_s9 + $0xf70] sm:$0xff]  }
 0x864   : > { %15354 = vmatprep.subr.bf16.mxu1 %v21980_v8  ;;  %15494 = vmatprep.subr.bf16.mxu0 %v21980_v8 }
 0x867   : > { %15355 = vmatpush3.bf16.msra.mxu1 %v16100_v6  ;;  %15495 = vmatpush3.bf16.msra.mxu0 %v16101_v36 }
 0x868   : > { %15356 = vmatprep.subr.bf16.mxu1 %v21980_v8  ;;  %15496 = vmatprep.subr.bf16.mxu0 %v21980_v8 }
 0x86b   : > { %15357 = vmatpush3.bf16.msra.mxu1 %v16102_v49  ;;  %15497 = vmatpush3.bf16.msra.mxu0 %v16103_v34 }
 0x86c   : > { %15358 = vmatprep.subr.bf16.mxu1 %v21980_v8  ;;  %15498 = vmatprep.subr.bf16.mxu0 %v21980_v8 }
 0x86f   : > { %15359 = vmatpush3.bf16.msra.mxu1 %v16104_v58  ;;  %15499 = vmatpush3.bf16.msra.mxu0 %v16105_v39  ;;  %v16129_v39 = vld [vmem:[%s16677_s9 + $0xf60] sm:$0xff]  }
 0x870   : > { %15360 = vmatprep.subr.bf16.mxu1 %v21980_v8  ;;  %15500 = vmatprep.subr.bf16.mxu0 %v21980_v8 }
 0x873   : > { %15361 = vmatpush3.bf16.msra.mxu1 %v16106_v46  ;;  %15501 = vmatpush3.bf16.msra.mxu0 %v16107_v57  ;;  %v16130_v46 = vld [vmem:[%s16677_s9 + $0xf58] sm:$0xff]   ;;  %v16131_v57 = vld [vmem:[%s16677_s9 + $0xf50] sm:$0xff]  }
 0x874   : > { %15362 = vmatprep.subr.bf16.mxu1 %v21980_v8  ;;  %15502 = vmatprep.subr.bf16.mxu0 %v21980_v8 }
 0x877   : > { %15363 = vmatpush3.bf16.msra.mxu1 %v16108_v22  ;;  %15503 = vmatpush3.bf16.msra.mxu0 %v16109_v43  ;;  %v16132_v22 = vld [vmem:[%s16677_s9 + $0xf48] sm:$0xff]   ;;  %v16133_v43 = vld [vmem:[%s16677_s9 + $0xf40] sm:$0xff]  }
 0x878   : > { %15388 = vmatprep.subr.bf16.mxu1 %v21980_v8  ;;  %15528 = vmatprep.subr.bf16.mxu0 %v21980_v8 }
 0x87a   : > { %v9684_v27 = vpop.f32.mrf.mxu1  ;;  %15365 = vmatmul.mubr.bf16.vlgmr.msra.gmra.mxu1 %v12763_v10  ;;  %v21108_v29 = vpop.f32.mrf.mxu0  ;;  %15505 = vmatmul.mubr.bf16.vlgmr.msra.gmra.mxu0 %v12770_v26  ;;  %v12769_v10 = vpack.c.bf16 %v21992_v0, %v21992_v0 }
 0x87b   : > { %v11492_v45 = vadd.f32 %v11491_v32, %v9684_v27  ;;  %15389 = vmatpush3.bf16.msra.mxu1 %v16110_v61  ;;  %15404 = vmatprep.mubr.msk.bf16.mxu1 %vm16385_vm1, %v21980_v8  ;;  %v16134_v61 = vld [vmem:[%s16677_s9 + $0xff8] sm:$0xff]  }
 0x87c   : > { %v15126_v3 = vpop.f32.mrf.mxu1  ;;  %15390 = vmatprep.subr.bf16.mxu1 %v21980_v8  ;;  %v15266_v51 = vpop.f32.mrf.mxu0  ;;  %15544 = vmatprep.mubr.msk.bf16.mxu0 %vm16385_vm1, %v21980_v8 }
 0x87d   : > { %v11493_v25 = vadd.f32 %v11492_v45, %v20980_v52  ;;  %v16120_v52 = vld [vmem:[%s16677_s9 + $0xee8] sm:$0xff]   ;;  %v16135_v45 = vld [vmem:[%s16677_s9 + $0xff0] sm:$0xff]  }
 0x87e   : > { %v9687_v13 = vpop.f32.mrf.mxu1  ;;  %v10303_v40 = vpop.f32.mrf.mxu0 }
 0x87f   : > { %15391 = vmatpush3.bf16.msra.mxu1 %v16111_v33 }
 0x880   : > { %v15127_v31 = vpop.f32.mrf.mxu1  ;;  %15392 = vmatprep.subr.bf16.mxu1 %v21980_v8  ;;  %v15267_v20 = vpop.f32.mrf.mxu0 }
 0x881   : > { %v16137_v31 = vld [vmem:[%s16677_s9 + $0xfe0] sm:$0xff]   ;;  %v16138_v20 = vld [vmem:[%s16677_s9 + $0xfd8] sm:$0xff]  }
 0x883   : > { %15393 = vmatpush3.bf16.msra.mxu1 %v16112_v17 }
 0x884   : > { %15394 = vmatprep.subr.bf16.mxu1 %v21980_v8 }
 0x887   : > { %15395 = vmatpush3.bf16.msra.mxu1 %v16113_v19  ;;  %v16139_v19 = vld [vmem:[%s16677_s9 + $0xfd0] sm:$0xff]  }
 0x888   : > { %15396 = vmatprep.subr.bf16.mxu1 %v21980_v8 }
 0x88b   : > { %15397 = vmatpush3.bf16.msra.mxu1 %v16114_v42  ;;  %v16140_v42 = vld [vmem:[%s16677_s9 + $0xfc8] sm:$0xff]  }
 0x88c   : > { %15398 = vmatprep.subr.bf16.mxu1 %v21980_v8 }
 0x88f   : > { %15399 = vmatpush3.bf16.msra.mxu1 %v16115_v30  ;;  %v16141_v30 = vld [vmem:[%s16677_s9 + $0xfc0] sm:$0xff]  }
 0x890   : > { %15400 = vmatprep.subr.bf16.mxu1 %v21980_v8 }
 0x893   : > { %15401 = vmatpush3.bf16.msra.mxu1 %v16116_v2  ;;  %v21993_v2 = vld [vmem:[#allocation23_spill] sm:$0xff] }
 0x894   : > { %15402 = vmatprep.subr.bf16.mxu1 %v21980_v8 }
 0x897   : > { %15403 = vmatpush3.bf16.msra.mxu1 %v16117_v62  ;;  %v12771_v62 = vpack.c.bf16 %v21993_v2, %v21993_v2 }
 0x898   : > { %15428 = vmatprep.subr.bf16.mxu1 %v21980_v8 }
 0x89a   : > { %v9860_v48 = vpop.f32.mrf.mxu1  ;;  %15405 = vmatmul.mubr.bf16.vlgmr.msra.gmra.mxu1 %v12765_v21  ;;  %v21133_v63 = vpop.f32.mrf.mxu0 }
 0x89b   : > { %v11494_v35 = vadd.f32 %v11493_v25, %v9860_v48  ;;  %15429 = vmatpush3.bf16.msra.mxu1 %v16118_v28  ;;  %15444 = vmatprep.mubr.msk.bf16.mxu1 %vm16385_vm1, %v21980_v8 }
 0x89c   : > { %v15166_v47 = vpop.f32.mrf.mxu1  ;;  %15430 = vmatprep.subr.bf16.mxu1 %v21980_v8  ;;  %v15306_v56 = vpop.f32.mrf.mxu0 }
 0x89d   : > { %v11495_v1 = vadd.f32 %v11494_v35, %v21023_v12  ;;  %v16128_v12 = vld [vmem:[%s16677_s9 + $0xf68] sm:$0xff]  }
 0x89e   : > { %v9863_v55 = vpop.f32.mrf.mxu1  ;;  %v10479_v50 = vpop.f32.mrf.mxu0 }
 0x89f   : > { %15431 = vmatpush3.bf16.msra.mxu1 %v16119_v9 }
 0x8a0   : > { %v15167_v41 = vpop.f32.mrf.mxu1  ;;  %15432 = vmatprep.subr.bf16.mxu1 %v21980_v8  ;;  %v15307_v14 = vpop.f32.mrf.mxu0 }
 0x8a3   : > { %15433 = vmatpush3.bf16.msra.mxu1 %v16120_v52 }
 0x8a4   : > { %15434 = vmatprep.subr.bf16.mxu1 %v21980_v8 }
 0x8a7   : > { %15435 = vmatpush3.bf16.msra.mxu1 %v16121_v7 }
 0x8a8   : > { %15436 = vmatprep.subr.bf16.mxu1 %v21980_v8 }
 0x8ab   : > { %15437 = vmatpush3.bf16.msra.mxu1 %v16122_v37 }
 0x8ac   : > { %15438 = vmatprep.subr.bf16.mxu1 %v21980_v8 }
 0x8af   : > { %15439 = vmatpush3.bf16.msra.mxu1 %v16123_v15 }
 0x8b0   : > { %15440 = vmatprep.subr.bf16.mxu1 %v21980_v8 }
 0x8b3   : > { %15441 = vmatpush3.bf16.msra.mxu1 %v16124_v59 }
 0x8b4   : > { %15442 = vmatprep.subr.bf16.mxu1 %v21980_v8 }
 0x8b7   : > { %15443 = vmatpush3.bf16.msra.mxu1 %v16125_v60  ;;  %v16142_v60 = vld [vmem:[%s16679_s29 + $0x38] sm:$0xff]  }
 0x8b8   : > { %15468 = vmatprep.subr.bf16.mxu1 %v21980_v8  ;;  %15529 = vmatpush3.bf16.msra.mxu0 %v16142_v60 }
 0x8b9   : > { %15530 = vmatprep.subr.bf16.mxu0 %v21980_v8 }
 0x8ba   : > { %v10036_v5 = vpop.f32.mrf.mxu1  ;;  %15445 = vmatmul.mubr.bf16.vlgmr.msra.gmra.mxu1 %v12767_v53  ;;  %v21156_v23 = vpop.f32.mrf.mxu0  ;;  %v16144_v53 = vld [vmem:[%s16679_s29 + $0x28] sm:$0xff]  }
 0x8bb   : > { %v11496_v44 = vadd.f32 %v11495_v1, %v10036_v5  ;;  %15469 = vmatpush3.bf16.msra.mxu1 %v16126_v11  ;;  %15484 = vmatprep.mubr.msk.bf16.mxu1 %vm16385_vm1, %v21980_v8  ;;  %v16146_v1 = vld [vmem:[%s16679_s29 + $0x18] sm:$0xff]   ;;  %v16147_v5 = vld [vmem:[%s16679_s29 + $0x10] sm:$0xff]  }
 0x8bc   : > { %v15206_v38 = vpop.f32.mrf.mxu1  ;;  %15470 = vmatprep.subr.bf16.mxu1 %v21980_v8  ;;  %v15346_v6 = vpop.f32.mrf.mxu0  ;;  %15531 = vmatpush3.bf16.msra.mxu0 %v16143_v4 }
 0x8bd   : > { %v11497_v54 = vadd.f32 %v11496_v44, %v21066_v18  ;;  %v16136_v18 = vld [vmem:[%s16677_s9 + $0xfe8] sm:$0xff]   ;;  %15532 = vmatprep.subr.bf16.mxu0 %v21980_v8 }
 0x8be   : > { %v10039_v36 = vpop.f32.mrf.mxu1  ;;  %v10655_v49 = vpop.f32.mrf.mxu0 }
 0x8bf   : > { %15471 = vmatpush3.bf16.msra.mxu1 %v16127_v24 }
 0x8c0   : > { %v15207_v34 = vpop.f32.mrf.mxu1  ;;  %15472 = vmatprep.subr.bf16.mxu1 %v21980_v8  ;;  %v15347_v58 = vpop.f32.mrf.mxu0  ;;  %15533 = vmatpush3.bf16.msra.mxu0 %v16144_v53 }
 0x8c1   : > { %15534 = vmatprep.subr.bf16.mxu0 %v21980_v8 }
 0x8c3   : > { %15473 = vmatpush3.bf16.msra.mxu1 %v16128_v12 }
 0x8c4   : > { %15474 = vmatprep.subr.bf16.mxu1 %v21980_v8 }
 0x8c7   : > { %15475 = vmatpush3.bf16.msra.mxu1 %v16129_v39 }
 0x8c8   : > { %15476 = vmatprep.subr.bf16.mxu1 %v21980_v8 }
 0x8cb   : > { %15477 = vmatpush3.bf16.msra.mxu1 %v16130_v46  ;;  %v16148_v46 = vld [vmem:[%s16679_s29 + $0x8] sm:$0xff]  }
 0x8cc   : > { %15478 = vmatprep.subr.bf16.mxu1 %v21980_v8 }
 0x8cf   : > { %15479 = vmatpush3.bf16.msra.mxu1 %v16131_v57  ;;  %v16149_v57 = vld [vmem:[%s16679_s29] sm:$0xff]  }
 0x8d0   : > { %15480 = vmatprep.subr.bf16.mxu1 %v21980_v8 }
 0x8d3   : > { %15481 = vmatpush3.bf16.msra.mxu1 %v16132_v22 }
 0x8d4   : > { %15482 = vmatprep.subr.bf16.mxu1 %v21980_v8 }
 0x8d7   : > { %15483 = vmatpush3.bf16.msra.mxu1 %v16133_v43 }
 0x8d8   : > { %15508 = vmatprep.subr.bf16.mxu1 %v21980_v8 }
 0x8da   : > { %v10212_v26 = vpop.f32.mrf.mxu1  ;;  %15485 = vmatmul.mubr.bf16.vlgmr.msra.gmra.mxu1 %v12769_v10  ;;  %v21179_v27 = vpop.f32.mrf.mxu0 }
 0x8db   : > { %v11498_v32 = vadd.f32 %v11497_v54, %v10212_v26  ;;  %15509 = vmatpush3.bf16.msra.mxu1 %v16134_v61  ;;  %15524 = vmatprep.mubr.msk.bf16.mxu1 %vm16385_vm1, %v21980_v8 }
 0x8dc   : > { %v15246_v33 = vpop.f32.mrf.mxu1  ;;  %15510 = vmatprep.subr.bf16.mxu1 %v21980_v8  ;;  %v15386_v3 = vpop.f32.mrf.mxu0 }
 0x8dd   : > { %v11499_v28 = vadd.f32 %v11498_v32, %v21108_v29 }
 0x8de   : > { %v10215_v51 = vpop.f32.mrf.mxu1  ;;  %v10831_v13 = vpop.f32.mrf.mxu0 }
 0x8df   : > { %15511 = vmatpush3.bf16.msra.mxu1 %v16135_v45 }
 0x8e0   : > { %v15247_v40 = vpop.f32.mrf.mxu1  ;;  %15512 = vmatprep.subr.bf16.mxu1 %v21980_v8  ;;  %v15387_v17 = vpop.f32.mrf.mxu0 }
 0x8e3   : > { %15513 = vmatpush3.bf16.msra.mxu1 %v16136_v18 }
 0x8e4   : > { %15514 = vmatprep.subr.bf16.mxu1 %v21980_v8 }
 0x8e7   : > { %15515 = vmatpush3.bf16.msra.mxu1 %v16137_v31  ;;  %v12694_v31 = vld [vmem:[%s411_s17] ss:$0 sm:$0xff] }
 0x8e8   : > { %15516 = vmatprep.subr.bf16.mxu1 %v21980_v8 }
 0x8eb   : > { %15517 = vmatpush3.bf16.msra.mxu1 %v16138_v20 }
 0x8ec   : > { %15518 = vmatprep.subr.bf16.mxu1 %v21980_v8 }
 0x8ef   : > { %15519 = vmatpush3.bf16.msra.mxu1 %v16139_v19 }
 0x8f0   : > { %15520 = vmatprep.subr.bf16.mxu1 %v21980_v8 }
 0x8f3   : > { %15521 = vmatpush3.bf16.msra.mxu1 %v16140_v42 }
 0x8f4   : > { %15522 = vmatprep.subr.bf16.mxu1 %v21980_v8 }
 0x8f7   : > { %15523 = vmatpush3.bf16.msra.mxu1 %v16141_v30 }
 0x8fa   : > { %v10388_v16 = vpop.f32.mrf.mxu1  ;;  %15525 = vmatmul.mubr.bf16.vlgmr.msra.gmra.mxu1 %v12771_v62  ;;  %v21200_v25 = vpop.f32.mrf.mxu0 }
 0x8fb   : > { %v11500_v21 = vadd.f32 %v11499_v28, %v10388_v16 }
 0x8fc   : > { %v15286_v48 = vpop.f32.mrf.mxu1  ;;  %v15426_v35 = vpop.f32.mrf.mxu0 }
 0x8fd   : > { %v11501_v50 = vadd.f32 %v11500_v21, %v21133_v63  ;;  %v16145_v63 = vld [vmem:[%s16679_s29 + $0x20] sm:$0xff]   ;;  %v12695_v21 = vld [vmem:[%s419_s27] ss:$0 sm:$0xff] }
 0x8fe   : > { %v10391_v9 = vpop.f32.mrf.mxu1  ;;  %v11007_v47 = vpop.f32.mrf.mxu0  ;;  %15535 = vmatpush3.bf16.msra.mxu0 %v16145_v63 }
 0x8ff   : > { %15536 = vmatprep.subr.bf16.mxu0 %v21980_v8 }
 0x900   : > { %v15287_v56 = vpop.f32.mrf.mxu1  ;;  %v15427_v55 = vpop.f32.mrf.mxu0 }
 0x902   : > { %15537 = vmatpush3.bf16.msra.mxu0 %v16146_v1 }
 0x903   : > { %15538 = vmatprep.subr.bf16.mxu0 %v21980_v8 }
 0x906   : > { %15539 = vmatpush3.bf16.msra.mxu0 %v16147_v5 }
 0x907   : > { %15540 = vmatprep.subr.bf16.mxu0 %v21980_v8 }
 0x90a   : > { %15541 = vmatpush3.bf16.msra.mxu0 %v16148_v46 }
 0x90b   : > { %15542 = vmatprep.subr.bf16.mxu0 %v21980_v8 }
 0x90e   : > { %15543 = vmatpush3.bf16.msra.mxu0 %v16149_v57 }
 0x91a   : > { %v10564_v52 = vpop.f32.mrf.mxu1  ;;  %v11180_v29 = vpop.f32.mrf.mxu0 }
 0x91b   : > { %v11502_v41 = vadd.f32 %v11501_v50, %v10564_v52 }
 0x91c   : > { %v15326_v14 = vpop.f32.mrf.mxu1  ;;  %v15466_v7 = vpop.f32.mrf.mxu0 }
 0x91d   : > { %v11503_v44 = vadd.f32 %v11502_v41, %v21156_v23 }
 0x91e   : > { %v10567_v37 = vpop.f32.mrf.mxu1  ;;  %v11183_v15 = vpop.f32.mrf.mxu0 }
 0x920   : > { %v15327_v59 = vpop.f32.mrf.mxu1  ;;  %v15467_v11 = vpop.f32.mrf.mxu0 }
 0x93a   : > { %v10740_v24 = vpop.f32.mrf.mxu1  ;;  %v11356_v6 = vpop.f32.mrf.mxu0 }
 0x93b   : > { %v11504_v38 = vadd.f32 %v11503_v44, %v10740_v24 }
 0x93c   : > { %v15366_v36 = vpop.f32.mrf.mxu1  ;;  %v15506_v49 = vpop.f32.mrf.mxu0 }
 0x93d   : > { %v11505_v22 = vadd.f32 %v11504_v38, %v21179_v27 }
 0x93e   : > { %v10743_v12 = vpop.f32.mrf.mxu1  ;;  %v11359_v34 = vpop.f32.mrf.mxu0 }
 0x940   : > { %v15367_v58 = vpop.f32.mrf.mxu1  ;;  %v15507_v39 = vpop.f32.mrf.mxu0 }
 0x95a   : > { %v10916_v43 = vpop.f32.mrf.mxu1 }
 0x95b   : > { %v11506_v61 = vadd.f32 %v11505_v22, %v10916_v43 }
 0x95c   : > { %v15406_v23 = vpop.f32.mrf.mxu1 }
 0x95d   : > { %v11507_v8 = vadd.f32 %v11506_v61, %v21200_v25 }
 0x95e   : > { %v10919_v0 = vpop.f32.mrf.mxu1 }
 0x960   : > { %v15407_v10 = vpop.f32.mrf.mxu1 }
 0x97a   : > { %v11092_v54 = vpop.f32.mrf.mxu1 }
 0x97b   : > { %v11508_v18 = vadd.f32 %v11507_v8, %v11092_v54 }
 0x97c   : > { %v15446_v26 = vpop.f32.mrf.mxu1 }
 0x97d   : > { %v11509_v27 = vadd.f32 %v11508_v18, %v11180_v29 }
 0x97e   : > { %v11095_v32 = vpop.f32.mrf.mxu1 }
 0x980   : > { %v15447_v45 = vpop.f32.mrf.mxu1 }
 0x99a   : > { %v11268_v33 = vpop.f32.mrf.mxu1 }
 0x99b   : > { %v11510_v40 = vadd.f32 %v11509_v27, %v11268_v33 }
 0x99c   : > { %v15486_v3 = vpop.f32.mrf.mxu1 }
 0x99d   : > { %v11511_v17 = vadd.f32 %v11510_v40, %v11356_v6 }
 0x99e   : > { %v11271_v51 = vpop.f32.mrf.mxu1 }
 0x9a0   : > { %v15487_v13 = vpop.f32.mrf.mxu1 }
 0x9ba   : > { %v11444_v20 = vpop.f32.mrf.mxu1 }
 0x9bb   : > { %v11512_v19 = vadd.f32 %v11511_v17, %v11444_v20 }
 0x9bc   : > { %v15526_v42 = vpop.f32.mrf.mxu1 }
 0x9bd   : > { %v11519_v30 = vadd.f32 %v12694_v31, %v11512_v19 }
 0x9be   : > { %v11447_v2 = vpop.f32.mrf.mxu1 }
 0x9bf   : > { %v11520_v62 = vmax.f32 %v11519_v30, 0.0 }
 0x9c0   : > { %v15527_v28 = vpop.f32.mrf.mxu1 }
 0x9c1   : > { %v11538_v16 = vpack.c.bf16 %v11520_v62, %v11520_v62 }
 0x9c3   : > { %15545 = vmatmul.mubr.bf16.vlgmr.msra.gmra.mxu0 %v11538_v16 }
 0xa83   : > { %v11627_v25 = vpop.f32.mrf.mxu0 }
 0xa84   : > { %v11628_v48 = vadd.f32 %v12695_v21, %v11627_v25 }
 0xa85   : > { %v15546_v35 = vpop.f32.mrf.mxu0 }
 0xa86   : > { %11633 = vst [vmem:[%s475_s19] sm:$0xff] %v11628_v48 }
 0xa87   : > { %v11630_v9 = vpop.f32.mrf.mxu0 }
 0xa89   : > { %v15547_v47 = vpop.f32.mrf.mxu0 }
 0xa8a PF: > { %s21994_s27 = sld [smem:[#allocation17_spill]]  ;;  %s21997_s24 = smov %s16366_s25 }
 0xa8b   : > { %s21995_s17 = sld [smem:[#allocation16_spill]] }
 0xa8c   : > { %s21996_s26 = sld [smem:[#allocation18_spill]] }
 0xa90   : > { %p26_p13 = scmp.ge.s32.totalorder %s21994_s27, 4  }
 0xa91   : > { %s21998_s25 = smov %s21995_s17 }
 0xa92   :  { %28 = sbr.rel (!%p26_p13) target bundleno = 12 (0xc), region = 149 }
 0xa97   :  { %11653 = vsyncpa [#allocation3], 1 }
 0xa98   :  { %11655 = vsyncpa [#allocation3 + $0x1], 1 }
 0xa99   :  { %11656 = vsyncpa [#allocation5], 1 }
 0xa9a   :  { %11658 = vsyncpa [#allocation5 + $0x1], 1 }
 0xa9b   :  { %11659 = vsyncpa [#allocation8], 1 }
 0xa9c   :  { %11661 = vsyncpa [#allocation8 + $0x1], 1 }
 0xa9d   :  { %11662 = vsyncpa [#allocation11], 1 }
 0xa9e   :  { %11664 = vsyncpa [#allocation11 + $0x1], 1 }

</bundles_post_ra>
